<compile_context>
chip_gen: v6e
topology: v6e:2x2x1
jax: 0.10.0
libtpu: 0.0.40
codegen_flags: <defaults>
</compile_context>

<pallas_src>
import functools
import math

import jax
import jax.numpy as jnp
from jax import lax
from jax.experimental import pallas as pl
from jax.experimental.pallas import tpu as pltpu


def _attention_body(x_ref, wqkv_ref, bqkv_ref, wo_ref, bo_ref, out_ref,
                    probs_ref, qkv_scr, *, num_heads, head_dim, seq_len):
    """One (padded) batch element per grid step.

    x_ref:     (1, S_pad, H)          input hidden states (MXU dtype)
    wqkv_ref:  (H, 3H)                fused QKV weights, head-major columns
                                      [h0_q | h0_k | h0_v | h1_q | ...],
                                      q columns pre-scaled by 1/sqrt(hd)
    bqkv_ref:  (1, 3H)                fused QKV bias (f32, same column order)
    wo_ref:    (nh, hd, H)            output projection weight, per-head rows
    bo_ref:    (1, H)                 output projection bias (f32)
    out_ref:   (1, S_pad, H)          attention output
    probs_ref: (1, nh, S_pad, S_pad)  softmax attention probs (or None)
    qkv_scr:   (nh, S_pad, 3*hd)      VMEM scratch, per-head [q|k|v] slabs
    """
    S_pad = x_ref.shape[1]
    hd = head_dim
    H = num_heads * hd
    cdt = wqkv_ref.dtype                      # MXU operand dtype (bf16 or f32)

    x = x_ref[0]                              # (S_pad, H)

    # Fused QKV projection: one MXU matmul, f32 accumulation.
    qkv = jnp.dot(x, wqkv_ref[...],
                  preferred_element_type=jnp.float32) + bqkv_ref[0]   # (S_pad, 3H)

    # Scatter per-head [q|k|v] slabs into scratch (static lane slices only),
    # so the head loop below uses cheap dynamic leading-axis ref indexing.
    for h in range(num_heads):
        lo = 3 * hd * h
        qkv_scr[h] = qkv[:, lo:lo + 3 * hd].astype(cdt)

    # Key-padding mask: padded key columns -> -inf before row-max / exp.
    if seq_len != S_pad:
        col = lax.broadcasted_iota(jnp.int32, (1, S_pad), 1)
        key_mask = jnp.where(col < seq_len, 0.0, -jnp.inf).astype(jnp.float32)
    else:
        key_mask = None

    def head_body(h, acc):
        blk = qkv_scr[h]                      # (S_pad, 3*hd)
        qh = blk[:, 0:hd]                     # already scaled by 1/sqrt(hd)
        kh = blk[:, hd:2 * hd]
        vh = blk[:, 2 * hd:3 * hd]

        # q @ k^T without an explicit transpose (contract last dims).
        scores = lax.dot_general(qh, kh, (((1,), (1,)), ((), ())),
                                 preferred_element_type=jnp.float32)  # (S_pad,S_pad)
        if key_mask is not None:
            scores = scores + key_mask

        # softmax over keys, f32 stats; reciprocal on the EUP slot.
        m = jnp.max(scores, axis=-1, keepdims=True)
        e = jnp.exp(scores - m)
        denom = jnp.sum(e, axis=-1, keepdims=True)
        probs = e * pl.reciprocal(denom, approx=True)

        if probs_ref is not None:
            probs_ref[0, h] = probs.astype(probs_ref.dtype)

        # attn_dropout / proj_dropout are identity in eval mode.
        ctx = jnp.dot(probs.astype(cdt), vh,
                      preferred_element_type=jnp.float32)             # (S_pad, hd)

        # Per-head accumulation of the output projection: no concat/relayout.
        return acc + jnp.dot(ctx.astype(cdt), wo_ref[h],
                             preferred_element_type=jnp.float32)      # (S_pad, H)

    acc0 = jnp.zeros((S_pad, H), jnp.float32)
    acc = lax.fori_loop(0, num_heads, head_body, acc0, unroll=True)

    out_ref[0] = (acc + bo_ref[0]).astype(out_ref.dtype)


def _attn_kernel_noprobs(x_ref, wqkv_ref, bqkv_ref, wo_ref, bo_ref, out_ref,
                         qkv_scr, *, num_heads, head_dim, seq_len):
    _attention_body(x_ref, wqkv_ref, bqkv_ref, wo_ref, bo_ref, out_ref, None,
                    qkv_scr, num_heads=num_heads, head_dim=head_dim,
                    seq_len=seq_len)


def _attn_kernel_probs(x_ref, wqkv_ref, bqkv_ref, wo_ref, bo_ref, out_ref,
                       probs_ref, qkv_scr, *, num_heads, head_dim, seq_len):
    _attention_body(x_ref, wqkv_ref, bqkv_ref, wo_ref, bo_ref, out_ref,
                    probs_ref, qkv_scr, num_heads=num_heads,
                    head_dim=head_dim, seq_len=seq_len)


def attention_forward(x, params, *, num_heads, vis=False,
                      mxu_dtype=jnp.bfloat16, probs_dtype=None):
    """x: [B, S, H].  params: wq/bq/wk/bk/wv/bv/wo/bo (W: [H,H], b: [1,H]).

    Returns (attention_output [B,S,H], probs [B,nh,S,S] if vis else None).
    mxu_dtype: MXU operand dtype (default bf16; pass jnp.float32 for the
    exact path).  Accumulation and softmax statistics are always f32.
    probs_dtype: dtype of the returned probs (default = mxu_dtype).
    """
    B, S, H = x.shape
    assert H % num_heads == 0
    hd = H // num_heads
    out_dtype = x.dtype
    mxu_dtype = jnp.dtype(mxu_dtype if mxu_dtype is not None else x.dtype)
    probs_dtype = jnp.dtype(probs_dtype if probs_dtype is not None else mxu_dtype)

    # Pad S to a multiple of 128 so scores/probs/out tiles are lane-dense.
    S_pad = ((S + 127) // 128) * 128
    scale = 1.0 / math.sqrt(hd)

    # Head-major fused QKV weights: columns [h0_q | h0_k | h0_v | h1_q | ...],
    # with 1/sqrt(hd) folded into the q columns of both weight and bias.
    wq = (params["wq"] * scale).reshape(H, num_heads, hd)
    wk = params["wk"].reshape(H, num_heads, hd)
    wv = params["wv"].reshape(H, num_heads, hd)
    wqkv = jnp.stack([wq, wk, wv], axis=2).reshape(H, 3 * H).astype(mxu_dtype)

    bq = (params["bq"] * scale).reshape(1, num_heads, hd)
    bk = params["bk"].reshape(1, num_heads, hd)
    bv = params["bv"].reshape(1, num_heads, hd)
    bqkv = jnp.stack([bq, bk, bv], axis=2).reshape(1, 3 * H).astype(jnp.float32)

    wo = params["wo"].reshape(num_heads, hd, H).astype(mxu_dtype)   # per-head rows
    bo = params["bo"].astype(jnp.float32)

    x_p = x
    if S_pad != S:
        x_p = jnp.pad(x_p, ((0, 0), (0, S_pad - S), (0, 0)))
    x_p = x_p.astype(mxu_dtype)

    # --- VMEM residency estimate (weights single-buffered) -----------------
    cb = mxu_dtype.itemsize
    resident = (wqkv.size + wo.size) * cb + (bqkv.size + bo.size) * 4
    resident += 2 * S_pad * H * cb                                   # x block (2 bufs)
    resident += 2 * S_pad * H * jnp.dtype(out_dtype).itemsize        # out block
    if vis:
        resident += 2 * num_heads * S_pad * S_pad * probs_dtype.itemsize
    resident += num_heads * S_pad * 3 * hd * cb                      # qkv scratch
    resident += (S_pad * 3 * H + 3 * S_pad * S_pad + 2 * S_pad * H) * 4  # f32 temps

    try:  # per-generation VMEM ceiling (v5e/v6e: 128 MiB, v7x: 64 MiB)
        info = pltpu.get_tpu_info()
        vmem_cap = int(getattr(info, "vmem_capacity_bytes", 64 << 20))
    except Exception:
        vmem_cap = 64 << 20
    vmem_ceiling = (vmem_cap * 3) // 4
    vmem_limit = int(min(max(resident + (4 << 20), 16 << 20), vmem_ceiling))

    # --- Cost estimate for XLA scheduling -----------------------------------
    flops = (2 * B * S_pad * H * 3 * H
             + 4 * B * num_heads * S_pad * S_pad * hd
             + 2 * B * S_pad * H * H)
    transcendentals = B * num_heads * S_pad * S_pad
    bytes_accessed = (x_p.size * cb
                      + B * S_pad * H * jnp.dtype(out_dtype).itemsize
                      + (wqkv.size + wo.size) * cb + (bqkv.size + bo.size) * 4)
    if vis:
        bytes_accessed += B * num_heads * S_pad * S_pad * probs_dtype.itemsize
    cost = pl.CostEstimate(flops=int(flops),
                           transcendentals=int(transcendentals),
                           bytes_accessed=int(bytes_accessed))

    kernel_kw = dict(num_heads=num_heads, head_dim=hd, seq_len=S)
    compiler_params = pltpu.CompilerParams(
        dimension_semantics=("parallel",),
        vmem_limit_bytes=vmem_limit)

    def _build(single_buffer_weights):
        def const_spec(shape, index_map):
            if single_buffer_weights:
                # Constant blocks never change -> no second pipeline buffer.
                return pl.BlockSpec(shape, index_map,
                                    pipeline_mode=pl.Buffered(1))
            return pl.BlockSpec(shape, index_map)

        in_specs = [
            pl.BlockSpec((1, S_pad, H), lambda b: (b, 0, 0)),        # x
            const_spec((H, 3 * H), lambda b: (0, 0)),                # wqkv
            const_spec((1, 3 * H), lambda b: (0, 0)),                # bqkv
            const_spec((num_heads, hd, H), lambda b: (0, 0, 0)),     # wo
            const_spec((1, H), lambda b: (0, 0)),                    # bo
        ]
        out_block = pl.BlockSpec((1, S_pad, H), lambda b: (b, 0, 0))
        scratch = [pltpu.VMEM((num_heads, S_pad, 3 * hd), mxu_dtype)]

        if vis:
            return pl.pallas_call(
                functools.partial(_attn_kernel_probs, **kernel_kw),
                out_shape=(
                    jax.ShapeDtypeStruct((B, S_pad, H), out_dtype),
                    jax.ShapeDtypeStruct((B, num_heads, S_pad, S_pad),
                                         probs_dtype),
                ),
                grid_spec=pltpu.PrefetchScalarGridSpec(
                    num_scalar_prefetch=0,
                    grid=(B,),
                    in_specs=in_specs,
                    out_specs=[
                        out_block,
                        pl.BlockSpec((1, num_heads, S_pad, S_pad),
                                     lambda b: (b, 0, 0, 0)),
                    ],
                    scratch_shapes=scratch),
                compiler_params=compiler_params,
                cost_estimate=cost)
        return pl.pallas_call(
            functools.partial(_attn_kernel_noprobs, **kernel_kw),
            out_shape=jax.ShapeDtypeStruct((B, S_pad, H), out_dtype),
            grid_spec=pltpu.PrefetchScalarGridSpec(
                num_scalar_prefetch=0,
                grid=(B,),
                in_specs=in_specs,
                out_specs=out_block,
                scratch_shapes=scratch),
            compiler_params=compiler_params,
            cost_estimate=cost)

    args = (x_p, wqkv, bqkv, wo, bo)
    use_single_buffer = hasattr(pl, "Buffered")
    try:
        result = _build(use_single_buffer)(*args)
    except Exception:
        if not use_single_buffer:
            raise
        # pipeline_mode / Buffered(1) not supported on this jax: fall back to
        # default double-buffered constant blocks.
        result = _build(False)(*args)

    if vis:
        out_p, probs_p = result
        return out_p[:, :S, :], probs_p[:, :, :S, :S]
    return result[:, :S, :], None


def _reference(x, params, num_heads):
    """Plain-JAX reference mirroring the torch forward pass (eval mode)."""
    B, S, H = x.shape
    hd = H // num_heads

    def proj(w, b):
        return x @ w + b[0]

    q = proj(params["wq"], params["bq"]).reshape(B, S, num_heads, hd).transpose(0, 2, 1, 3)
    k = proj(params["wk"], params["bk"]).reshape(B, S, num_heads, hd).transpose(0, 2, 1, 3)
    v = proj(params["wv"], params["bv"]).reshape(B, S, num_heads, hd).transpose(0, 2, 1, 3)

    scores = jnp.einsum("bhqd,bhkd->bhqk", q, k) / math.sqrt(hd)
    probs = jax.nn.softmax(scores, axis=-1)
    ctx = jnp.einsum("bhqk,bhkd->bhqd", probs, v)
    ctx = ctx.transpose(0, 2, 1, 3).reshape(B, S, H)
    out = ctx @ params["wo"] + params["bo"][0]
    return out, probs


if __name__ == "__main__":
    # Small config: hidden=32, num_heads=4, seq=8, batch=2.
    B, S, H, NH = 2, 8, 32, 4

    key = jax.random.PRNGKey(0)
    keys = jax.random.split(key, 10)
    scale = 1.0 / math.sqrt(H)

    params = {
        "wq": jax.random.normal(keys[0], (H, H), jnp.float32) * scale,
        "bq": jax.random.normal(keys[1], (1, H), jnp.float32) * 0.02,
        "wk": jax.random.normal(keys[2], (H, H), jnp.float32) * scale,
        "bk": jax.random.normal(keys[3], (1, H), jnp.float32) * 0.02,
        "wv": jax.random.normal(keys[4], (H, H), jnp.float32) * scale,
        "bv": jax.random.normal(keys[5], (1, H), jnp.float32) * 0.02,
        "wo": jax.random.normal(keys[6], (H, H), jnp.float32) * scale,
        "bo": jax.random.normal(keys[7], (1, H), jnp.float32) * 0.02,
    }
    x = jax.random.normal(keys[8], (B, S, H), jnp.float32)

    ref_out, ref_probs = _reference(x, params, NH)

    # 1) exact path (f32 MXU operands), vis=True: padded/masked softmax must
    #    exactly reproduce the unpadded reference (up to approx reciprocal).
    out, probs = attention_forward(x, params, num_heads=NH, vis=True,
                                   mxu_dtype=jnp.float32)
    out = jax.block_until_ready(out)
    probs = jax.block_until_ready(probs)
    assert out.shape == (B, S, H) and probs.shape == (B, NH, S, S)
    assert jnp.allclose(out, ref_out, atol=5e-3, rtol=5e-3), "output mismatch (f32 vis)"
    assert jnp.allclose(probs, ref_probs, atol=5e-3, rtol=5e-3), "probs mismatch (f32 vis)"

    # 2) default (bf16 MXU operands), vis=False: probs never computed/stored.
    out2, none_probs = attention_forward(x, params, num_heads=NH, vis=False)
    out2 = jax.block_until_ready(out2)
    assert none_probs is None
    assert jnp.allclose(out2, ref_out, atol=1e-1, rtol=1e-1), "output mismatch (bf16)"

    # 3) default (bf16) with vis=True: probs emitted in bf16 (halved writeback).
    out3, probs3 = attention_forward(x, params, num_heads=NH, vis=True)
    out3 = jax.block_until_ready(out3)
    probs3 = jax.block_until_ready(probs3)
    assert probs3.shape == (B, NH, S, S)
    assert jnp.allclose(out3.astype(jnp.float32), ref_out,
                        atol=1e-1, rtol=1e-1), "output mismatch (bf16 vis)"
    assert jnp.allclose(probs3.astype(jnp.float32), ref_probs,
                        atol=5e-2, rtol=5e-2), "probs mismatch (bf16 vis)"

    print("KERNEL_OK")
</pallas_src>

<mosaic_0001>
module attributes {stable_mosaic.version = 11 : i64} {
  func.func @_attn_kernel_probs(%arg0: i32, %arg1: memref<1x128x32xf32, #tpu.memory_space<vmem>>, %arg2: memref<32x96xf32, #tpu.memory_space<vmem>>, %arg3: memref<1x96xf32, #tpu.memory_space<vmem>>, %arg4: memref<4x8x32xf32, #tpu.memory_space<vmem>>, %arg5: memref<1x32xf32, #tpu.memory_space<vmem>>, %arg6: memref<1x128x32xf32, #tpu.memory_space<vmem>>, %arg7: memref<1x4x128x128xf32, #tpu.memory_space<vmem>>, %arg8: memref<4x128x24xf32, #tpu.memory_space<vmem>>) attributes {dimension_semantics = [#tpu.dimension_semantics<parallel>], iteration_bounds = array<i64: 2>, scalar_prefetch = 0 : i64, scratch_operands = 1 : i64, tpu.core_type = #tpu.core_type<tc>, window_params = [{transform_indices = @transform_0, window_bounds = array<i64: 1, 128, 32>}, {pipeline_mode = #tpu.pipeline_mode<synchronous>, transform_indices = @transform_1, window_bounds = array<i64: 32, 96>}, {pipeline_mode = #tpu.pipeline_mode<synchronous>, transform_indices = @transform_2, window_bounds = array<i64: 1, 96>}, {pipeline_mode = #tpu.pipeline_mode<synchronous>, transform_indices = @transform_3, window_bounds = array<i64: 4, 8, 32>}, {pipeline_mode = #tpu.pipeline_mode<synchronous>, transform_indices = @transform_4, window_bounds = array<i64: 1, 32>}, {transform_indices = @transform_5, window_bounds = array<i64: 1, 128, 32>}, {transform_indices = @transform_6, window_bounds = array<i64: 1, 4, 128, 128>}]} {
    %c0 = arith.constant 0 : index
    %c0_0 = arith.constant 0 : index
    %c0_1 = arith.constant 0 : index
    %0 = vector.load %arg1[%c0, %c0_0, %c0_1] : memref<1x128x32xf32, #tpu.memory_space<vmem>>, vector<1x128x32xf32>
    %1 = vector.shape_cast %0 : vector<1x128x32xf32> to vector<128x32xf32>
    %c0_2 = arith.constant 0 : index
    %c0_3 = arith.constant 0 : index
    %2 = vector.load %arg2[%c0_2, %c0_3] : memref<32x96xf32, #tpu.memory_space<vmem>>, vector<32x96xf32>
    %cst = arith.constant dense<0.000000e+00> : vector<128x96xf32>
    %3 = tpu.matmul %1, %2, %cst {dimension_numbers = #tpu.dot_dimension_numbers<[1], [0], [0], [1], [0, 0, 1, 1], [], []>} : vector<128x32xf32>, vector<32x96xf32>, vector<128x96xf32> -> vector<128x96xf32>
    %c0_4 = arith.constant 0 : index
    %c0_5 = arith.constant 0 : index
    %4 = vector.load %arg3[%c0_4, %c0_5] : memref<1x96xf32, #tpu.memory_space<vmem>>, vector<1x96xf32>
    %5 = vector.shape_cast %4 : vector<1x96xf32> to vector<96xf32>
    %6 = vector.shape_cast %5 : vector<96xf32> to vector<1x96xf32>
    %7 = vector.broadcast %6 : vector<1x96xf32> to vector<128x96xf32>
    %8 = arith.addf %3, %7 : vector<128x96xf32>
    %9 = vector.extract_strided_slice %8 {offsets = [0, 0], sizes = [128, 24], strides = [1, 1]} : vector<128x96xf32> to vector<128x24xf32>
    %c0_6 = arith.constant 0 : index
    %c0_7 = arith.constant 0 : index
    %c0_8 = arith.constant 0 : index
    %10 = vector.load %arg8[%c0_6, %c0_7, %c0_8] : memref<4x128x24xf32, #tpu.memory_space<vmem>>, vector<1x128x24xf32>
    %11 = vector.shape_cast %10 : vector<1x128x24xf32> to vector<128x24xf32>
    %12 = vector.shape_cast %9 : vector<128x24xf32> to vector<1x128x24xf32>
    tpu.vector_store %arg8[%c0_6, %c0_7, %c0_8], %12 {strides = array<i32>} : memref<4x128x24xf32, #tpu.memory_space<vmem>>, vector<1x128x24xf32>,
    %13 = vector.extract_strided_slice %8 {offsets = [0, 24], sizes = [128, 24], strides = [1, 1]} : vector<128x96xf32> to vector<128x24xf32>
    %c1 = arith.constant 1 : index
    %c0_9 = arith.constant 0 : index
    %c0_10 = arith.constant 0 : index
    %14 = vector.load %arg8[%c1, %c0_9, %c0_10] : memref<4x128x24xf32, #tpu.memory_space<vmem>>, vector<1x128x24xf32>
    %15 = vector.shape_cast %14 : vector<1x128x24xf32> to vector<128x24xf32>
    %16 = vector.shape_cast %13 : vector<128x24xf32> to vector<1x128x24xf32>
    tpu.vector_store %arg8[%c1, %c0_9, %c0_10], %16 {strides = array<i32>} : memref<4x128x24xf32, #tpu.memory_space<vmem>>, vector<1x128x24xf32>,
    %17 = vector.extract_strided_slice %8 {offsets = [0, 48], sizes = [128, 24], strides = [1, 1]} : vector<128x96xf32> to vector<128x24xf32>
    %c2 = arith.constant 2 : index
    %c0_11 = arith.constant 0 : index
    %c0_12 = arith.constant 0 : index
    %18 = vector.load %arg8[%c2, %c0_11, %c0_12] : memref<4x128x24xf32, #tpu.memory_space<vmem>>, vector<1x128x24xf32>
    %19 = vector.shape_cast %18 : vector<1x128x24xf32> to vector<128x24xf32>
    %20 = vector.shape_cast %17 : vector<128x24xf32> to vector<1x128x24xf32>
    tpu.vector_store %arg8[%c2, %c0_11, %c0_12], %20 {strides = array<i32>} : memref<4x128x24xf32, #tpu.memory_space<vmem>>, vector<1x128x24xf32>,
    %21 = vector.extract_strided_slice %8 {offsets = [0, 72], sizes = [128, 24], strides = [1, 1]} : vector<128x96xf32> to vector<128x24xf32>
    %c3 = arith.constant 3 : index
    %c0_13 = arith.constant 0 : index
    %c0_14 = arith.constant 0 : index
    %22 = vector.load %arg8[%c3, %c0_13, %c0_14] : memref<4x128x24xf32, #tpu.memory_space<vmem>>, vector<1x128x24xf32>
    %23 = vector.shape_cast %22 : vector<1x128x24xf32> to vector<128x24xf32>
    %24 = vector.shape_cast %21 : vector<128x24xf32> to vector<1x128x24xf32>
    tpu.vector_store %arg8[%c3, %c0_13, %c0_14], %24 {strides = array<i32>} : memref<4x128x24xf32, #tpu.memory_space<vmem>>, vector<1x128x24xf32>,
    %25 = tpu.iota {dimensions = array<i32: 1>} : vector<1x128xi32>
    %c8_i32 = arith.constant 8 : i32
    %26 = vector.broadcast %c8_i32 : i32 to vector<1x128xi32>
    %27 = arith.cmpi slt, %25, %26 : vector<1x128xi32>
    %cst_15 = arith.constant 0.000000e+00 : f32
    %cst_16 = arith.constant 0xFF800000 : f32
    %28 = vector.broadcast %cst_15 : f32 to vector<1x128xf32>
    %29 = vector.broadcast %cst_16 : f32 to vector<1x128xf32>
    %30 = arith.select %27, %28, %29 : vector<1x128xi1>, vector<1x128xf32>
    %cst_17 = arith.constant 0.000000e+00 : f32
    %31 = vector.broadcast %cst_17 : f32 to vector<128x32xf32>
    %c0_i32 = arith.constant 0 : i32
    %32 = arith.index_cast %c0_i32 : i32 to index
    %c0_18 = arith.constant 0 : index
    %c0_19 = arith.constant 0 : index
    %33 = vector.load %arg8[%32, %c0_18, %c0_19] : memref<4x128x24xf32, #tpu.memory_space<vmem>>, vector<1x128x24xf32>
    %34 = vector.shape_cast %33 : vector<1x128x24xf32> to vector<128x24xf32>
    %35 = vector.extract_strided_slice %34 {offsets = [0, 0], sizes = [128, 8], strides = [1, 1]} : vector<128x24xf32> to vector<128x8xf32>
    %36 = vector.extract_strided_slice %34 {offsets = [0, 8], sizes = [128, 8], strides = [1, 1]} : vector<128x24xf32> to vector<128x8xf32>
    %37 = vector.extract_strided_slice %34 {offsets = [0, 16], sizes = [128, 8], strides = [1, 1]} : vector<128x24xf32> to vector<128x8xf32>
    %cst_20 = arith.constant dense<0.000000e+00> : vector<128x128xf32>
    %38 = tpu.matmul %35, %36, %cst_20 {dimension_numbers = #tpu.dot_dimension_numbers<[1], [1], [0], [0], [0, 0, 1, 0], [], []>} : vector<128x8xf32>, vector<128x8xf32>, vector<128x128xf32> -> vector<128x128xf32>
    %39 = vector.broadcast %30 : vector<1x128xf32> to vector<128x128xf32>
    %40 = arith.addf %38, %39 : vector<128x128xf32>
    %cst_21 = arith.constant dense<0xFF800000> : vector<128xf32>
    %41 = vector.multi_reduction <maximumf>, %40, %cst_21 [1] : vector<128x128xf32> to vector<128xf32>
    %42 = vector.shape_cast %41 : vector<128xf32> to vector<128x1xf32>
    %43 = vector.broadcast %42 : vector<128x1xf32> to vector<128x128xf32>
    %44 = arith.subf %40, %43 : vector<128x128xf32>
    %45 = math.exp %44 : vector<128x128xf32>
    %cst_22 = arith.constant dense<0.000000e+00> : vector<128xf32>
    %46 = vector.multi_reduction <add>, %45, %cst_22 [1] : vector<128x128xf32> to vector<128xf32>
    %47 = vector.shape_cast %46 : vector<128xf32> to vector<128x1xf32>
    %48 = tpu.reciprocal %47 {approx = true} : vector<128x1xf32> -> vector<128x1xf32>
    %49 = vector.broadcast %48 : vector<128x1xf32> to vector<128x128xf32>
    %50 = arith.mulf %45, %49 : vector<128x128xf32>
    %c0_23 = arith.constant 0 : index
    %51 = arith.index_cast %c0_i32 : i32 to index
    %c0_24 = arith.constant 0 : index
    %c0_25 = arith.constant 0 : index
    %52 = vector.load %arg7[%c0_23, %51, %c0_24, %c0_25] : memref<1x4x128x128xf32, #tpu.memory_space<vmem>>, vector<1x1x128x128xf32>
    %53 = vector.shape_cast %52 : vector<1x1x128x128xf32> to vector<128x128xf32>
    %54 = vector.shape_cast %50 : vector<128x128xf32> to vector<1x1x128x128xf32>
    tpu.vector_store %arg7[%c0_23, %51, %c0_24, %c0_25], %54 {strides = array<i32>} : memref<1x4x128x128xf32, #tpu.memory_space<vmem>>, vector<1x1x128x128xf32>,
    %cst_26 = arith.constant dense<0.000000e+00> : vector<128x8xf32>
    %55 = tpu.matmul %50, %37, %cst_26 {dimension_numbers = #tpu.dot_dimension_numbers<[1], [0], [0], [1], [0, 0, 1, 1], [], []>} : vector<128x128xf32>, vector<128x8xf32>, vector<128x8xf32> -> vector<128x8xf32>
    %56 = arith.index_cast %c0_i32 : i32 to index
    %c0_27 = arith.constant 0 : index
    %c0_28 = arith.constant 0 : index
    %57 = vector.load %arg4[%56, %c0_27, %c0_28] : memref<4x8x32xf32, #tpu.memory_space<vmem>>, vector<1x8x32xf32>
    %58 = vector.shape_cast %57 : vector<1x8x32xf32> to vector<8x32xf32>
    %cst_29 = arith.constant dense<0.000000e+00> : vector<128x32xf32>
    %59 = tpu.matmul %55, %58, %cst_29 {dimension_numbers = #tpu.dot_dimension_numbers<[1], [0], [0], [1], [0, 0, 1, 1], [], []>} : vector<128x8xf32>, vector<8x32xf32>, vector<128x32xf32> -> vector<128x32xf32>
    %60 = arith.addf %31, %59 : vector<128x32xf32>
    %c1_i32 = arith.constant 1 : i32
    %61 = arith.index_cast %c1_i32 : i32 to index
    %c0_30 = arith.constant 0 : index
    %c0_31 = arith.constant 0 : index
    %62 = vector.load %arg8[%61, %c0_30, %c0_31] : memref<4x128x24xf32, #tpu.memory_space<vmem>>, vector<1x128x24xf32>
    %63 = vector.shape_cast %62 : vector<1x128x24xf32> to vector<128x24xf32>
    %64 = vector.extract_strided_slice %63 {offsets = [0, 0], sizes = [128, 8], strides = [1, 1]} : vector<128x24xf32> to vector<128x8xf32>
    %65 = vector.extract_strided_slice %63 {offsets = [0, 8], sizes = [128, 8], strides = [1, 1]} : vector<128x24xf32> to vector<128x8xf32>
    %66 = vector.extract_strided_slice %63 {offsets = [0, 16], sizes = [128, 8], strides = [1, 1]} : vector<128x24xf32> to vector<128x8xf32>
    %cst_32 = arith.constant dense<0.000000e+00> : vector<128x128xf32>
    %67 = tpu.matmul %64, %65, %cst_32 {dimension_numbers = #tpu.dot_dimension_numbers<[1], [1], [0], [0], [0, 0, 1, 0], [], []>} : vector<128x8xf32>, vector<128x8xf32>, vector<128x128xf32> -> vector<128x128xf32>
    %68 = vector.broadcast %30 : vector<1x128xf32> to vector<128x128xf32>
    %69 = arith.addf %67, %68 : vector<128x128xf32>
    %cst_33 = arith.constant dense<0xFF800000> : vector<128xf32>
    %70 = vector.multi_reduction <maximumf>, %69, %cst_33 [1] : vector<128x128xf32> to vector<128xf32>
    %71 = vector.shape_cast %70 : vector<128xf32> to vector<128x1xf32>
    %72 = vector.broadcast %71 : vector<128x1xf32> to vector<128x128xf32>
    %73 = arith.subf %69, %72 : vector<128x128xf32>
    %74 = math.exp %73 : vector<128x128xf32>
    %cst_34 = arith.constant dense<0.000000e+00> : vector<128xf32>
    %75 = vector.multi_reduction <add>, %74, %cst_34 [1] : vector<128x128xf32> to vector<128xf32>
    %76 = vector.shape_cast %75 : vector<128xf32> to vector<128x1xf32>
    %77 = tpu.reciprocal %76 {approx = true} : vector<128x1xf32> -> vector<128x1xf32>
    %78 = vector.broadcast %77 : vector<128x1xf32> to vector<128x128xf32>
    %79 = arith.mulf %74, %78 : vector<128x128xf32>
    %c0_35 = arith.constant 0 : index
    %80 = arith.index_cast %c1_i32 : i32 to index
    %c0_36 = arith.constant 0 : index
    %c0_37 = arith.constant 0 : index
    %81 = vector.load %arg7[%c0_35, %80, %c0_36, %c0_37] : memref<1x4x128x128xf32, #tpu.memory_space<vmem>>, vector<1x1x128x128xf32>
    %82 = vector.shape_cast %81 : vector<1x1x128x128xf32> to vector<128x128xf32>
    %83 = vector.shape_cast %79 : vector<128x128xf32> to vector<1x1x128x128xf32>
    tpu.vector_store %arg7[%c0_35, %80, %c0_36, %c0_37], %83 {strides = array<i32>} : memref<1x4x128x128xf32, #tpu.memory_space<vmem>>, vector<1x1x128x128xf32>,
    %cst_38 = arith.constant dense<0.000000e+00> : vector<128x8xf32>
    %84 = tpu.matmul %79, %66, %cst_38 {dimension_numbers = #tpu.dot_dimension_numbers<[1], [0], [0], [1], [0, 0, 1, 1], [], []>} : vector<128x128xf32>, vector<128x8xf32>, vector<128x8xf32> -> vector<128x8xf32>
    %85 = arith.index_cast %c1_i32 : i32 to index
    %c0_39 = arith.constant 0 : index
    %c0_40 = arith.constant 0 : index
    %86 = vector.load %arg4[%85, %c0_39, %c0_40] : memref<4x8x32xf32, #tpu.memory_space<vmem>>, vector<1x8x32xf32>
    %87 = vector.shape_cast %86 : vector<1x8x32xf32> to vector<8x32xf32>
    %cst_41 = arith.constant dense<0.000000e+00> : vector<128x32xf32>
    %88 = tpu.matmul %84, %87, %cst_41 {dimension_numbers = #tpu.dot_dimension_numbers<[1], [0], [0], [1], [0, 0, 1, 1], [], []>} : vector<128x8xf32>, vector<8x32xf32>, vector<128x32xf32> -> vector<128x32xf32>
    %89 = arith.addf %60, %88 : vector<128x32xf32>
    %c2_i32 = arith.constant 2 : i32
    %90 = arith.index_cast %c2_i32 : i32 to index
    %c0_42 = arith.constant 0 : index
    %c0_43 = arith.constant 0 : index
    %91 = vector.load %arg8[%90, %c0_42, %c0_43] : memref<4x128x24xf32, #tpu.memory_space<vmem>>, vector<1x128x24xf32>
    %92 = vector.shape_cast %91 : vector<1x128x24xf32> to vector<128x24xf32>
    %93 = vector.extract_strided_slice %92 {offsets = [0, 0], sizes = [128, 8], strides = [1, 1]} : vector<128x24xf32> to vector<128x8xf32>
    %94 = vector.extract_strided_slice %92 {offsets = [0, 8], sizes = [128, 8], strides = [1, 1]} : vector<128x24xf32> to vector<128x8xf32>
    %95 = vector.extract_strided_slice %92 {offsets = [0, 16], sizes = [128, 8], strides = [1, 1]} : vector<128x24xf32> to vector<128x8xf32>
    %cst_44 = arith.constant dense<0.000000e+00> : vector<128x128xf32>
    %96 = tpu.matmul %93, %94, %cst_44 {dimension_numbers = #tpu.dot_dimension_numbers<[1], [1], [0], [0], [0, 0, 1, 0], [], []>} : vector<128x8xf32>, vector<128x8xf32>, vector<128x128xf32> -> vector<128x128xf32>
    %97 = vector.broadcast %30 : vector<1x128xf32> to vector<128x128xf32>
    %98 = arith.addf %96, %97 : vector<128x128xf32>
    %cst_45 = arith.constant dense<0xFF800000> : vector<128xf32>
    %99 = vector.multi_reduction <maximumf>, %98, %cst_45 [1] : vector<128x128xf32> to vector<128xf32>
    %100 = vector.shape_cast %99 : vector<128xf32> to vector<128x1xf32>
    %101 = vector.broadcast %100 : vector<128x1xf32> to vector<128x128xf32>
    %102 = arith.subf %98, %101 : vector<128x128xf32>
    %103 = math.exp %102 : vector<128x128xf32>
    %cst_46 = arith.constant dense<0.000000e+00> : vector<128xf32>
    %104 = vector.multi_reduction <add>, %103, %cst_46 [1] : vector<128x128xf32> to vector<128xf32>
    %105 = vector.shape_cast %104 : vector<128xf32> to vector<128x1xf32>
    %106 = tpu.reciprocal %105 {approx = true} : vector<128x1xf32> -> vector<128x1xf32>
    %107 = vector.broadcast %106 : vector<128x1xf32> to vector<128x128xf32>
    %108 = arith.mulf %103, %107 : vector<128x128xf32>
    %c0_47 = arith.constant 0 : index
    %109 = arith.index_cast %c2_i32 : i32 to index
    %c0_48 = arith.constant 0 : index
    %c0_49 = arith.constant 0 : index
    %110 = vector.load %arg7[%c0_47, %109, %c0_48, %c0_49] : memref<1x4x128x128xf32, #tpu.memory_space<vmem>>, vector<1x1x128x128xf32>
    %111 = vector.shape_cast %110 : vector<1x1x128x128xf32> to vector<128x128xf32>
    %112 = vector.shape_cast %108 : vector<128x128xf32> to vector<1x1x128x128xf32>
    tpu.vector_store %arg7[%c0_47, %109, %c0_48, %c0_49], %112 {strides = array<i32>} : memref<1x4x128x128xf32, #tpu.memory_space<vmem>>, vector<1x1x128x128xf32>,
    %cst_50 = arith.constant dense<0.000000e+00> : vector<128x8xf32>
    %113 = tpu.matmul %108, %95, %cst_50 {dimension_numbers = #tpu.dot_dimension_numbers<[1], [0], [0], [1], [0, 0, 1, 1], [], []>} : vector<128x128xf32>, vector<128x8xf32>, vector<128x8xf32> -> vector<128x8xf32>
    %114 = arith.index_cast %c2_i32 : i32 to index
    %c0_51 = arith.constant 0 : index
    %c0_52 = arith.constant 0 : index
    %115 = vector.load %arg4[%114, %c0_51, %c0_52] : memref<4x8x32xf32, #tpu.memory_space<vmem>>, vector<1x8x32xf32>
    %116 = vector.shape_cast %115 : vector<1x8x32xf32> to vector<8x32xf32>
    %cst_53 = arith.constant dense<0.000000e+00> : vector<128x32xf32>
    %117 = tpu.matmul %113, %116, %cst_53 {dimension_numbers = #tpu.dot_dimension_numbers<[1], [0], [0], [1], [0, 0, 1, 1], [], []>} : vector<128x8xf32>, vector<8x32xf32>, vector<128x32xf32> -> vector<128x32xf32>
    %118 = arith.addf %89, %117 : vector<128x32xf32>
    %c3_i32 = arith.constant 3 : i32
    %119 = arith.index_cast %c3_i32 : i32 to index
    %c0_54 = arith.constant 0 : index
    %c0_55 = arith.constant 0 : index
    %120 = vector.load %arg8[%119, %c0_54, %c0_55] : memref<4x128x24xf32, #tpu.memory_space<vmem>>, vector<1x128x24xf32>
    %121 = vector.shape_cast %120 : vector<1x128x24xf32> to vector<128x24xf32>
    %122 = vector.extract_strided_slice %121 {offsets = [0, 0], sizes = [128, 8], strides = [1, 1]} : vector<128x24xf32> to vector<128x8xf32>
    %123 = vector.extract_strided_slice %121 {offsets = [0, 8], sizes = [128, 8], strides = [1, 1]} : vector<128x24xf32> to vector<128x8xf32>
    %124 = vector.extract_strided_slice %121 {offsets = [0, 16], sizes = [128, 8], strides = [1, 1]} : vector<128x24xf32> to vector<128x8xf32>
    %cst_56 = arith.constant dense<0.000000e+00> : vector<128x128xf32>
    %125 = tpu.matmul %122, %123, %cst_56 {dimension_numbers = #tpu.dot_dimension_numbers<[1], [1], [0], [0], [0, 0, 1, 0], [], []>} : vector<128x8xf32>, vector<128x8xf32>, vector<128x128xf32> -> vector<128x128xf32>
    %126 = vector.broadcast %30 : vector<1x128xf32> to vector<128x128xf32>
    %127 = arith.addf %125, %126 : vector<128x128xf32>
    %cst_57 = arith.constant dense<0xFF800000> : vector<128xf32>
    %128 = vector.multi_reduction <maximumf>, %127, %cst_57 [1] : vector<128x128xf32> to vector<128xf32>
    %129 = vector.shape_cast %128 : vector<128xf32> to vector<128x1xf32>
    %130 = vector.broadcast %129 : vector<128x1xf32> to vector<128x128xf32>
    %131 = arith.subf %127, %130 : vector<128x128xf32>
    %132 = math.exp %131 : vector<128x128xf32>
    %cst_58 = arith.constant dense<0.000000e+00> : vector<128xf32>
    %133 = vector.multi_reduction <add>, %132, %cst_58 [1] : vector<128x128xf32> to vector<128xf32>
    %134 = vector.shape_cast %133 : vector<128xf32> to vector<128x1xf32>
    %135 = tpu.reciprocal %134 {approx = true} : vector<128x1xf32> -> vector<128x1xf32>
    %136 = vector.broadcast %135 : vector<128x1xf32> to vector<128x128xf32>
    %137 = arith.mulf %132, %136 : vector<128x128xf32>
    %c0_59 = arith.constant 0 : index
    %138 = arith.index_cast %c3_i32 : i32 to index
    %c0_60 = arith.constant 0 : index
    %c0_61 = arith.constant 0 : index
    %139 = vector.load %arg7[%c0_59, %138, %c0_60, %c0_61] : memref<1x4x128x128xf32, #tpu.memory_space<vmem>>, vector<1x1x128x128xf32>
    %140 = vector.shape_cast %139 : vector<1x1x128x128xf32> to vector<128x128xf32>
    %141 = vector.shape_cast %137 : vector<128x128xf32> to vector<1x1x128x128xf32>
    tpu.vector_store %arg7[%c0_59, %138, %c0_60, %c0_61], %141 {strides = array<i32>} : memref<1x4x128x128xf32, #tpu.memory_space<vmem>>, vector<1x1x128x128xf32>,
    %cst_62 = arith.constant dense<0.000000e+00> : vector<128x8xf32>
    %142 = tpu.matmul %137, %124, %cst_62 {dimension_numbers = #tpu.dot_dimension_numbers<[1], [0], [0], [1], [0, 0, 1, 1], [], []>} : vector<128x128xf32>, vector<128x8xf32>, vector<128x8xf32> -> vector<128x8xf32>
    %143 = arith.index_cast %c3_i32 : i32 to index
    %c0_63 = arith.constant 0 : index
    %c0_64 = arith.constant 0 : index
    %144 = vector.load %arg4[%143, %c0_63, %c0_64] : memref<4x8x32xf32, #tpu.memory_space<vmem>>, vector<1x8x32xf32>
    %145 = vector.shape_cast %144 : vector<1x8x32xf32> to vector<8x32xf32>
    %cst_65 = arith.constant dense<0.000000e+00> : vector<128x32xf32>
    %146 = tpu.matmul %142, %145, %cst_65 {dimension_numbers = #tpu.dot_dimension_numbers<[1], [0], [0], [1], [0, 0, 1, 1], [], []>} : vector<128x8xf32>, vector<8x32xf32>, vector<128x32xf32> -> vector<128x32xf32>
    %147 = arith.addf %118, %146 : vector<128x32xf32>
    %c4_i32 = arith.constant 4 : i32
    %c0_66 = arith.constant 0 : index
    %c0_67 = arith.constant 0 : index
    %148 = vector.load %arg5[%c0_66, %c0_67] : memref<1x32xf32, #tpu.memory_space<vmem>>, vector<1x32xf32>
    %149 = vector.shape_cast %148 : vector<1x32xf32> to vector<32xf32>
    %150 = vector.shape_cast %149 : vector<32xf32> to vector<1x32xf32>
    %151 = vector.broadcast %150 : vector<1x32xf32> to vector<128x32xf32>
    %152 = arith.addf %147, %151 : vector<128x32xf32>
    %c0_68 = arith.constant 0 : index
    %c0_69 = arith.constant 0 : index
    %c0_70 = arith.constant 0 : index
    %153 = vector.load %arg6[%c0_68, %c0_69, %c0_70] : memref<1x128x32xf32, #tpu.memory_space<vmem>>, vector<1x128x32xf32>
    %154 = vector.shape_cast %153 : vector<1x128x32xf32> to vector<128x32xf32>
    %155 = vector.shape_cast %152 : vector<128x32xf32> to vector<1x128x32xf32>
    tpu.vector_store %arg6[%c0_68, %c0_69, %c0_70], %155 {strides = array<i32>} : memref<1x128x32xf32, #tpu.memory_space<vmem>>, vector<1x128x32xf32>,
    return
  }
  func.func @transform_0(%arg0: i32) -> (i32, i32, i32) {
    %c0_i32 = arith.constant 0 : i32
    %c0_i32_0 = arith.constant 0 : i32
    %c0_i32_1 = arith.constant 0 : i32
    return %arg0, %c0_i32, %c0_i32_0 : i32, i32, i32
  }
  func.func @transform_1(%arg0: i32) -> (i32, i32) {
    %c0_i32 = arith.constant 0 : i32
    %c0_i32_0 = arith.constant 0 : i32
    %c0_i32_1 = arith.constant 0 : i32
    return %c0_i32, %c0_i32_0 : i32, i32
  }
  func.func @transform_2(%arg0: i32) -> (i32, i32) {
    %c0_i32 = arith.constant 0 : i32
    %c0_i32_0 = arith.constant 0 : i32
    %c0_i32_1 = arith.constant 0 : i32
    return %c0_i32, %c0_i32_0 : i32, i32
  }
  func.func @transform_3(%arg0: i32) -> (i32, i32, i32) {
    %c0_i32 = arith.constant 0 : i32
    %c0_i32_0 = arith.constant 0 : i32
    %c0_i32_1 = arith.constant 0 : i32
    %c0_i32_2 = arith.constant 0 : i32
    return %c0_i32, %c0_i32_0, %c0_i32_1 : i32, i32, i32
  }
  func.func @transform_4(%arg0: i32) -> (i32, i32) {
    %c0_i32 = arith.constant 0 : i32
    %c0_i32_0 = arith.constant 0 : i32
    %c0_i32_1 = arith.constant 0 : i32
    return %c0_i32, %c0_i32_0 : i32, i32
  }
  func.func @transform_5(%arg0: i32) -> (i32, i32, i32) {
    %c0_i32 = arith.constant 0 : i32
    %c0_i32_0 = arith.constant 0 : i32
    %c0_i32_1 = arith.constant 0 : i32
    return %arg0, %c0_i32, %c0_i32_0 : i32, i32, i32
  }
  func.func @transform_6(%arg0: i32) -> (i32, i32, i32, i32) {
    %c0_i32 = arith.constant 0 : i32
    %c0_i32_0 = arith.constant 0 : i32
    %c0_i32_1 = arith.constant 0 : i32
    %c0_i32_2 = arith.constant 0 : i32
    return %arg0, %c0_i32, %c0_i32_0, %c0_i32_1 : i32, i32, i32, i32
  }
}

module attributes {stable_mosaic.version = 11 : i64} {
  func.func @_attn_kernel_probs(%arg0: i32, %arg1: memref<1x128x32xf32, #tpu.memory_space<vmem>>, %arg2: memref<32x96xf32, #tpu.memory_space<vmem>>, %arg3: memref<1x96xf32, #tpu.memory_space<vmem>>, %arg4: memref<4x8x32xf32, #tpu.memory_space<vmem>>, %arg5: memref<1x32xf32, #tpu.memory_space<vmem>>, %arg6: memref<1x128x32xf32, #tpu.memory_space<vmem>>, %arg7: memref<1x4x128x128xf32, #tpu.memory_space<vmem>>, %arg8: memref<4x128x24xf32, #tpu.memory_space<vmem>>) attributes {dimension_semantics = [#tpu.dimension_semantics<parallel>], iteration_bounds = array<i64: 2>, scalar_prefetch = 0 : i64, scratch_operands = 1 : i64, tpu.core_type = #tpu.core_type<tc>, window_params = [{transform_indices = @transform_0, window_bounds = array<i64: 1, 128, 32>}, {pipeline_mode = #tpu.pipeline_mode<synchronous>, transform_indices = @transform_1, window_bounds = array<i64: 32, 96>}, {pipeline_mode = #tpu.pipeline_mode<synchronous>, transform_indices = @transform_2, window_bounds = array<i64: 1, 96>}, {pipeline_mode = #tpu.pipeline_mode<synchronous>, transform_indices = @transform_3, window_bounds = array<i64: 4, 8, 32>}, {pipeline_mode = #tpu.pipeline_mode<synchronous>, transform_indices = @transform_4, window_bounds = array<i64: 1, 32>}, {transform_indices = @transform_5, window_bounds = array<i64: 1, 128, 32>}, {transform_indices = @transform_6, window_bounds = array<i64: 1, 4, 128, 128>}]} {
    %c0 = arith.constant 0 : index
    %c0_0 = arith.constant 0 : index
    %c0_1 = arith.constant 0 : index
    %0 = vector.load %arg1[%c0, %c0_0, %c0_1] : memref<1x128x32xf32, #tpu.memory_space<vmem>>, vector<1x128x32xf32>
    %1 = vector.shape_cast %0 : vector<1x128x32xf32> to vector<128x32xf32>
    %c0_2 = arith.constant 0 : index
    %c0_3 = arith.constant 0 : index
    %2 = vector.load %arg2[%c0_2, %c0_3] : memref<32x96xf32, #tpu.memory_space<vmem>>, vector<32x96xf32>
    %cst = arith.constant dense<0.000000e+00> : vector<128x96xf32>
    %3 = tpu.matmul %1, %2, %cst {dimension_numbers = #tpu.dot_dimension_numbers<[1], [0], [0], [1], [0, 0, 1, 1], [], []>} : vector<128x32xf32>, vector<32x96xf32>, vector<128x96xf32> -> vector<128x96xf32>
    %c0_4 = arith.constant 0 : index
    %c0_5 = arith.constant 0 : index
    %4 = vector.load %arg3[%c0_4, %c0_5] : memref<1x96xf32, #tpu.memory_space<vmem>>, vector<1x96xf32>
    %5 = vector.shape_cast %4 : vector<1x96xf32> to vector<96xf32>
    %6 = vector.shape_cast %5 : vector<96xf32> to vector<1x96xf32>
    %7 = vector.broadcast %6 : vector<1x96xf32> to vector<128x96xf32>
    %8 = arith.addf %3, %7 : vector<128x96xf32>
    %9 = vector.extract_strided_slice %8 {offsets = [0, 0], sizes = [128, 24], strides = [1, 1]} : vector<128x96xf32> to vector<128x24xf32>
    %c0_6 = arith.constant 0 : index
    %c0_7 = arith.constant 0 : index
    %c0_8 = arith.constant 0 : index
    %10 = vector.load %arg8[%c0_6, %c0_7, %c0_8] : memref<4x128x24xf32, #tpu.memory_space<vmem>>, vector<1x128x24xf32>
    %11 = vector.shape_cast %10 : vector<1x128x24xf32> to vector<128x24xf32>
    %12 = vector.shape_cast %9 : vector<128x24xf32> to vector<1x128x24xf32>
    tpu.vector_store %arg8[%c0_6, %c0_7, %c0_8], %12 {strides = array<i32>} : memref<4x128x24xf32, #tpu.memory_space<vmem>>, vector<1x128x24xf32>,
    %13 = vector.extract_strided_slice %8 {offsets = [0, 24], sizes = [128, 24], strides = [1, 1]} : vector<128x96xf32> to vector<128x24xf32>
    %c1 = arith.constant 1 : index
    %c0_9 = arith.constant 0 : index
    %c0_10 = arith.constant 0 : index
    %14 = vector.load %arg8[%c1, %c0_9, %c0_10] : memref<4x128x24xf32, #tpu.memory_space<vmem>>, vector<1x128x24xf32>
    %15 = vector.shape_cast %14 : vector<1x128x24xf32> to vector<128x24xf32>
    %16 = vector.shape_cast %13 : vector<128x24xf32> to vector<1x128x24xf32>
    tpu.vector_store %arg8[%c1, %c0_9, %c0_10], %16 {strides = array<i32>} : memref<4x128x24xf32, #tpu.memory_space<vmem>>, vector<1x128x24xf32>,
    %17 = vector.extract_strided_slice %8 {offsets = [0, 48], sizes = [128, 24], strides = [1, 1]} : vector<128x96xf32> to vector<128x24xf32>
    %c2 = arith.constant 2 : index
    %c0_11 = arith.constant 0 : index
    %c0_12 = arith.constant 0 : index
    %18 = vector.load %arg8[%c2, %c0_11, %c0_12] : memref<4x128x24xf32, #tpu.memory_space<vmem>>, vector<1x128x24xf32>
    %19 = vector.shape_cast %18 : vector<1x128x24xf32> to vector<128x24xf32>
    %20 = vector.shape_cast %17 : vector<128x24xf32> to vector<1x128x24xf32>
    tpu.vector_store %arg8[%c2, %c0_11, %c0_12], %20 {strides = array<i32>} : memref<4x128x24xf32, #tpu.memory_space<vmem>>, vector<1x128x24xf32>,
    %21 = vector.extract_strided_slice %8 {offsets = [0, 72], sizes = [128, 24], strides = [1, 1]} : vector<128x96xf32> to vector<128x24xf32>
    %c3 = arith.constant 3 : index
    %c0_13 = arith.constant 0 : index
    %c0_14 = arith.constant 0 : index
    %22 = vector.load %arg8[%c3, %c0_13, %c0_14] : memref<4x128x24xf32, #tpu.memory_space<vmem>>, vector<1x128x24xf32>
    %23 = vector.shape_cast %22 : vector<1x128x24xf32> to vector<128x24xf32>
    %24 = vector.shape_cast %21 : vector<128x24xf32> to vector<1x128x24xf32>
    tpu.vector_store %arg8[%c3, %c0_13, %c0_14], %24 {strides = array<i32>} : memref<4x128x24xf32, #tpu.memory_space<vmem>>, vector<1x128x24xf32>,
    %25 = tpu.iota {dimensions = array<i32: 1>} : vector<1x128xi32>
    %c8_i32 = arith.constant 8 : i32
    %26 = vector.broadcast %c8_i32 : i32 to vector<1x128xi32>
    %27 = arith.cmpi slt, %25, %26 : vector<1x128xi32>
    %cst_15 = arith.constant 0.000000e+00 : f32
    %cst_16 = arith.constant 0xFF800000 : f32
    %28 = vector.broadcast %cst_15 : f32 to vector<1x128xf32>
    %29 = vector.broadcast %cst_16 : f32 to vector<1x128xf32>
    %30 = arith.select %27, %28, %29 : vector<1x128xi1>, vector<1x128xf32>
    %cst_17 = arith.constant 0.000000e+00 : f32
    %31 = vector.broadcast %cst_17 : f32 to vector<128x32xf32>
    %c0_i32 = arith.constant 0 : i32
    %32 = arith.index_cast %c0_i32 : i32 to index
    %c0_18 = arith.constant 0 : index
    %c0_19 = arith.constant 0 : index
    %33 = vector.load %arg8[%32, %c0_18, %c0_19] : memref<4x128x24xf32, #tpu.memory_space<vmem>>, vector<1x128x24xf32>
    %34 = vector.shape_cast %33 : vector<1x128x24xf32> to vector<128x24xf32>
    %35 = vector.extract_strided_slice %34 {offsets = [0, 0], sizes = [128, 8], strides = [1, 1]} : vector<128x24xf32> to vector<128x8xf32>
    %36 = vector.extract_strided_slice %34 {offsets = [0, 8], sizes = [128, 8], strides = [1, 1]} : vector<128x24xf32> to vector<128x8xf32>
    %37 = vector.extract_strided_slice %34 {offsets = [0, 16], sizes = [128, 8], strides = [1, 1]} : vector<128x24xf32> to vector<128x8xf32>
    %cst_20 = arith.constant dense<0.000000e+00> : vector<128x128xf32>
    %38 = tpu.matmul %35, %36, %cst_20 {dimension_numbers = #tpu.dot_dimension_numbers<[1], [1], [0], [0], [0, 0, 1, 0], [], []>} : vector<128x8xf32>, vector<128x8xf32>, vector<128x128xf32> -> vector<128x128xf32>
    %39 = vector.broadcast %30 : vector<1x128xf32> to vector<128x128xf32>
    %40 = arith.addf %38, %39 : vector<128x128xf32>
    %cst_21 = arith.constant dense<0xFF800000> : vector<128xf32>
    %41 = vector.multi_reduction <maximumf>, %40, %cst_21 [1] : vector<128x128xf32> to vector<128xf32>
    %42 = vector.shape_cast %41 : vector<128xf32> to vector<128x1xf32>
    %43 = vector.broadcast %42 : vector<128x1xf32> to vector<128x128xf32>
    %44 = arith.subf %40, %43 : vector<128x128xf32>
    %45 = math.exp %44 : vector<128x128xf32>
    %cst_22 = arith.constant dense<0.000000e+00> : vector<128xf32>
    %46 = vector.multi_reduction <add>, %45, %cst_22 [1] : vector<128x128xf32> to vector<128xf32>
    %47 = vector.shape_cast %46 : vector<128xf32> to vector<128x1xf32>
    %48 = tpu.reciprocal %47 {approx = true} : vector<128x1xf32> -> vector<128x1xf32>
    %49 = vector.broadcast %48 : vector<128x1xf32> to vector<128x128xf32>
    %50 = arith.mulf %45, %49 : vector<128x128xf32>
    %c0_23 = arith.constant 0 : index
    %51 = arith.index_cast %c0_i32 : i32 to index
    %c0_24 = arith.constant 0 : index
    %c0_25 = arith.constant 0 : index
    %52 = vector.load %arg7[%c0_23, %51, %c0_24, %c0_25] : memref<1x4x128x128xf32, #tpu.memory_space<vmem>>, vector<1x1x128x128xf32>
    %53 = vector.shape_cast %52 : vector<1x1x128x128xf32> to vector<128x128xf32>
    %54 = vector.shape_cast %50 : vector<128x128xf32> to vector<1x1x128x128xf32>
    tpu.vector_store %arg7[%c0_23, %51, %c0_24, %c0_25], %54 {strides = array<i32>} : memref<1x4x128x128xf32, #tpu.memory_space<vmem>>, vector<1x1x128x128xf32>,
    %cst_26 = arith.constant dense<0.000000e+00> : vector<128x8xf32>
    %55 = tpu.matmul %50, %37, %cst_26 {dimension_numbers = #tpu.dot_dimension_numbers<[1], [0], [0], [1], [0, 0, 1, 1], [], []>} : vector<128x128xf32>, vector<128x8xf32>, vector<128x8xf32> -> vector<128x8xf32>
    %56 = arith.index_cast %c0_i32 : i32 to index
    %c0_27 = arith.constant 0 : index
    %c0_28 = arith.constant 0 : index
    %57 = vector.load %arg4[%56, %c0_27, %c0_28] : memref<4x8x32xf32, #tpu.memory_space<vmem>>, vector<1x8x32xf32>
    %58 = vector.shape_cast %57 : vector<1x8x32xf32> to vector<8x32xf32>
    %cst_29 = arith.constant dense<0.000000e+00> : vector<128x32xf32>
    %59 = tpu.matmul %55, %58, %cst_29 {dimension_numbers = #tpu.dot_dimension_numbers<[1], [0], [0], [1], [0, 0, 1, 1], [], []>} : vector<128x8xf32>, vector<8x32xf32>, vector<128x32xf32> -> vector<128x32xf32>
    %60 = arith.addf %31, %59 : vector<128x32xf32>
    %c1_i32 = arith.constant 1 : i32
    %61 = arith.index_cast %c1_i32 : i32 to index
    %c0_30 = arith.constant 0 : index
    %c0_31 = arith.constant 0 : index
    %62 = vector.load %arg8[%61, %c0_30, %c0_31] : memref<4x128x24xf32, #tpu.memory_space<vmem>>, vector<1x128x24xf32>
    %63 = vector.shape_cast %62 : vector<1x128x24xf32> to vector<128x24xf32>
    %64 = vector.extract_strided_slice %63 {offsets = [0, 0], sizes = [128, 8], strides = [1, 1]} : vector<128x24xf32> to vector<128x8xf32>
    %65 = vector.extract_strided_slice %63 {offsets = [0, 8], sizes = [128, 8], strides = [1, 1]} : vector<128x24xf32> to vector<128x8xf32>
    %66 = vector.extract_strided_slice %63 {offsets = [0, 16], sizes = [128, 8], strides = [1, 1]} : vector<128x24xf32> to vector<128x8xf32>
    %cst_32 = arith.constant dense<0.000000e+00> : vector<128x128xf32>
    %67 = tpu.matmul %64, %65, %cst_32 {dimension_numbers = #tpu.dot_dimension_numbers<[1], [1], [0], [0], [0, 0, 1, 0], [], []>} : vector<128x8xf32>, vector<128x8xf32>, vector<128x128xf32> -> vector<128x128xf32>
    %68 = vector.broadcast %30 : vector<1x128xf32> to vector<128x128xf32>
    %69 = arith.addf %67, %68 : vector<128x128xf32>
    %cst_33 = arith.constant dense<0xFF800000> : vector<128xf32>
    %70 = vector.multi_reduction <maximumf>, %69, %cst_33 [1] : vector<128x128xf32> to vector<128xf32>
    %71 = vector.shape_cast %70 : vector<128xf32> to vector<128x1xf32>
    %72 = vector.broadcast %71 : vector<128x1xf32> to vector<128x128xf32>
    %73 = arith.subf %69, %72 : vector<128x128xf32>
    %74 = math.exp %73 : vector<128x128xf32>
    %cst_34 = arith.constant dense<0.000000e+00> : vector<128xf32>
    %75 = vector.multi_reduction <add>, %74, %cst_34 [1] : vector<128x128xf32> to vector<128xf32>
    %76 = vector.shape_cast %75 : vector<128xf32> to vector<128x1xf32>
    %77 = tpu.reciprocal %76 {approx = true} : vector<128x1xf32> -> vector<128x1xf32>
    %78 = vector.broadcast %77 : vector<128x1xf32> to vector<128x128xf32>
    %79 = arith.mulf %74, %78 : vector<128x128xf32>
    %c0_35 = arith.constant 0 : index
    %80 = arith.index_cast %c1_i32 : i32 to index
    %c0_36 = arith.constant 0 : index
    %c0_37 = arith.constant 0 : index
    %81 = vector.load %arg7[%c0_35, %80, %c0_36, %c0_37] : memref<1x4x128x128xf32, #tpu.memory_space<vmem>>, vector<1x1x128x128xf32>
    %82 = vector.shape_cast %81 : vector<1x1x128x128xf32> to vector<128x128xf32>
    %83 = vector.shape_cast %79 : vector<128x128xf32> to vector<1x1x128x128xf32>
    tpu.vector_store %arg7[%c0_35, %80, %c0_36, %c0_37], %83 {strides = array<i32>} : memref<1x4x128x128xf32, #tpu.memory_space<vmem>>, vector<1x1x128x128xf32>,
    %cst_38 = arith.constant dense<0.000000e+00> : vector<128x8xf32>
    %84 = tpu.matmul %79, %66, %cst_38 {dimension_numbers = #tpu.dot_dimension_numbers<[1], [0], [0], [1], [0, 0, 1, 1], [], []>} : vector<128x128xf32>, vector<128x8xf32>, vector<128x8xf32> -> vector<128x8xf32>
    %85 = arith.index_cast %c1_i32 : i32 to index
    %c0_39 = arith.constant 0 : index
    %c0_40 = arith.constant 0 : index
    %86 = vector.load %arg4[%85, %c0_39, %c0_40] : memref<4x8x32xf32, #tpu.memory_space<vmem>>, vector<1x8x32xf32>
    %87 = vector.shape_cast %86 : vector<1x8x32xf32> to vector<8x32xf32>
    %cst_41 = arith.constant dense<0.000000e+00> : vector<128x32xf32>
    %88 = tpu.matmul %84, %87, %cst_41 {dimension_numbers = #tpu.dot_dimension_numbers<[1], [0], [0], [1], [0, 0, 1, 1], [], []>} : vector<128x8xf32>, vector<8x32xf32>, vector<128x32xf32> -> vector<128x32xf32>
    %89 = arith.addf %60, %88 : vector<128x32xf32>
    %c2_i32 = arith.constant 2 : i32
    %90 = arith.index_cast %c2_i32 : i32 to index
    %c0_42 = arith.constant 0 : index
    %c0_43 = arith.constant 0 : index
    %91 = vector.load %arg8[%90, %c0_42, %c0_43] : memref<4x128x24xf32, #tpu.memory_space<vmem>>, vector<1x128x24xf32>
    %92 = vector.shape_cast %91 : vector<1x128x24xf32> to vector<128x24xf32>
    %93 = vector.extract_strided_slice %92 {offsets = [0, 0], sizes = [128, 8], strides = [1, 1]} : vector<128x24xf32> to vector<128x8xf32>
    %94 = vector.extract_strided_slice %92 {offsets = [0, 8], sizes = [128, 8], strides = [1, 1]} : vector<128x24xf32> to vector<128x8xf32>
    %95 = vector.extract_strided_slice %92 {offsets = [0, 16], sizes = [128, 8], strides = [1, 1]} : vector<128x24xf32> to vector<128x8xf32>
    %cst_44 = arith.constant dense<0.000000e+00> : vector<128x128xf32>
    %96 = tpu.matmul %93, %94, %cst_44 {dimension_numbers = #tpu.dot_dimension_numbers<[1], [1], [0], [0], [0, 0, 1, 0], [], []>} : vector<128x8xf32>, vector<128x8xf32>, vector<128x128xf32> -> vector<128x128xf32>
    %97 = vector.broadcast %30 : vector<1x128xf32> to vector<128x128xf32>
    %98 = arith.addf %96, %97 : vector<128x128xf32>
    %cst_45 = arith.constant dense<0xFF800000> : vector<128xf32>
    %99 = vector.multi_reduction <maximumf>, %98, %cst_45 [1] : vector<128x128xf32> to vector<128xf32>
    %100 = vector.shape_cast %99 : vector<128xf32> to vector<128x1xf32>
    %101 = vector.broadcast %100 : vector<128x1xf32> to vector<128x128xf32>
    %102 = arith.subf %98, %101 : vector<128x128xf32>
    %103 = math.exp %102 : vector<128x128xf32>
    %cst_46 = arith.constant dense<0.000000e+00> : vector<128xf32>
    %104 = vector.multi_reduction <add>, %103, %cst_46 [1] : vector<128x128xf32> to vector<128xf32>
    %105 = vector.shape_cast %104 : vector<128xf32> to vector<128x1xf32>
    %106 = tpu.reciprocal %105 {approx = true} : vector<128x1xf32> -> vector<128x1xf32>
    %107 = vector.broadcast %106 : vector<128x1xf32> to vector<128x128xf32>
    %108 = arith.mulf %103, %107 : vector<128x128xf32>
    %c0_47 = arith.constant 0 : index
    %109 = arith.index_cast %c2_i32 : i32 to index
    %c0_48 = arith.constant 0 : index
    %c0_49 = arith.constant 0 : index
    %110 = vector.load %arg7[%c0_47, %109, %c0_48, %c0_49] : memref<1x4x128x128xf32, #tpu.memory_space<vmem>>, vector<1x1x128x128xf32>
    %111 = vector.shape_cast %110 : vector<1x1x128x128xf32> to vector<128x128xf32>
    %112 = vector.shape_cast %108 : vector<128x128xf32> to vector<1x1x128x128xf32>
    tpu.vector_store %arg7[%c0_47, %109, %c0_48, %c0_49], %112 {strides = array<i32>} : memref<1x4x128x128xf32, #tpu.memory_space<vmem>>, vector<1x1x128x128xf32>,
    %cst_50 = arith.constant dense<0.000000e+00> : vector<128x8xf32>
    %113 = tpu.matmul %108, %95, %cst_50 {dimension_numbers = #tpu.dot_dimension_numbers<[1], [0], [0], [1], [0, 0, 1, 1], [], []>} : vector<128x128xf32>, vector<128x8xf32>, vector<128x8xf32> -> vector<128x8xf32>
    %114 = arith.index_cast %c2_i32 : i32 to index
    %c0_51 = arith.constant 0 : index
    %c0_52 = arith.constant 0 : index
    %115 = vector.load %arg4[%114, %c0_51, %c0_52] : memref<4x8x32xf32, #tpu.memory_space<vmem>>, vector<1x8x32xf32>
    %116 = vector.shape_cast %115 : vector<1x8x32xf32> to vector<8x32xf32>
    %cst_53 = arith.constant dense<0.000000e+00> : vector<128x32xf32>
    %117 = tpu.matmul %113, %116, %cst_53 {dimension_numbers = #tpu.dot_dimension_numbers<[1], [0], [0], [1], [0, 0, 1, 1], [], []>} : vector<128x8xf32>, vector<8x32xf32>, vector<128x32xf32> -> vector<128x32xf32>
    %118 = arith.addf %89, %117 : vector<128x32xf32>
    %c3_i32 = arith.constant 3 : i32
    %119 = arith.index_cast %c3_i32 : i32 to index
    %c0_54 = arith.constant 0 : index
    %c0_55 = arith.constant 0 : index
    %120 = vector.load %arg8[%119, %c0_54, %c0_55] : memref<4x128x24xf32, #tpu.memory_space<vmem>>, vector<1x128x24xf32>
    %121 = vector.shape_cast %120 : vector<1x128x24xf32> to vector<128x24xf32>
    %122 = vector.extract_strided_slice %121 {offsets = [0, 0], sizes = [128, 8], strides = [1, 1]} : vector<128x24xf32> to vector<128x8xf32>
    %123 = vector.extract_strided_slice %121 {offsets = [0, 8], sizes = [128, 8], strides = [1, 1]} : vector<128x24xf32> to vector<128x8xf32>
    %124 = vector.extract_strided_slice %121 {offsets = [0, 16], sizes = [128, 8], strides = [1, 1]} : vector<128x24xf32> to vector<128x8xf32>
    %cst_56 = arith.constant dense<0.000000e+00> : vector<128x128xf32>
    %125 = tpu.matmul %122, %123, %cst_56 {dimension_numbers = #tpu.dot_dimension_numbers<[1], [1], [0], [0], [0, 0, 1, 0], [], []>} : vector<128x8xf32>, vector<128x8xf32>, vector<128x128xf32> -> vector<128x128xf32>
    %126 = vector.broadcast %30 : vector<1x128xf32> to vector<128x128xf32>
    %127 = arith.addf %125, %126 : vector<128x128xf32>
    %cst_57 = arith.constant dense<0xFF800000> : vector<128xf32>
    %128 = vector.multi_reduction <maximumf>, %127, %cst_57 [1] : vector<128x128xf32> to vector<128xf32>
    %129 = vector.shape_cast %128 : vector<128xf32> to vector<128x1xf32>
    %130 = vector.broadcast %129 : vector<128x1xf32> to vector<128x128xf32>
    %131 = arith.subf %127, %130 : vector<128x128xf32>
    %132 = math.exp %131 : vector<128x128xf32>
    %cst_58 = arith.constant dense<0.000000e+00> : vector<128xf32>
    %133 = vector.multi_reduction <add>, %132, %cst_58 [1] : vector<128x128xf32> to vector<128xf32>
    %134 = vector.shape_cast %133 : vector<128xf32> to vector<128x1xf32>
    %135 = tpu.reciprocal %134 {approx = true} : vector<128x1xf32> -> vector<128x1xf32>
    %136 = vector.broadcast %135 : vector<128x1xf32> to vector<128x128xf32>
    %137 = arith.mulf %132, %136 : vector<128x128xf32>
    %c0_59 = arith.constant 0 : index
    %138 = arith.index_cast %c3_i32 : i32 to index
    %c0_60 = arith.constant 0 : index
    %c0_61 = arith.constant 0 : index
    %139 = vector.load %arg7[%c0_59, %138, %c0_60, %c0_61] : memref<1x4x128x128xf32, #tpu.memory_space<vmem>>, vector<1x1x128x128xf32>
    %140 = vector.shape_cast %139 : vector<1x1x128x128xf32> to vector<128x128xf32>
    %141 = vector.shape_cast %137 : vector<128x128xf32> to vector<1x1x128x128xf32>
    tpu.vector_store %arg7[%c0_59, %138, %c0_60, %c0_61], %141 {strides = array<i32>} : memref<1x4x128x128xf32, #tpu.memory_space<vmem>>, vector<1x1x128x128xf32>,
    %cst_62 = arith.constant dense<0.000000e+00> : vector<128x8xf32>
    %142 = tpu.matmul %137, %124, %cst_62 {dimension_numbers = #tpu.dot_dimension_numbers<[1], [0], [0], [1], [0, 0, 1, 1], [], []>} : vector<128x128xf32>, vector<128x8xf32>, vector<128x8xf32> -> vector<128x8xf32>
    %143 = arith.index_cast %c3_i32 : i32 to index
    %c0_63 = arith.constant 0 : index
    %c0_64 = arith.constant 0 : index
    %144 = vector.load %arg4[%143, %c0_63, %c0_64] : memref<4x8x32xf32, #tpu.memory_space<vmem>>, vector<1x8x32xf32>
    %145 = vector.shape_cast %144 : vector<1x8x32xf32> to vector<8x32xf32>
    %cst_65 = arith.constant dense<0.000000e+00> : vector<128x32xf32>
    %146 = tpu.matmul %142, %145, %cst_65 {dimension_numbers = #tpu.dot_dimension_numbers<[1], [0], [0], [1], [0, 0, 1, 1], [], []>} : vector<128x8xf32>, vector<8x32xf32>, vector<128x32xf32> -> vector<128x32xf32>
    %147 = arith.addf %118, %146 : vector<128x32xf32>
    %c4_i32 = arith.constant 4 : i32
    %c0_66 = arith.constant 0 : index
    %c0_67 = arith.constant 0 : index
    %148 = vector.load %arg5[%c0_66, %c0_67] : memref<1x32xf32, #tpu.memory_space<vmem>>, vector<1x32xf32>
    %149 = vector.shape_cast %148 : vector<1x32xf32> to vector<32xf32>
    %150 = vector.shape_cast %149 : vector<32xf32> to vector<1x32xf32>
    %151 = vector.broadcast %150 : vector<1x32xf32> to vector<128x32xf32>
    %152 = arith.addf %147, %151 : vector<128x32xf32>
    %c0_68 = arith.constant 0 : index
    %c0_69 = arith.constant 0 : index
    %c0_70 = arith.constant 0 : index
    %153 = vector.load %arg6[%c0_68, %c0_69, %c0_70] : memref<1x128x32xf32, #tpu.memory_space<vmem>>, vector<1x128x32xf32>
    %154 = vector.shape_cast %153 : vector<1x128x32xf32> to vector<128x32xf32>
    %155 = vector.shape_cast %152 : vector<128x32xf32> to vector<1x128x32xf32>
    tpu.vector_store %arg6[%c0_68, %c0_69, %c0_70], %155 {strides = array<i32>} : memref<1x128x32xf32, #tpu.memory_space<vmem>>, vector<1x128x32xf32>,
    return
  }
  func.func @transform_0(%arg0: i32) -> (i32, i32, i32) {
    %c0_i32 = arith.constant 0 : i32
    %c0_i32_0 = arith.constant 0 : i32
    %c0_i32_1 = arith.constant 0 : i32
    return %arg0, %c0_i32, %c0_i32_0 : i32, i32, i32
  }
  func.func @transform_1(%arg0: i32) -> (i32, i32) {
    %c0_i32 = arith.constant 0 : i32
    %c0_i32_0 = arith.constant 0 : i32
    %c0_i32_1 = arith.constant 0 : i32
    return %c0_i32, %c0_i32_0 : i32, i32
  }
  func.func @transform_2(%arg0: i32) -> (i32, i32) {
    %c0_i32 = arith.constant 0 : i32
    %c0_i32_0 = arith.constant 0 : i32
    %c0_i32_1 = arith.constant 0 : i32
    return %c0_i32, %c0_i32_0 : i32, i32
  }
  func.func @transform_3(%arg0: i32) -> (i32, i32, i32) {
    %c0_i32 = arith.constant 0 : i32
    %c0_i32_0 = arith.constant 0 : i32
    %c0_i32_1 = arith.constant 0 : i32
    %c0_i32_2 = arith.constant 0 : i32
    return %c0_i32, %c0_i32_0, %c0_i32_1 : i32, i32, i32
  }
  func.func @transform_4(%arg0: i32) -> (i32, i32) {
    %c0_i32 = arith.constant 0 : i32
    %c0_i32_0 = arith.constant 0 : i32
    %c0_i32_1 = arith.constant 0 : i32
    return %c0_i32, %c0_i32_0 : i32, i32
  }
  func.func @transform_5(%arg0: i32) -> (i32, i32, i32) {
    %c0_i32 = arith.constant 0 : i32
    %c0_i32_0 = arith.constant 0 : i32
    %c0_i32_1 = arith.constant 0 : i32
    return %arg0, %c0_i32, %c0_i32_0 : i32, i32, i32
  }
  func.func @transform_6(%arg0: i32) -> (i32, i32, i32, i32) {
    %c0_i32 = arith.constant 0 : i32
    %c0_i32_0 = arith.constant 0 : i32
    %c0_i32_1 = arith.constant 0 : i32
    %c0_i32_2 = arith.constant 0 : i32
    return %arg0, %c0_i32, %c0_i32_0, %c0_i32_1 : i32, i32, i32, i32
  }
}

</mosaic_0001>

<bundles_post_ra>
// kernel: tpu_custom_call.1
= control target key start
LH: loop header
LB: loop body
LE: loop exit
PB: predicated region body
PF: predicated region fallthrough
CT: control target
= control target key end

     0   :  { %12 = vsyncpa [#allocation4], 0  ;;  %s7913_s0 = inlined_call_operand.vmem [shape: f32[2,128,32], index: 0, kind: input, shape index: {}]   ;;  %s7914_s1 = inlined_call_operand.vmem [shape: f32[32,96], index: 1, kind: input, shape index: {}]   ;;  %s7915_s2 = inlined_call_operand.vmem [shape: f32[1,96], index: 2, kind: input, shape index: {}]   ;;  %s7916_s3 = inlined_call_operand.vmem [shape: f32[4,8,32], index: 3, kind: input, shape index: {}]   ;;  %s7917_s4 = inlined_call_operand.vmem [shape: f32[1,32], index: 4, kind: input, shape index: {}]   ;;  %s7918_s5 = inlined_call_operand.vmem [shape: f32[2,128,32], index: 5, kind: output, shape index: {0}]   ;;  %s7919_s6 = inlined_call_operand.hbm [shape: f32[2,4,128,128], index: 6, kind: output, shape index: {1}]  }
   0x1   :  { %14 = vsyncpa [#allocation4 + $0x1], 0  ;;  %s5830_s21 = smov 0   ;;  %s5832_s22 = smov 0  }
   0x2   :  { %s5834_s23 = smov 0   ;;  %s5836_s24 = smov 0  }
   0x3 LB: > { %s5851_s25 = sadd.s32 4294967295, %s5784_s24   ;;  %s4183_s26 = sadd.s32 4294967294, %s5784_s24   ;;  %s5784_s24 = sphi %s5836_s24, %s7987_s24   ;;  %s5780_s23 = sphi %s5834_s23, %s7986_s23   ;;  %s5776_s22 = sphi %s5832_s22, %s7985_s22   ;;  %s5772_s21 = sphi %s5830_s21, %s7984_s21  }
   0x4   : > { %s5855_s27 = sadd.s32 1, %s5784_s24   ;;  %s163_s28 = sadd.s32 1, %s5780_s23 }
   0x5   : > { %s160_s29 = ssub.s32 %s5784_s24, %s5855_s27  ;;  %p173_p0 = scmp.ne.s32.totalorder %s5780_s23, %s5776_s22 }
   0x6   : > { %p161_p1 = scmp.eq.s32.totalorder %s160_s29, 0  ;;  %p174_p2 = scmp.eq.s32.totalorder %s5851_s25, 1 }
   0x7   : > { %p179_p3 = scmp.ne.s32.totalorder %s5776_s22, %s5772_s21  ;;  %p180_p4 = scmp.eq.s32.totalorder %s4183_s26, 1 }
   0x8   : > { %s5866_s30 = scalar_select %p161_p1, %s5780_s23, %s163_s28  }
   0x9   : > { %p5868_p5 = por %p174_p2, %p173_p0  ;;  %p5872_p6 = por %p180_p4, %p179_p3 }
   0xa   : > { %p4186_p7 = scmp.ge.s32.totalorder %s5784_s24, 1  ;;  %p218_p8 = scmp.lt.s32.totalorder %s5784_s24, 3 }
   0xc   : > { %p219_p9 = pnand %p4186_p7, %p218_p8 }
   0xe   : > { %222 = sbr.rel (%p219_p9) target bundleno = 3023 (0xbcf), region = 40 }
  0x13   : > { %v282_v0 = vld [vmem:[%s7914_s1 + $0x18] sm:$0xff]  ;;  %v281_v1 = vld [vmem:[%s7914_s1 + $0x10] sm:$0xff]  ;;  %p253_p10 = scmp.lt.s32.totalorder %s5851_s25, 1  ;;  %v280_v2 = vld [vmem:[%s7914_s1 + $0x8] sm:$0xff]  ;;  %vm290_vm0 = vcmask 261120   ;;  %vm484_vm1 = vcmask 195584  }
  0x14   : > { %4805 = vmatprep.subr.mxu0 %v282_v0  ;;  %v279_v3 = vld [vmem:[%s7914_s1] sm:$0xff]  ;;  %vm780_vm2 = vcmask 64512   ;;  %s5786_s9 = smov 120   ;;  %s5787_s10 = smov 104  }
  0x15   : > { %4806 = vmatpush3.msra.mxu0 %v282_v0  ;;  %s5889_s15 = scalar_select %p253_p10, %s5851_s25, 1  ;;  %v4192_v20 = vld [vmem:[%s7915_s2] ss:$0 sm:$0xff] }
  0x16   : > { %4807 = vmatprep.subr.mxu0 %v281_v1  ;;  %s5788_s11 = smov 112   ;;  %s250_s12 = sand.u32 1, %s5776_s22  }
  0x17   : > { %4808 = vmatpush3.msra.mxu0 %v281_v1  ;;  %s4458_s18 = sshll.u32 %s5889_s15, 7  ;;  %s4187_s13 = sshll.u32 %s250_s12, 9 }
  0x18   : > { %4809 = vmatprep.subr.mxu0 %v280_v2  ;;  %s5900_s26 = scalar_lea.vmem %s7913_s0, %s4458_s18  ;;  %s6428_s14 = scalar_lea.vmem [#allocation3], %s4187_s13 }
  0x19   : > { %4810 = vmatpush3.msra.mxu0 %v280_v2  ;;  %v263_v4 = vld [vmem:[%s5900_s26] sm:$0xff]  ;;  %v264_v5 = vld [vmem:[%s5900_s26 + $0x8] sm:$0xff]  ;;  %v265_v6 = vld [vmem:[%s5900_s26 + $0x10] sm:$0xff]  ;;  %s5790_s19 = smov 80   ;;  %s5791_s28 = smov 56  }
  0x1a   : > { %4811 = vmatprep.subr.mxu0 %v279_v3  ;;  %4813 = vmatprep.mubr.msk.f32.mxu0 %vm290_vm0, %v263_v4  ;;  %v266_v7 = vld [vmem:[%s5900_s26 + $0x18] sm:$0xff]  ;;  %v267_v8 = vld [vmem:[%s5900_s26 + $0x20] sm:$0xff]  ;;  %v268_v9 = vld [vmem:[%s5900_s26 + $0x28] sm:$0xff]  ;;  %s4460_s13 = sshll.u32 %s5851_s25, 13  ;;  %s4096_s16 = sshll.u32 %s6428_s14, 4  ;;  %s7793_s16 = int_to_ptr.vmem [resolvable:$true] %s4096_s16 }
  0x1b   : > { %4812 = vmatpush3.msra.mxu0 %v279_v3  ;;  %v269_v10 = vld [vmem:[%s5900_s26 + $0x30] sm:$0xff]  ;;  %v270_v11 = vld [vmem:[%s5900_s26 + $0x38] sm:$0xff]  ;;  %v271_v12 = vld [vmem:[%s5900_s26 + $0x40] sm:$0xff]  ;;  %s7791_s20 = scalar_lea.hbm %s7919_s6, %s4460_s13  ;;  %s5792_s25 = smov [#allocation3]  }
  0x1c   : > { %4814 = vmatmul.mubr.msk.f32.vlgmr.msra.gmra.mxu0 %vm290_vm0, %v264_v5  ;;  %v272_v13 = vld [vmem:[%s5900_s26 + $0x48] sm:$0xff]  ;;  %v273_v14 = vld [vmem:[%s5900_s26 + $0x50] sm:$0xff]  ;;  %v274_v15 = vld [vmem:[%s5900_s26 + $0x58] sm:$0xff] }
  0x1d   : > { %4816 = vmatprep.mubr.msk.f32.mxu0 %vm290_vm0, %v265_v6  ;;  %v275_v16 = vld [vmem:[%s5900_s26 + $0x60] sm:$0xff]  ;;  %v276_v17 = vld [vmem:[%s5900_s26 + $0x68] sm:$0xff]  ;;  %v277_v18 = vld [vmem:[%s5900_s26 + $0x70] sm:$0xff] }
  0x1e   : > { %v278_v19 = vld [vmem:[%s5900_s26 + $0x78] sm:$0xff]  ;;  %s7797_s26 = scalar_lea.sflag [#allocation4], %s250_s12 }
  0x20   : > { %4817 = vmatmul.mubr.msk.f32.gmra.mxu0 %vm290_vm0, %v266_v7 }
  0x21   : > { %4819 = vmatprep.mubr.msk.f32.mxu0 %vm290_vm0, %v267_v8 }
  0x24   : > { %4820 = vmatmul.mubr.msk.f32.gmra.mxu0 %vm290_vm0, %v268_v9 }
  0x25   : > { %4822 = vmatprep.mubr.msk.f32.mxu0 %vm290_vm0, %v269_v10 }
  0x28   : > { %4823 = vmatmul.mubr.msk.f32.gmra.mxu0 %vm290_vm0, %v270_v11 }
  0x29   : > { %4825 = vmatprep.mubr.msk.f32.mxu0 %vm290_vm0, %v271_v12 }
  0x2c   : > { %4826 = vmatmul.mubr.msk.f32.gmra.mxu0 %vm290_vm0, %v272_v13 }
  0x2d   : > { %4828 = vmatprep.mubr.msk.f32.mxu0 %vm290_vm0, %v273_v14 }
  0x30   : > { %4829 = vmatmul.mubr.msk.f32.gmra.mxu0 %vm290_vm0, %v274_v15 }
  0x31   : > { %4831 = vmatprep.mubr.msk.f32.mxu0 %vm290_vm0, %v275_v16 }
  0x34   : > { %4832 = vmatmul.mubr.msk.f32.gmra.mxu0 %vm290_vm0, %v276_v17 }
  0x35   : > { %4834 = vmatprep.mubr.msk.f32.mxu0 %vm290_vm0, %v277_v18 }
  0x38   : > { %4835 = vmatmul.mubr.msk.f32.gmra.mxu0 %vm290_vm0, %v278_v19 }
  0xdc   : > { %v4815_v21 = vpop.f32.mrf.mxu0 }
  0xdd   : > { %v5937_v22 = vadd.f32 %v4815_v21, %v4192_v20 }
  0xde   : > { %v405_v23 = vpop.f32.mrf.mxu0 }
  0xdf   : > { %7944 = vst [vmem:[#allocation6_spill] sm:$0xff] %v5937_v22  ;;  %486 = vst.msk [vmem:[#allocation2 + $0x8] sm:$0xff] %vm484_vm1, %v5937_v22  ;;  %v5941_v24 = vadd.f32 %v4192_v20, %v405_v23 }
  0xe0   : > { %v4818_v25 = vpop.f32.mrf.mxu0 }
  0xe1   : > { %7945 = vst [vmem:[#allocation7_spill] sm:$0xff] %v5941_v24  ;;  %485 = vst.msk [vmem:[#allocation2] sm:$0xff] %vm484_vm1, %v5941_v24  ;;  %v5945_v26 = vadd.f32 %v4818_v25, %v4192_v20 }
  0xe2   : > { %v415_v27 = vpop.f32.mrf.mxu0 }
  0xe3   : > { %7946 = vst [vmem:[#allocation8_spill] sm:$0xff] %v5945_v26  ;;  %488 = vst.msk [vmem:[#allocation2 + $0x18] sm:$0xff] %vm484_vm1, %v5945_v26  ;;  %v5949_v28 = vadd.f32 %v4192_v20, %v415_v27 }
  0xe4   : > { %v4821_v29 = vpop.f32.mrf.mxu0 }
  0xe5   : > { %7947 = vst [vmem:[#allocation9_spill] sm:$0xff] %v5949_v28  ;;  %487 = vst.msk [vmem:[#allocation2 + $0x10] sm:$0xff] %vm484_vm1, %v5949_v28  ;;  %v5953_v30 = vadd.f32 %v4821_v29, %v4192_v20 }
  0xe6   : > { %v425_v31 = vpop.f32.mrf.mxu0  ;;  %v6063_v4 = vld [vmem:[#allocation2 + $0x8] sm:$0xff] }
  0xe7   : > { %7948 = vst [vmem:[#allocation10_spill] sm:$0xff] %v5953_v30  ;;  %490 = vst.msk [vmem:[#allocation2 + $0x28] sm:$0xff] %vm484_vm1, %v5953_v30  ;;  %v5957_v32 = vadd.f32 %v4192_v20, %v425_v31 }
  0xe8   : > { %v4824_v33 = vpop.f32.mrf.mxu0  ;;  %v5959_v34 = vld [vmem:[#allocation2] sm:$0xff] }
  0xe9   : > { %7949 = vst [vmem:[#allocation11_spill] sm:$0xff] %v5957_v32  ;;  %489 = vst.msk [vmem:[#allocation2 + $0x20] sm:$0xff] %vm484_vm1, %v5957_v32  ;;  %v5963_v35 = vadd.f32 %v4824_v33, %v4192_v20  ;;  %4869 = vmatprep.mubr.msk.f32.mxu1 %vm780_vm2, %v5959_v34 }
  0xea   : > { %v435_v36 = vpop.f32.mrf.mxu0  ;;  %v6057_v3 = vld [vmem:[#allocation2 + $0x18] sm:$0xff] }
  0xeb   : > { %7950 = vst [vmem:[#allocation12_spill] sm:$0xff] %v5963_v35  ;;  %492 = vst.msk [vmem:[#allocation2 + $0x38] sm:$0xff] %vm484_vm1, %v5963_v35  ;;  %v5969_v37 = vadd.f32 %v4192_v20, %v435_v36 }
  0xec   : > { %v4827_v38 = vpop.f32.mrf.mxu0  ;;  %v6051_v2 = vld [vmem:[#allocation2 + $0x10] sm:$0xff] }
  0xed   : > { %7951 = vst [vmem:[#allocation13_spill] sm:$0xff] %v5969_v37  ;;  %491 = vst.msk [vmem:[#allocation2 + $0x30] sm:$0xff] %vm484_vm1, %v5969_v37  ;;  %v5973_v39 = vadd.f32 %v4827_v38, %v4192_v20 }
  0xee   : > { %v445_v40 = vpop.f32.mrf.mxu0  ;;  %v6049_v1 = vld [vmem:[#allocation2 + $0x28] sm:$0xff] }
  0xef   : > { %7952 = vst [vmem:[#allocation14_spill] sm:$0xff] %v5973_v39  ;;  %494 = vst.msk [vmem:[#allocation2 + $0x48] sm:$0xff] %vm484_vm1, %v5973_v39  ;;  %v5977_v41 = vadd.f32 %v4192_v20, %v445_v40 }
  0xf0   : > { %v4830_v42 = vpop.f32.mrf.mxu0  ;;  %v6043_v0 = vld [vmem:[#allocation2 + $0x20] sm:$0xff] }
  0xf1   : > { %7953 = vst [vmem:[#allocation15_spill] sm:$0xff] %v5977_v41  ;;  %493 = vst.msk [vmem:[#allocation2 + $0x40] sm:$0xff] %vm484_vm1, %v5977_v41  ;;  %v5981_v43 = vadd.f32 %v4830_v42, %v4192_v20 }
  0xf2   : > { %v455_v44 = vpop.f32.mrf.mxu0  ;;  %v6041_v63 = vld [vmem:[#allocation2 + $0x38] sm:$0xff] }
  0xf3   : > { %7954 = vst [vmem:[#allocation16_spill] sm:$0xff] %v5981_v43  ;;  %496 = vst.msk [vmem:[#allocation2 + $0x58] sm:$0xff] %vm484_vm1, %v5981_v43  ;;  %v5985_v45 = vadd.f32 %v4192_v20, %v455_v44 }
  0xf4   : > { %v4833_v46 = vpop.f32.mrf.mxu0  ;;  %v6035_v62 = vld [vmem:[#allocation2 + $0x30] sm:$0xff] }
  0xf5   : > { %495 = vst.msk [vmem:[#allocation2 + $0x50] sm:$0xff] %vm484_vm1, %v5985_v45  ;;  %v5989_v47 = vadd.f32 %v4833_v46, %v4192_v20 }
  0xf6   : > { %v465_v48 = vpop.f32.mrf.mxu0  ;;  %v6033_v61 = vld [vmem:[#allocation2 + $0x48] sm:$0xff] }
  0xf7   : > { %498 = vst.msk [vmem:[#allocation2 + $0x68] sm:$0xff] %vm484_vm1, %v5989_v47  ;;  %v5993_v49 = vadd.f32 %v4192_v20, %v465_v48 }
  0xf8   : > { %v4836_v50 = vpop.f32.mrf.mxu0  ;;  %v6027_v60 = vld [vmem:[#allocation2 + $0x40] sm:$0xff] }
  0xf9   : > { %497 = vst.msk [vmem:[#allocation2 + $0x60] sm:$0xff] %vm484_vm1, %v5993_v49  ;;  %v5997_v51 = vadd.f32 %v4836_v50, %v4192_v20 }
  0xfa   : > { %v475_v52 = vpop.f32.mrf.mxu0  ;;  %v6025_v59 = vld [vmem:[#allocation2 + $0x58] sm:$0xff] }
  0xfb   : > { %500 = vst.msk [vmem:[#allocation2 + $0x78] sm:$0xff] %vm484_vm1, %v5997_v51  ;;  %v6001_v53 = vadd.f32 %v4192_v20, %v475_v52 }
  0xfc   : > { %v6019_v58 = vld [vmem:[#allocation2 + $0x50] sm:$0xff] }
  0xfd   : > { %499 = vst.msk [vmem:[#allocation2 + $0x70] sm:$0xff] %vm484_vm1, %v6001_v53 }
  0xfe   : > { %v6005_v54 = vld [vmem:[#allocation2 + $0x68] sm:$0xff] }
  0xff   : > { %774 = vrot.lane.b32.xlu1 %v6005_v54, %s5786_s9 }
 0x100   : > { %v6011_v56 = vld [vmem:[#allocation2 + $0x60] sm:$0xff] }
 0x102   : > { %v6009_v55 = vld [vmem:[#allocation2 + $0x78] sm:$0xff] }
 0x103   : > { %778 = vrot.lane.b32.xlu0 %v6009_v55, %s5786_s9  ;;  %772 = vrot.lane.b32.xlu1 %v6011_v56, %s5786_s9 }
 0x104   : > { %v6017_v57 = vld [vmem:[#allocation2 + $0x70] sm:$0xff] }
 0x107   : > { %776 = vrot.lane.b32.xlu0 %v6017_v57, %s5786_s9  ;;  %768 = vrot.lane.b32.xlu1 %v6019_v58, %s5786_s9 }
 0x10b   : > { %770 = vrot.lane.b32.xlu0 %v6025_v59, %s5786_s9  ;;  %764 = vrot.lane.b32.xlu1 %v6027_v60, %s5786_s9 }
 0x10f   : > { %766 = vrot.lane.b32.xlu0 %v6033_v61, %s5786_s9  ;;  %760 = vrot.lane.b32.xlu1 %v6035_v62, %s5786_s9 }
 0x113   : > { %762 = vrot.lane.b32.xlu0 %v6041_v63, %s5786_s9  ;;  %756 = vrot.lane.b32.xlu1 %v6043_v0, %s5786_s9 }
 0x117   : > { %758 = vrot.lane.b32.xlu0 %v6049_v1, %s5786_s9  ;;  %752 = vrot.lane.b32.xlu1 %v6051_v2, %s5786_s9 }
 0x11b   : > { %754 = vrot.lane.b32.xlu0 %v6057_v3, %s5786_s9  ;;  %748 = vrot.lane.b32.xlu1 %v5959_v34, %s5786_s9 }
 0x11f   : > { %750 = vrot.lane.b32.xlu0 %v6063_v4, %s5786_s9  ;;  %547 = vrot.lane.b32.xlu1 %v5997_v51, %s5787_s10 }
 0x123   : > { %545 = vrot.lane.b32.xlu0 %v6001_v53, %s5787_s10  ;;  %543 = vrot.lane.b32.xlu1 %v5989_v47, %s5787_s10 }
 0x127   : > { %539 = vrot.lane.b32.xlu0 %v5981_v43, %s5787_s10  ;;  %541 = vrot.lane.b32.xlu1 %v5993_v49, %s5787_s10 }
 0x12b   : > { %529 = vrot.lane.b32.xlu0 %v5969_v37, %s5787_s10  ;;  %537 = vrot.lane.b32.xlu1 %v5985_v45, %s5787_s10 }
 0x12f   : > { %527 = vrot.lane.b32.xlu0 %v5953_v30, %s5787_s10  ;;  %535 = vrot.lane.b32.xlu1 %v5973_v39, %s5787_s10 }
 0x133   : > { %1172 = vrot.lane.b32.xlu0 %v6025_v59, %s5788_s11  ;;  %533 = vrot.lane.b32.xlu1 %v5977_v41, %s5787_s10 }
 0x137   : > { %525 = vrot.lane.b32.xlu0 %v5957_v32, %s5787_s10  ;;  %531 = vrot.lane.b32.xlu1 %v5963_v35, %s5787_s10 }
 0x13b   : > { %1168 = vrot.lane.b32.xlu0 %v6033_v61, %s5788_s11  ;;  %1180 = vrot.lane.b32.xlu1 %v6009_v55, %s5788_s11 }
 0x13f   : > { %1166 = vrot.lane.b32.xlu0 %v6027_v60, %s5788_s11  ;;  %1176 = vrot.lane.b32.xlu1 %v6005_v54, %s5788_s11 }
 0x143   : > { %521 = vrot.lane.b32.xlu0 %v5949_v28, %s5787_s10  ;;  %1174 = vrot.lane.b32.xlu1 %v6011_v56, %s5788_s11 }
 0x147   : > { %1160 = vrot.lane.b32.xlu0 %v6049_v1, %s5788_s11  ;;  %1170 = vrot.lane.b32.xlu1 %v6019_v58, %s5788_s11 }
 0x14b   : > { %1158 = vrot.lane.b32.xlu0 %v6043_v0, %s5788_s11  ;;  %523 = vrot.lane.b32.xlu1 %v5945_v26, %s5787_s10 }
 0x14f   : > { %517 = vrot.lane.b32.xlu0 %v5941_v24, %s5787_s10  ;;  %1164 = vrot.lane.b32.xlu1 %v6041_v63, %s5788_s11 }
 0x153   : > { %1152 = vrot.lane.b32.xlu0 %v6063_v4, %s5788_s11  ;;  %1162 = vrot.lane.b32.xlu1 %v6035_v62, %s5788_s11 }
 0x157   : > { %519 = vrot.lane.b32.xlu1 %v5937_v22, %s5787_s10 }
 0x15b   : > { %1156 = vrot.lane.b32.xlu1 %v6057_v3, %s5788_s11 }
 0x15f   : > { %1154 = vrot.lane.b32.xlu1 %v6051_v2, %s5788_s11 }
 0x163   : > { %1150 = vrot.lane.b32.xlu1 %v5959_v34, %s5788_s11 }
 0x167   : > { %1178 = vrot.lane.b32.xlu1 %v6017_v57, %s5788_s11 }
 0x171   : > { %v775_v5 = vpop.permute.xlu1 %774 }
 0x175   : > { %v779_v6 = vpop.permute.xlu0 %778  ;;  %v773_v7 = vpop.permute.xlu1 %772 }
 0x176   : > { %4837 = vmatprep.subr.msk.mxu1 %vm780_vm2, %v779_v6 }
 0x177   : > { %4838 = vmatpush3.xpose.msk.msra.mxu1 %vm780_vm2, %v779_v6 }
 0x179   : > { %v777_v8 = vpop.permute.xlu0 %776  ;;  %v769_v9 = vpop.permute.xlu1 %768 }
 0x17a   : > { %4839 = vmatprep.subr.msk.mxu1 %vm780_vm2, %v777_v8 }
 0x17b   : > { %4840 = vmatpush3.xpose.msk.msra.mxu1 %vm780_vm2, %v777_v8 }
 0x17c   : > { %4841 = vmatprep.subr.msk.mxu1 %vm780_vm2, %v775_v5 }
 0x17d   : > { %v771_v10 = vpop.permute.xlu0 %770  ;;  %v765_v11 = vpop.permute.xlu1 %764 }
 0x17f   : > { %4842 = vmatpush3.xpose.msk.msra.mxu1 %vm780_vm2, %v775_v5 }
 0x180   : > { %4843 = vmatprep.subr.msk.mxu1 %vm780_vm2, %v773_v7 }
 0x181   : > { %v767_v12 = vpop.permute.xlu0 %766  ;;  %v761_v13 = vpop.permute.xlu1 %760 }
 0x183   : > { %4844 = vmatpush3.xpose.msk.msra.mxu1 %vm780_vm2, %v773_v7 }
 0x184   : > { %4845 = vmatprep.subr.msk.mxu1 %vm780_vm2, %v771_v10 }
 0x185   : > { %v763_v14 = vpop.permute.xlu0 %762  ;;  %v757_v15 = vpop.permute.xlu1 %756 }
 0x187   : > { %4846 = vmatpush3.xpose.msk.msra.mxu1 %vm780_vm2, %v771_v10 }
 0x188   : > { %4847 = vmatprep.subr.msk.mxu1 %vm780_vm2, %v769_v9 }
 0x189   : > { %v759_v16 = vpop.permute.xlu0 %758  ;;  %v753_v17 = vpop.permute.xlu1 %752 }
 0x18b   : > { %4848 = vmatpush3.xpose.msk.msra.mxu1 %vm780_vm2, %v769_v9 }
 0x18c   : > { %4849 = vmatprep.subr.msk.mxu1 %vm780_vm2, %v767_v12 }
 0x18d   : > { %v755_v18 = vpop.permute.xlu0 %754  ;;  %v6128_v19 = vpop.permute.xlu1 %748 }
 0x18f   : > { %4850 = vmatpush3.xpose.msk.msra.mxu1 %vm780_vm2, %v767_v12 }
 0x190   : > { %4851 = vmatprep.subr.msk.mxu1 %vm780_vm2, %v765_v11 }
 0x191   : > { %v751_v20 = vpop.permute.xlu0 %750  ;;  %v548_v21 = vpop.permute.xlu1 %547 }
 0x192   : > { %581 = vst.msk [vmem:[#allocation2 + $0xf8] sm:$0xff] %vm484_vm1, %v548_v21 }
 0x193   : > { %4852 = vmatpush3.xpose.msk.msra.mxu1 %vm780_vm2, %v765_v11 }
 0x194   : > { %4853 = vmatprep.subr.msk.mxu1 %vm780_vm2, %v763_v14 }
 0x195   : > { %v546_v23 = vpop.permute.xlu0 %545  ;;  %v544_v25 = vpop.permute.xlu1 %543 }
 0x196   : > { %580 = vst.msk [vmem:[#allocation2 + $0xf0] sm:$0xff] %vm484_vm1, %v546_v23  ;;  %579 = vst.msk [vmem:[#allocation2 + $0xe8] sm:$0xff] %vm484_vm1, %v544_v25 }
 0x197   : > { %4854 = vmatpush3.xpose.msk.msra.mxu1 %vm780_vm2, %v763_v14 }
 0x198   : > { %4855 = vmatprep.subr.msk.mxu1 %vm780_vm2, %v761_v13 }
 0x199   : > { %v540_v27 = vpop.permute.xlu0 %539  ;;  %v542_v29 = vpop.permute.xlu1 %541 }
 0x19a   : > { %577 = vst.msk [vmem:[#allocation2 + $0xd8] sm:$0xff] %vm484_vm1, %v540_v27  ;;  %578 = vst.msk [vmem:[#allocation2 + $0xe0] sm:$0xff] %vm484_vm1, %v542_v29 }
 0x19b   : > { %4856 = vmatpush3.xpose.msk.msra.mxu1 %vm780_vm2, %v761_v13  ;;  %v6189_v13 = vld [vmem:[#allocation2 + $0xf8] sm:$0xff] }
 0x19c   : > { %4857 = vmatprep.subr.msk.mxu1 %vm780_vm2, %v759_v16 }
 0x19d   : > { %v530_v31 = vpop.permute.xlu0 %529  ;;  %v538_v33 = vpop.permute.xlu1 %537  ;;  %v6172_v6 = vld [vmem:[#allocation2 + $0xf0] sm:$0xff]  ;;  %v6183_v10 = vld [vmem:[#allocation2 + $0xe8] sm:$0xff] }
 0x19e   : > { %572 = vst.msk [vmem:[#allocation2 + $0xb0] sm:$0xff] %vm484_vm1, %v530_v31  ;;  %576 = vst.msk [vmem:[#allocation2 + $0xd0] sm:$0xff] %vm484_vm1, %v538_v33 }
 0x19f   : > { %4858 = vmatpush3.xpose.msk.msra.mxu1 %vm780_vm2, %v759_v16 }
 0x1a0   : > { %4859 = vmatprep.subr.msk.mxu1 %vm780_vm2, %v757_v15 }
 0x1a1   : > { %v528_v34 = vpop.permute.xlu0 %527  ;;  %v536_v36 = vpop.permute.xlu1 %535  ;;  %v6160_v48 = vld [vmem:[#allocation2 + $0xe0] sm:$0xff]  ;;  %v6174_v7 = vld [vmem:[#allocation2 + $0xd8] sm:$0xff] }
 0x1a2   : > { %571 = vst.msk [vmem:[#allocation2 + $0xa8] sm:$0xff] %vm484_vm1, %v528_v34  ;;  %575 = vst.msk [vmem:[#allocation2 + $0xc8] sm:$0xff] %vm484_vm1, %v536_v36 }
 0x1a3   : > { %4860 = vmatpush3.xpose.msk.msra.mxu1 %vm780_vm2, %v757_v15 }
 0x1a4   : > { %4861 = vmatprep.subr.msk.mxu1 %vm780_vm2, %v755_v18 }
 0x1a5   : > { %v6151_v38 = vpop.permute.xlu0 %1172  ;;  %v534_v40 = vpop.permute.xlu1 %533  ;;  %v6153_v42 = vld [vmem:[#allocation2 + $0xd0] sm:$0xff] }
 0x1a6   : > { %574 = vst.msk [vmem:[#allocation2 + $0xc0] sm:$0xff] %vm484_vm1, %v534_v40  ;;  %1396 = vrot.lane.b32.xlu1 %v6153_v42, %s5786_s9 }
 0x1a7   : > { %4862 = vmatpush3.xpose.msk.msra.mxu1 %vm780_vm2, %v755_v18 }
 0x1a8   : > { %4863 = vmatprep.subr.msk.mxu1 %vm780_vm2, %v753_v17 }
 0x1a9   : > { %v526_v44 = vpop.permute.xlu0 %525  ;;  %v532_v46 = vpop.permute.xlu1 %531  ;;  %v6162_v50 = vld [vmem:[#allocation2 + $0xc8] sm:$0xff] }
 0x1aa   : > { %570 = vst.msk [vmem:[#allocation2 + $0xa0] sm:$0xff] %vm484_vm1, %v526_v44  ;;  %573 = vst.msk [vmem:[#allocation2 + $0xb8] sm:$0xff] %vm484_vm1, %v532_v46  ;;  %1400 = vrot.lane.b32.xlu1 %v6160_v48, %s5786_s9  ;;  %1394 = vrot.lane.b32.xlu0 %v6162_v50, %s5786_s9 }
 0x1ab   : > { %4864 = vmatpush3.xpose.msk.msra.mxu1 %vm780_vm2, %v753_v17 }
 0x1ac   : > { %4865 = vmatprep.subr.msk.mxu1 %vm780_vm2, %v751_v20 }
 0x1ad   : > { %v1169_v52 = vpop.permute.xlu0 %1168  ;;  %v1181_v5 = vpop.permute.xlu1 %1180 }
 0x1ae   : > { %1404 = vrot.lane.b32.xlu1 %v6172_v6, %s5786_s9  ;;  %1398 = vrot.lane.b32.xlu0 %v6174_v7, %s5786_s9 }
 0x1af   : > { %4893 = vmatprep.subr.mxu0 %v1181_v5  ;;  %4866 = vmatpush3.xpose.msk.msra.mxu1 %vm780_vm2, %v751_v20 }
 0x1b0   : > { %4894 = vmatpush3.msra.mxu0 %v1181_v5  ;;  %4867 = vmatprep.subr.msk.mxu1 %vm780_vm2, %v6128_v19 }
 0x1b1   : > { %v1167_v8 = vpop.permute.xlu0 %1166  ;;  %v1177_v9 = vpop.permute.xlu1 %1176  ;;  %v6198_v16 = vld [vmem:[#allocation2 + $0xb8] sm:$0xff] }
 0x1b2   : > { %1402 = vrot.lane.b32.xlu0 %v6183_v10, %s5786_s9 }
 0x1b3   : > { %4868 = vmatpush3.xpose.msk.msra.mxu1 %vm780_vm2, %v6128_v19  ;;  %v5789_v19 = vmov -inf  }
 0x1b5   : > { %v522_v11 = vpop.permute.xlu0 %521  ;;  %v1175_v12 = vpop.permute.xlu1 %1174 }
 0x1b6   : > { %568 = vst.msk [vmem:[#allocation2 + $0x90] sm:$0xff] %vm484_vm1, %v522_v11  ;;  %1406 = vrot.lane.b32.xlu0 %v6189_v13, %s5786_s9  ;;  %4870 = vmatmul.mubr.msk.f32.vlgmr.msra.gmra.mxu1 %vm780_vm2, %v6063_v4 }
 0x1b7   : > { %4872 = vmatprep.mubr.msk.f32.mxu1 %vm780_vm2, %v6051_v2 }
 0x1b9   : > { %v1161_v14 = vpop.permute.xlu0 %1160  ;;  %v1171_v15 = vpop.permute.xlu1 %1170 }
 0x1ba   : > { %1390 = vrot.lane.b32.xlu0 %v6198_v16, %s5786_s9  ;;  %4873 = vmatmul.mubr.msk.f32.gmra.mxu1 %vm780_vm2, %v6057_v3 }
 0x1bb   : > { %4875 = vmatprep.mubr.msk.f32.mxu1 %vm780_vm2, %v6043_v0 }
 0x1bd   : > { %v1159_v17 = vpop.permute.xlu0 %1158  ;;  %v524_v18 = vpop.permute.xlu1 %523 }
 0x1be   : > { %569 = vst.msk [vmem:[#allocation2 + $0x98] sm:$0xff] %vm484_vm1, %v524_v18  ;;  %4876 = vmatmul.mubr.msk.f32.gmra.mxu1 %vm780_vm2, %v6049_v1 }
 0x1bf   : > { %4878 = vmatprep.mubr.msk.f32.mxu1 %vm780_vm2, %v6035_v62 }
 0x1c1   : > { %v518_v2 = vpop.permute.xlu0 %517  ;;  %v1165_v4 = vpop.permute.xlu1 %1164 }
 0x1c2   : > { %566 = vst.msk [vmem:[#allocation2 + $0x80] sm:$0xff] %vm484_vm1, %v518_v2  ;;  %4879 = vmatmul.mubr.msk.f32.gmra.mxu1 %vm780_vm2, %v6041_v63  ;;  %v712_v63 = vlaneseq }
 0x1c3   : > { %4881 = vmatprep.mubr.msk.f32.mxu1 %vm780_vm2, %v6027_v60 }
 0x1c4   : > { %v713_v3 = vand.u32 127, %v712_v63 }
 0x1c5   : > { %v1163_v0 = vpop.permute.xlu1 %1162 }
 0x1c6   : > { %4882 = vmatmul.mubr.msk.f32.gmra.mxu1 %vm780_vm2, %v6033_v61  ;;  %vm714_vm3 = vcmp.lt.s32.totalorder %v713_v3, 8  ;;  %v6300_v3 = vld [vmem:[#allocation2 + $0xa8] sm:$0xff] }
 0x1c7   : > { %4884 = vmatprep.mubr.msk.f32.mxu1 %vm780_vm2, %v6019_v58  ;;  %v6243_v20 = vsel %vm714_vm3, 0.0, %v5789_v19  ;;  %v6305_v19 = vld [vmem:[#allocation2 + $0xa0] sm:$0xff] }
 0x1c9   : > { %v520_v1 = vpop.permute.xlu1 %519 }
 0x1ca   : > { %567 = vst.msk [vmem:[#allocation2 + $0x88] sm:$0xff] %vm484_vm1, %v520_v1  ;;  %4885 = vmatmul.mubr.msk.f32.gmra.mxu1 %vm780_vm2, %v6025_v59 }
 0x1cb   : > { %4887 = vmatprep.mubr.msk.f32.mxu1 %vm780_vm2, %v6011_v56 }
 0x1cd   : > { %v1157_v62 = vpop.permute.xlu1 %1156 }
 0x1ce   : > { %4888 = vmatmul.mubr.msk.f32.gmra.mxu1 %vm780_vm2, %v6005_v54  ;;  %v1153_v54 = vpop.permute.xlu0 %1152 }
 0x1cf   : > { %4890 = vmatprep.mubr.msk.f32.mxu1 %vm780_vm2, %v6017_v57 }
 0x1d1   : > { %v1155_v60 = vpop.permute.xlu1 %1154 }
 0x1d2   : > { %4891 = vmatmul.mubr.msk.f32.gmra.mxu1 %vm780_vm2, %v6009_v55 }
 0x1d5   : > { %v1151_v58 = vpop.permute.xlu1 %1150 }
 0x1d9   : > { %v1179_v61 = vpop.permute.xlu1 %1178 }
 0x1da   : > { %4895 = vmatprep.subr.mxu0 %v1179_v61 }
 0x1db   : > { %4896 = vmatpush3.msra.mxu0 %v1179_v61 }
 0x1dc   : > { %4897 = vmatprep.subr.mxu0 %v1177_v9 }
 0x1dd   : > { %4898 = vmatpush3.msra.mxu0 %v1177_v9  ;;  %v6262_v9 = vld [vmem:[#allocation2 + $0xc0] sm:$0xff] }
 0x1de   : > { %4899 = vmatprep.subr.mxu0 %v1175_v12 }
 0x1df   : > { %4900 = vmatpush3.msra.mxu0 %v1175_v12 }
 0x1e0   : > { %4901 = vmatprep.subr.mxu0 %v6151_v38 }
 0x1e1   : > { %4902 = vmatpush3.msra.mxu0 %v6151_v38 }
 0x1e2   : > { %4903 = vmatprep.subr.mxu0 %v1171_v15 }
 0x1e3   : > { %4904 = vmatpush3.msra.mxu0 %v1171_v15 }
 0x1e4   : > { %4905 = vmatprep.subr.mxu0 %v1169_v52 }
 0x1e5   : > { %4906 = vmatpush3.msra.mxu0 %v1169_v52 }
 0x1e6   : > { %4907 = vmatprep.subr.mxu0 %v1167_v8 }
 0x1e7   : > { %4908 = vmatpush3.msra.mxu0 %v1167_v8 }
 0x1e8   : > { %4909 = vmatprep.subr.mxu0 %v1165_v4 }
 0x1e9   : > { %4910 = vmatpush3.msra.mxu0 %v1165_v4 }
 0x1ea   : > { %4911 = vmatprep.subr.mxu0 %v1163_v0 }
 0x1eb   : > { %4912 = vmatpush3.msra.mxu0 %v1163_v0 }
 0x1ec   : > { %4913 = vmatprep.subr.mxu0 %v1161_v14 }
 0x1ed   : > { %4914 = vmatpush3.msra.mxu0 %v1161_v14 }
 0x1ee   : > { %4915 = vmatprep.subr.mxu0 %v1159_v17 }
 0x1ef   : > { %4916 = vmatpush3.msra.mxu0 %v1159_v17 }
 0x1f0   : > { %4917 = vmatprep.subr.mxu0 %v1157_v62 }
 0x1f1   : > { %4918 = vmatpush3.msra.mxu0 %v1157_v62 }
 0x1f2   : > { %4919 = vmatprep.subr.mxu0 %v1155_v60 }
 0x1f3   : > { %4920 = vmatpush3.msra.mxu0 %v1155_v60 }
 0x1f4   : > { %4921 = vmatprep.subr.mxu0 %v1153_v54 }
 0x1f5   : > { %4922 = vmatpush3.msra.mxu0 %v1153_v54 }
 0x1f6   : > { %4923 = vmatprep.subr.mxu0 %v1151_v58 }
 0x1f7   : > { %4924 = vmatpush3.msra.mxu0 %v1151_v58 }
 0x21c   : > { %v6233_v55 = vpop.permute.xlu0 %1394 }
 0x220   : > { %v6235_v56 = vpop.permute.xlu0 %1398 }
 0x224   : > { %v6237_v57 = vpop.permute.xlu0 %1402 }
 0x228   : > { %v6239_v59 = vpop.permute.xlu0 %1406 }
 0x229   : > { %4949 = vmatprep.subr.msk.mxu0 %vm780_vm2, %v6239_v59 }
 0x276   : > { %v4871_v21 = vpop.f32.mrf.mxu1 }
 0x277   : > { %v917_v23 = vadd.f32 %v4871_v21, %v6243_v20  ;;  %v6309_v21 = vld [vmem:[#allocation2 + $0x98] sm:$0xff] }
 0x278   : > { %v911_v25 = vpop.f32.mrf.mxu1 }
 0x279   : > { %v6247_v27 = vadd.f32 %v911_v25, %v6243_v20  ;;  %992 = vmax.xlane.f32.xlu1 %v917_v23  ;;  %v6313_v25 = vpop.permute.xlu1 %1396 }
 0x27a   : > { %v4874_v29 = vpop.f32.mrf.mxu1 }
 0x27b   : > { %990 = vmax.xlane.f32.xlu0 %v6247_v27  ;;  %v6251_v33 = vadd.f32 %v4874_v29, %v6243_v20 }
 0x27c   : > { %v921_v31 = vpop.f32.mrf.mxu1 }
 0x27d   : > { %v922_v38 = vadd.f32 %v921_v31, %v6243_v20  ;;  %v6315_v29 = vpop.permute.xlu1 %1400 }
 0x27e   : > { %v4877_v34 = vpop.f32.mrf.mxu1 }
 0x27f   : > { %996 = vmax.xlane.f32.xlu0 %v6251_v33  ;;  %v6256_v46 = vadd.f32 %v4877_v34, %v6243_v20  ;;  %v6319_v34 = vpop.permute.xlu0 %1390 }
 0x280   : > { %v931_v36 = vpop.f32.mrf.mxu1 }
 0x281   : > { %v932_v58 = vadd.f32 %v931_v36, %v6243_v20  ;;  %v6317_v31 = vpop.permute.xlu1 %1404 }
 0x282   : > { %v4880_v40 = vpop.f32.mrf.mxu1 }
 0x283   : > { %994 = vmax.xlane.f32.xlu0 %v922_v38  ;;  %v6260_v8 = vadd.f32 %v4880_v40, %v6243_v20 }
 0x284   : > { %v941_v44 = vpop.f32.mrf.mxu1 }
 0x285   : > { %v942_v61 = vadd.f32 %v941_v44, %v6243_v20 }
 0x286   : > { %v4883_v52 = vpop.f32.mrf.mxu1 }
 0x287   : > { %1000 = vmax.xlane.f32.xlu0 %v6256_v46  ;;  %v6268_v12 = vadd.f32 %v4883_v52, %v6243_v20 }
 0x288   : > { %v951_v5 = vpop.f32.mrf.mxu1 }
 0x289   : > { %v6294_v54 = vadd.f32 %v951_v5, %v6243_v20 }
 0x28a   : > { %1392 = vrot.lane.b32.xlu1 %v6262_v9, %s5786_s9  ;;  %v4886_v11 = vpop.f32.mrf.mxu1 }
 0x28b   : > { %1004 = vmax.xlane.f32.xlu0 %v6260_v8  ;;  %v6272_v15 = vadd.f32 %v4886_v11, %v6243_v20 }
 0x28c   : > { %v961_v14 = vpop.f32.mrf.mxu1 }
 0x28d   : > { %v6276_v18 = vadd.f32 %v961_v14, %v6243_v20 }
 0x28e   : > { %v4889_v17 = vpop.f32.mrf.mxu1 }
 0x28f   : > { %1008 = vmax.xlane.f32.xlu0 %v6268_v12  ;;  %v6280_v4 = vadd.f32 %v4889_v17, %v6243_v20 }
 0x290   : > { %v971_v2 = vpop.f32.mrf.mxu1 }
 0x291   : > { %v6298_v63 = vadd.f32 %v971_v2, %v6243_v20 }
 0x292   : > { %v4892_v0 = vpop.f32.mrf.mxu1 }
 0x293   : > { %1012 = vmax.xlane.f32.xlu0 %v6272_v15  ;;  %v6284_v1 = vadd.f32 %v4892_v0, %v6243_v20 }
 0x294   : > { %v981_v62 = vpop.f32.mrf.mxu1 }
 0x295   : > { %v6288_v60 = vadd.f32 %v981_v62, %v6243_v20 }
 0x297   : > { %1010 = vmax.xlane.f32.xlu0 %v6276_v18 }
 0x29b   : > { %1016 = vmax.xlane.f32.xlu0 %v6280_v4 }
 0x29f   : > { %1020 = vmax.xlane.f32.xlu0 %v6284_v1 }
 0x2a3   : > { %1018 = vmax.xlane.f32.xlu0 %v6288_v60 }
 0x2ae   : > { %998 = vmax.xlane.f32.xlu1 %v932_v58 }
 0x2b2   : > { %1002 = vmax.xlane.f32.xlu1 %v942_v61 }
 0x2b6   : > { %1006 = vmax.xlane.f32.xlu1 %v6294_v54 }
 0x2b9   : > { %1386 = vrot.lane.b32.xlu0 %v6300_v3, %s5786_s9 }
 0x2ba   : > { %1014 = vmax.xlane.f32.xlu1 %v6298_v63 }
 0x2bd   : > { %1384 = vrot.lane.b32.xlu0 %v6305_v19, %s5786_s9 }
 0x2c1   : > { %1382 = vrot.lane.b32.xlu0 %v6309_v21, %s5786_s9 }
 0x302   : > { %v993_v36 = vpop.xlane.xlu1 %992 }
 0x303   : > { %v1023_v40 = vsub.f32 %v917_v23, %v993_v36  ;;  %v6331_v36 = vld [vmem:[#allocation2 + $0xb0] sm:$0xff] }
 0x304   : > { %v991_v44 = vpop.xlane.xlu0 %990 }
 0x305   : > { %v1040_v52 = vmul.f32 1.442695, %v1023_v40  ;;  %v1022_v5 = vsub.f32 %v6247_v27, %v991_v44 }
 0x306   : > { %v6335_v44 = vpop.permute.xlu1 %1392 }
 0x307   : > { %5468 = vpow2.f32 %v1040_v52  ;;  %v1038_v11 = vmul.f32 1.442695, %v1022_v5  ;;  %v6338_v5 = vld [vmem:[#allocation2 + $0x90] sm:$0xff] }
 0x308   : > { %v997_v14 = vpop.xlane.xlu0 %996 }
 0x309   : > { %5470 = vpow2.f32 %v1038_v11  ;;  %v1025_v52 = vsub.f32 %v6251_v33, %v997_v14 }
 0x30c   : > { %v995_v17 = vpop.xlane.xlu0 %994 }
 0x30d   : > { %v1024_v2 = vsub.f32 %v922_v38, %v995_v17 }
 0x30f   : > { %v1042_v0 = vmul.f32 1.442695, %v1024_v2  ;;  %v1044_v2 = vmul.f32 1.442695, %v1025_v52 }
 0x310   : > { %v1001_v27 = vpop.xlane.xlu0 %1000 }
 0x311   : > { %5472 = vpow2.f32 %v1042_v0  ;;  %v1027_v0 = vsub.f32 %v6256_v46, %v1001_v27 }
 0x312   : > { %5474 = vpow2.f32 %v1044_v2 }
 0x313   : > { %v1048_v28 = vmul.f32 1.442695, %v1027_v0 }
 0x314   : > { %v6322_v62 = vpop.eup %5468  ;;  %v1005_v38 = vpop.xlane.xlu0 %1004 }
 0x315   : > { %1072 = vadd.xlane.f32.xlu1 %v6322_v62  ;;  %5476 = vpow2.f32 %v1048_v28  ;;  %v1029_v35 = vsub.f32 %v6260_v8, %v1005_v38 }
 0x316   : > { %v6325_v22 = vpop.eup %5470 }
 0x317   : > { %1070 = vadd.xlane.f32.xlu0 %v6325_v22  ;;  %v1052_v41 = vmul.f32 1.442695, %v1029_v35 }
 0x318   : > { %v1009_v40 = vpop.xlane.xlu0 %1008 }
 0x319   : > { %v1031_v43 = vsub.f32 %v6268_v12, %v1009_v40 }
 0x31c   : > { %v1013_v11 = vpop.xlane.xlu0 %1012 }
 0x31e   : > { %v6328_v23 = vpop.eup %5472 }
 0x31f   : > { %1074 = vadd.xlane.f32.xlu0 %v6328_v23  ;;  %v6348_v8 = vpop.eup %5474 }
 0x320   : > { %v1011_v24 = vpop.xlane.xlu0 %1010 }
 0x321   : > { %v1032_v37 = vsub.f32 %v6276_v18, %v1011_v24 }
 0x323   : > { %v1058_v46 = vmul.f32 1.442695, %v1032_v37  ;;  %v6353_v37 = vpop.eup %5476 }
 0x324   : > { %v1017_v14 = vpop.xlane.xlu0 %1016 }
 0x325   : > { %v1035_v27 = vsub.f32 %v6280_v4, %v1017_v14  ;;  %v6391_v14 = vld [vmem:[#allocation2 + $0x88] sm:$0xff] }
 0x326   : > { %1388 = vrot.lane.b32.xlu1 %v6331_v36, %s5786_s9 }
 0x328   : > { %v1021_v2 = vpop.xlane.xlu0 %1020 }
 0x329   : > { %v1037_v24 = vsub.f32 %v6284_v1, %v1021_v2 }
 0x32c   : > { %v1019_v4 = vpop.xlane.xlu0 %1018 }
 0x335   : > { %1380 = vrot.lane.b32.xlu0 %v6338_v5, %s5786_s9 }
 0x337   : > { %v999_v17 = vpop.xlane.xlu1 %998 }
 0x338   : > { %v1026_v30 = vsub.f32 %v932_v58, %v999_v17 }
 0x33a   : > { %v1046_v33 = vmul.f32 1.442695, %v1026_v30  ;;  %v1064_v30 = vmul.f32 1.442695, %v1035_v27 }
 0x33b   : > { %v1003_v26 = vpop.xlane.xlu1 %1002 }
 0x33c   : > { %v1028_v32 = vsub.f32 %v942_v61, %v1003_v26  ;;  %5478 = vpow2.f32 %v1046_v33  ;;  %v1056_v26 = vmul.f32 1.442695, %v1031_v43 }
 0x33e   : > { %v1050_v39 = vmul.f32 1.442695, %v1028_v32  ;;  %v1033_v32 = vsub.f32 %v6272_v15, %v1013_v11  ;;  %v1036_v15 = vsub.f32 %v6288_v60, %v1019_v4 }
 0x33f   : > { %v1007_v52 = vpop.xlane.xlu1 %1006 }
 0x340   : > { %5480 = vpow2.f32 %v1050_v39  ;;  %v1030_v28 = vsub.f32 %v6294_v54, %v1007_v52  ;;  %v1060_v43 = vmul.f32 1.442695, %v1033_v32  ;;  %v6397_v52 = vld [vmem:[#allocation2 + $0x80] sm:$0xff] }
 0x341   : > { %5482 = vpow2.f32 %v1052_v41  ;;  %v1068_v41 = vmul.f32 1.442695, %v1037_v24 }
 0x342   : > { %5484 = vpow2.f32 %v1058_v46  ;;  %v1054_v35 = vmul.f32 1.442695, %v1030_v28  ;;  %v1387_v46 = vpop.permute.xlu0 %1386 }
 0x343   : > { %5486 = vpow2.f32 %v1056_v26  ;;  %v1015_v39 = vpop.xlane.xlu1 %1014 }
 0x344   : > { %5488 = vpow2.f32 %v1064_v30  ;;  %v1034_v12 = vsub.f32 %v6298_v63, %v1015_v39  ;;  %v1066_v63 = vmul.f32 1.442695, %v1036_v15 }
 0x345   : > { %5490 = vpow2.f32 %v1054_v35 }
 0x346   : > { %5492 = vpow2.f32 %v1068_v41  ;;  %v1062_v58 = vmul.f32 1.442695, %v1034_v12  ;;  %v1385_v27 = vpop.permute.xlu0 %1384 }
 0x347   : > { %5494 = vpow2.f32 %v1060_v43 }
 0x348   : > { %5496 = vpow2.f32 %v1062_v58 }
 0x349   : > { %v6357_v18 = vpop.eup %5478  ;;  %5498 = vpow2.f32 %v1066_v63 }
 0x34a   : > { %1076 = vadd.xlane.f32.xlu1 %v6348_v8  ;;  %v1383_v2 = vpop.permute.xlu0 %1382 }
 0x34d   : > { %v6360_v1 = vpop.eup %5480 }
 0x34e   : > { %1080 = vadd.xlane.f32.xlu1 %v6353_v37  ;;  %v6364_v61 = vpop.eup %5482 }
 0x34f   : > { %v6367_v54 = vpop.eup %5484 }
 0x350   : > { %v6370_v38 = vpop.eup %5486 }
 0x351   : > { %v6373_v40 = vpop.eup %5488 }
 0x352   : > { %1078 = vadd.xlane.f32.xlu1 %v6357_v18  ;;  %v6376_v60 = vpop.eup %5490 }
 0x353   : > { %v6379_v11 = vpop.eup %5492 }
 0x354   : > { %1082 = vadd.xlane.f32.xlu0 %v6360_v1  ;;  %v6382_v17 = vpop.eup %5494 }
 0x355   : > { %v6385_v0 = vpop.eup %5496 }
 0x356   : > { %1084 = vadd.xlane.f32.xlu1 %v6364_v61  ;;  %v6388_v33 = vpop.eup %5498 }
 0x358   : > { %1090 = vadd.xlane.f32.xlu0 %v6367_v54 }
 0x35a   : > { %1088 = vadd.xlane.f32.xlu1 %v6370_v38 }
 0x35c   : > { %1096 = vadd.xlane.f32.xlu0 %v6373_v40 }
 0x35e   : > { %1086 = vadd.xlane.f32.xlu1 %v6376_v60 }
 0x360   : > { %1100 = vadd.xlane.f32.xlu0 %v6379_v11 }
 0x362   : > { %1092 = vadd.xlane.f32.xlu1 %v6382_v17 }
 0x366   : > { %1094 = vadd.xlane.f32.xlu1 %v6385_v0 }
 0x36a   : > { %1098 = vadd.xlane.f32.xlu1 %v6388_v33 }
 0x376   : > { %1378 = vrot.lane.b32.xlu0 %v6391_v14, %s5786_s9 }
 0x37a   : > { %1806 = vrot.lane.b32.xlu0 %v6172_v6, %s5788_s11 }
 0x37b   : > { %1376 = vrot.lane.b32.xlu1 %v6397_v52, %s5786_s9 }
 0x37e   : > { %1802 = vrot.lane.b32.xlu0 %v6160_v48, %s5788_s11 }
 0x37f   : > { %1808 = vrot.lane.b32.xlu1 %v6189_v13, %s5788_s11 }
 0x382   : > { %1796 = vrot.lane.b32.xlu0 %v6162_v50, %s5788_s11 }
 0x383   : > { %1804 = vrot.lane.b32.xlu1 %v6183_v10, %s5788_s11 }
 0x386   : > { %1792 = vrot.lane.b32.xlu0 %v6198_v16, %s5788_s11 }
 0x387   : > { %1800 = vrot.lane.b32.xlu1 %v6174_v7, %s5788_s11 }
 0x38a   : > { %1788 = vrot.lane.b32.xlu0 %v6300_v3, %s5788_s11 }
 0x38b   : > { %1798 = vrot.lane.b32.xlu1 %v6153_v42, %s5788_s11 }
 0x38f   : > { %1794 = vrot.lane.b32.xlu1 %v6262_v9, %s5788_s11 }
 0x393   : > { %1790 = vrot.lane.b32.xlu1 %v6331_v36, %s5788_s11 }
 0x397   : > { %1786 = vrot.lane.b32.xlu1 %v6305_v19, %s5788_s11 }
 0x39e   : > { %v1073_v26 = vpop.xlane.xlu1 %1072 }
 0x39f   : > { %5500 = vrcp.f32 %v1073_v26 }
 0x3a0   : > { %v1071_v28 = vpop.xlane.xlu0 %1070 }
 0x3a1   : > { %5502 = vrcp.f32 %v1071_v28 }
 0x3a8   : > { %v1075_v30 = vpop.xlane.xlu0 %1074 }
 0x3a9   : > { %5504 = vrcp.f32 %v1075_v30 }
 0x3ac   : > { %v5501_v24 = vpop.eup %5500 }
 0x3ad   : > { %v1119_v32 = vmul.f32 %v5501_v24, %v6322_v62 }
 0x3ae   : > { %v5503_v35 = vpop.eup %5502 }
 0x3af   : > { %v1118_v39 = vmul.f32 %v5503_v35, %v6325_v22  ;;  %1135 = vst [vmem:[%s6428_s14 + $0x8] sm:$0xff] %v1119_v32 }
 0x3b1   : > { %1134 = vst [vmem:[%s6428_s14] sm:$0xff] %v1118_v39  ;;  %4925 = vmatprep.mubr.f32.mxu0 %v1118_v39 }
 0x3b2   : > { %4926 = vmatmul.mubr.f32.vlgmr.msra.gmra.mxu0 %v1119_v32 }
 0x3b3   : > { %4950 = vmatpush3.xpose.msk.msra.mxu0 %vm780_vm2, %v6239_v59  ;;  %v1381_v59 = vpop.permute.xlu0 %1380 }
 0x3b4   : > { %4951 = vmatprep.subr.msk.mxu0 %vm780_vm2, %v6317_v31 }
 0x3b6   : > { %v5505_v41 = vpop.eup %5504 }
 0x3b7   : > { %4952 = vmatpush3.xpose.msk.msra.mxu0 %vm780_vm2, %v6317_v31  ;;  %v1120_v22 = vmul.f32 %v5505_v41, %v6328_v23 }
 0x3b8   : > { %4953 = vmatprep.subr.msk.mxu0 %vm780_vm2, %v6237_v57 }
 0x3b9   : > { %1136 = vst [vmem:[%s6428_s14 + $0x10] sm:$0xff] %v1120_v22  ;;  %4928 = vmatprep.mubr.f32.mxu0 %v1120_v22 }
 0x3bb   : > { %4954 = vmatpush3.xpose.msk.msra.mxu0 %vm780_vm2, %v6237_v57  ;;  %v1389_v57 = vpop.permute.xlu1 %1388 }
 0x3bc   : > { %4955 = vmatprep.subr.msk.mxu0 %vm780_vm2, %v6315_v29 }
 0x3bf   : > { %4956 = vmatpush3.xpose.msk.msra.mxu0 %vm780_vm2, %v6315_v29 }
 0x3c0   : > { %4957 = vmatprep.subr.msk.mxu0 %vm780_vm2, %v6235_v56 }
 0x3c3   : > { %4958 = vmatpush3.xpose.msk.msra.mxu0 %vm780_vm2, %v6235_v56 }
 0x3c4   : > { %4959 = vmatprep.subr.msk.mxu0 %vm780_vm2, %v6313_v25 }
 0x3c7   : > { %4960 = vmatpush3.xpose.msk.msra.mxu0 %vm780_vm2, %v6313_v25 }
 0x3c8   : > { %4961 = vmatprep.subr.msk.mxu0 %vm780_vm2, %v6233_v55 }
 0x3cb   : > { %4962 = vmatpush3.xpose.msk.msra.mxu0 %vm780_vm2, %v6233_v55 }
 0x3cc   : > { %4963 = vmatprep.subr.msk.mxu0 %vm780_vm2, %v6335_v44 }
 0x3cf   : > { %4964 = vmatpush3.xpose.msk.msra.mxu0 %vm780_vm2, %v6335_v44 }
 0x3d0   : > { %4965 = vmatprep.subr.msk.mxu0 %vm780_vm2, %v6319_v34 }
 0x3d3   : > { %4966 = vmatpush3.xpose.msk.msra.mxu0 %vm780_vm2, %v6319_v34  ;;  %v1077_v56 = vpop.xlane.xlu1 %1076 }
 0x3d4   : > { %5506 = vrcp.f32 %v1077_v56  ;;  %4967 = vmatprep.subr.msk.mxu0 %vm780_vm2, %v1389_v57 }
 0x3d7   : > { %4968 = vmatpush3.xpose.msk.msra.mxu0 %vm780_vm2, %v1389_v57  ;;  %v1081_v55 = vpop.xlane.xlu1 %1080 }
 0x3d8   : > { %5508 = vrcp.f32 %v1081_v55  ;;  %4969 = vmatprep.subr.msk.mxu0 %vm780_vm2, %v1387_v46 }
 0x3db   : > { %4970 = vmatpush3.xpose.msk.msra.mxu0 %vm780_vm2, %v1387_v46  ;;  %v1079_v25 = vpop.xlane.xlu1 %1078 }
 0x3dc   : > { %5510 = vrcp.f32 %v1079_v25  ;;  %4971 = vmatprep.subr.msk.mxu0 %vm780_vm2, %v1385_v27 }
 0x3dd   : > { %v1083_v29 = vpop.xlane.xlu0 %1082 }
 0x3de   : > { %5512 = vrcp.f32 %v1083_v29 }
 0x3df   : > { %4972 = vmatpush3.xpose.msk.msra.mxu0 %vm780_vm2, %v1385_v27  ;;  %v1085_v31 = vpop.xlane.xlu1 %1084 }
 0x3e0   : > { %5514 = vrcp.f32 %v1085_v31  ;;  %4973 = vmatprep.subr.msk.mxu0 %vm780_vm2, %v1383_v2 }
 0x3e1   : > { %v5507_v34 = vpop.eup %5506  ;;  %v1091_v62 = vpop.xlane.xlu0 %1090 }
 0x3e2   : > { %5516 = vrcp.f32 %v1091_v62  ;;  %v1121_v23 = vmul.f32 %v5507_v34, %v6348_v8 }
 0x3e3   : > { %4974 = vmatpush3.xpose.msk.msra.mxu0 %vm780_vm2, %v1383_v2  ;;  %v1089_v44 = vpop.xlane.xlu1 %1088 }
 0x3e4   : > { %5518 = vrcp.f32 %v1089_v44  ;;  %4975 = vmatprep.subr.msk.mxu0 %vm780_vm2, %v1381_v59  ;;  %1137 = vst [vmem:[%s6428_s14 + $0x18] sm:$0xff] %v1121_v23  ;;  %4929 = vmatmul.mubr.f32.gmra.mxu0 %v1121_v23 }
 0x3e5   : > { %v5509_v43 = vpop.eup %5508  ;;  %v1097_v12 = vpop.xlane.xlu0 %1096 }
 0x3e6   : > { %5520 = vrcp.f32 %v1097_v12  ;;  %v1123_v4 = vmul.f32 %v5509_v43, %v6353_v37 }
 0x3e7   : > { %4976 = vmatpush3.xpose.msk.msra.mxu0 %vm780_vm2, %v1381_v59  ;;  %v1087_v15 = vpop.xlane.xlu1 %1086 }
 0x3e8   : > { %5522 = vrcp.f32 %v1087_v15  ;;  %1139 = vst [vmem:[%s6428_s14 + $0x28] sm:$0xff] %v1123_v4 }
 0x3e9   : > { %v5511_v8 = vpop.eup %5510  ;;  %v1101_v58 = vpop.xlane.xlu0 %1100 }
 0x3ea   : > { %5524 = vrcp.f32 %v1101_v58  ;;  %v1122_v63 = vmul.f32 %v5511_v8, %v6357_v18 }
 0x3eb   : > { %v5513_v46 = vpop.eup %5512  ;;  %v1093_v27 = vpop.xlane.xlu1 %1092 }
 0x3ec   : > { %5526 = vrcp.f32 %v1093_v27  ;;  %1138 = vst [vmem:[%s6428_s14 + $0x20] sm:$0xff] %v1122_v63  ;;  %4931 = vmatprep.mubr.f32.mxu0 %v1122_v63  ;;  %v1124_v2 = vmul.f32 %v5513_v46, %v6360_v1 }
 0x3ed   : > { %v5515_v37 = vpop.eup %5514  ;;  %4932 = vmatmul.mubr.f32.gmra.mxu0 %v1123_v4  ;;  %v1379_v26 = vpop.permute.xlu0 %1378 }
 0x3ee   : > { %1140 = vst [vmem:[%s6428_s14 + $0x30] sm:$0xff] %v1124_v2  ;;  %4934 = vmatprep.mubr.f32.mxu0 %v1124_v2  ;;  %4977 = vmatprep.subr.msk.mxu0 %vm780_vm2, %v1379_v26  ;;  %v1125_v28 = vmul.f32 %v5515_v37, %v6364_v61 }
 0x3ef   : > { %v5517_v18 = vpop.eup %5516  ;;  %v1095_v30 = vpop.xlane.xlu1 %1094  ;;  %4978 = vmatpush3.xpose.msk.msra.mxu0 %vm780_vm2, %v1379_v26 }
 0x3f0   : > { %5528 = vrcp.f32 %v1095_v30  ;;  %1141 = vst [vmem:[%s6428_s14 + $0x38] sm:$0xff] %v1125_v28  ;;  %v1128_v1 = vmul.f32 %v5517_v18, %v6367_v54 }
 0x3f1   : > { %v5519_v24 = vpop.eup %5518  ;;  %4935 = vmatmul.mubr.f32.gmra.mxu0 %v1125_v28 }
 0x3f2   : > { %v1127_v32 = vmul.f32 %v5519_v24, %v6370_v38  ;;  %1144 = vst [vmem:[%s6428_s14 + $0x50] sm:$0xff] %v1128_v1  ;;  %v1343_v38 = vld [vmem:[%s7916_s3] sm:$0xff] }
 0x3f3   : > { %v5521_v35 = vpop.eup %5520  ;;  %v1099_v39 = vpop.xlane.xlu1 %1098 }
 0x3f4   : > { %5530 = vrcp.f32 %v1099_v39  ;;  %1143 = vst [vmem:[%s6428_s14 + $0x48] sm:$0xff] %v1127_v32  ;;  %v1131_v61 = vmul.f32 %v5521_v35, %v6373_v40  ;;  %v1807_v40 = vpop.permute.xlu0 %1806 }
 0x3f5   : > { %v5523_v41 = vpop.eup %5522 }
 0x3f6   : > { %v1126_v22 = vmul.f32 %v5523_v41, %v6376_v60  ;;  %1147 = vst [vmem:[%s6428_s14 + $0x68] sm:$0xff] %v1131_v61 }
 0x3f7   : > { %v5525_v57 = vpop.eup %5524  ;;  %v1377_v56 = vpop.permute.xlu1 %1376 }
 0x3f8   : > { %1142 = vst [vmem:[%s6428_s14 + $0x40] sm:$0xff] %v1126_v22  ;;  %4937 = vmatprep.mubr.f32.mxu0 %v1126_v22  ;;  %4979 = vmatprep.subr.msk.mxu0 %vm780_vm2, %v1377_v56  ;;  %v1133_v54 = vmul.f32 %v5525_v57, %v6379_v11  ;;  %v1803_v29 = vpop.permute.xlu0 %1802 }
 0x3f9   : > { %v5527_v55 = vpop.eup %5526  ;;  %4938 = vmatmul.mubr.f32.gmra.mxu0 %v1127_v32 }
 0x3fa   : > { %4980 = vmatpush3.xpose.msk.msra.mxu0 %vm780_vm2, %v1377_v56  ;;  %4940 = vmatprep.mubr.f32.mxu0 %v1128_v1  ;;  %v1129_v60 = vmul.f32 %v5527_v55, %v6382_v17  ;;  %1149 = vst [vmem:[%s6428_s14 + $0x78] sm:$0xff] %v1133_v54 }
 0x3fb   : > { %v1809_v59 = vpop.permute.xlu1 %1808  ;;  %5087 = vmatprep.subr.mxu0 %v1343_v38 }
 0x3fc   : > { %5005 = vmatprep.subr.mxu1 %v1809_v59  ;;  %1145 = vst [vmem:[%s6428_s14 + $0x58] sm:$0xff] %v1129_v60  ;;  %v1797_v23 = vpop.permute.xlu0 %1796 }
 0x3fd   : > { %v5529_v25 = vpop.eup %5528  ;;  %4941 = vmatmul.mubr.f32.gmra.mxu0 %v1129_v60  ;;  %5006 = vmatpush3.msra.mxu1 %v1809_v59 }
 0x3fe   : > { %5007 = vmatprep.subr.mxu1 %v1807_v40  ;;  %v1130_v11 = vmul.f32 %v5529_v25, %v6385_v0 }
 0x3ff   : > { %v1805_v31 = vpop.permute.xlu1 %1804  ;;  %5008 = vmatpush3.msra.mxu1 %v1807_v40 }
 0x400   : > { %1146 = vst [vmem:[%s6428_s14 + $0x60] sm:$0xff] %v1130_v11  ;;  %4943 = vmatprep.mubr.f32.mxu0 %v1130_v11  ;;  %5009 = vmatprep.subr.mxu1 %v1805_v31 }
 0x401   : > { %v5531_v34 = vpop.eup %5530  ;;  %4944 = vmatmul.mubr.f32.gmra.mxu0 %v1131_v61  ;;  %5010 = vmatpush3.msra.mxu1 %v1805_v31 }
 0x402   : > { %5011 = vmatprep.subr.mxu1 %v1803_v29  ;;  %v1132_v17 = vmul.f32 %v5531_v34, %v6388_v33  ;;  %v1793_v33 = vpop.permute.xlu0 %1792 }
 0x403   : > { %v1801_v62 = vpop.permute.xlu1 %1800  ;;  %5012 = vmatpush3.msra.mxu1 %v1803_v29 }
 0x404   : > { %1148 = vst [vmem:[%s6428_s14 + $0x70] sm:$0xff] %v1132_v17  ;;  %4946 = vmatprep.mubr.f32.mxu0 %v1132_v17  ;;  %5013 = vmatprep.subr.mxu1 %v1801_v62 }
 0x405   : > { %4947 = vmatmul.mubr.f32.gmra.mxu0 %v1133_v54  ;;  %5014 = vmatpush3.msra.mxu1 %v1801_v62 }
 0x406   : > { %4981 = vmatprep.mubr.msk.f32.mxu0 %vm780_vm2, %v6397_v52  ;;  %v1789_v12 = vpop.permute.xlu0 %1788 }
 0x407   : > { %v1799_v0 = vpop.permute.xlu1 %1798 }
 0x408   : > { %5015 = vmatprep.subr.mxu1 %v1799_v0 }
 0x409   : > { %4982 = vmatmul.mubr.msk.f32.vlgmr.msra.gmra.mxu0 %vm780_vm2, %v6391_v14  ;;  %5016 = vmatpush3.msra.mxu1 %v1799_v0 }
 0x40a   : > { %4984 = vmatprep.mubr.msk.f32.mxu0 %vm780_vm2, %v6338_v5  ;;  %5017 = vmatprep.subr.mxu1 %v1797_v23 }
 0x40b   : > { %v1795_v44 = vpop.permute.xlu1 %1794  ;;  %5018 = vmatpush3.msra.mxu1 %v1797_v23  ;;  %5088 = vmatpush3.msra.mxu0 %v1343_v38 }
 0x40c   : > { %5019 = vmatprep.subr.mxu1 %v1795_v44 }
 0x40d   : > { %4985 = vmatmul.mubr.msk.f32.gmra.mxu0 %vm780_vm2, %v6309_v21  ;;  %5020 = vmatpush3.msra.mxu1 %v1795_v44 }
 0x40e   : > { %4987 = vmatprep.mubr.msk.f32.mxu0 %vm780_vm2, %v6305_v19  ;;  %5021 = vmatprep.subr.mxu1 %v1793_v33 }
 0x40f   : > { %v1791_v43 = vpop.permute.xlu1 %1790  ;;  %5022 = vmatpush3.msra.mxu1 %v1793_v33 }
 0x410   : > { %5023 = vmatprep.subr.mxu1 %v1791_v43 }
 0x411   : > { %4988 = vmatmul.mubr.msk.f32.gmra.mxu0 %vm780_vm2, %v6300_v3  ;;  %5024 = vmatpush3.msra.mxu1 %v1791_v43 }
 0x412   : > { %4990 = vmatprep.mubr.msk.f32.mxu0 %vm780_vm2, %v6331_v36  ;;  %5025 = vmatprep.subr.mxu1 %v1789_v12 }
 0x413   : > { %v1787_v4 = vpop.permute.xlu1 %1786  ;;  %5026 = vmatpush3.msra.mxu1 %v1789_v12 }
 0x414   : > { %5027 = vmatprep.subr.mxu1 %v1787_v4 }
 0x415   : > { %4991 = vmatmul.mubr.msk.f32.gmra.mxu0 %vm780_vm2, %v6198_v16  ;;  %5028 = vmatpush3.msra.mxu1 %v1787_v4 }
 0x416   : > { %4993 = vmatprep.mubr.msk.f32.mxu0 %vm780_vm2, %v6262_v9 }
 0x419   : > { %4994 = vmatmul.mubr.msk.f32.gmra.mxu0 %vm780_vm2, %v6162_v50 }
 0x41a   : > { %4996 = vmatprep.mubr.msk.f32.mxu0 %vm780_vm2, %v6153_v42 }
 0x41d   : > { %4997 = vmatmul.mubr.msk.f32.gmra.mxu0 %vm780_vm2, %v6174_v7 }
 0x41e   : > { %4999 = vmatprep.mubr.msk.f32.mxu0 %vm780_vm2, %v6160_v48 }
 0x421   : > { %5000 = vmatmul.mubr.msk.f32.gmra.mxu0 %vm780_vm2, %v6183_v10 }
 0x422   : > { %5002 = vmatprep.mubr.msk.f32.mxu0 %vm780_vm2, %v6172_v6 }
 0x425   : > { %5003 = vmatmul.mubr.msk.f32.gmra.mxu0 %vm780_vm2, %v6189_v13 }
 0x472   : > { %v4927_v16 = vpop.f32.mrf.mxu0 }
 0x474   : > { %v1264_v50 = vpop.f32.mrf.mxu0 }
 0x475   : > { %5089 = vmatprep.mubr.msk.f32.mxu0 %vm780_vm2, %v1264_v50 }
 0x476   : > { %5090 = vmatmul.mubr.msk.f32.vlgmr.msra.gmra.mxu0 %vm780_vm2, %v4927_v16 }
 0x4a4   : > { %v4930_v42 = vpop.f32.mrf.mxu0 }
 0x4a6   : > { %v1274_v7 = vpop.f32.mrf.mxu0 }
 0x4a7   : > { %5092 = vmatprep.mubr.msk.f32.mxu0 %vm780_vm2, %v1274_v7 }
 0x4a8   : > { %5093 = vmatmul.mubr.msk.f32.gmra.mxu0 %vm780_vm2, %v4930_v42 }
 0x4ad   : > { %v4933_v48 = vpop.f32.mrf.mxu0 }
 0x4af   : > { %v1284_v10 = vpop.f32.mrf.mxu0 }
 0x4b0   : > { %5095 = vmatprep.mubr.msk.f32.mxu0 %vm780_vm2, %v1284_v10 }
 0x4b1   : > { %v4936_v6 = vpop.f32.mrf.mxu0  ;;  %5096 = vmatmul.mubr.msk.f32.gmra.mxu0 %vm780_vm2, %v4933_v48 }
 0x4b3   : > { %v1294_v13 = vpop.f32.mrf.mxu0 }
 0x4b4   : > { %5098 = vmatprep.mubr.msk.f32.mxu0 %vm780_vm2, %v1294_v13 }
 0x4b5   : > { %5099 = vmatmul.mubr.msk.f32.gmra.mxu0 %vm780_vm2, %v4936_v6 }
 0x4b9   : > { %v4939_v9 = vpop.f32.mrf.mxu0 }
 0x4bb   : > { %v1304_v3 = vpop.f32.mrf.mxu0 }
 0x4bc   : > { %5101 = vmatprep.mubr.msk.f32.mxu0 %vm780_vm2, %v1304_v3 }
 0x4bd   : > { %v4942_v19 = vpop.f32.mrf.mxu0  ;;  %5102 = vmatmul.mubr.msk.f32.gmra.mxu0 %vm780_vm2, %v4939_v9 }
 0x4bf   : > { %v1314_v36 = vpop.f32.mrf.mxu0 }
 0x4c0   : > { %5104 = vmatprep.mubr.msk.f32.mxu0 %vm780_vm2, %v1314_v36 }
 0x4c1   : > { %v4945_v15 = vpop.f32.mrf.mxu0  ;;  %5105 = vmatmul.mubr.msk.f32.gmra.mxu0 %vm780_vm2, %v4942_v19 }
 0x4c3   : > { %v1324_v8 = vpop.f32.mrf.mxu0 }
 0x4c4   : > { %5107 = vmatprep.mubr.msk.f32.mxu0 %vm780_vm2, %v1324_v8 }
 0x4c5   : > { %v4948_v58 = vpop.f32.mrf.mxu0  ;;  %5108 = vmatmul.mubr.msk.f32.gmra.mxu0 %vm780_vm2, %v4945_v15 }
 0x4c7   : > { %v1334_v63 = vpop.f32.mrf.mxu0 }
 0x4c8   : > { %5110 = vmatprep.mubr.msk.f32.mxu0 %vm780_vm2, %v1334_v63 }
 0x4c9   : > { %v4983_v46 = vpop.f32.mrf.mxu0  ;;  %5111 = vmatmul.mubr.msk.f32.gmra.mxu0 %vm780_vm2, %v4948_v58 }
 0x4ca   : > { %v1544_v27 = vadd.f32 %v4983_v46, %v6243_v20 }
 0x4cb   : > { %v1538_v2 = vpop.f32.mrf.mxu0 }
 0x4cc   : > { %v1539_v37 = vadd.f32 %v1538_v2, %v6243_v20  ;;  %1619 = vmax.xlane.f32.xlu1 %v1544_v27 }
 0x4cd   : > { %v4986_v26 = vpop.f32.mrf.mxu0 }
 0x4ce   : > { %1617 = vmax.xlane.f32.xlu0 %v1539_v37  ;;  %v6562_v18 = vadd.f32 %v4986_v26, %v6243_v20 }
 0x4cf   : > { %v1548_v28 = vpop.f32.mrf.mxu0 }
 0x4d0   : > { %v6566_v24 = vadd.f32 %v1548_v28, %v6243_v20 }
 0x4d1   : > { %v4989_v30 = vpop.f32.mrf.mxu0 }
 0x4d2   : > { %1623 = vmax.xlane.f32.xlu0 %v6562_v18  ;;  %v6574_v61 = vadd.f32 %v4989_v30, %v6243_v20 }
 0x4d3   : > { %v1558_v1 = vpop.f32.mrf.mxu0 }
 0x4d4   : > { %v6569_v32 = vadd.f32 %v1558_v1, %v6243_v20 }
 0x4d5   : > { %v4992_v35 = vpop.f32.mrf.mxu0 }
 0x4d6   : > { %1625 = vmax.xlane.f32.xlu1 %v6569_v32  ;;  %1621 = vmax.xlane.f32.xlu0 %v6566_v24  ;;  %v6582_v56 = vadd.f32 %v4992_v35, %v6243_v20 }
 0x4d7   : > { %v1568_v39 = vpop.f32.mrf.mxu0 }
 0x4d8   : > { %v6577_v41 = vadd.f32 %v1568_v39, %v6243_v20 }
 0x4d9   : > { %v4995_v22 = vpop.f32.mrf.mxu0 }
 0x4da   : > { %1629 = vmax.xlane.f32.xlu1 %v6577_v41  ;;  %1627 = vmax.xlane.f32.xlu0 %v6574_v61  ;;  %v6590_v40 = vadd.f32 %v4995_v22, %v6243_v20 }
 0x4db   : > { %v1578_v57 = vpop.f32.mrf.mxu0 }
 0x4dc   : > { %v6585_v54 = vadd.f32 %v1578_v57, %v6243_v20 }
 0x4dd   : > { %v4998_v38 = vpop.f32.mrf.mxu0 }
 0x4de   : > { %1633 = vmax.xlane.f32.xlu1 %v6585_v54  ;;  %1631 = vmax.xlane.f32.xlu0 %v6582_v56  ;;  %v6598_v11 = vadd.f32 %v4998_v38, %v6243_v20 }
 0x4df   : > { %v1588_v55 = vpop.f32.mrf.mxu0 }
 0x4e0   : > { %v6593_v60 = vadd.f32 %v1588_v55, %v6243_v20 }
 0x4e1   : > { %v5001_v59 = vpop.f32.mrf.mxu0 }
 0x4e2   : > { %1637 = vmax.xlane.f32.xlu1 %v6593_v60  ;;  %1635 = vmax.xlane.f32.xlu0 %v6590_v40  ;;  %v6606_v17 = vadd.f32 %v5001_v59, %v6243_v20 }
 0x4e3   : > { %v1598_v25 = vpop.f32.mrf.mxu0 }
 0x4e4   : > { %v6601_v29 = vadd.f32 %v1598_v25, %v6243_v20 }
 0x4e5   : > { %v5004_v31 = vpop.f32.mrf.mxu0 }
 0x4e6   : > { %1641 = vmax.xlane.f32.xlu1 %v6601_v29  ;;  %1639 = vmax.xlane.f32.xlu0 %v6598_v11  ;;  %v6614_v23 = vadd.f32 %v5004_v31, %v6243_v20 }
 0x4e7   : > { %v1608_v34 = vpop.f32.mrf.mxu0 }
 0x4e8   : > { %v6609_v62 = vadd.f32 %v1608_v34, %v6243_v20 }
 0x4ea   : > { %1645 = vmax.xlane.f32.xlu1 %v6609_v62  ;;  %1643 = vmax.xlane.f32.xlu0 %v6606_v17 }
 0x4ee   : > { %1647 = vmax.xlane.f32.xlu0 %v6614_v23 }
 0x4fb   : > { %1782 = vrot.lane.b32.xlu1 %v6338_v5, %s5788_s11 }
 0x504   : > { %1784 = vrot.lane.b32.xlu0 %v6309_v21, %s5788_s11 }
 0x555   : > { %v1620_v0 = vpop.xlane.xlu1 %1619 }
 0x556   : > { %v1650_v33 = vsub.f32 %v1544_v27, %v1620_v0 }
 0x557   : > { %v1618_v44 = vpop.xlane.xlu0 %1617 }
 0x558   : > { %v1667_v43 = vmul.f32 1.442695, %v1650_v33  ;;  %v1649_v12 = vsub.f32 %v1539_v37, %v1618_v44 }
 0x55a   : > { %5532 = vpow2.f32 %v1667_v43  ;;  %v1665_v4 = vmul.f32 1.442695, %v1649_v12 }
 0x55b   : > { %v1624_v16 = vpop.xlane.xlu0 %1623 }
 0x55c   : > { %5534 = vpow2.f32 %v1665_v4  ;;  %v1652_v27 = vsub.f32 %v6562_v18, %v1624_v16 }
 0x55e   : > { %v1671_v26 = vmul.f32 1.442695, %v1652_v27 }
 0x55f   : > { %v1626_v50 = vpop.xlane.xlu1 %1625  ;;  %v1622_v42 = vpop.xlane.xlu0 %1621 }
 0x560   : > { %v1651_v46 = vsub.f32 %v6566_v24, %v1622_v42  ;;  %v1653_v2 = vsub.f32 %v6569_v32, %v1626_v50  ;;  %v7955_v42 = vld [vmem:[#allocation16_spill] sm:$0xff] }
 0x562   : > { %v1669_v37 = vmul.f32 1.442695, %v1651_v46 }
 0x563   : > { %v1630_v7 = vpop.xlane.xlu1 %1629  ;;  %v1628_v48 = vpop.xlane.xlu0 %1627 }
 0x564   : > { %v1655_v28 = vsub.f32 %v6577_v41, %v1630_v7  ;;  %5536 = vpow2.f32 %v1669_v37  ;;  %v1654_v30 = vsub.f32 %v6574_v61, %v1628_v48  ;;  %v7956_v7 = vld [vmem:[#allocation15_spill] sm:$0xff]  ;;  %v7957_v48 = vld [vmem:[#allocation14_spill] sm:$0xff] }
 0x565   : > { %5538 = vpow2.f32 %v1671_v26 }
 0x566   : > { %v1677_v1 = vmul.f32 1.442695, %v1655_v28  ;;  %v1675_v35 = vmul.f32 1.442695, %v1654_v30  ;;  %v4289_v28 = vld [vmem:[%s7916_s3 + $0x8] sm:$0xff] }
 0x567   : > { %v6621_v10 = vpop.eup %5532  ;;  %v1634_v6 = vpop.xlane.xlu1 %1633 }
 0x568   : > { %v1632_v5 = vpop.xlane.xlu0 %1631  ;;  %1699 = vadd.xlane.f32.xlu0 %v6621_v10 }
 0x569   : > { %v6624_v21 = vpop.eup %5534  ;;  %v1656_v24 = vsub.f32 %v6582_v56, %v1632_v5  ;;  %v7959_v5 = vld [vmem:[#allocation12_spill] sm:$0xff] }
 0x56a   : > { %1697 = vadd.xlane.f32.xlu1 %v6624_v21 }
 0x56b   : > { %v1638_v9 = vpop.xlane.xlu1 %1637  ;;  %v1679_v39 = vmul.f32 1.442695, %v1656_v24 }
 0x56c   : > { %v1636_v13 = vpop.xlane.xlu0 %1635  ;;  %v1659_v32 = vsub.f32 %v6593_v60, %v1638_v9  ;;  %v7961_v9 = vld [vmem:[#allocation10_spill] sm:$0xff] }
 0x56d   : > { %v1658_v41 = vsub.f32 %v6590_v40, %v1636_v13  ;;  %v7960_v13 = vld [vmem:[#allocation11_spill] sm:$0xff] }
 0x56e   : > { %v1685_v22 = vmul.f32 1.442695, %v1659_v32 }
 0x56f   : > { %v1642_v19 = vpop.xlane.xlu1 %1641  ;;  %v1683_v57 = vmul.f32 1.442695, %v1658_v41 }
 0x570   : > { %v1640_v3 = vpop.xlane.xlu0 %1639  ;;  %v1661_v61 = vsub.f32 %v6601_v29, %v1642_v19  ;;  %v7963_v19 = vld [vmem:[#allocation8_spill] sm:$0xff] }
 0x571   : > { %v6642_v38 = vpop.eup %5536 }
 0x572   : > { %v1689_v56 = vmul.f32 1.442695, %v1661_v61  ;;  %v6646_v60 = vpop.eup %5538 }
 0x573   : > { %v1646_v15 = vpop.xlane.xlu1 %1645 }
 0x574   : > { %v1644_v36 = vpop.xlane.xlu0 %1643  ;;  %v1663_v55 = vsub.f32 %v6609_v62, %v1646_v15  ;;  %v7965_v15 = vld [vmem:[#allocation6_spill] sm:$0xff] }
 0x575   : > { %v1662_v59 = vsub.f32 %v6606_v17, %v1644_v36  ;;  %v7964_v36 = vld [vmem:[#allocation7_spill] sm:$0xff] }
 0x577   : > { %v1783_v63 = vpop.permute.xlu1 %1782  ;;  %v1691_v31 = vmul.f32 1.442695, %v1662_v59 }
 0x578   : > { %v1648_v8 = vpop.xlane.xlu0 %1647 }
 0x579   : > { %v1664_v34 = vsub.f32 %v6614_v23, %v1648_v8 }
 0x57b   : > { %1778 = vrot.lane.b32.xlu1 %v6397_v52, %s5788_s11  ;;  %v1673_v52 = vmul.f32 1.442695, %v1653_v2  ;;  %v1695_v0 = vmul.f32 1.442695, %v1664_v34 }
 0x57c   : > { %v1785_v58 = vpop.permute.xlu0 %1784 }
 0x57d   : > { %5029 = vmatprep.subr.mxu1 %v1785_v58  ;;  %5540 = vpow2.f32 %v1673_v52 }
 0x57e   : > { %5030 = vmatpush3.msra.mxu1 %v1785_v58  ;;  %1780 = vrot.lane.b32.xlu0 %v6391_v14, %s5788_s11  ;;  %v1657_v14 = vsub.f32 %v6585_v54, %v1634_v6  ;;  %5542 = vpow2.f32 %v1677_v1  ;;  %v1660_v54 = vsub.f32 %v6598_v11, %v1640_v3  ;;  %v1693_v11 = vmul.f32 1.442695, %v1663_v55  ;;  %v7958_v6 = vld [vmem:[#allocation13_spill] sm:$0xff] }
 0x57f   : > { %5031 = vmatprep.subr.mxu1 %v1783_v63  ;;  %5544 = vpow2.f32 %v1675_v35  ;;  %v7962_v3 = vld [vmem:[#allocation9_spill] sm:$0xff] }
 0x580   : > { %5032 = vmatpush3.msra.mxu1 %v1783_v63  ;;  %v1681_v18 = vmul.f32 1.442695, %v1657_v14  ;;  %v1687_v40 = vmul.f32 1.442695, %v1660_v54 }
 0x582   : > { %5546 = vpow2.f32 %v1681_v18 }
 0x583   : > { %5548 = vpow2.f32 %v1679_v39 }
 0x584   : > { %5550 = vpow2.f32 %v1685_v22 }
 0x585   : > { %5552 = vpow2.f32 %v1683_v57 }
 0x586   : > { %5554 = vpow2.f32 %v1689_v56 }
 0x587   : > { %5556 = vpow2.f32 %v1687_v40 }
 0x588   : > { %5558 = vpow2.f32 %v1693_v11 }
 0x589   : > { %5560 = vpow2.f32 %v1691_v31 }
 0x58a   : > { %v6650_v25 = vpop.eup %5540  ;;  %5562 = vpow2.f32 %v1695_v0 }
 0x58b   : > { %v6653_v29 = vpop.eup %5542 }
 0x58c   : > { %v6657_v62 = vpop.eup %5544 }
 0x58f   : > { %v6660_v17 = vpop.eup %5546 }
 0x590   : > { %v6663_v33 = vpop.eup %5548 }
 0x591   : > { %v6666_v44 = vpop.eup %5550 }
 0x592   : > { %v6669_v23 = vpop.eup %5552 }
 0x593   : > { %v6672_v43 = vpop.eup %5554 }
 0x594   : > { %v6675_v12 = vpop.eup %5556 }
 0x595   : > { %v6678_v4 = vpop.eup %5558 }
 0x596   : > { %v6681_v16 = vpop.eup %5560 }
 0x597   : > { %v6684_v50 = vpop.eup %5562 }
 0x59d   : > { %1701 = vadd.xlane.f32.xlu0 %v6642_v38 }
 0x59f   : > { %1703 = vadd.xlane.f32.xlu1 %v6646_v60 }
 0x5a1   : > { %1705 = vadd.xlane.f32.xlu0 %v6650_v25 }
 0x5a3   : > { %1709 = vadd.xlane.f32.xlu1 %v6653_v29 }
 0x5a5   : > { %1707 = vadd.xlane.f32.xlu0 %v6657_v62 }
 0x5a7   : > { %1713 = vadd.xlane.f32.xlu1 %v6660_v17 }
 0x5a9   : > { %1711 = vadd.xlane.f32.xlu0 %v6663_v33 }
 0x5ab   : > { %1717 = vadd.xlane.f32.xlu1 %v6666_v44 }
 0x5ad   : > { %1715 = vadd.xlane.f32.xlu0 %v6669_v23 }
 0x5af   : > { %1721 = vadd.xlane.f32.xlu1 %v6672_v43 }
 0x5b1   : > { %1719 = vadd.xlane.f32.xlu0 %v6675_v12 }
 0x5b3   : > { %1725 = vadd.xlane.f32.xlu1 %v6678_v4 }
 0x5b5   : > { %1723 = vadd.xlane.f32.xlu0 %v6681_v16 }
 0x5b9   : > { %1727 = vadd.xlane.f32.xlu0 %v6684_v50 }
 0x5c4   : > { %612 = vrot.lane.b32.xlu1 %v5997_v51, %s5790_s19 }
 0x5c8   : > { %608 = vrot.lane.b32.xlu1 %v5989_v47, %s5790_s19 }
 0x5cc   : > { %606 = vrot.lane.b32.xlu1 %v5993_v49, %s5790_s19 }
 0x5cf   : > { %610 = vrot.lane.b32.xlu0 %v6001_v53, %s5790_s19 }
 0x5d0   : > { %602 = vrot.lane.b32.xlu1 %v5985_v45, %s5790_s19 }
 0x5d3   : > { %604 = vrot.lane.b32.xlu0 %v7955_v42, %s5790_s19 }
 0x5d4   : > { %598 = vrot.lane.b32.xlu1 %v7956_v7, %s5790_s19 }
 0x5d7   : > { %600 = vrot.lane.b32.xlu0 %v7957_v48, %s5790_s19 }
 0x5d8   : > { %594 = vrot.lane.b32.xlu1 %v7958_v6, %s5790_s19 }
 0x5db   : > { %596 = vrot.lane.b32.xlu0 %v7959_v5, %s5790_s19 }
 0x5dc   : > { %590 = vrot.lane.b32.xlu1 %v7960_v13, %s5790_s19 }
 0x5df   : > { %592 = vrot.lane.b32.xlu0 %v7961_v9, %s5790_s19 }
 0x5e0   : > { %586 = vrot.lane.b32.xlu1 %v7962_v3, %s5790_s19 }
 0x5e3   : > { %588 = vrot.lane.b32.xlu0 %v7963_v19, %s5790_s19 }
 0x5e4   : > { %582 = vrot.lane.b32.xlu1 %v7964_v36, %s5790_s19 }
 0x5e7   : > { %584 = vrot.lane.b32.xlu0 %v7965_v15, %s5790_s19 }
 0x5f1   : > { %v1700_v8 = vpop.xlane.xlu0 %1699 }
 0x5f2   : > { %5564 = vrcp.f32 %v1700_v8 }
 0x5f3   : > { %v1698_v58 = vpop.xlane.xlu1 %1697 }
 0x5f4   : > { %5566 = vrcp.f32 %v1698_v58 }
 0x5f5   : > { %v1781_v63 = vpop.permute.xlu0 %1780 }
 0x5f6   : > { %5033 = vmatprep.subr.mxu1 %v1781_v63 }
 0x5f7   : > { %v1779_v46 = vpop.permute.xlu1 %1778  ;;  %5034 = vmatpush3.msra.mxu1 %v1781_v63 }
 0x5f8   : > { %5035 = vmatprep.subr.mxu1 %v1779_v46 }
 0x5f9   : > { %5036 = vmatpush3.msra.mxu1 %v1779_v46 }
 0x5fa   : > { %5061 = vmatprep.subr.mxu1 %v4289_v28 }
 0x5ff   : > { %v5565_v27 = vpop.eup %5564 }
 0x600   : > { %v1746_v2 = vmul.f32 %v5565_v27, %v6621_v10 }
 0x601   : > { %v5567_v37 = vpop.eup %5566 }
 0x602   : > { %v1745_v26 = vmul.f32 %v5567_v37, %v6624_v21  ;;  %4274 = vst [vmem:[%s6428_s14 + $0x88] sm:$0xff] %v1746_v2 }
 0x604   : > { %4273 = vst [vmem:[%s6428_s14 + $0x80] sm:$0xff] %v1745_v26  ;;  %5037 = vmatprep.mubr.f32.mxu1 %v1745_v26 }
 0x605   : > { %5038 = vmatmul.mubr.f32.vlgmr.msra.gmra.mxu1 %v1746_v2 }
 0x606   : > { %5062 = vmatpush3.msra.mxu1 %v4289_v28 }
 0x626   : > { %v1702_v52 = vpop.xlane.xlu0 %1701 }
 0x627   : > { %5568 = vrcp.f32 %v1702_v52 }
 0x628   : > { %v1704_v30 = vpop.xlane.xlu1 %1703 }
 0x629   : > { %5570 = vrcp.f32 %v1704_v30 }
 0x62a   : > { %v1706_v1 = vpop.xlane.xlu0 %1705 }
 0x62b   : > { %5572 = vrcp.f32 %v1706_v1 }
 0x62c   : > { %v1710_v10 = vpop.xlane.xlu1 %1709 }
 0x62d   : > { %5574 = vrcp.f32 %v1710_v10 }
 0x62e   : > { %v1708_v21 = vpop.xlane.xlu0 %1707 }
 0x62f   : > { %5576 = vrcp.f32 %v1708_v21 }
 0x630   : > { %v1714_v14 = vpop.xlane.xlu1 %1713 }
 0x631   : > { %5578 = vrcp.f32 %v1714_v14 }
 0x632   : > { %v1712_v35 = vpop.xlane.xlu0 %1711 }
 0x633   : > { %5580 = vrcp.f32 %v1712_v35 }
 0x634   : > { %v5569_v24 = vpop.eup %5568  ;;  %v1718_v18 = vpop.xlane.xlu1 %1717 }
 0x635   : > { %5582 = vrcp.f32 %v1718_v18  ;;  %v1747_v32 = vmul.f32 %v5569_v24, %v6642_v38 }
 0x636   : > { %v5571_v39 = vpop.eup %5570  ;;  %v1716_v41 = vpop.xlane.xlu0 %1715 }
 0x637   : > { %5584 = vrcp.f32 %v1716_v41  ;;  %4275 = vst [vmem:[%s6428_s14 + $0x90] sm:$0xff] %v1747_v32  ;;  %5040 = vmatprep.mubr.f32.mxu1 %v1747_v32  ;;  %v1748_v22 = vmul.f32 %v5571_v39, %v6646_v60 }
 0x638   : > { %v5573_v61 = vpop.eup %5572  ;;  %v1722_v57 = vpop.xlane.xlu1 %1721 }
 0x639   : > { %5586 = vrcp.f32 %v1722_v57  ;;  %4276 = vst [vmem:[%s6428_s14 + $0x98] sm:$0xff] %v1748_v22  ;;  %5041 = vmatmul.mubr.f32.gmra.mxu1 %v1748_v22  ;;  %v1749_v54 = vmul.f32 %v5573_v61, %v6650_v25 }
 0x63a   : > { %v5575_v56 = vpop.eup %5574  ;;  %v1720_v55 = vpop.xlane.xlu0 %1719 }
 0x63b   : > { %5588 = vrcp.f32 %v1720_v55  ;;  %4277 = vst [vmem:[%s6428_s14 + $0xa0] sm:$0xff] %v1749_v54  ;;  %5043 = vmatprep.mubr.f32.mxu1 %v1749_v54  ;;  %v1751_v38 = vmul.f32 %v5575_v56, %v6653_v29 }
 0x63c   : > { %v5577_v40 = vpop.eup %5576  ;;  %v1726_v59 = vpop.xlane.xlu1 %1725 }
 0x63d   : > { %5590 = vrcp.f32 %v1726_v59  ;;  %v1750_v60 = vmul.f32 %v5577_v40, %v6657_v62  ;;  %4279 = vst [vmem:[%s6428_s14 + $0xb0] sm:$0xff] %v1751_v38 }
 0x63e   : > { %v5579_v11 = vpop.eup %5578  ;;  %v1724_v31 = vpop.xlane.xlu0 %1723 }
 0x63f   : > { %5592 = vrcp.f32 %v1724_v31  ;;  %4278 = vst [vmem:[%s6428_s14 + $0xa8] sm:$0xff] %v1750_v60  ;;  %5044 = vmatmul.mubr.f32.gmra.mxu1 %v1750_v60  ;;  %v1753_v25 = vmul.f32 %v5579_v11, %v6660_v17 }
 0x640   : > { %v5581_v34 = vpop.eup %5580  ;;  %v613_v0 = vpop.permute.xlu1 %612  ;;  %5046 = vmatprep.mubr.f32.mxu1 %v1751_v38 }
 0x641   : > { %646 = vst.msk [vmem:[#allocation2 + $0x178] sm:$0xff] %vm484_vm1, %v613_v0  ;;  %v1752_v29 = vmul.f32 %v5581_v34, %v6663_v33  ;;  %4281 = vst [vmem:[%s6428_s14 + $0xc0] sm:$0xff] %v1753_v25 }
 0x642   : > { %v5583_v62 = vpop.eup %5582  ;;  %v1728_v8 = vpop.xlane.xlu0 %1727 }
 0x643   : > { %5594 = vrcp.f32 %v1728_v8  ;;  %4280 = vst [vmem:[%s6428_s14 + $0xb8] sm:$0xff] %v1752_v29  ;;  %5047 = vmatmul.mubr.f32.gmra.mxu1 %v1752_v29  ;;  %v1755_v58 = vmul.f32 %v5583_v62, %v6666_v44 }
 0x644   : > { %v5585_v63 = vpop.eup %5584  ;;  %v609_v46 = vpop.permute.xlu1 %608  ;;  %5049 = vmatprep.mubr.f32.mxu1 %v1753_v25 }
 0x645   : > { %644 = vst.msk [vmem:[#allocation2 + $0x168] sm:$0xff] %vm484_vm1, %v609_v46  ;;  %v1754_v17 = vmul.f32 %v5585_v63, %v6669_v23  ;;  %4283 = vst [vmem:[%s6428_s14 + $0xd0] sm:$0xff] %v1755_v58 }
 0x646   : > { %v5587_v27 = vpop.eup %5586  ;;  %v611_v33 = vpop.permute.xlu0 %610 }
 0x647   : > { %645 = vst.msk [vmem:[#allocation2 + $0x170] sm:$0xff] %vm484_vm1, %v611_v33  ;;  %4282 = vst [vmem:[%s6428_s14 + $0xc8] sm:$0xff] %v1754_v17  ;;  %5050 = vmatmul.mubr.f32.gmra.mxu1 %v1754_v17  ;;  %v1757_v2 = vmul.f32 %v5587_v27, %v6672_v43 }
 0x648   : > { %v5589_v37 = vpop.eup %5588  ;;  %v607_v44 = vpop.permute.xlu1 %606  ;;  %5052 = vmatprep.mubr.f32.mxu1 %v1755_v58  ;;  %v6732_v26 = vld [vmem:[#allocation2 + $0x178] sm:$0xff] }
 0x649   : > { %643 = vst.msk [vmem:[#allocation2 + $0x160] sm:$0xff] %vm484_vm1, %v607_v44  ;;  %2421 = vrot.lane.b32.xlu0 %v6732_v26, %s5786_s9  ;;  %v1756_v23 = vmul.f32 %v5589_v37, %v6675_v12  ;;  %4285 = vst [vmem:[%s6428_s14 + $0xe0] sm:$0xff] %v1757_v2 }
 0x64a   : > { %v5591_v28 = vpop.eup %5590  ;;  %v605_v52 = vpop.permute.xlu0 %604 }
 0x64b   : > { %642 = vst.msk [vmem:[#allocation2 + $0x158] sm:$0xff] %vm484_vm1, %v605_v52  ;;  %4284 = vst [vmem:[%s6428_s14 + $0xd8] sm:$0xff] %v1756_v23  ;;  %5053 = vmatmul.mubr.f32.gmra.mxu1 %v1756_v23  ;;  %v1759_v43 = vmul.f32 %v5591_v28, %v6678_v4 }
 0x64c   : > { %v5593_v30 = vpop.eup %5592  ;;  %v603_v1 = vpop.permute.xlu1 %602  ;;  %5055 = vmatprep.mubr.f32.mxu1 %v1757_v2  ;;  %v6742_v10 = vld [vmem:[#allocation2 + $0x168] sm:$0xff] }
 0x64d   : > { %641 = vst.msk [vmem:[#allocation2 + $0x150] sm:$0xff] %vm484_vm1, %v603_v1  ;;  %2417 = vrot.lane.b32.xlu0 %v6742_v10, %s5786_s9  ;;  %v1758_v12 = vmul.f32 %v5593_v30, %v6681_v16  ;;  %4287 = vst [vmem:[%s6428_s14 + $0xf0] sm:$0xff] %v1759_v43 }
 0x64e   : > { %v601_v21 = vpop.permute.xlu0 %600  ;;  %v6749_v14 = vld [vmem:[#allocation2 + $0x170] sm:$0xff] }
 0x64f   : > { %640 = vst.msk [vmem:[#allocation2 + $0x148] sm:$0xff] %vm484_vm1, %v601_v21  ;;  %4286 = vst [vmem:[%s6428_s14 + $0xe8] sm:$0xff] %v1758_v12  ;;  %5056 = vmatmul.mubr.f32.gmra.mxu1 %v1758_v12  ;;  %2419 = vrot.lane.b32.xlu1 %v6749_v14, %s5786_s9 }
 0x650   : > { %v5595_v4 = vpop.eup %5594  ;;  %v599_v35 = vpop.permute.xlu1 %598  ;;  %5058 = vmatprep.mubr.f32.mxu1 %v1759_v43  ;;  %v6757_v18 = vld [vmem:[#allocation2 + $0x160] sm:$0xff] }
 0x651   : > { %639 = vst.msk [vmem:[#allocation2 + $0x140] sm:$0xff] %vm484_vm1, %v599_v35  ;;  %v1760_v24 = vmul.f32 %v5595_v4, %v6684_v50 }
 0x652   : > { %v597_v16 = vpop.permute.xlu0 %596  ;;  %v6759_v32 = vld [vmem:[#allocation2 + $0x158] sm:$0xff] }
 0x653   : > { %638 = vst.msk [vmem:[#allocation2 + $0x138] sm:$0xff] %vm484_vm1, %v597_v16  ;;  %4288 = vst [vmem:[%s6428_s14 + $0xf8] sm:$0xff] %v1760_v24  ;;  %5059 = vmatmul.mubr.f32.gmra.mxu1 %v1760_v24  ;;  %2415 = vrot.lane.b32.xlu1 %v6757_v18, %s5786_s9 }
 0x654   : > { %2413 = vrot.lane.b32.xlu0 %v6759_v32, %s5786_s9  ;;  %v595_v39 = vpop.permute.xlu1 %594  ;;  %v6768_v50 = vld [vmem:[#allocation2 + $0x150] sm:$0xff] }
 0x655   : > { %637 = vst.msk [vmem:[#allocation2 + $0x130] sm:$0xff] %vm484_vm1, %v595_v39 }
 0x656   : > { %v593_v41 = vpop.permute.xlu0 %592  ;;  %v6770_v22 = vld [vmem:[#allocation2 + $0x148] sm:$0xff] }
 0x657   : > { %636 = vst.msk [vmem:[#allocation2 + $0x128] sm:$0xff] %vm484_vm1, %v593_v41  ;;  %2411 = vrot.lane.b32.xlu1 %v6768_v50, %s5786_s9 }
 0x658   : > { %2409 = vrot.lane.b32.xlu0 %v6770_v22, %s5786_s9  ;;  %v591_v61 = vpop.permute.xlu1 %590  ;;  %v6778_v54 = vld [vmem:[#allocation2 + $0x140] sm:$0xff] }
 0x659   : > { %635 = vst.msk [vmem:[#allocation2 + $0x120] sm:$0xff] %vm484_vm1, %v591_v61 }
 0x65a   : > { %v589_v57 = vpop.permute.xlu0 %588  ;;  %v6780_v56 = vld [vmem:[#allocation2 + $0x138] sm:$0xff] }
 0x65b   : > { %634 = vst.msk [vmem:[#allocation2 + $0x118] sm:$0xff] %vm484_vm1, %v589_v57  ;;  %2407 = vrot.lane.b32.xlu1 %v6778_v54, %s5786_s9 }
 0x65c   : > { %2405 = vrot.lane.b32.xlu0 %v6780_v56, %s5786_s9  ;;  %v587_v55 = vpop.permute.xlu1 %586  ;;  %v6788_v40 = vld [vmem:[#allocation2 + $0x130] sm:$0xff] }
 0x65d   : > { %633 = vst.msk [vmem:[#allocation2 + $0x110] sm:$0xff] %vm484_vm1, %v587_v55 }
 0x65e   : > { %v585_v38 = vpop.permute.xlu0 %584  ;;  %v6790_v59 = vld [vmem:[#allocation2 + $0x128] sm:$0xff] }
 0x65f   : > { %632 = vst.msk [vmem:[#allocation2 + $0x108] sm:$0xff] %vm484_vm1, %v585_v38  ;;  %2403 = vrot.lane.b32.xlu1 %v6788_v40, %s5786_s9 }
 0x660   : > { %2401 = vrot.lane.b32.xlu0 %v6790_v59, %s5786_s9  ;;  %v583_v60 = vpop.permute.xlu1 %582  ;;  %v6798_v11 = vld [vmem:[#allocation2 + $0x120] sm:$0xff] }
 0x661   : > { %631 = vst.msk [vmem:[#allocation2 + $0x100] sm:$0xff] %vm484_vm1, %v583_v60 }
 0x662   : > { %v6800_v31 = vld [vmem:[#allocation2 + $0x118] sm:$0xff] }
 0x663   : > { %2399 = vrot.lane.b32.xlu1 %v6798_v11, %s5786_s9 }
 0x664   : > { %2397 = vrot.lane.b32.xlu0 %v6800_v31, %s5786_s9  ;;  %v6806_v25 = vld [vmem:[#allocation2 + $0x110] sm:$0xff] }
 0x666   : > { %v6808_v34 = vld [vmem:[#allocation2 + $0x108] sm:$0xff] }
 0x667   : > { %2395 = vrot.lane.b32.xlu1 %v6806_v25, %s5786_s9 }
 0x668   : > { %2393 = vrot.lane.b32.xlu0 %v6808_v34, %s5786_s9  ;;  %v6814_v0 = vld [vmem:[#allocation2 + $0x100] sm:$0xff] }
 0x66b   : > { %2391 = vrot.lane.b32.xlu1 %v6814_v0, %s5786_s9 }
 0x66c   : > { %677 = vrot.lane.b32.xlu0 %v5997_v51, %s5791_s28 }
 0x66f   : > { %675 = vrot.lane.b32.xlu1 %v6001_v53, %s5791_s28 }
 0x670   : > { %673 = vrot.lane.b32.xlu0 %v5989_v47, %s5791_s28 }
 0x673   : > { %671 = vrot.lane.b32.xlu1 %v5993_v49, %s5791_s28 }
 0x674   : > { %669 = vrot.lane.b32.xlu0 %v7955_v42, %s5791_s28 }
 0x677   : > { %667 = vrot.lane.b32.xlu1 %v5985_v45, %s5791_s28 }
 0x678   : > { %665 = vrot.lane.b32.xlu0 %v7957_v48, %s5791_s28 }
 0x67b   : > { %663 = vrot.lane.b32.xlu1 %v7956_v7, %s5791_s28 }
 0x67c   : > { %661 = vrot.lane.b32.xlu0 %v7959_v5, %s5791_s28 }
 0x67f   : > { %659 = vrot.lane.b32.xlu1 %v7958_v6, %s5791_s28 }
 0x680   : > { %657 = vrot.lane.b32.xlu0 %v7961_v9, %s5791_s28 }
 0x683   : > { %655 = vrot.lane.b32.xlu1 %v7960_v13, %s5791_s28 }
 0x684   : > { %653 = vrot.lane.b32.xlu0 %v7963_v19, %s5791_s28 }
 0x687   : > { %651 = vrot.lane.b32.xlu1 %v7962_v3, %s5791_s28 }
 0x688   : > { %649 = vrot.lane.b32.xlu0 %v7965_v15, %s5791_s28 }
 0x68b   : > { %647 = vrot.lane.b32.xlu1 %v7964_v36, %s5791_s28  ;;  %s5724_s28 = scalar_lea.vmem %s7793_s16, 8192 }
 0x68c   : > { %p5725_p11 = scmp.ne.s32.totalorder %s7793_s16, %s5724_s28 }
 0x68e   : > { %p5726_p12 = pnand %p5725_p11, %p5868_p5 }
 0x690   : > { %p5727_p13 = pneg %p5726_p12 }
 0x6bb   : > { %v2422_v45 = vpop.permute.xlu0 %2421 }
 0x6bc   : > { %5113 = vmatprep.subr.msk.mxu1 %vm780_vm2, %v2422_v45 }
 0x6bf   : > { %v2418_v49 = vpop.permute.xlu0 %2417 }
 0x6c1   : > { %v2420_v47 = vpop.permute.xlu1 %2419 }
 0x6c5   : > { %v5039_v51 = vpop.f32.mrf.mxu1  ;;  %v2416_v53 = vpop.permute.xlu1 %2415 }
 0x6c6   : > { %v2414_v42 = vpop.permute.xlu0 %2413 }
 0x6c7   : > { %v1892_v7 = vpop.f32.mrf.mxu1 }
 0x6c8   : > { %5063 = vmatprep.mubr.msk.f32.mxu1 %vm780_vm2, %v1892_v7 }
 0x6c9   : > { %5064 = vmatmul.mubr.msk.f32.vlgmr.msra.gmra.mxu1 %vm780_vm2, %v5039_v51  ;;  %v2412_v48 = vpop.permute.xlu1 %2411 }
 0x6ca   : > { %5114 = vmatpush3.xpose.msk.msra.mxu1 %vm780_vm2, %v2422_v45  ;;  %v2410_v6 = vpop.permute.xlu0 %2409 }
 0x6cb   : > { %5115 = vmatprep.subr.msk.mxu1 %vm780_vm2, %v2420_v47 }
 0x6cd   : > { %v2408_v5 = vpop.permute.xlu1 %2407 }
 0x6ce   : > { %5116 = vmatpush3.xpose.msk.msra.mxu1 %vm780_vm2, %v2420_v47  ;;  %v2406_v13 = vpop.permute.xlu0 %2405 }
 0x6cf   : > { %5117 = vmatprep.subr.msk.mxu1 %vm780_vm2, %v2418_v49 }
 0x6d1   : > { %v2404_v9 = vpop.permute.xlu1 %2403 }
 0x6d2   : > { %5118 = vmatpush3.xpose.msk.msra.mxu1 %vm780_vm2, %v2418_v49  ;;  %v2402_v3 = vpop.permute.xlu0 %2401 }
 0x6d3   : > { %5119 = vmatprep.subr.msk.mxu1 %vm780_vm2, %v2416_v53 }
 0x6d5   : > { %v2400_v19 = vpop.permute.xlu1 %2399 }
 0x6d6   : > { %5120 = vmatpush3.xpose.msk.msra.mxu1 %vm780_vm2, %v2416_v53  ;;  %v6844_v36 = vpop.permute.xlu0 %2397 }
 0x6d7   : > { %5121 = vmatprep.subr.msk.mxu1 %vm780_vm2, %v2414_v42 }
 0x6d9   : > { %v6847_v15 = vpop.permute.xlu1 %2395 }
 0x6da   : > { %5122 = vmatpush3.xpose.msk.msra.mxu1 %vm780_vm2, %v2414_v42  ;;  %v6850_v29 = vpop.permute.xlu0 %2393 }
 0x6db   : > { %5123 = vmatprep.subr.msk.mxu1 %vm780_vm2, %v2412_v48 }
 0x6dd   : > { %v6853_v62 = vpop.permute.xlu1 %2391 }
 0x6de   : > { %5124 = vmatpush3.xpose.msk.msra.mxu1 %vm780_vm2, %v2412_v48  ;;  %v678_v8 = vpop.permute.xlu0 %677 }
 0x6df   : > { %711 = vst.msk [vmem:[#allocation2 + $0x1f8] sm:$0xff] %vm484_vm1, %v678_v8  ;;  %5125 = vmatprep.subr.msk.mxu1 %vm780_vm2, %v2410_v6 }
 0x6e1   : > { %v676_v58 = vpop.permute.xlu1 %675 }
 0x6e2   : > { %710 = vst.msk [vmem:[#allocation2 + $0x1f0] sm:$0xff] %vm484_vm1, %v676_v58  ;;  %5126 = vmatpush3.xpose.msk.msra.mxu1 %vm780_vm2, %v2410_v6  ;;  %v674_v63 = vpop.permute.xlu0 %673 }
 0x6e3   : > { %709 = vst.msk [vmem:[#allocation2 + $0x1e8] sm:$0xff] %vm484_vm1, %v674_v63  ;;  %5127 = vmatprep.subr.msk.mxu1 %vm780_vm2, %v2408_v5 }
 0x6e5   : > { %v672_v46 = vpop.permute.xlu1 %671 }
 0x6e6   : > { %708 = vst.msk [vmem:[#allocation2 + $0x1e0] sm:$0xff] %vm484_vm1, %v672_v46  ;;  %5128 = vmatpush3.xpose.msk.msra.mxu1 %vm780_vm2, %v2408_v5  ;;  %v670_v17 = vpop.permute.xlu0 %669  ;;  %v6864_v27 = vld [vmem:[#allocation2 + $0x1f8] sm:$0xff] }
 0x6e7   : > { %707 = vst.msk [vmem:[#allocation2 + $0x1d8] sm:$0xff] %vm484_vm1, %v670_v17  ;;  %5129 = vmatprep.subr.msk.mxu1 %vm780_vm2, %v2406_v13  ;;  %3259 = vrot.lane.b32.xlu0 %v6864_v27, %s5786_s9 }
 0x6e9   : > { %v668_v33 = vpop.permute.xlu1 %667  ;;  %v6870_v2 = vld [vmem:[#allocation2 + $0x1f0] sm:$0xff] }
 0x6ea   : > { %706 = vst.msk [vmem:[#allocation2 + $0x1d0] sm:$0xff] %vm484_vm1, %v668_v33  ;;  %5130 = vmatpush3.xpose.msk.msra.mxu1 %vm780_vm2, %v2406_v13  ;;  %v666_v37 = vpop.permute.xlu0 %665  ;;  %3257 = vrot.lane.b32.xlu1 %v6870_v2, %s5786_s9  ;;  %v6876_v44 = vld [vmem:[#allocation2 + $0x1e8] sm:$0xff] }
 0x6eb   : > { %705 = vst.msk [vmem:[#allocation2 + $0x1c8] sm:$0xff] %vm484_vm1, %v666_v37  ;;  %5131 = vmatprep.subr.msk.mxu1 %vm780_vm2, %v2404_v9  ;;  %3255 = vrot.lane.b32.xlu0 %v6876_v44, %s5786_s9 }
 0x6ed   : > { %v664_v23 = vpop.permute.xlu1 %663  ;;  %v6882_v28 = vld [vmem:[#allocation2 + $0x1e0] sm:$0xff] }
 0x6ee   : > { %704 = vst.msk [vmem:[#allocation2 + $0x1c0] sm:$0xff] %vm484_vm1, %v664_v23  ;;  %5132 = vmatpush3.xpose.msk.msra.mxu1 %vm780_vm2, %v2404_v9  ;;  %v662_v52 = vpop.permute.xlu0 %661  ;;  %3253 = vrot.lane.b32.xlu1 %v6882_v28, %s5786_s9  ;;  %v6888_v43 = vld [vmem:[#allocation2 + $0x1d8] sm:$0xff] }
 0x6ef   : > { %703 = vst.msk [vmem:[#allocation2 + $0x1b8] sm:$0xff] %vm484_vm1, %v662_v52  ;;  %5133 = vmatprep.subr.msk.mxu1 %vm780_vm2, %v2402_v3  ;;  %3251 = vrot.lane.b32.xlu0 %v6888_v43, %s5786_s9 }
 0x6f1   : > { %v660_v30 = vpop.permute.xlu1 %659  ;;  %v6894_v1 = vld [vmem:[#allocation2 + $0x1d0] sm:$0xff] }
 0x6f2   : > { %702 = vst.msk [vmem:[#allocation2 + $0x1b0] sm:$0xff] %vm484_vm1, %v660_v30  ;;  %5134 = vmatpush3.xpose.msk.msra.mxu1 %vm780_vm2, %v2402_v3  ;;  %v658_v12 = vpop.permute.xlu0 %657  ;;  %3249 = vrot.lane.b32.xlu1 %v6894_v1, %s5786_s9  ;;  %v6900_v21 = vld [vmem:[#allocation2 + $0x1c8] sm:$0xff] }
 0x6f3   : > { %701 = vst.msk [vmem:[#allocation2 + $0x1a8] sm:$0xff] %vm484_vm1, %v658_v12  ;;  %5135 = vmatprep.subr.msk.mxu1 %vm780_vm2, %v2400_v19  ;;  %3247 = vrot.lane.b32.xlu0 %v6900_v21, %s5786_s9 }
 0x6f5   : > { %v656_v4 = vpop.permute.xlu1 %655  ;;  %v6906_v35 = vld [vmem:[#allocation2 + $0x1c0] sm:$0xff] }
 0x6f6   : > { %700 = vst.msk [vmem:[#allocation2 + $0x1a0] sm:$0xff] %vm484_vm1, %v656_v4  ;;  %5136 = vmatpush3.xpose.msk.msra.mxu1 %vm780_vm2, %v2400_v19  ;;  %v654_v24 = vpop.permute.xlu0 %653  ;;  %3245 = vrot.lane.b32.xlu1 %v6906_v35, %s5786_s9  ;;  %v6912_v16 = vld [vmem:[#allocation2 + $0x1b8] sm:$0xff] }
 0x6f7   : > { %699 = vst.msk [vmem:[#allocation2 + $0x198] sm:$0xff] %vm484_vm1, %v654_v24  ;;  %5137 = vmatprep.subr.msk.mxu1 %vm780_vm2, %v6844_v36  ;;  %3243 = vrot.lane.b32.xlu0 %v6912_v16, %s5786_s9 }
 0x6f9   : > { %v5042_v39 = vpop.f32.mrf.mxu1  ;;  %v652_v41 = vpop.permute.xlu1 %651  ;;  %v6919_v61 = vld [vmem:[#allocation2 + $0x1b0] sm:$0xff] }
 0x6fa   : > { %698 = vst.msk [vmem:[#allocation2 + $0x190] sm:$0xff] %vm484_vm1, %v652_v41  ;;  %5138 = vmatpush3.xpose.msk.msra.mxu1 %vm780_vm2, %v6844_v36  ;;  %v650_v57 = vpop.permute.xlu0 %649  ;;  %3241 = vrot.lane.b32.xlu1 %v6919_v61, %s5786_s9  ;;  %v6926_v55 = vld [vmem:[#allocation2 + $0x1a8] sm:$0xff] }
 0x6fb   : > { %697 = vst.msk [vmem:[#allocation2 + $0x188] sm:$0xff] %vm484_vm1, %v650_v57  ;;  %5139 = vmatprep.subr.msk.mxu1 %vm780_vm2, %v6847_v15  ;;  %3239 = vrot.lane.b32.xlu0 %v6926_v55, %s5786_s9  ;;  %v1902_v38 = vpop.f32.mrf.mxu1 }
 0x6fc   : > { %5066 = vmatprep.mubr.msk.f32.mxu1 %vm780_vm2, %v1902_v38 }
 0x6fd   : > { %5067 = vmatmul.mubr.msk.f32.gmra.mxu1 %vm780_vm2, %v5042_v39  ;;  %v648_v60 = vpop.permute.xlu1 %647  ;;  %v6935_v45 = vld [vmem:[#allocation2 + $0x1a0] sm:$0xff] }
 0x6fe   : > { %696 = vst.msk [vmem:[#allocation2 + $0x180] sm:$0xff] %vm484_vm1, %v648_v60  ;;  %5140 = vmatpush3.xpose.msk.msra.mxu1 %vm780_vm2, %v6847_v15  ;;  %3237 = vrot.lane.b32.xlu1 %v6935_v45, %s5786_s9  ;;  %v6942_v47 = vld [vmem:[#allocation2 + $0x198] sm:$0xff] }
 0x6ff   : > { %5141 = vmatprep.subr.msk.mxu1 %vm780_vm2, %v6850_v29  ;;  %3235 = vrot.lane.b32.xlu0 %v6942_v47, %s5786_s9  ;;  %v5045_v49 = vpop.f32.mrf.mxu1 }
 0x701   : > { %v1912_v51 = vpop.f32.mrf.mxu1  ;;  %v6948_v53 = vld [vmem:[#allocation2 + $0x190] sm:$0xff] }
 0x702   : > { %5142 = vmatpush3.xpose.msk.msra.mxu1 %vm780_vm2, %v6850_v29  ;;  %5069 = vmatprep.mubr.msk.f32.mxu1 %vm780_vm2, %v1912_v51  ;;  %v6953_v42 = vld [vmem:[#allocation2 + $0x188] sm:$0xff] }
 0x703   : > { %3233 = vrot.lane.b32.xlu1 %v6948_v53, %s5786_s9  ;;  %5143 = vmatprep.subr.msk.mxu1 %vm780_vm2, %v6853_v62  ;;  %v5048_v7 = vpop.f32.mrf.mxu1 }
 0x704   : > { %3231 = vrot.lane.b32.xlu0 %v6953_v42, %s5786_s9  ;;  %5070 = vmatmul.mubr.msk.f32.gmra.mxu1 %vm780_vm2, %v5045_v49 }
 0x705   : > { %v1922_v48 = vpop.f32.mrf.mxu1  ;;  %v6962_v6 = vld [vmem:[#allocation2 + $0x180] sm:$0xff] }
 0x706   : > { %5144 = vmatpush3.xpose.msk.msra.mxu1 %vm780_vm2, %v6853_v62  ;;  %5072 = vmatprep.mubr.msk.f32.mxu1 %vm780_vm2, %v1922_v48 }
 0x707   : > { %3229 = vrot.lane.b32.xlu1 %v6962_v6, %s5786_s9  ;;  %v5051_v5 = vpop.f32.mrf.mxu1 }
 0x708   : > { %2821 = vrot.lane.b32.xlu0 %v6749_v14, %s5788_s11  ;;  %5073 = vmatmul.mubr.msk.f32.gmra.mxu1 %vm780_vm2, %v5048_v7 }
 0x709   : > { %v1932_v13 = vpop.f32.mrf.mxu1 }
 0x70a   : > { %5075 = vmatprep.mubr.msk.f32.mxu1 %vm780_vm2, %v1932_v13 }
 0x70b   : > { %2823 = vrot.lane.b32.xlu1 %v6732_v26, %s5788_s11  ;;  %v5054_v9 = vpop.f32.mrf.mxu1 }
 0x70c   : > { %2817 = vrot.lane.b32.xlu0 %v6757_v18, %s5788_s11  ;;  %5076 = vmatmul.mubr.msk.f32.gmra.mxu1 %vm780_vm2, %v5051_v5 }
 0x70d   : > { %v1942_v3 = vpop.f32.mrf.mxu1 }
 0x70e   : > { %5078 = vmatprep.mubr.msk.f32.mxu1 %vm780_vm2, %v1942_v3 }
 0x70f   : > { %2819 = vrot.lane.b32.xlu1 %v6742_v10, %s5788_s11  ;;  %v5057_v19 = vpop.f32.mrf.mxu1 }
 0x710   : > { %2813 = vrot.lane.b32.xlu0 %v6768_v50, %s5788_s11  ;;  %5079 = vmatmul.mubr.msk.f32.gmra.mxu1 %vm780_vm2, %v5054_v9 }
 0x711   : > { %v1952_v36 = vpop.f32.mrf.mxu1 }
 0x712   : > { %5081 = vmatprep.mubr.msk.f32.mxu1 %vm780_vm2, %v1952_v36 }
 0x713   : > { %2815 = vrot.lane.b32.xlu1 %v6759_v32, %s5788_s11  ;;  %v5060_v15 = vpop.f32.mrf.mxu1 }
 0x714   : > { %2809 = vrot.lane.b32.xlu0 %v6778_v54, %s5788_s11  ;;  %5082 = vmatmul.mubr.msk.f32.gmra.mxu1 %vm780_vm2, %v5057_v19 }
 0x715   : > { %v1962_v29 = vpop.f32.mrf.mxu1 }
 0x716   : > { %5084 = vmatprep.mubr.msk.f32.mxu1 %vm780_vm2, %v1962_v29 }
 0x717   : > { %2811 = vrot.lane.b32.xlu1 %v6770_v22, %s5788_s11 }
 0x718   : > { %2805 = vrot.lane.b32.xlu0 %v6788_v40, %s5788_s11  ;;  %5085 = vmatmul.mubr.msk.f32.gmra.mxu1 %vm780_vm2, %v5060_v15 }
 0x719   : > { %5145 = vmatprep.mubr.msk.f32.mxu1 %vm780_vm2, %v6814_v0 }
 0x71c   : > { %5146 = vmatmul.mubr.msk.f32.vlgmr.msra.gmra.mxu1 %vm780_vm2, %v6808_v34 }
 0x71d   : > { %5148 = vmatprep.mubr.msk.f32.mxu1 %vm780_vm2, %v6806_v25 }
 0x720   : > { %5149 = vmatmul.mubr.msk.f32.gmra.mxu1 %vm780_vm2, %v6800_v31 }
 0x721   : > { %5151 = vmatprep.mubr.msk.f32.mxu1 %vm780_vm2, %v6798_v11 }
 0x724   : > { %5152 = vmatmul.mubr.msk.f32.gmra.mxu1 %vm780_vm2, %v6790_v59 }
 0x725   : > { %5154 = vmatprep.mubr.msk.f32.mxu1 %vm780_vm2, %v6788_v40 }
 0x728   : > { %5155 = vmatmul.mubr.msk.f32.gmra.mxu1 %vm780_vm2, %v6780_v56 }
 0x729   : > { %5157 = vmatprep.mubr.msk.f32.mxu1 %vm780_vm2, %v6778_v54 }
 0x72c   : > { %5158 = vmatmul.mubr.msk.f32.gmra.mxu1 %vm780_vm2, %v6770_v22 }
 0x72d   : > { %5160 = vmatprep.mubr.msk.f32.mxu1 %vm780_vm2, %v6768_v50 }
 0x730   : > { %5161 = vmatmul.mubr.msk.f32.gmra.mxu1 %vm780_vm2, %v6759_v32 }
 0x731   : > { %5163 = vmatprep.mubr.msk.f32.mxu1 %vm780_vm2, %v6757_v18 }
 0x734   : > { %5164 = vmatmul.mubr.msk.f32.gmra.mxu1 %vm780_vm2, %v6742_v10 }
 0x735   : > { %5166 = vmatprep.mubr.msk.f32.mxu1 %vm780_vm2, %v6749_v14 }
 0x738   : > { %5167 = vmatmul.mubr.msk.f32.gmra.mxu1 %vm780_vm2, %v6732_v26 }
 0x739   : > { %5283 = vmatprep.mubr.msk.f32.mxu1 %vm780_vm2, %v6962_v6 }
 0x759   : > { %v3260_v22 = vpop.permute.xlu0 %3259 }
 0x75a   : > { %5251 = vmatprep.subr.msk.mxu1 %vm780_vm2, %v3260_v22 }
 0x75b   : > { %5252 = vmatpush3.xpose.msk.msra.mxu1 %vm780_vm2, %v3260_v22 }
 0x75c   : > { %v3258_v32 = vpop.permute.xlu1 %3257 }
 0x75d   : > { %v3256_v50 = vpop.permute.xlu0 %3255  ;;  %5253 = vmatprep.subr.msk.mxu1 %vm780_vm2, %v3258_v32 }
 0x75f   : > { %5254 = vmatpush3.xpose.msk.msra.mxu1 %vm780_vm2, %v3258_v32 }
 0x760   : > { %5255 = vmatprep.subr.msk.mxu1 %vm780_vm2, %v3256_v50  ;;  %v3254_v10 = vpop.permute.xlu1 %3253 }
 0x761   : > { %v3252_v14 = vpop.permute.xlu0 %3251 }
 0x763   : > { %5256 = vmatpush3.xpose.msk.msra.mxu1 %vm780_vm2, %v3256_v50 }
 0x764   : > { %5257 = vmatprep.subr.msk.mxu1 %vm780_vm2, %v3254_v10  ;;  %v3250_v26 = vpop.permute.xlu1 %3249 }
 0x765   : > { %v3248_v18 = vpop.permute.xlu0 %3247 }
 0x767   : > { %5258 = vmatpush3.xpose.msk.msra.mxu1 %vm780_vm2, %v3254_v10 }
 0x768   : > { %5259 = vmatprep.subr.msk.mxu1 %vm780_vm2, %v3252_v14  ;;  %v3246_v54 = vpop.permute.xlu1 %3245 }
 0x769   : > { %v3244_v40 = vpop.permute.xlu0 %3243 }
 0x76b   : > { %5260 = vmatpush3.xpose.msk.msra.mxu1 %vm780_vm2, %v3252_v14 }
 0x76c   : > { %5261 = vmatprep.subr.msk.mxu1 %vm780_vm2, %v3250_v26  ;;  %v3242_v62 = vpop.permute.xlu1 %3241 }
 0x76d   : > { %v3240_v8 = vpop.permute.xlu0 %3239 }
 0x76f   : > { %5262 = vmatpush3.xpose.msk.msra.mxu1 %vm780_vm2, %v3250_v26 }
 0x770   : > { %5263 = vmatprep.subr.msk.mxu1 %vm780_vm2, %v3248_v18  ;;  %v3238_v58 = vpop.permute.xlu1 %3237 }
 0x771   : > { %v3236_v63 = vpop.permute.xlu0 %3235 }
 0x773   : > { %5264 = vmatpush3.xpose.msk.msra.mxu1 %vm780_vm2, %v3248_v18 }
 0x774   : > { %5265 = vmatprep.subr.msk.mxu1 %vm780_vm2, %v3246_v54 }
 0x775   : > { %v3234_v46 = vpop.permute.xlu1 %3233 }
 0x776   : > { %v3232_v17 = vpop.permute.xlu0 %3231 }
 0x777   : > { %5266 = vmatpush3.xpose.msk.msra.mxu1 %vm780_vm2, %v3246_v54 }
 0x778   : > { %5267 = vmatprep.subr.msk.mxu1 %vm780_vm2, %v3244_v40 }
 0x779   : > { %v3230_v33 = vpop.permute.xlu1 %3229 }
 0x77a   : > { %v2822_v37 = vpop.permute.xlu0 %2821 }
 0x77b   : > { %5268 = vmatpush3.xpose.msk.msra.mxu1 %vm780_vm2, %v3244_v40 }
 0x77c   : > { %5269 = vmatprep.subr.msk.mxu1 %vm780_vm2, %v3242_v62 }
 0x77d   : > { %v2824_v23 = vpop.permute.xlu1 %2823 }
 0x77e   : > { %5169 = vmatprep.subr.mxu0 %v2824_v23  ;;  %v2818_v52 = vpop.permute.xlu0 %2817 }
 0x77f   : > { %5170 = vmatpush3.msra.mxu0 %v2824_v23  ;;  %5270 = vmatpush3.xpose.msk.msra.mxu1 %vm780_vm2, %v3242_v62 }
 0x780   : > { %5171 = vmatprep.subr.mxu0 %v2822_v37  ;;  %5271 = vmatprep.subr.msk.mxu1 %vm780_vm2, %v3240_v8 }
 0x781   : > { %v2820_v30 = vpop.permute.xlu1 %2819  ;;  %5172 = vmatpush3.msra.mxu0 %v2822_v37 }
 0x782   : > { %5173 = vmatprep.subr.mxu0 %v2820_v30  ;;  %v2814_v12 = vpop.permute.xlu0 %2813 }
 0x783   : > { %5174 = vmatpush3.msra.mxu0 %v2820_v30  ;;  %5272 = vmatpush3.xpose.msk.msra.mxu1 %vm780_vm2, %v3240_v8 }
 0x784   : > { %5175 = vmatprep.subr.mxu0 %v2818_v52  ;;  %5273 = vmatprep.subr.msk.mxu1 %vm780_vm2, %v3238_v58 }
 0x785   : > { %v2816_v4 = vpop.permute.xlu1 %2815  ;;  %5176 = vmatpush3.msra.mxu0 %v2818_v52 }
 0x786   : > { %5177 = vmatprep.subr.mxu0 %v2816_v4  ;;  %v2810_v39 = vpop.permute.xlu0 %2809 }
 0x787   : > { %5178 = vmatpush3.msra.mxu0 %v2816_v4  ;;  %5274 = vmatpush3.xpose.msk.msra.mxu1 %vm780_vm2, %v3238_v58 }
 0x788   : > { %5179 = vmatprep.subr.mxu0 %v2814_v12  ;;  %5275 = vmatprep.subr.msk.mxu1 %vm780_vm2, %v3236_v63 }
 0x789   : > { %v2812_v24 = vpop.permute.xlu1 %2811  ;;  %5180 = vmatpush3.msra.mxu0 %v2814_v12  ;;  %v7092_v41 = vpop.f32.mrf.mxu1 }
 0x78a   : > { %5181 = vmatprep.subr.mxu0 %v2812_v24 }
 0x78b   : > { %5182 = vmatpush3.msra.mxu0 %v2812_v24  ;;  %5276 = vmatpush3.xpose.msk.msra.mxu1 %vm780_vm2, %v3236_v63  ;;  %v7094_v57 = vpop.f32.mrf.mxu1 }
 0x78c   : > { %5183 = vmatprep.subr.mxu0 %v2810_v39  ;;  %5277 = vmatprep.subr.msk.mxu1 %vm780_vm2, %v3234_v46 }
 0x78d   : > { %5184 = vmatpush3.msra.mxu0 %v2810_v39 }
 0x78f   : > { %5278 = vmatpush3.xpose.msk.msra.mxu1 %vm780_vm2, %v3234_v46 }
 0x790   : > { %5279 = vmatprep.subr.msk.mxu1 %vm780_vm2, %v3232_v17 }
 0x793   : > { %5280 = vmatpush3.xpose.msk.msra.mxu1 %vm780_vm2, %v3232_v17 }
 0x794   : > { %5281 = vmatprep.subr.msk.mxu1 %vm780_vm2, %v3230_v33 }
 0x797   : > { %5282 = vmatpush3.xpose.msk.msra.mxu1 %vm780_vm2, %v3230_v33 }
 0x79a   : > { %5284 = vmatmul.mubr.msk.f32.vlgmr.msra.gmra.mxu1 %vm780_vm2, %v6953_v42 }
 0x79b   : > { %5286 = vmatprep.mubr.msk.f32.mxu1 %vm780_vm2, %v6948_v53 }
 0x79e   : > { %5287 = vmatmul.mubr.msk.f32.gmra.mxu1 %vm780_vm2, %v6942_v47 }
 0x79f   : > { %5289 = vmatprep.mubr.msk.f32.mxu1 %vm780_vm2, %v6935_v45 }
 0x7a2   : > { %5290 = vmatmul.mubr.msk.f32.gmra.mxu1 %vm780_vm2, %v6926_v55 }
 0x7a3   : > { %5292 = vmatprep.mubr.msk.f32.mxu1 %vm780_vm2, %v6919_v61 }
 0x7a6   : > { %5293 = vmatmul.mubr.msk.f32.gmra.mxu1 %vm780_vm2, %v6912_v16 }
 0x7a7   : > { %5295 = vmatprep.mubr.msk.f32.mxu1 %vm780_vm2, %v6906_v35 }
 0x7aa   : > { %5296 = vmatmul.mubr.msk.f32.gmra.mxu1 %vm780_vm2, %v6900_v21 }
 0x7ab   : > { %5298 = vmatprep.mubr.msk.f32.mxu1 %vm780_vm2, %v6894_v1 }
 0x7ae   : > { %5299 = vmatmul.mubr.msk.f32.gmra.mxu1 %vm780_vm2, %v6888_v43 }
 0x7af   : > { %5301 = vmatprep.mubr.msk.f32.mxu1 %vm780_vm2, %v6882_v28 }
 0x7b2   : > { %5302 = vmatmul.mubr.msk.f32.gmra.mxu1 %vm780_vm2, %v6876_v44 }
 0x7b3   : > { %5304 = vmatprep.mubr.msk.f32.mxu1 %vm780_vm2, %v6870_v2 }
 0x7b6   : > { %5305 = vmatmul.mubr.msk.f32.gmra.mxu1 %vm780_vm2, %v6864_v27 }
 0x7bd   : > { %v7096_v38 = vpop.f32.mrf.mxu1 }
 0x7bf   : > { %v7098_v60 = vpop.f32.mrf.mxu1 }
 0x7c4   : > { %v7100_v49 = vpop.f32.mrf.mxu1 }
 0x7c6   : > { %v7102_v51 = vpop.f32.mrf.mxu1 }
 0x7c8   : > { %v7104_v7 = vpop.f32.mrf.mxu1 }
 0x7ca   : > { %v7106_v48 = vpop.f32.mrf.mxu1 }
 0x7cc   : > { %v7108_v5 = vpop.f32.mrf.mxu1 }
 0x7ce   : > { %v7110_v13 = vpop.f32.mrf.mxu1 }
 0x7d0   : > { %v7112_v9 = vpop.f32.mrf.mxu1 }
 0x7d2   : > { %v7114_v3 = vpop.f32.mrf.mxu1 }
 0x7d3   : > { %7966 = vst [vmem:[#allocation16_spill] sm:$0xff] %v7114_v3 }
 0x7d4   : > { %v7116_v19 = vpop.f32.mrf.mxu1 }
 0x7d5   : > { %7967 = vst [vmem:[#allocation15_spill] sm:$0xff] %v7116_v19 }
 0x7d6   : > { %v7118_v36 = vpop.f32.mrf.mxu1 }
 0x7d7   : > { %7968 = vst [vmem:[#allocation14_spill] sm:$0xff] %v7118_v36 }
 0x7d8   : > { %v7120_v15 = vpop.f32.mrf.mxu1 }
 0x7d9   : > { %7969 = vst [vmem:[#allocation13_spill] sm:$0xff] %v7120_v15 }
 0x7da   : > { %v7122_v29 = vpop.f32.mrf.mxu1 }
 0x7db   : > { %7970 = vst [vmem:[#allocation12_spill] sm:$0xff] %v7122_v29 }
 0x7dc   : > { %v5147_v22 = vpop.f32.mrf.mxu1 }
 0x7dd   : > { %v2559_v32 = vadd.f32 %v5147_v22, %v6243_v20 }
 0x7de   : > { %v2553_v50 = vpop.f32.mrf.mxu1 }
 0x7df   : > { %v2554_v10 = vadd.f32 %v2553_v50, %v6243_v20  ;;  %2634 = vmax.xlane.f32.xlu1 %v2559_v32 }
 0x7e0   : > { %v5150_v14 = vpop.f32.mrf.mxu1 }
 0x7e1   : > { %2632 = vmax.xlane.f32.xlu0 %v2554_v10  ;;  %v7127_v18 = vadd.f32 %v5150_v14, %v6243_v20 }
 0x7e2   : > { %v2563_v26 = vpop.f32.mrf.mxu1 }
 0x7e3   : > { %v7131_v62 = vadd.f32 %v2563_v26, %v6243_v20 }
 0x7e4   : > { %v5153_v54 = vpop.f32.mrf.mxu1 }
 0x7e5   : > { %2638 = vmax.xlane.f32.xlu0 %v7127_v18  ;;  %v7135_v63 = vadd.f32 %v5153_v54, %v6243_v20 }
 0x7e6   : > { %v2573_v40 = vpop.f32.mrf.mxu1 }
 0x7e7   : > { %v7161_v22 = vadd.f32 %v2573_v40, %v6243_v20 }
 0x7e8   : > { %v5156_v8 = vpop.f32.mrf.mxu1 }
 0x7e9   : > { %2636 = vmax.xlane.f32.xlu0 %v7131_v62  ;;  %v7139_v33 = vadd.f32 %v5156_v8, %v6243_v20 }
 0x7ea   : > { %v2583_v58 = vpop.f32.mrf.mxu1 }
 0x7eb   : > { %v7165_v50 = vadd.f32 %v2583_v58, %v6243_v20 }
 0x7ec   : > { %v5159_v46 = vpop.f32.mrf.mxu1 }
 0x7ed   : > { %2642 = vmax.xlane.f32.xlu0 %v7135_v63  ;;  %v7145_v52 = vadd.f32 %v5159_v46, %v6243_v20 }
 0x7ee   : > { %v2593_v17 = vpop.f32.mrf.mxu1 }
 0x7ef   : > { %v7171_v14 = vadd.f32 %v2593_v17, %v6243_v20 }
 0x7f0   : > { %2807 = vrot.lane.b32.xlu1 %v6780_v56, %s5788_s11  ;;  %v5162_v37 = vpop.f32.mrf.mxu1 }
 0x7f1   : > { %2646 = vmax.xlane.f32.xlu0 %v7139_v33  ;;  %v7149_v12 = vadd.f32 %v5162_v37, %v6243_v20 }
 0x7f2   : > { %v2603_v23 = vpop.f32.mrf.mxu1 }
 0x7f3   : > { %v7177_v26 = vadd.f32 %v2603_v23, %v6243_v20 }
 0x7f4   : > { %v5165_v30 = vpop.f32.mrf.mxu1 }
 0x7f5   : > { %2650 = vmax.xlane.f32.xlu0 %v7145_v52  ;;  %v7153_v24 = vadd.f32 %v5165_v30, %v6243_v20 }
 0x7f6   : > { %v2613_v4 = vpop.f32.mrf.mxu1 }
 0x7f8   : > { %v5168_v56 = vpop.f32.mrf.mxu1 }
 0x7f9   : > { %2654 = vmax.xlane.f32.xlu0 %v7149_v12  ;;  %v7157_v39 = vadd.f32 %v5168_v56, %v6243_v20 }
 0x7fa   : > { %v2623_v54 = vpop.f32.mrf.mxu1 }
 0x7fb   : > { %v7187_v40 = vadd.f32 %v2623_v54, %v6243_v20 }
 0x7fd   : > { %2658 = vmax.xlane.f32.xlu0 %v7153_v24 }
 0x801   : > { %2662 = vmax.xlane.f32.xlu0 %v7157_v39 }
 0x814   : > { %2640 = vmax.xlane.f32.xlu1 %v7161_v22 }
 0x817   : > { %2801 = vrot.lane.b32.xlu0 %v6798_v11, %s5788_s11  ;;  %v7183_v11 = vadd.f32 %v2613_v4, %v6243_v20 }
 0x818   : > { %2644 = vmax.xlane.f32.xlu1 %v7165_v50 }
 0x81b   : > { %2797 = vrot.lane.b32.xlu0 %v6806_v25, %s5788_s11  ;;  %v2806_v25 = vpop.permute.xlu0 %2805 }
 0x81c   : > { %2648 = vmax.xlane.f32.xlu1 %v7171_v14 }
 0x81f   : > { %2793 = vrot.lane.b32.xlu0 %v6814_v0, %s5788_s11 }
 0x820   : > { %2652 = vmax.xlane.f32.xlu1 %v7177_v26 }
 0x824   : > { %2656 = vmax.xlane.f32.xlu1 %v7183_v11 }
 0x828   : > { %2660 = vmax.xlane.f32.xlu1 %v7187_v40 }
 0x839   : > { %2803 = vrot.lane.b32.xlu1 %v6790_v59, %s5788_s11 }
 0x83d   : > { %2799 = vrot.lane.b32.xlu1 %v6800_v31, %s5788_s11 }
 0x841   : > { %2795 = vrot.lane.b32.xlu1 %v6808_v34, %s5788_s11 }
 0x868   : > { %v2635_v0 = vpop.xlane.xlu1 %2634 }
 0x869   : > { %v2665_v8 = vsub.f32 %v2559_v32, %v2635_v0 }
 0x86a   : > { %v2633_v58 = vpop.xlane.xlu0 %2632 }
 0x86b   : > { %v2682_v46 = vmul.f32 1.442695, %v2665_v8  ;;  %v2664_v17 = vsub.f32 %v2554_v10, %v2633_v58 }
 0x86c   : > { %v2808_v37 = vpop.permute.xlu1 %2807 }
 0x86d   : > { %5596 = vpow2.f32 %v2682_v46  ;;  %v2680_v23 = vmul.f32 1.442695, %v2664_v17  ;;  %5185 = vmatprep.subr.mxu0 %v2808_v37 }
 0x86e   : > { %5186 = vmatpush3.msra.mxu0 %v2808_v37  ;;  %v2639_v30 = vpop.xlane.xlu0 %2638 }
 0x86f   : > { %5598 = vpow2.f32 %v2680_v23  ;;  %v2667_v59 = vsub.f32 %v7127_v18, %v2639_v30  ;;  %5187 = vmatprep.subr.mxu0 %v2806_v25 }
 0x870   : > { %5188 = vmatpush3.msra.mxu0 %v2806_v25 }
 0x871   : > { %v2686_v31 = vmul.f32 1.442695, %v2667_v59 }
 0x872   : > { %v2637_v4 = vpop.xlane.xlu0 %2636 }
 0x873   : > { %5600 = vpow2.f32 %v2686_v31  ;;  %v2666_v34 = vsub.f32 %v7131_v62, %v2637_v4 }
 0x875   : > { %v2684_v32 = vmul.f32 1.442695, %v2666_v34 }
 0x876   : > { %v2643_v56 = vpop.xlane.xlu0 %2642 }
 0x877   : > { %5602 = vpow2.f32 %v2684_v32  ;;  %v2669_v10 = vsub.f32 %v7135_v63, %v2643_v56  ;;  %v5285_v63 = vpop.f32.mrf.mxu1 }
 0x879   : > { %v2690_v54 = vmul.f32 1.442695, %v2669_v10  ;;  %v7213_v59 = vpop.f32.mrf.mxu1 }
 0x87a   : > { %v7199_v0 = vpop.eup %5596  ;;  %v2647_v8 = vpop.xlane.xlu0 %2646 }
 0x87b   : > { %5604 = vpow2.f32 %v2690_v54  ;;  %v2671_v58 = vsub.f32 %v7139_v33, %v2647_v8  ;;  %2714 = vadd.xlane.f32.xlu0 %v7199_v0  ;;  %v5288_v32 = vpop.f32.mrf.mxu1 }
 0x87c   : > { %v7203_v18 = vpop.eup %5598  ;;  %v7249_v29 = vadd.f32 %v5288_v32, %v6243_v20 }
 0x87d   : > { %v2694_v25 = vmul.f32 1.442695, %v2671_v58  ;;  %2712 = vadd.xlane.f32.xlu1 %v7203_v18  ;;  %v7223_v8 = vpop.f32.mrf.mxu1 }
 0x87e   : > { %v2651_v62 = vpop.xlane.xlu0 %2650 }
 0x87f   : > { %5606 = vpow2.f32 %v2694_v25  ;;  %v2673_v46 = vsub.f32 %v7145_v52, %v2651_v62 }
 0x880   : > { %v7207_v17 = vpop.eup %5600 }
 0x881   : > { %v2698_v37 = vmul.f32 1.442695, %v2673_v46  ;;  %2718 = vadd.xlane.f32.xlu0 %v7207_v17 }
 0x882   : > { %v2655_v23 = vpop.xlane.xlu0 %2654 }
 0x883   : > { %5608 = vpow2.f32 %v2698_v37  ;;  %v2675_v33 = vsub.f32 %v7149_v12, %v2655_v23 }
 0x884   : > { %v7211_v30 = vpop.eup %5602 }
 0x885   : > { %v2702_v31 = vmul.f32 1.442695, %v2675_v33  ;;  %2716 = vadd.xlane.f32.xlu1 %v7211_v30 }
 0x886   : > { %v2659_v4 = vpop.xlane.xlu0 %2658 }
 0x887   : > { %5610 = vpow2.f32 %v2702_v31  ;;  %v2677_v52 = vsub.f32 %v7153_v24, %v2659_v4  ;;  %v5291_v24 = vpop.f32.mrf.mxu1 }
 0x888   : > { %v7217_v34 = vpop.eup %5604 }
 0x889   : > { %v2706_v56 = vmul.f32 1.442695, %v2677_v52  ;;  %2722 = vadd.xlane.f32.xlu0 %v7217_v34  ;;  %v7231_v46 = vpop.f32.mrf.mxu1  ;;  %v7244_v52 = vadd.f32 %v5285_v63, %v6243_v20  ;;  %v7256_v63 = vadd.f32 %v5291_v24, %v6243_v20 }
 0x88a   : > { %v2663_v10 = vpop.xlane.xlu0 %2662 }
 0x88b   : > { %5612 = vpow2.f32 %v2706_v56  ;;  %v2679_v12 = vsub.f32 %v7157_v39, %v2663_v10  ;;  %v5294_v37 = vpop.f32.mrf.mxu1 }
 0x88c   : > { %v7221_v54 = vpop.eup %5606  ;;  %v7261_v32 = vadd.f32 %v5294_v37, %v6243_v20 }
 0x88d   : > { %v2710_v58 = vmul.f32 1.442695, %v2679_v12  ;;  %2726 = vadd.xlane.f32.xlu0 %v7221_v54  ;;  %v7239_v33 = vpop.f32.mrf.mxu1 }
 0x88f   : > { %5614 = vpow2.f32 %v2710_v58  ;;  %v5297_v56 = vpop.f32.mrf.mxu1 }
 0x890   : > { %v7226_v25 = vpop.eup %5608  ;;  %v7270_v24 = vadd.f32 %v5297_v56, %v6243_v20 }
 0x891   : > { %2730 = vadd.xlane.f32.xlu0 %v7226_v25  ;;  %v7251_v15 = vpop.f32.mrf.mxu1 }
 0x894   : > { %v7229_v62 = vpop.eup %5610 }
 0x895   : > { %2734 = vadd.xlane.f32.xlu0 %v7229_v62 }
 0x898   : > { %v7234_v39 = vpop.eup %5612 }
 0x899   : > { %2738 = vadd.xlane.f32.xlu0 %v7234_v39 }
 0x89c   : > { %v7237_v23 = vpop.eup %5614 }
 0x89d   : > { %v2641_v31 = vpop.xlane.xlu1 %2640  ;;  %2742 = vadd.xlane.f32.xlu0 %v7237_v23 }
 0x89e   : > { %v2668_v4 = vsub.f32 %v7161_v22, %v2641_v31  ;;  %v5300_v31 = vpop.f32.mrf.mxu1 }
 0x8a0   : > { %v2688_v10 = vmul.f32 1.442695, %v2668_v4 }
 0x8a1   : > { %v2645_v12 = vpop.xlane.xlu1 %2644  ;;  %3472 = vmax.xlane.f32.xlu0 %v7244_v52 }
 0x8a2   : > { %5616 = vpow2.f32 %v2688_v10  ;;  %v2670_v58 = vsub.f32 %v7165_v50, %v2645_v12  ;;  %v7263_v12 = vpop.f32.mrf.mxu1 }
 0x8a4   : > { %v2692_v36 = vmul.f32 1.442695, %v2670_v58 }
 0x8a5   : > { %v2649_v19 = vpop.xlane.xlu1 %2648  ;;  %3476 = vmax.xlane.f32.xlu0 %v7249_v29 }
 0x8a6   : > { %5618 = vpow2.f32 %v2692_v36  ;;  %v2672_v22 = vsub.f32 %v7171_v14, %v2649_v19 }
 0x8a8   : > { %v2696_v4 = vmul.f32 1.442695, %v2672_v22  ;;  %v5303_v22 = vpop.f32.mrf.mxu1 }
 0x8a9   : > { %v2653_v10 = vpop.xlane.xlu1 %2652  ;;  %3480 = vmax.xlane.f32.xlu0 %v7256_v63 }
 0x8aa   : > { %5620 = vpow2.f32 %v2696_v4  ;;  %v2674_v50 = vsub.f32 %v7177_v26, %v2653_v10 }
 0x8ac   : > { %v2700_v58 = vmul.f32 1.442695, %v2674_v50  ;;  %v7278_v50 = vadd.f32 %v5300_v31, %v6243_v20 }
 0x8ad   : > { %v2657_v36 = vpop.xlane.xlu1 %2656  ;;  %3484 = vmax.xlane.f32.xlu0 %v7261_v32 }
 0x8ae   : > { %5622 = vpow2.f32 %v2700_v58  ;;  %v2676_v19 = vsub.f32 %v7183_v11, %v2657_v36  ;;  %v2802_v11 = vpop.permute.xlu0 %2801  ;;  %v3451_v58 = vpop.f32.mrf.mxu1 }
 0x8af   : > { %v7267_v14 = vpop.eup %5616 }
 0x8b0   : > { %v2704_v4 = vmul.f32 1.442695, %v2676_v19  ;;  %2720 = vadd.xlane.f32.xlu1 %v7267_v14 }
 0x8b1   : > { %v2661_v26 = vpop.xlane.xlu1 %2660  ;;  %3488 = vmax.xlane.f32.xlu0 %v7270_v24 }
 0x8b2   : > { %5624 = vpow2.f32 %v2704_v4  ;;  %v2678_v37 = vsub.f32 %v7187_v40, %v2661_v26  ;;  %v7285_v4 = vadd.f32 %v5303_v22, %v6243_v20  ;;  %v5306_v40 = vpop.f32.mrf.mxu1  ;;  %v2798_v31 = vpop.permute.xlu0 %2797 }
 0x8b3   : > { %v7275_v10 = vpop.eup %5618 }
 0x8b4   : > { %v2708_v36 = vmul.f32 1.442695, %v2678_v37  ;;  %2724 = vadd.xlane.f32.xlu1 %v7275_v10 }
 0x8b5   : > { %v2804_v56 = vpop.permute.xlu1 %2803  ;;  %3492 = vmax.xlane.f32.xlu0 %v7278_v50 }
 0x8b6   : > { %5626 = vpow2.f32 %v2708_v36  ;;  %5189 = vmatprep.subr.mxu0 %v2804_v56  ;;  %v7292_v36 = vadd.f32 %v5306_v40, %v6243_v20  ;;  %v2794_v3 = vpop.permute.xlu0 %2793  ;;  %v7304_v40 = vadd.f32 %v7213_v59, %v6243_v20  ;;  %v7326_v59 = vadd.f32 %v7251_v15, %v6243_v20 }
 0x8b7   : > { %v7282_v19 = vpop.eup %5620  ;;  %5190 = vmatpush3.msra.mxu0 %v2804_v56 }
 0x8b8   : > { %2728 = vadd.xlane.f32.xlu1 %v7282_v19  ;;  %5191 = vmatprep.subr.mxu0 %v2802_v11 }
 0x8b9   : > { %v2800_v26 = vpop.permute.xlu1 %2799  ;;  %3496 = vmax.xlane.f32.xlu0 %v7285_v4  ;;  %5192 = vmatpush3.msra.mxu0 %v2802_v11 }
 0x8ba   : > { %5193 = vmatprep.subr.mxu0 %v2800_v26 }
 0x8bb   : > { %v7289_v37 = vpop.eup %5622  ;;  %5194 = vmatpush3.msra.mxu0 %v2800_v26  ;;  %v7314_v26 = vadd.f32 %v7231_v46, %v6243_v20  ;;  %v3461_v46 = vpop.f32.mrf.mxu1 }
 0x8bc   : > { %2732 = vadd.xlane.f32.xlu1 %v7289_v37  ;;  %5195 = vmatprep.subr.mxu0 %v2798_v31 }
 0x8bd   : > { %v2796_v22 = vpop.permute.xlu1 %2795  ;;  %3500 = vmax.xlane.f32.xlu0 %v7292_v36  ;;  %5196 = vmatpush3.msra.mxu0 %v2798_v31  ;;  %v7309_v31 = vadd.f32 %v7223_v8, %v6243_v20  ;;  %v7333_v8 = vadd.f32 %v7263_v12, %v6243_v20 }
 0x8be   : > { %5197 = vmatprep.subr.mxu0 %v2796_v22 }
 0x8bf   : > { %v7296_v56 = vpop.eup %5624  ;;  %5198 = vmatpush3.msra.mxu0 %v2796_v22 }
 0x8c0   : > { %2736 = vadd.xlane.f32.xlu1 %v7296_v56  ;;  %5199 = vmatprep.subr.mxu0 %v2794_v3 }
 0x8c1   : > { %5200 = vmatpush3.msra.mxu0 %v2794_v3  ;;  %v7319_v3 = vadd.f32 %v7239_v33, %v6243_v20 }
 0x8c3   : > { %v7299_v11 = vpop.eup %5626 }
 0x8c4   : > { %2740 = vadd.xlane.f32.xlu1 %v7299_v11 }
 0x8c8   : > { %3470 = vmax.xlane.f32.xlu1 %v7304_v40 }
 0x8cc   : > { %3474 = vmax.xlane.f32.xlu1 %v7309_v31 }
 0x8d0   : > { %3478 = vmax.xlane.f32.xlu1 %v7314_v26 }
 0x8d3   : > { %3659 = vrot.lane.b32.xlu0 %v6870_v2, %s5788_s11  ;;  %v7339_v2 = vadd.f32 %v3451_v58, %v6243_v20 }
 0x8d4   : > { %3482 = vmax.xlane.f32.xlu1 %v7319_v3 }
 0x8d7   : > { %3655 = vrot.lane.b32.xlu0 %v6882_v28, %s5788_s11  ;;  %v7345_v28 = vadd.f32 %v3461_v46, %v6243_v20 }
 0x8d8   : > { %3486 = vmax.xlane.f32.xlu1 %v7326_v59 }
 0x8db   : > { %3651 = vrot.lane.b32.xlu0 %v6894_v1, %s5788_s11  ;;  %v4370_v1 = vld [vmem:[%s7916_s3 + $0x10] sm:$0xff] }
 0x8dc   : > { %3490 = vmax.xlane.f32.xlu1 %v7333_v8  ;;  %5225 = vmatprep.subr.mxu0 %v4370_v1 }
 0x8df   : > { %3647 = vrot.lane.b32.xlu0 %v6906_v35, %s5788_s11 }
 0x8e0   : > { %3494 = vmax.xlane.f32.xlu1 %v7339_v2 }
 0x8e3   : > { %3643 = vrot.lane.b32.xlu0 %v6919_v61, %s5788_s11 }
 0x8e4   : > { %3498 = vmax.xlane.f32.xlu1 %v7345_v28 }
 0x8e7   : > { %3639 = vrot.lane.b32.xlu0 %v6935_v45, %s5788_s11 }
 0x8eb   : > { %3635 = vrot.lane.b32.xlu0 %v6948_v53, %s5788_s11 }
 0x8ef   : > { %3631 = vrot.lane.b32.xlu0 %v6962_v6, %s5788_s11 }
 0x8f5   : > { %3661 = vrot.lane.b32.xlu1 %v6864_v27, %s5788_s11 }
 0x8f9   : > { %3657 = vrot.lane.b32.xlu1 %v6876_v44, %s5788_s11 }
 0x8fd   : > { %3653 = vrot.lane.b32.xlu1 %v6888_v43, %s5788_s11 }
 0x901   : > { %3649 = vrot.lane.b32.xlu1 %v6900_v21, %s5788_s11 }
 0x904   : > { %v2715_v20 = vpop.xlane.xlu0 %2714 }
 0x905   : > { %5628 = vrcp.f32 %v2715_v20  ;;  %3645 = vrot.lane.b32.xlu1 %v6912_v16, %s5788_s11 }
 0x906   : > { %v2713_v35 = vpop.xlane.xlu1 %2712 }
 0x907   : > { %5630 = vrcp.f32 %v2713_v35 }
 0x909   : > { %3641 = vrot.lane.b32.xlu1 %v6926_v55, %s5788_s11 }
 0x90a   : > { %v2719_v27 = vpop.xlane.xlu0 %2718 }
 0x90b   : > { %5632 = vrcp.f32 %v2719_v27 }
 0x90d   : > { %3637 = vrot.lane.b32.xlu1 %v6942_v47, %s5788_s11 }
 0x90e   : > { %v2717_v44 = vpop.xlane.xlu1 %2716 }
 0x90f   : > { %5634 = vrcp.f32 %v2717_v44 }
 0x911   : > { %3633 = vrot.lane.b32.xlu1 %v6953_v42, %s5788_s11 }
 0x912   : > { %v5629_v43 = vpop.eup %5628  ;;  %v2723_v21 = vpop.xlane.xlu0 %2722 }
 0x913   : > { %5636 = vrcp.f32 %v2723_v21  ;;  %v2761_v16 = vmul.f32 %v5629_v43, %v7199_v0 }
 0x914   : > { %v5631_v61 = vpop.eup %5630 }
 0x915   : > { %v2760_v55 = vmul.f32 %v5631_v61, %v7203_v18  ;;  %4355 = vst [vmem:[%s6428_s14 + $0x108] sm:$0xff] %v2761_v16 }
 0x916   : > { %v2727_v45 = vpop.xlane.xlu0 %2726 }
 0x917   : > { %5638 = vrcp.f32 %v2727_v45  ;;  %4354 = vst [vmem:[%s6428_s14 + $0x100] sm:$0xff] %v2760_v55  ;;  %5201 = vmatprep.mubr.f32.mxu0 %v2760_v55 }
 0x918   : > { %v5633_v47 = vpop.eup %5632  ;;  %5202 = vmatmul.mubr.f32.vlgmr.msra.gmra.mxu0 %v2761_v16 }
 0x919   : > { %v2763_v53 = vmul.f32 %v5633_v47, %v7207_v17  ;;  %5226 = vmatpush3.msra.mxu0 %v4370_v1 }
 0x91a   : > { %v2731_v42 = vpop.xlane.xlu0 %2730 }
 0x91b   : > { %5640 = vrcp.f32 %v2731_v42  ;;  %4357 = vst [vmem:[%s6428_s14 + $0x118] sm:$0xff] %v2763_v53 }
 0x91c   : > { %v5635_v6 = vpop.eup %5634 }
 0x91d   : > { %v2762_v15 = vmul.f32 %v5635_v6, %v7211_v30 }
 0x91e   : > { %v2735_v0 = vpop.xlane.xlu0 %2734 }
 0x91f   : > { %5642 = vrcp.f32 %v2735_v0  ;;  %4356 = vst [vmem:[%s6428_s14 + $0x110] sm:$0xff] %v2762_v15  ;;  %5204 = vmatprep.mubr.f32.mxu0 %v2762_v15 }
 0x920   : > { %v5637_v18 = vpop.eup %5636  ;;  %5205 = vmatmul.mubr.f32.gmra.mxu0 %v2763_v53 }
 0x921   : > { %v7384_v33 = vmul.f32 %v5637_v18, %v7217_v34 }
 0x922   : > { %v2739_v17 = vpop.xlane.xlu0 %2738 }
 0x923   : > { %5644 = vrcp.f32 %v2739_v17  ;;  %4359 = vst [vmem:[%s6428_s14 + $0x128] sm:$0xff] %v7384_v33 }
 0x924   : > { %v5639_v12 = vpop.eup %5638 }
 0x925   : > { %v7389_v58 = vmul.f32 %v5639_v12, %v7221_v54 }
 0x926   : > { %v2743_v30 = vpop.xlane.xlu0 %2742 }
 0x927   : > { %5646 = vrcp.f32 %v2743_v30  ;;  %4361 = vst [vmem:[%s6428_s14 + $0x138] sm:$0xff] %v7389_v58 }
 0x928   : > { %v5641_v22 = vpop.eup %5640 }
 0x929   : > { %v7394_v46 = vmul.f32 %v5641_v22, %v7226_v25 }
 0x92a   : > { %v3473_v1 = vpop.xlane.xlu0 %3472 }
 0x92b   : > { %v3503_v34 = vsub.f32 %v7244_v52, %v3473_v1  ;;  %4363 = vst [vmem:[%s6428_s14 + $0x148] sm:$0xff] %v7394_v46 }
 0x92c   : > { %v5643_v20 = vpop.eup %5642 }
 0x92d   : > { %v3520_v35 = vmul.f32 1.442695, %v3503_v34  ;;  %v7400_v27 = vmul.f32 %v5643_v20, %v7229_v62 }
 0x92e   : > { %v3477_v54 = vpop.xlane.xlu0 %3476 }
 0x92f   : > { %5648 = vpow2.f32 %v3520_v35  ;;  %v3505_v44 = vsub.f32 %v7249_v29, %v3477_v54  ;;  %4365 = vst [vmem:[%s6428_s14 + $0x158] sm:$0xff] %v7400_v27 }
 0x930   : > { %v5645_v25 = vpop.eup %5644 }
 0x931   : > { %v3524_v43 = vmul.f32 1.442695, %v3505_v44  ;;  %v7406_v21 = vmul.f32 %v5645_v25, %v7234_v39 }
 0x932   : > { %v3481_v52 = vpop.xlane.xlu0 %3480 }
 0x933   : > { %5650 = vpow2.f32 %v3524_v43  ;;  %v3507_v16 = vsub.f32 %v7256_v63, %v3481_v52  ;;  %4367 = vst [vmem:[%s6428_s14 + $0x168] sm:$0xff] %v7406_v21 }
 0x934   : > { %v5647_v62 = vpop.eup %5646 }
 0x935   : > { %v3528_v61 = vmul.f32 1.442695, %v3507_v16  ;;  %v7412_v55 = vmul.f32 %v5647_v62, %v7237_v23 }
 0x936   : > { %v3485_v45 = vpop.xlane.xlu0 %3484 }
 0x937   : > { %5652 = vpow2.f32 %v3528_v61  ;;  %v3509_v29 = vsub.f32 %v7261_v32, %v3485_v45  ;;  %4369 = vst [vmem:[%s6428_s14 + $0x178] sm:$0xff] %v7412_v55 }
 0x939   : > { %v3532_v47 = vmul.f32 1.442695, %v3509_v29  ;;  %v2721_v39 = vpop.xlane.xlu1 %2720 }
 0x93a   : > { %5654 = vrcp.f32 %v2721_v39  ;;  %v3489_v53 = vpop.xlane.xlu0 %3488 }
 0x93b   : > { %5656 = vpow2.f32 %v3532_v47  ;;  %v3511_v63 = vsub.f32 %v7270_v24, %v3489_v53 }
 0x93c   : > { %v7418_v42 = vpop.eup %5648 }
 0x93d   : > { %v3536_v6 = vmul.f32 1.442695, %v3511_v63  ;;  %v2725_v15 = vpop.xlane.xlu1 %2724  ;;  %3552 = vadd.xlane.f32.xlu0 %v7418_v42 }
 0x93e   : > { %5658 = vrcp.f32 %v2725_v15  ;;  %v3493_v23 = vpop.xlane.xlu0 %3492 }
 0x93f   : > { %5660 = vpow2.f32 %v3536_v6  ;;  %v3513_v32 = vsub.f32 %v7278_v50, %v3493_v23 }
 0x940   : > { %v7422_v0 = vpop.eup %5650 }
 0x941   : > { %v3540_v18 = vmul.f32 1.442695, %v3513_v32  ;;  %v2729_v17 = vpop.xlane.xlu1 %2728  ;;  %3556 = vadd.xlane.f32.xlu0 %v7422_v0 }
 0x942   : > { %5662 = vrcp.f32 %v2729_v17  ;;  %v3497_v12 = vpop.xlane.xlu0 %3496 }
 0x943   : > { %5664 = vpow2.f32 %v3540_v18  ;;  %v3515_v24 = vsub.f32 %v7285_v4, %v3497_v12 }
 0x944   : > { %v7426_v30 = vpop.eup %5652 }
 0x945   : > { %v3544_v22 = vmul.f32 1.442695, %v3515_v24  ;;  %v2733_v1 = vpop.xlane.xlu1 %2732  ;;  %3560 = vadd.xlane.f32.xlu0 %v7426_v30 }
 0x946   : > { %5666 = vrcp.f32 %v2733_v1  ;;  %v3501_v50 = vpop.xlane.xlu0 %3500 }
 0x947   : > { %v5655_v34 = vpop.eup %5654  ;;  %5668 = vpow2.f32 %v3544_v22  ;;  %v3517_v20 = vsub.f32 %v7292_v36, %v3501_v50 }
 0x948   : > { %v7430_v35 = vpop.eup %5656  ;;  %v2764_v54 = vmul.f32 %v5655_v34, %v7267_v14 }
 0x949   : > { %v3548_v44 = vmul.f32 1.442695, %v3517_v20  ;;  %v2737_v4 = vpop.xlane.xlu1 %2736  ;;  %3564 = vadd.xlane.f32.xlu0 %v7430_v35 }
 0x94a   : > { %5670 = vrcp.f32 %v2737_v4  ;;  %4358 = vst [vmem:[%s6428_s14 + $0x120] sm:$0xff] %v2764_v54  ;;  %5207 = vmatprep.mubr.f32.mxu0 %v2764_v54 }
 0x94b   : > { %v5659_v25 = vpop.eup %5658  ;;  %5672 = vpow2.f32 %v3548_v44  ;;  %5208 = vmatmul.mubr.f32.gmra.mxu0 %v7384_v33 }
 0x94c   : > { %v7436_v43 = vpop.eup %5660  ;;  %v2766_v36 = vmul.f32 %v5659_v25, %v7275_v10 }
 0x94d   : > { %v2741_v52 = vpop.xlane.xlu1 %2740  ;;  %3568 = vadd.xlane.f32.xlu0 %v7436_v43 }
 0x94e   : > { %5674 = vrcp.f32 %v2741_v52  ;;  %4360 = vst [vmem:[%s6428_s14 + $0x130] sm:$0xff] %v2766_v36  ;;  %5210 = vmatprep.mubr.f32.mxu0 %v2766_v36 }
 0x94f   : > { %v5663_v14 = vpop.eup %5662  ;;  %5211 = vmatmul.mubr.f32.gmra.mxu0 %v7389_v58 }
 0x950   : > { %v7442_v16 = vpop.eup %5664  ;;  %v2768_v62 = vmul.f32 %v5663_v14, %v7282_v19 }
 0x951   : > { %v3471_v61 = vpop.xlane.xlu1 %3470  ;;  %3572 = vadd.xlane.f32.xlu0 %v7442_v16 }
 0x952   : > { %v3502_v33 = vsub.f32 %v7304_v40, %v3471_v61  ;;  %4362 = vst [vmem:[%s6428_s14 + $0x140] sm:$0xff] %v2768_v62  ;;  %5213 = vmatprep.mubr.f32.mxu0 %v2768_v62 }
 0x953   : > { %v5667_v10 = vpop.eup %5666  ;;  %5214 = vmatmul.mubr.f32.gmra.mxu0 %v7394_v46 }
 0x954   : > { %v7449_v45 = vpop.eup %5668  ;;  %v3518_v29 = vmul.f32 1.442695, %v3502_v33  ;;  %v2770_v58 = vmul.f32 %v5667_v10, %v7289_v37 }
 0x955   : > { %v3475_v47 = vpop.xlane.xlu1 %3474  ;;  %3576 = vadd.xlane.f32.xlu0 %v7449_v45 }
 0x956   : > { %5676 = vpow2.f32 %v3518_v29  ;;  %v3504_v19 = vsub.f32 %v7309_v31, %v3475_v47  ;;  %4364 = vst [vmem:[%s6428_s14 + $0x150] sm:$0xff] %v2770_v58  ;;  %5216 = vmatprep.mubr.f32.mxu0 %v2770_v58 }
 0x957   : > { %v5671_v40 = vpop.eup %5670  ;;  %5217 = vmatmul.mubr.f32.gmra.mxu0 %v7400_v27 }
 0x958   : > { %v7456_v39 = vpop.eup %5672  ;;  %v3522_v46 = vmul.f32 1.442695, %v3504_v19  ;;  %v2772_v53 = vmul.f32 %v5671_v40, %v7296_v56 }
 0x959   : > { %v3479_v63 = vpop.xlane.xlu1 %3478  ;;  %3580 = vadd.xlane.f32.xlu0 %v7456_v39 }
 0x95a   : > { %5678 = vpow2.f32 %v3522_v46  ;;  %v3506_v37 = vsub.f32 %v7314_v26, %v3479_v63  ;;  %4366 = vst [vmem:[%s6428_s14 + $0x160] sm:$0xff] %v2772_v53  ;;  %5219 = vmatprep.mubr.f32.mxu0 %v2772_v53  ;;  %v7560_v53 = vpop.f32.mrf.mxu0 }
 0x95b   : > { %v5675_v31 = vpop.eup %5674  ;;  %5220 = vmatmul.mubr.f32.gmra.mxu0 %v7406_v21  ;;  %v7471_v21 = vpop.permute.xlu0 %3659 }
 0x95c   : > { %v3526_v6 = vmul.f32 1.442695, %v3506_v37  ;;  %v2774_v27 = vmul.f32 %v5675_v31, %v7299_v11  ;;  %v7562_v63 = vpop.f32.mrf.mxu0 }
 0x95d   : > { %v3483_v15 = vpop.xlane.xlu1 %3482 }
 0x95e   : > { %5680 = vpow2.f32 %v3526_v6  ;;  %v3508_v23 = vsub.f32 %v7319_v3, %v3483_v15  ;;  %4368 = vst [vmem:[%s6428_s14 + $0x170] sm:$0xff] %v2774_v27  ;;  %5222 = vmatprep.mubr.f32.mxu0 %v2774_v27  ;;  %v7564_v37 = vpop.f32.mrf.mxu0 }
 0x95f   : > { %5223 = vmatmul.mubr.f32.gmra.mxu0 %v7412_v55  ;;  %v7480_v1 = vpop.permute.xlu0 %3655 }
 0x960   : > { %v3530_v56 = vmul.f32 1.442695, %v3508_v23  ;;  %v7566_v31 = vpop.f32.mrf.mxu0 }
 0x961   : > { %v3487_v32 = vpop.xlane.xlu1 %3486 }
 0x962   : > { %5682 = vpow2.f32 %v3530_v56  ;;  %v3510_v26 = vsub.f32 %v7326_v59, %v3487_v32  ;;  %v7568_v6 = vpop.f32.mrf.mxu0 }
 0x963   : > { %v7468_v18 = vpop.eup %5676  ;;  %v7487_v44 = vpop.permute.xlu0 %3651 }
 0x964   : > { %v3534_v17 = vmul.f32 1.442695, %v3510_v26  ;;  %3550 = vadd.xlane.f32.xlu1 %v7468_v18  ;;  %v7570_v27 = vpop.f32.mrf.mxu0 }
 0x965   : > { %v3491_v11 = vpop.xlane.xlu1 %3490 }
 0x966   : > { %5684 = vpow2.f32 %v3534_v17  ;;  %v3512_v3 = vsub.f32 %v7333_v8, %v3491_v11  ;;  %v7572_v15 = vpop.f32.mrf.mxu0 }
 0x967   : > { %v7474_v12 = vpop.eup %5678  ;;  %v7504_v36 = vpop.permute.xlu0 %3647 }
 0x968   : > { %v3538_v24 = vmul.f32 1.442695, %v3512_v3  ;;  %3554 = vadd.xlane.f32.xlu1 %v7474_v12  ;;  %v7574_v23 = vpop.f32.mrf.mxu0 }
 0x969   : > { %v3495_v55 = vpop.xlane.xlu1 %3494 }
 0x96a   : > { %5686 = vpow2.f32 %v3538_v24  ;;  %v3514_v59 = vsub.f32 %v7339_v2, %v3495_v55  ;;  %v7576_v56 = vpop.f32.mrf.mxu0 }
 0x96b   : > { %v7478_v22 = vpop.eup %5680  ;;  %v7518_v62 = vpop.permute.xlu0 %3643 }
 0x96c   : > { %v3542_v50 = vmul.f32 1.442695, %v3514_v59  ;;  %3558 = vadd.xlane.f32.xlu1 %v7478_v22  ;;  %v7578_v32 = vpop.f32.mrf.mxu0 }
 0x96d   : > { %v3499_v34 = vpop.xlane.xlu1 %3498 }
 0x96e   : > { %5688 = vpow2.f32 %v3542_v50  ;;  %v3516_v8 = vsub.f32 %v7345_v28, %v3499_v34  ;;  %v7580_v26 = vpop.f32.mrf.mxu0 }
 0x96f   : > { %v7484_v20 = vpop.eup %5682  ;;  %v7533_v29 = vpop.permute.xlu0 %3639 }
 0x970   : > { %v3546_v54 = vmul.f32 1.442695, %v3516_v8  ;;  %3562 = vadd.xlane.f32.xlu1 %v7484_v20  ;;  %v7582_v17 = vpop.f32.mrf.mxu0 }
 0x971   : > { %v7489_v4 = vpop.permute.xlu1 %3661  ;;  %7971 = vst [vmem:[#allocation11_spill] sm:$0xff] %v7582_v17 }
 0x972   : > { %5690 = vpow2.f32 %v3546_v54  ;;  %5307 = vmatprep.subr.mxu0 %v7489_v4  ;;  %5389 = vmatprep.subr.mxu1 %v7489_v4  ;;  %v7584_v3 = vpop.f32.mrf.mxu0 }
 0x973   : > { %v7493_v2 = vpop.eup %5684  ;;  %5405 = vmatpush3.msra.mxu1 %v7489_v4  ;;  %v7543_v47 = vpop.permute.xlu0 %3635  ;;  %7972 = vst [vmem:[#allocation10_spill] sm:$0xff] %v7584_v3 }
 0x974   : > { %3566 = vadd.xlane.f32.xlu1 %v7493_v2  ;;  %5390 = vmatprep.subr.mxu1 %v7471_v21  ;;  %v7586_v55 = vpop.f32.mrf.mxu0 }
 0x975   : > { %v7498_v28 = vpop.permute.xlu1 %3657  ;;  %5406 = vmatpush3.msra.mxu1 %v7471_v21  ;;  %7973 = vst [vmem:[#allocation9_spill] sm:$0xff] %v7586_v55 }
 0x976   : > { %5391 = vmatprep.subr.mxu1 %v7498_v28  ;;  %v7588_v50 = vpop.f32.mrf.mxu0 }
 0x977   : > { %v7502_v25 = vpop.eup %5686  ;;  %5407 = vmatpush3.msra.mxu1 %v7498_v28  ;;  %v7555_v46 = vpop.permute.xlu0 %3631  ;;  %7974 = vst [vmem:[#allocation8_spill] sm:$0xff] %v7588_v50 }
 0x978   : > { %3570 = vadd.xlane.f32.xlu1 %v7502_v25  ;;  %5392 = vmatprep.subr.mxu1 %v7480_v1  ;;  %v7593_v17 = vpop.f32.mrf.mxu0 }
 0x979   : > { %v7509_v52 = vpop.permute.xlu1 %3653  ;;  %5408 = vmatpush3.msra.mxu1 %v7480_v1 }
 0x97a   : > { %5393 = vmatprep.subr.mxu1 %v7509_v52 }
 0x97b   : > { %v7513_v14 = vpop.eup %5688  ;;  %5409 = vmatpush3.msra.mxu1 %v7509_v52 }
 0x97c   : > { %3574 = vadd.xlane.f32.xlu1 %v7513_v14  ;;  %5394 = vmatprep.subr.mxu1 %v7487_v44 }
 0x97d   : > { %v7520_v61 = vpop.permute.xlu1 %3649  ;;  %5410 = vmatpush3.msra.mxu1 %v7487_v44 }
 0x97e   : > { %5395 = vmatprep.subr.mxu1 %v7520_v61 }
 0x97f   : > { %v7524_v33 = vpop.eup %5690  ;;  %5411 = vmatpush3.msra.mxu1 %v7520_v61 }
 0x980   : > { %3578 = vadd.xlane.f32.xlu1 %v7524_v33  ;;  %5396 = vmatprep.subr.mxu1 %v7504_v36 }
 0x981   : > { %v7529_v10 = vpop.permute.xlu1 %3645  ;;  %5412 = vmatpush3.msra.mxu1 %v7504_v36 }
 0x982   : > { %5397 = vmatprep.subr.mxu1 %v7529_v10 }
 0x983   : > { %5413 = vmatpush3.msra.mxu1 %v7529_v10 }
 0x984   : > { %5398 = vmatprep.subr.mxu1 %v7518_v62 }
 0x985   : > { %v7537_v58 = vpop.permute.xlu1 %3641  ;;  %5414 = vmatpush3.msra.mxu1 %v7518_v62 }
 0x986   : > { %5399 = vmatprep.subr.mxu1 %v7537_v58 }
 0x987   : > { %5415 = vmatpush3.msra.mxu1 %v7537_v58 }
 0x988   : > { %5400 = vmatprep.subr.mxu1 %v7533_v29 }
 0x989   : > { %v7545_v19 = vpop.permute.xlu1 %3637  ;;  %5416 = vmatpush3.msra.mxu1 %v7533_v29 }
 0x98a   : > { %5401 = vmatprep.subr.mxu1 %v7545_v19 }
 0x98b   : > { %5417 = vmatpush3.msra.mxu1 %v7545_v19 }
 0x98c   : > { %5402 = vmatprep.subr.mxu1 %v7543_v47 }
 0x98d   : > { %v7551_v40 = vpop.permute.xlu1 %3633  ;;  %5418 = vmatpush3.msra.mxu1 %v7543_v47 }
 0x98e   : > { %5403 = vmatprep.subr.mxu1 %v7551_v40 }
 0x98f   : > { %5419 = vmatpush3.msra.mxu1 %v7551_v40 }
 0x990   : > { %5404 = vmatprep.subr.mxu1 %v7555_v46 }
 0x991   : > { %5420 = vmatpush3.msra.mxu1 %v7555_v46 }
 0x9c6   : > { %v3553_v11 = vpop.xlane.xlu0 %3552 }
 0x9c7   : > { %5692 = vrcp.f32 %v3553_v11 }
 0x9ca   : > { %v3557_v24 = vpop.xlane.xlu0 %3556 }
 0x9cb   : > { %5694 = vrcp.f32 %v3557_v24 }
 0x9ce   : > { %v3561_v59 = vpop.xlane.xlu0 %3560 }
 0x9cf   : > { %5696 = vrcp.f32 %v3561_v59 }
 0x9d2   : > { %v3565_v34 = vpop.xlane.xlu0 %3564 }
 0x9d3   : > { %5698 = vrcp.f32 %v3565_v34 }
 0x9d4   : > { %v5693_v8 = vpop.eup %5692 }
 0x9d5   : > { %v7591_v54 = vmul.f32 %v5693_v8, %v7418_v42 }
 0x9d6   : > { %v3569_v11 = vpop.xlane.xlu0 %3568 }
 0x9d7   : > { %5700 = vrcp.f32 %v3569_v11  ;;  %4420 = vst [vmem:[%s6428_s14 + $0x188] sm:$0xff] %v7591_v54 }
 0x9d8   : > { %v5695_v24 = vpop.eup %5694  ;;  %v5203_v55 = vpop.f32.mrf.mxu0 }
 0x9d9   : > { %v7598_v59 = vmul.f32 %v5695_v24, %v7422_v0 }
 0x9da   : > { %v2907_v50 = vpop.f32.mrf.mxu0  ;;  %v3573_v3 = vpop.xlane.xlu0 %3572 }
 0x9db   : > { %5702 = vrcp.f32 %v3573_v3  ;;  %5227 = vmatprep.mubr.msk.f32.mxu0 %vm780_vm2, %v2907_v50  ;;  %4422 = vst [vmem:[%s6428_s14 + $0x198] sm:$0xff] %v7598_v59 }
 0x9dc   : > { %v5697_v42 = vpop.eup %5696  ;;  %5228 = vmatmul.mubr.msk.f32.vlgmr.msra.gmra.mxu0 %vm780_vm2, %v5203_v55 }
 0x9dd   : > { %5308 = vmatpush3.msra.mxu0 %v7489_v4  ;;  %v7606_v34 = vmul.f32 %v5697_v42, %v7426_v30 }
 0x9de   : > { %5309 = vmatprep.subr.mxu0 %v7471_v21  ;;  %v3577_v0 = vpop.xlane.xlu0 %3576 }
 0x9df   : > { %5310 = vmatpush3.msra.mxu0 %v7471_v21  ;;  %5704 = vrcp.f32 %v3577_v0  ;;  %4424 = vst [vmem:[%s6428_s14 + $0x1a8] sm:$0xff] %v7606_v34 }
 0x9e0   : > { %v5699_v3 = vpop.eup %5698  ;;  %5311 = vmatprep.subr.mxu0 %v7498_v28  ;;  %v5206_v50 = vpop.f32.mrf.mxu0 }
 0x9e1   : > { %5312 = vmatpush3.msra.mxu0 %v7498_v28  ;;  %v7615_v4 = vmul.f32 %v5699_v3, %v7430_v35 }
 0x9e2   : > { %5313 = vmatprep.subr.mxu0 %v7480_v1  ;;  %v2917_v30 = vpop.f32.mrf.mxu0  ;;  %v3581_v55 = vpop.xlane.xlu0 %3580 }
 0x9e3   : > { %5314 = vmatpush3.msra.mxu0 %v7480_v1  ;;  %5706 = vrcp.f32 %v3581_v55  ;;  %5230 = vmatprep.mubr.msk.f32.mxu0 %vm780_vm2, %v2917_v30  ;;  %4426 = vst [vmem:[%s6428_s14 + $0x1b8] sm:$0xff] %v7615_v4 }
 0x9e4   : > { %v5701_v21 = vpop.eup %5700  ;;  %5315 = vmatprep.subr.mxu0 %v7509_v52  ;;  %5231 = vmatmul.mubr.msk.f32.gmra.mxu0 %vm780_vm2, %v5206_v50 }
 0x9e5   : > { %5316 = vmatpush3.msra.mxu0 %v7509_v52  ;;  %v7626_v35 = vmul.f32 %v5701_v21, %v7436_v43 }
 0x9e6   : > { %5317 = vmatprep.subr.mxu0 %v7487_v44 }
 0x9e7   : > { %5318 = vmatpush3.msra.mxu0 %v7487_v44  ;;  %4428 = vst [vmem:[%s6428_s14 + $0x1c8] sm:$0xff] %v7626_v35 }
 0x9e8   : > { %v5703_v1 = vpop.eup %5702  ;;  %5319 = vmatprep.subr.mxu0 %v7520_v61 }
 0x9e9   : > { %5320 = vmatpush3.msra.mxu0 %v7520_v61  ;;  %v7635_v28 = vmul.f32 %v5703_v1, %v7442_v16 }
 0x9ea   : > { %5321 = vmatprep.subr.mxu0 %v7504_v36 }
 0x9eb   : > { %5322 = vmatpush3.msra.mxu0 %v7504_v36  ;;  %4430 = vst [vmem:[%s6428_s14 + $0x1d8] sm:$0xff] %v7635_v28 }
 0x9ec   : > { %v5705_v43 = vpop.eup %5704  ;;  %5323 = vmatprep.subr.mxu0 %v7529_v10 }
 0x9ed   : > { %5324 = vmatpush3.msra.mxu0 %v7529_v10  ;;  %v3551_v44 = vpop.xlane.xlu1 %3550  ;;  %v7644_v52 = vmul.f32 %v5705_v43, %v7449_v45 }
 0x9ee   : > { %5708 = vrcp.f32 %v3551_v44  ;;  %5325 = vmatprep.subr.mxu0 %v7518_v62 }
 0x9ef   : > { %5326 = vmatpush3.msra.mxu0 %v7518_v62  ;;  %4432 = vst [vmem:[%s6428_s14 + $0x1e8] sm:$0xff] %v7644_v52 }
 0x9f0   : > { %v5707_v16 = vpop.eup %5706  ;;  %5327 = vmatprep.subr.mxu0 %v7537_v58 }
 0x9f1   : > { %5328 = vmatpush3.msra.mxu0 %v7537_v58  ;;  %v3555_v36 = vpop.xlane.xlu1 %3554  ;;  %v7653_v61 = vmul.f32 %v5707_v16, %v7456_v39 }
 0x9f2   : > { %5710 = vrcp.f32 %v3555_v36  ;;  %5329 = vmatprep.subr.mxu0 %v7533_v29 }
 0x9f3   : > { %5330 = vmatpush3.msra.mxu0 %v7533_v29  ;;  %4434 = vst [vmem:[%s6428_s14 + $0x1f8] sm:$0xff] %v7653_v61 }
 0x9f4   : > { %5331 = vmatprep.subr.mxu0 %v7545_v19 }
 0x9f5   : > { %5332 = vmatpush3.msra.mxu0 %v7545_v19  ;;  %v3559_v45 = vpop.xlane.xlu1 %3558 }
 0x9f6   : > { %5712 = vrcp.f32 %v3559_v45  ;;  %5333 = vmatprep.subr.mxu0 %v7543_v47 }
 0x9f7   : > { %5334 = vmatpush3.msra.mxu0 %v7543_v47 }
 0x9f8   : > { %5335 = vmatprep.subr.mxu0 %v7551_v40 }
 0x9f9   : > { %5336 = vmatpush3.msra.mxu0 %v7551_v40  ;;  %v3563_v39 = vpop.xlane.xlu1 %3562 }
 0x9fa   : > { %5714 = vrcp.f32 %v3563_v39  ;;  %5337 = vmatprep.subr.mxu0 %v7555_v46 }
 0x9fb   : > { %v5709_v62 = vpop.eup %5708  ;;  %5338 = vmatpush3.msra.mxu0 %v7555_v46 }
 0x9fc   : > { %v3598_v10 = vmul.f32 %v5709_v62, %v7468_v18 }
 0x9fd   : > { %v3567_v29 = vpop.xlane.xlu1 %3566 }
 0x9fe   : > { %5716 = vrcp.f32 %v3567_v29  ;;  %4419 = vst [vmem:[%s6428_s14 + $0x180] sm:$0xff] %v3598_v10 }
 0x9ff   : > { %v5711_v58 = vpop.eup %5710 }
 0xa00   : > { %v3600_v47 = vmul.f32 %v5711_v58, %v7474_v12 }
 0xa01   : > { %v3571_v19 = vpop.xlane.xlu1 %3570 }
 0xa02   : > { %5718 = vrcp.f32 %v3571_v19  ;;  %4421 = vst [vmem:[%s6428_s14 + $0x190] sm:$0xff] %v3600_v47 }
 0xa03   : > { %v5713_v40 = vpop.eup %5712 }
 0xa04   : > { %v3602_v8 = vmul.f32 %v5713_v40, %v7478_v22 }
 0xa05   : > { %v3575_v11 = vpop.xlane.xlu1 %3574 }
 0xa06   : > { %5720 = vrcp.f32 %v3575_v11  ;;  %4423 = vst [vmem:[%s6428_s14 + $0x1a0] sm:$0xff] %v3602_v8 }
 0xa07   : > { %v5715_v46 = vpop.eup %5714 }
 0xa08   : > { %v3604_v18 = vmul.f32 %v5715_v46, %v7484_v20  ;;  %v7976_v46 = vld [vmem:[#allocation11_spill] sm:$0xff] }
 0xa09   : > { %v3579_v24 = vpop.xlane.xlu1 %3578 }
 0xa0a   : > { %5722 = vrcp.f32 %v3579_v24  ;;  %4425 = vst [vmem:[%s6428_s14 + $0x1b0] sm:$0xff] %v3604_v18 }
 0xa0b   : > { %v5717_v42 = vpop.eup %5716  ;;  %v5209_v0 = vpop.f32.mrf.mxu0 }
 0xa0c   : > { %v3606_v12 = vmul.f32 %v5717_v42, %v7493_v2  ;;  %v7978_v42 = vld [vmem:[#allocation10_spill] sm:$0xff] }
 0xa0d   : > { %v2927_v3 = vpop.f32.mrf.mxu0 }
 0xa0e   : > { %5233 = vmatprep.mubr.msk.f32.mxu0 %vm780_vm2, %v2927_v3  ;;  %4427 = vst [vmem:[%s6428_s14 + $0x1c0] sm:$0xff] %v3606_v12  ;;  %v7980_v3 = vld [vmem:[#allocation9_spill] sm:$0xff] }
 0xa0f   : > { %v5719_v22 = vpop.eup %5718  ;;  %v5212_v50 = vpop.f32.mrf.mxu0  ;;  %5234 = vmatmul.mubr.msk.f32.gmra.mxu0 %vm780_vm2, %v5209_v0 }
 0xa10   : > { %v3608_v30 = vmul.f32 %v5719_v22, %v7502_v25 }
 0xa11   : > { %v2937_v20 = vpop.f32.mrf.mxu0 }
 0xa12   : > { %5236 = vmatprep.mubr.msk.f32.mxu0 %vm780_vm2, %v2937_v20  ;;  %4429 = vst [vmem:[%s6428_s14 + $0x1d0] sm:$0xff] %v3608_v30 }
 0xa13   : > { %v5721_v55 = vpop.eup %5720  ;;  %v5215_v21 = vpop.f32.mrf.mxu0  ;;  %5237 = vmatmul.mubr.msk.f32.gmra.mxu0 %vm780_vm2, %v5212_v50 }
 0xa14   : > { %v3610_v2 = vmul.f32 %v5721_v55, %v7513_v14 }
 0xa15   : > { %v2947_v1 = vpop.f32.mrf.mxu0 }
 0xa16   : > { %5239 = vmatprep.mubr.msk.f32.mxu0 %vm780_vm2, %v2947_v1  ;;  %4431 = vst [vmem:[%s6428_s14 + $0x1e0] sm:$0xff] %v3610_v2 }
 0xa17   : > { %v5723_v43 = vpop.eup %5722  ;;  %v5218_v44 = vpop.f32.mrf.mxu0  ;;  %5240 = vmatmul.mubr.msk.f32.gmra.mxu0 %vm780_vm2, %v5215_v21 }
 0xa18   : > { %v3612_v25 = vmul.f32 %v5723_v43, %v7524_v33  ;;  %v4435_v33 = vld [vmem:[%s7916_s3 + $0x18] sm:$0xff] }
 0xa19   : > { %v2957_v16 = vpop.f32.mrf.mxu0  ;;  %5363 = vmatprep.subr.mxu0 %v4435_v33 }
 0xa1a   : > { %5242 = vmatprep.mubr.msk.f32.mxu0 %vm780_vm2, %v2957_v16  ;;  %4433 = vst [vmem:[%s6428_s14 + $0x1f0] sm:$0xff] %v3612_v25  ;;  %5360 = vmatprep.mubr.f32.mxu1 %v3612_v25  ;;  %s5728_s14 = sshll.u32 %s5792_s25, 4  ;;  %s5729_s14 = int_to_ptr.vmem [resolvable:$false] %s5728_s14 }
 0xa1b   : > { %v5221_v36 = vpop.f32.mrf.mxu0  ;;  %5243 = vmatmul.mubr.msk.f32.gmra.mxu0 %vm780_vm2, %v5218_v44  ;;  %5361 = vmatmul.mubr.f32.vlgmr.msra.gmra.mxu1 %v7653_v61  ;;  %s5730_s29 = scalar_lea.vmem %s5729_s14, 16384  ;;  %p5731_p0 = scmp.lt.s32.totalorder %s7793_s16, %s5729_s14 }
 0xa1c   : > { %p5732_p1 = scmp.lt.s32.totalorder %s5730_s29, %s5724_s28 }
 0xa1d   : > { %v2967_v14 = vpop.f32.mrf.mxu0 }
 0xa1e   : > { %5245 = vmatprep.mubr.msk.f32.mxu0 %vm780_vm2, %v2967_v14  ;;  %p5733_p2 = por %p5732_p1, %p5731_p0 }
 0xa1f   : > { %v5224_v45 = vpop.f32.mrf.mxu0  ;;  %5246 = vmatmul.mubr.msk.f32.gmra.mxu0 %vm780_vm2, %v5221_v36 }
 0xa20   : > { %p5734_p3 = pnand %p5733_p2, %p5727_p13 }
 0xa21   : > { %v2977_v39 = vpop.f32.mrf.mxu0 }
 0xa22   : > { %5248 = vmatprep.mubr.msk.f32.mxu0 %vm780_vm2, %v2977_v39 }
 0xa23   : > { %5249 = vmatmul.mubr.msk.f32.gmra.mxu0 %vm780_vm2, %v5224_v45 }
 0xa24   : > { %5339 = vmatprep.mubr.f32.mxu0 %v3598_v10 }
 0xa27   : > { %5340 = vmatmul.mubr.f32.vlgmr.msra.gmra.mxu0 %v7591_v54  ;;  %v2286_v54 = vadd.f32 %v7560_v53, %v7092_v41 }
 0xa28   : > { %5342 = vmatprep.mubr.f32.mxu0 %v3600_v47  ;;  %5364 = vmatpush3.msra.mxu0 %v4435_v33 }
 0xa2b   : > { %5343 = vmatmul.mubr.f32.gmra.mxu0 %v7598_v59  ;;  %v2281_v59 = vadd.f32 %v7562_v63, %v7094_v57  ;;  %v2306_v57 = vadd.f32 %v7568_v6, %v7100_v49  ;;  %v2301_v63 = vadd.f32 %v7570_v27, %v7102_v51  ;;  %v2326_v49 = vadd.f32 %v7576_v56, %v7108_v5  ;;  %v7977_v56 = vld [vmem:[#allocation15_spill] sm:$0xff] }
 0xa2c   : > { %5345 = vmatprep.mubr.f32.mxu0 %v3602_v8  ;;  %v2321_v27 = vadd.f32 %v7578_v32, %v7110_v13  ;;  %v2346_v0 = vadd.f32 %v7978_v42, %v7977_v56  ;;  %v7979_v32 = vld [vmem:[#allocation14_spill] sm:$0xff] }
 0xa2d   : > { %v2341_v22 = vadd.f32 %v7980_v3, %v7979_v32 }
 0xa2f   : > { %5346 = vmatmul.mubr.f32.gmra.mxu0 %v7606_v34 }
 0xa30   : > { %5348 = vmatprep.mubr.f32.mxu0 %v3604_v18 }
 0xa33   : > { %5349 = vmatmul.mubr.f32.gmra.mxu0 %v7615_v4 }
 0xa34   : > { %5351 = vmatprep.mubr.f32.mxu0 %v3606_v12 }
 0xa37   : > { %5352 = vmatmul.mubr.f32.gmra.mxu0 %v7626_v35  ;;  %v2296_v35 = vadd.f32 %v7564_v37, %v7096_v38  ;;  %v2316_v38 = vadd.f32 %v7572_v15, %v7104_v7  ;;  %v2336_v15 = vadd.f32 %v7580_v26, %v7112_v9  ;;  %v7981_v26 = vld [vmem:[#allocation13_spill] sm:$0xff] }
 0xa38   : > { %5354 = vmatprep.mubr.f32.mxu0 %v3608_v30  ;;  %v7982_v30 = vld [vmem:[#allocation8_spill] sm:$0xff] }
 0xa39   : > { %v2356_v20 = vadd.f32 %v7982_v30, %v7981_v26 }
 0xa3b   : > { %5355 = vmatmul.mubr.f32.gmra.mxu0 %v7635_v28  ;;  %v2291_v28 = vadd.f32 %v7566_v31, %v7098_v60  ;;  %v2311_v31 = vadd.f32 %v7574_v23, %v7106_v48  ;;  %v7975_v23 = vld [vmem:[#allocation16_spill] sm:$0xff] }
 0xa3c   : > { %5357 = vmatprep.mubr.f32.mxu0 %v3610_v2  ;;  %v2331_v18 = vadd.f32 %v7976_v46, %v7975_v23  ;;  %v7983_v2 = vld [vmem:[#allocation12_spill] sm:$0xff] }
 0xa3d   : > { %v2351_v1 = vadd.f32 %v7593_v17, %v7983_v2 }
 0xa3f   : > { %5358 = vmatmul.mubr.f32.gmra.mxu0 %v7644_v52 }
 0xa9c   : > { %v5229_v61 = vpop.f32.mrf.mxu0 }
 0xa9d   : > { %v7710_v34 = vadd.f32 %v5229_v61, %v2286_v54 }
 0xa9e   : > { %v3102_v62 = vpop.f32.mrf.mxu0 }
 0xa9f   : > { %v7712_v4 = vadd.f32 %v3102_v62, %v2281_v59 }
 0xaa4   : > { %v5232_v10 = vpop.f32.mrf.mxu0 }
 0xaa5   : > { %v7718_v52 = vadd.f32 %v5232_v10, %v2296_v35 }
 0xaa6   : > { %v3112_v29 = vpop.f32.mrf.mxu0 }
 0xaa7   : > { %v7720_v41 = vadd.f32 %v3112_v29, %v2291_v28 }
 0xacf   : > { %v5235_v53 = vpop.f32.mrf.mxu0 }
 0xad0   : > { %v7726_v58 = vadd.f32 %v5235_v53, %v2306_v57 }
 0xad1   : > { %v3122_v47 = vpop.f32.mrf.mxu0 }
 0xad2   : > { %v7730_v37 = vadd.f32 %v3122_v47, %v2301_v63 }
 0xad3   : > { %v5238_v60 = vpop.f32.mrf.mxu0 }
 0xad4   : > { %v7734_v19 = vadd.f32 %v5238_v60, %v2316_v38 }
 0xad5   : > { %v3132_v40 = vpop.f32.mrf.mxu0 }
 0xad6   : > { %v7738_v6 = vadd.f32 %v3132_v40, %v2311_v31 }
 0xad7   : > { %v5241_v51 = vpop.f32.mrf.mxu0 }
 0xad8   : > { %v7742_v8 = vadd.f32 %v5241_v51, %v2326_v49 }
 0xad9   : > { %v3142_v7 = vpop.f32.mrf.mxu0 }
 0xada   : > { %v7746_v11 = vadd.f32 %v3142_v7, %v2321_v27 }
 0xadb   : > { %v5244_v48 = vpop.f32.mrf.mxu0  ;;  %v5362_v10 = vpop.f32.mrf.mxu1 }
 0xadc   : > { %v7750_v24 = vadd.f32 %v5244_v48, %v2336_v15 }
 0xadd   : > { %v3152_v5 = vpop.f32.mrf.mxu0  ;;  %v3815_v57 = vpop.f32.mrf.mxu1 }
 0xade   : > { %v7754_v12 = vadd.f32 %v3152_v5, %v2331_v18 }
 0xadf   : > { %v5247_v13 = vpop.f32.mrf.mxu0 }
 0xae0   : > { %v7758_v50 = vadd.f32 %v5247_v13, %v2346_v0 }
 0xae1   : > { %v3162_v9 = vpop.f32.mrf.mxu0 }
 0xae2   : > { %v7762_v55 = vadd.f32 %v3162_v9, %v2341_v22 }
 0xae3   : > { %v5250_v21 = vpop.f32.mrf.mxu0 }
 0xae4   : > { %v7766_v43 = vadd.f32 %v5250_v21, %v2356_v20 }
 0xae5   : > { %v3172_v44 = vpop.f32.mrf.mxu0 }
 0xae6   : > { %v7768_v25 = vadd.f32 %v3172_v44, %v2351_v1 }
 0xae7   : > { %v5341_v16 = vpop.f32.mrf.mxu0 }
 0xae9   : > { %v3745_v36 = vpop.f32.mrf.mxu0 }
 0xaea   : > { %5365 = vmatprep.mubr.msk.f32.mxu0 %vm780_vm2, %v3745_v36 }
 0xaeb   : > { %v5344_v14 = vpop.f32.mrf.mxu0  ;;  %5366 = vmatmul.mubr.msk.f32.vlgmr.msra.gmra.mxu0 %vm780_vm2, %v5341_v16 }
 0xaed   : > { %v3755_v45 = vpop.f32.mrf.mxu0 }
 0xaee   : > { %5368 = vmatprep.mubr.msk.f32.mxu0 %vm780_vm2, %v3755_v45 }
 0xaef   : > { %v5347_v39 = vpop.f32.mrf.mxu0  ;;  %5369 = vmatmul.mubr.msk.f32.gmra.mxu0 %vm780_vm2, %v5344_v14 }
 0xaf1   : > { %v3765_v33 = vpop.f32.mrf.mxu0 }
 0xaf2   : > { %5371 = vmatprep.mubr.msk.f32.mxu0 %vm780_vm2, %v3765_v33 }
 0xaf3   : > { %v5350_v17 = vpop.f32.mrf.mxu0  ;;  %5372 = vmatmul.mubr.msk.f32.gmra.mxu0 %vm780_vm2, %v5347_v39 }
 0xaf5   : > { %v3775_v54 = vpop.f32.mrf.mxu0 }
 0xaf6   : > { %5374 = vmatprep.mubr.msk.f32.mxu0 %vm780_vm2, %v3775_v54 }
 0xaf7   : > { %v5353_v61 = vpop.f32.mrf.mxu0  ;;  %5375 = vmatmul.mubr.msk.f32.gmra.mxu0 %vm780_vm2, %v5350_v17 }
 0xaf9   : > { %v3785_v59 = vpop.f32.mrf.mxu0 }
 0xafa   : > { %5377 = vmatprep.mubr.msk.f32.mxu0 %vm780_vm2, %v3785_v59 }
 0xafb   : > { %v5356_v62 = vpop.f32.mrf.mxu0  ;;  %5378 = vmatmul.mubr.msk.f32.gmra.mxu0 %vm780_vm2, %v5353_v61 }
 0xafd   : > { %v3795_v35 = vpop.f32.mrf.mxu0 }
 0xafe   : > { %5380 = vmatprep.mubr.msk.f32.mxu0 %vm780_vm2, %v3795_v35 }
 0xaff   : > { %v5359_v28 = vpop.f32.mrf.mxu0  ;;  %5381 = vmatmul.mubr.msk.f32.gmra.mxu0 %vm780_vm2, %v5356_v62 }
 0xb01   : > { %v3805_v29 = vpop.f32.mrf.mxu0 }
 0xb02   : > { %5383 = vmatprep.mubr.msk.f32.mxu0 %vm780_vm2, %v3805_v29 }
 0xb03   : > { %5384 = vmatmul.mubr.msk.f32.gmra.mxu0 %vm780_vm2, %v5359_v28 }
 0xb04   : > { %5386 = vmatprep.mubr.msk.f32.mxu0 %vm780_vm2, %v3815_v57 }
 0xb07   : > { %5387 = vmatmul.mubr.msk.f32.gmra.mxu0 %vm780_vm2, %v5362_v10 }
 0xb08   : > { %5737 = shalt.err (!%p5734_p3)
}
 0xb09   : > { %s5738_s12 = scalar_lea.hbm %s7791_s20, 8192  ;;  %s5742_s11 = scalar_lea.hbm %s7919_s6, 16384 }
 0xb0a   : > { %p5739_p4 = scmp.ne.s32.totalorder %s7791_s20, %s5738_s12  ;;  %p5743_p9 = scmp.lt.s32.totalorder %s7791_s20, %s7919_s6 }
 0xb0b   : > { %p5744_p10 = scmp.lt.s32.totalorder %s5742_s11, %s5738_s12 }
 0xb0c   : > { %p5740_p7 = pnand %p5739_p4, %p5868_p5 }
 0xb0d   : > { %p5745_p11 = por %p5744_p10, %p5743_p9 }
 0xb0e   : > { %p5741_p8 = pneg %p5740_p7 }
 0xb10   : > { %p5746_p12 = pnand %p5745_p11, %p5741_p8 }
 0xb12   : > { %5749 = shalt.err (!%p5746_p12)
}
 0xb13   : > { %s5793_s19 = smov 128   ;;  %s5794_s28 = smov 8   ;;  %v7823_v63 = vld [vmem:[%s7917_s4] ss:$0 sm:$0xff] }
 0xb14   : > { %5421 = dma.vmem_to_hbm [thread:$0]  (%p5868_p5), %s7793_s16, 8192, %s7791_s20, %s7797_s26, %s5793_s19, %s5793_s19, %s5794_s28  }
 0xb15   : > { %s7831_s9 = scalar_lea.vmem %s7918_s5, %s4458_s18 }
 0xbab   : > { %v5367_v53 = vpop.f32.mrf.mxu0 }
 0xbac   : > { %v4020_v47 = vadd.f32 %v5367_v53, %v7710_v34 }
 0xbad   : > { %v3940_v38 = vpop.f32.mrf.mxu0 }
 0xbae   : > { %v4043_v60 = vadd.f32 %v7823_v63, %v4020_v47  ;;  %v4019_v31 = vadd.f32 %v3940_v38, %v7712_v4 }
 0xbaf   : > { %v5370_v40 = vpop.f32.mrf.mxu0 }
 0xbb0   : > { %4059 = vst.msk [vmem:[%s7831_s9 + $0x8] sm:$0xff] %vm290_vm0, %v4043_v60  ;;  %v4042_v34 = vadd.f32 %v7823_v63, %v4019_v31  ;;  %v4022_v49 = vadd.f32 %v5370_v40, %v7718_v52 }
 0xbb1   : > { %v3950_v51 = vpop.f32.mrf.mxu0 }
 0xbb2   : > { %4058 = vst.msk [vmem:[%s7831_s9] sm:$0xff] %vm290_vm0, %v4042_v34  ;;  %v4045_v27 = vadd.f32 %v7823_v63, %v4022_v49  ;;  %v4021_v7 = vadd.f32 %v3950_v51, %v7720_v41 }
 0xbb3   : > { %v5373_v15 = vpop.f32.mrf.mxu0 }
 0xbb4   : > { %4061 = vst.msk [vmem:[%s7831_s9 + $0x18] sm:$0xff] %vm290_vm0, %v4045_v27  ;;  %v4044_v4 = vadd.f32 %v7823_v63, %v4021_v7  ;;  %v4024_v48 = vadd.f32 %v5373_v15, %v7726_v58 }
 0xbb5   : > { %v3960_v23 = vpop.f32.mrf.mxu0 }
 0xbb6   : > { %4060 = vst.msk [vmem:[%s7831_s9 + $0x10] sm:$0xff] %vm290_vm0, %v4044_v4  ;;  %v4047_v52 = vadd.f32 %v7823_v63, %v4024_v48  ;;  %v4023_v46 = vadd.f32 %v3960_v23, %v7730_v37 }
 0xbb7   : > { %v5376_v18 = vpop.f32.mrf.mxu0 }
 0xbb8   : > { %4063 = vst.msk [vmem:[%s7831_s9 + $0x28] sm:$0xff] %vm290_vm0, %v4047_v52  ;;  %v4046_v41 = vadd.f32 %v7823_v63, %v4023_v46  ;;  %v4026_v5 = vadd.f32 %v5376_v18, %v7734_v19 }
 0xbb9   : > { %v3970_v56 = vpop.f32.mrf.mxu0 }
 0xbba   : > { %4062 = vst.msk [vmem:[%s7831_s9 + $0x20] sm:$0xff] %vm290_vm0, %v4046_v41  ;;  %v4049_v58 = vadd.f32 %v7823_v63, %v4026_v5  ;;  %v4025_v42 = vadd.f32 %v3970_v56, %v7738_v6 }
 0xbbb   : > { %v5379_v0 = vpop.f32.mrf.mxu0 }
 0xbbc   : > { %4065 = vst.msk [vmem:[%s7831_s9 + $0x38] sm:$0xff] %vm290_vm0, %v4049_v58  ;;  %v4048_v37 = vadd.f32 %v7823_v63, %v4025_v42  ;;  %v4028_v13 = vadd.f32 %v5379_v0, %v7742_v8 }
 0xbbd   : > { %v3980_v32 = vpop.f32.mrf.mxu0 }
 0xbbe   : > { %4064 = vst.msk [vmem:[%s7831_s9 + $0x30] sm:$0xff] %vm290_vm0, %v4048_v37  ;;  %v4051_v19 = vadd.f32 %v7823_v63, %v4028_v13  ;;  %v4027_v3 = vadd.f32 %v3980_v32, %v7746_v11 }
 0xbbf   : > { %v5382_v22 = vpop.f32.mrf.mxu0 }
 0xbc0   : > { %4067 = vst.msk [vmem:[%s7831_s9 + $0x48] sm:$0xff] %vm290_vm0, %v4051_v19  ;;  %v4050_v6 = vadd.f32 %v7823_v63, %v4027_v3  ;;  %v4030_v9 = vadd.f32 %v5382_v22, %v7750_v24 }
 0xbc1   : > { %v3990_v26 = vpop.f32.mrf.mxu0 }
 0xbc2   : > { %4066 = vst.msk [vmem:[%s7831_s9 + $0x40] sm:$0xff] %vm290_vm0, %v4050_v6  ;;  %v4053_v8 = vadd.f32 %v7823_v63, %v4030_v9  ;;  %v4029_v30 = vadd.f32 %v3990_v26, %v7754_v12 }
 0xbc3   : > { %v5385_v20 = vpop.f32.mrf.mxu0 }
 0xbc4   : > { %4069 = vst.msk [vmem:[%s7831_s9 + $0x58] sm:$0xff] %vm290_vm0, %v4053_v8  ;;  %v4052_v11 = vadd.f32 %v7823_v63, %v4029_v30  ;;  %v4032_v21 = vadd.f32 %v5385_v20, %v7758_v50 }
 0xbc5   : > { %v4000_v2 = vpop.f32.mrf.mxu0 }
 0xbc6   : > { %4068 = vst.msk [vmem:[%s7831_s9 + $0x50] sm:$0xff] %vm290_vm0, %v4052_v11  ;;  %v4055_v24 = vadd.f32 %v7823_v63, %v4032_v21  ;;  %v4031_v1 = vadd.f32 %v4000_v2, %v7762_v55 }
 0xbc7   : > { %v5388_v44 = vpop.f32.mrf.mxu0 }
 0xbc8   : > { %4071 = vst.msk [vmem:[%s7831_s9 + $0x68] sm:$0xff] %vm290_vm0, %v4055_v24  ;;  %v4054_v12 = vadd.f32 %v7823_v63, %v4031_v1  ;;  %v4034_v16 = vadd.f32 %v5388_v44, %v7766_v43 }
 0xbc9   : > { %v4010_v36 = vpop.f32.mrf.mxu0 }
 0xbca   : > { %4070 = vst.msk [vmem:[%s7831_s9 + $0x60] sm:$0xff] %vm290_vm0, %v4054_v12  ;;  %v4057_v14 = vadd.f32 %v7823_v63, %v4034_v16  ;;  %v4033_v50 = vadd.f32 %v4010_v36, %v7768_v25 }
 0xbcc   : > { %4073 = vst.msk [vmem:[%s7831_s9 + $0x78] sm:$0xff] %vm290_vm0, %v4057_v14  ;;  %v4056_v45 = vadd.f32 %v7823_v63, %v4033_v50 }
 0xbce   : > { %4072 = vst.msk [vmem:[%s7831_s9 + $0x70] sm:$0xff] %vm290_vm0, %v4056_v45 }
 0xbcf PF: > { %p5427_p5 = scmp.ge.s32.totalorder %s5784_s24, 2  ;;  %s4119_s7 = sand.u32 1, %s5772_s21  }
 0xbd0   : > { %s4120_s15 = scalar_lea.sflag [#allocation4], %s4119_s7 }
 0xbd1   : > { %p5424_p13 = pnand %p5427_p5, %p5872_p6 }
 0xbd3   : > { %p5425_p0 = pneg %p5424_p13 }
 0xbd5   : > { %5767 = dma.done.wait (%p5425_p0), %s4120_s15, 8192  }
 0xbd6   : > { %5769 = vsyncadd (%p5425_p0), %s4120_s15, 4294959104  ;;  %p17_p1 = scmp.ge.s32.totalorder %s5855_s27, 4   ;;  %s7984_s21 = smov %s5776_s22 }
 0xbd7   : > { %s7985_s22 = smov %s5780_s23  ;;  %s7986_s23 = smov %s5866_s30 }
 0xbd8   : > { %s7987_s24 = smov %s5855_s27  ;;  %19 = sbr.rel (!%p17_p1) target bundleno = 3 (0x3), region = 96 }
 0xbdd   :  { %4125 = vsyncpa [#allocation4], 1 }
 0xbde   :  { %4127 = vsyncpa [#allocation4 + $0x1], 1 }

// kernel: tpu_custom_call.1
= control target key start
LH: loop header
LB: loop body
LE: loop exit
PB: predicated region body
PF: predicated region fallthrough
CT: control target
= control target key end

     0   :  { %12 = vsyncpa [#allocation4], 0  ;;  %s7913_s0 = inlined_call_operand.vmem [shape: f32[2,128,32], index: 0, kind: input, shape index: {}]   ;;  %s7914_s1 = inlined_call_operand.vmem [shape: f32[32,96], index: 1, kind: input, shape index: {}]   ;;  %s7915_s2 = inlined_call_operand.vmem [shape: f32[1,96], index: 2, kind: input, shape index: {}]   ;;  %s7916_s3 = inlined_call_operand.vmem [shape: f32[4,8,32], index: 3, kind: input, shape index: {}]   ;;  %s7917_s4 = inlined_call_operand.vmem [shape: f32[1,32], index: 4, kind: input, shape index: {}]   ;;  %s7918_s5 = inlined_call_operand.vmem [shape: f32[2,128,32], index: 5, kind: output, shape index: {0}]   ;;  %s7919_s6 = inlined_call_operand.hbm [shape: f32[2,4,128,128], index: 6, kind: output, shape index: {1}]  }
   0x1   :  { %14 = vsyncpa [#allocation4 + $0x1], 0  ;;  %s5830_s21 = smov 0   ;;  %s5832_s22 = smov 0  }
   0x2   :  { %s5834_s23 = smov 0   ;;  %s5836_s24 = smov 0  }
   0x3 LB: > { %s5851_s25 = sadd.s32 4294967295, %s5784_s24   ;;  %s4183_s26 = sadd.s32 4294967294, %s5784_s24   ;;  %s5784_s24 = sphi %s5836_s24, %s7987_s24   ;;  %s5780_s23 = sphi %s5834_s23, %s7986_s23   ;;  %s5776_s22 = sphi %s5832_s22, %s7985_s22   ;;  %s5772_s21 = sphi %s5830_s21, %s7984_s21  }
   0x4   : > { %s5855_s27 = sadd.s32 1, %s5784_s24   ;;  %s163_s28 = sadd.s32 1, %s5780_s23 }
   0x5   : > { %s160_s29 = ssub.s32 %s5784_s24, %s5855_s27  ;;  %p173_p0 = scmp.ne.s32.totalorder %s5780_s23, %s5776_s22 }
   0x6   : > { %p161_p1 = scmp.eq.s32.totalorder %s160_s29, 0  ;;  %p174_p2 = scmp.eq.s32.totalorder %s5851_s25, 1 }
   0x7   : > { %p179_p3 = scmp.ne.s32.totalorder %s5776_s22, %s5772_s21  ;;  %p180_p4 = scmp.eq.s32.totalorder %s4183_s26, 1 }
   0x8   : > { %s5866_s30 = scalar_select %p161_p1, %s5780_s23, %s163_s28  }
   0x9   : > { %p5868_p5 = por %p174_p2, %p173_p0  ;;  %p5872_p6 = por %p180_p4, %p179_p3 }
   0xa   : > { %p4186_p7 = scmp.ge.s32.totalorder %s5784_s24, 1  ;;  %p218_p8 = scmp.lt.s32.totalorder %s5784_s24, 3 }
   0xc   : > { %p219_p9 = pnand %p4186_p7, %p218_p8 }
   0xe   : > { %222 = sbr.rel (%p219_p9) target bundleno = 3023 (0xbcf), region = 40 }
  0x13   : > { %v282_v0 = vld [vmem:[%s7914_s1 + $0x18] sm:$0xff]  ;;  %v281_v1 = vld [vmem:[%s7914_s1 + $0x10] sm:$0xff]  ;;  %p253_p10 = scmp.lt.s32.totalorder %s5851_s25, 1  ;;  %v280_v2 = vld [vmem:[%s7914_s1 + $0x8] sm:$0xff]  ;;  %vm290_vm0 = vcmask 261120   ;;  %vm484_vm1 = vcmask 195584  }
  0x14   : > { %4805 = vmatprep.subr.mxu0 %v282_v0  ;;  %v279_v3 = vld [vmem:[%s7914_s1] sm:$0xff]  ;;  %vm780_vm2 = vcmask 64512   ;;  %s5786_s9 = smov 120   ;;  %s5787_s10 = smov 104  }
  0x15   : > { %4806 = vmatpush3.msra.mxu0 %v282_v0  ;;  %s5889_s15 = scalar_select %p253_p10, %s5851_s25, 1  ;;  %v4192_v20 = vld [vmem:[%s7915_s2] ss:$0 sm:$0xff] }
  0x16   : > { %4807 = vmatprep.subr.mxu0 %v281_v1  ;;  %s5788_s11 = smov 112   ;;  %s250_s12 = sand.u32 1, %s5776_s22  }
  0x17   : > { %4808 = vmatpush3.msra.mxu0 %v281_v1  ;;  %s4458_s18 = sshll.u32 %s5889_s15, 7  ;;  %s4187_s13 = sshll.u32 %s250_s12, 9 }
  0x18   : > { %4809 = vmatprep.subr.mxu0 %v280_v2  ;;  %s5900_s26 = scalar_lea.vmem %s7913_s0, %s4458_s18  ;;  %s6428_s14 = scalar_lea.vmem [#allocation3], %s4187_s13 }
  0x19   : > { %4810 = vmatpush3.msra.mxu0 %v280_v2  ;;  %v263_v4 = vld [vmem:[%s5900_s26] sm:$0xff]  ;;  %v264_v5 = vld [vmem:[%s5900_s26 + $0x8] sm:$0xff]  ;;  %v265_v6 = vld [vmem:[%s5900_s26 + $0x10] sm:$0xff]  ;;  %s5790_s19 = smov 80   ;;  %s5791_s28 = smov 56  }
  0x1a   : > { %4811 = vmatprep.subr.mxu0 %v279_v3  ;;  %4813 = vmatprep.mubr.msk.f32.mxu0 %vm290_vm0, %v263_v4  ;;  %v266_v7 = vld [vmem:[%s5900_s26 + $0x18] sm:$0xff]  ;;  %v267_v8 = vld [vmem:[%s5900_s26 + $0x20] sm:$0xff]  ;;  %v268_v9 = vld [vmem:[%s5900_s26 + $0x28] sm:$0xff]  ;;  %s4460_s13 = sshll.u32 %s5851_s25, 13  ;;  %s4096_s16 = sshll.u32 %s6428_s14, 4  ;;  %s7793_s16 = int_to_ptr.vmem [resolvable:$true] %s4096_s16 }
  0x1b   : > { %4812 = vmatpush3.msra.mxu0 %v279_v3  ;;  %v269_v10 = vld [vmem:[%s5900_s26 + $0x30] sm:$0xff]  ;;  %v270_v11 = vld [vmem:[%s5900_s26 + $0x38] sm:$0xff]  ;;  %v271_v12 = vld [vmem:[%s5900_s26 + $0x40] sm:$0xff]  ;;  %s7791_s20 = scalar_lea.hbm %s7919_s6, %s4460_s13  ;;  %s5792_s25 = smov [#allocation3]  }
  0x1c   : > { %4814 = vmatmul.mubr.msk.f32.vlgmr.msra.gmra.mxu0 %vm290_vm0, %v264_v5  ;;  %v272_v13 = vld [vmem:[%s5900_s26 + $0x48] sm:$0xff]  ;;  %v273_v14 = vld [vmem:[%s5900_s26 + $0x50] sm:$0xff]  ;;  %v274_v15 = vld [vmem:[%s5900_s26 + $0x58] sm:$0xff] }
  0x1d   : > { %4816 = vmatprep.mubr.msk.f32.mxu0 %vm290_vm0, %v265_v6  ;;  %v275_v16 = vld [vmem:[%s5900_s26 + $0x60] sm:$0xff]  ;;  %v276_v17 = vld [vmem:[%s5900_s26 + $0x68] sm:$0xff]  ;;  %v277_v18 = vld [vmem:[%s5900_s26 + $0x70] sm:$0xff] }
  0x1e   : > { %v278_v19 = vld [vmem:[%s5900_s26 + $0x78] sm:$0xff]  ;;  %s7797_s26 = scalar_lea.sflag [#allocation4], %s250_s12 }
  0x20   : > { %4817 = vmatmul.mubr.msk.f32.gmra.mxu0 %vm290_vm0, %v266_v7 }
  0x21   : > { %4819 = vmatprep.mubr.msk.f32.mxu0 %vm290_vm0, %v267_v8 }
  0x24   : > { %4820 = vmatmul.mubr.msk.f32.gmra.mxu0 %vm290_vm0, %v268_v9 }
  0x25   : > { %4822 = vmatprep.mubr.msk.f32.mxu0 %vm290_vm0, %v269_v10 }
  0x28   : > { %4823 = vmatmul.mubr.msk.f32.gmra.mxu0 %vm290_vm0, %v270_v11 }
  0x29   : > { %4825 = vmatprep.mubr.msk.f32.mxu0 %vm290_vm0, %v271_v12 }
  0x2c   : > { %4826 = vmatmul.mubr.msk.f32.gmra.mxu0 %vm290_vm0, %v272_v13 }
  0x2d   : > { %4828 = vmatprep.mubr.msk.f32.mxu0 %vm290_vm0, %v273_v14 }
  0x30   : > { %4829 = vmatmul.mubr.msk.f32.gmra.mxu0 %vm290_vm0, %v274_v15 }
  0x31   : > { %4831 = vmatprep.mubr.msk.f32.mxu0 %vm290_vm0, %v275_v16 }
  0x34   : > { %4832 = vmatmul.mubr.msk.f32.gmra.mxu0 %vm290_vm0, %v276_v17 }
  0x35   : > { %4834 = vmatprep.mubr.msk.f32.mxu0 %vm290_vm0, %v277_v18 }
  0x38   : > { %4835 = vmatmul.mubr.msk.f32.gmra.mxu0 %vm290_vm0, %v278_v19 }
  0xdc   : > { %v4815_v21 = vpop.f32.mrf.mxu0 }
  0xdd   : > { %v5937_v22 = vadd.f32 %v4815_v21, %v4192_v20 }
  0xde   : > { %v405_v23 = vpop.f32.mrf.mxu0 }
  0xdf   : > { %7944 = vst [vmem:[#allocation6_spill] sm:$0xff] %v5937_v22  ;;  %486 = vst.msk [vmem:[#allocation2 + $0x8] sm:$0xff] %vm484_vm1, %v5937_v22  ;;  %v5941_v24 = vadd.f32 %v4192_v20, %v405_v23 }
  0xe0   : > { %v4818_v25 = vpop.f32.mrf.mxu0 }
  0xe1   : > { %7945 = vst [vmem:[#allocation7_spill] sm:$0xff] %v5941_v24  ;;  %485 = vst.msk [vmem:[#allocation2] sm:$0xff] %vm484_vm1, %v5941_v24  ;;  %v5945_v26 = vadd.f32 %v4818_v25, %v4192_v20 }
  0xe2   : > { %v415_v27 = vpop.f32.mrf.mxu0 }
  0xe3   : > { %7946 = vst [vmem:[#allocation8_spill] sm:$0xff] %v5945_v26  ;;  %488 = vst.msk [vmem:[#allocation2 + $0x18] sm:$0xff] %vm484_vm1, %v5945_v26  ;;  %v5949_v28 = vadd.f32 %v4192_v20, %v415_v27 }
  0xe4   : > { %v4821_v29 = vpop.f32.mrf.mxu0 }
  0xe5   : > { %7947 = vst [vmem:[#allocation9_spill] sm:$0xff] %v5949_v28  ;;  %487 = vst.msk [vmem:[#allocation2 + $0x10] sm:$0xff] %vm484_vm1, %v5949_v28  ;;  %v5953_v30 = vadd.f32 %v4821_v29, %v4192_v20 }
  0xe6   : > { %v425_v31 = vpop.f32.mrf.mxu0  ;;  %v6063_v4 = vld [vmem:[#allocation2 + $0x8] sm:$0xff] }
  0xe7   : > { %7948 = vst [vmem:[#allocation10_spill] sm:$0xff] %v5953_v30  ;;  %490 = vst.msk [vmem:[#allocation2 + $0x28] sm:$0xff] %vm484_vm1, %v5953_v30  ;;  %v5957_v32 = vadd.f32 %v4192_v20, %v425_v31 }
  0xe8   : > { %v4824_v33 = vpop.f32.mrf.mxu0  ;;  %v5959_v34 = vld [vmem:[#allocation2] sm:$0xff] }
  0xe9   : > { %7949 = vst [vmem:[#allocation11_spill] sm:$0xff] %v5957_v32  ;;  %489 = vst.msk [vmem:[#allocation2 + $0x20] sm:$0xff] %vm484_vm1, %v5957_v32  ;;  %v5963_v35 = vadd.f32 %v4824_v33, %v4192_v20  ;;  %4869 = vmatprep.mubr.msk.f32.mxu1 %vm780_vm2, %v5959_v34 }
  0xea   : > { %v435_v36 = vpop.f32.mrf.mxu0  ;;  %v6057_v3 = vld [vmem:[#allocation2 + $0x18] sm:$0xff] }
  0xeb   : > { %7950 = vst [vmem:[#allocation12_spill] sm:$0xff] %v5963_v35  ;;  %492 = vst.msk [vmem:[#allocation2 + $0x38] sm:$0xff] %vm484_vm1, %v5963_v35  ;;  %v5969_v37 = vadd.f32 %v4192_v20, %v435_v36 }
  0xec   : > { %v4827_v38 = vpop.f32.mrf.mxu0  ;;  %v6051_v2 = vld [vmem:[#allocation2 + $0x10] sm:$0xff] }
  0xed   : > { %7951 = vst [vmem:[#allocation13_spill] sm:$0xff] %v5969_v37  ;;  %491 = vst.msk [vmem:[#allocation2 + $0x30] sm:$0xff] %vm484_vm1, %v5969_v37  ;;  %v5973_v39 = vadd.f32 %v4827_v38, %v4192_v20 }
  0xee   : > { %v445_v40 = vpop.f32.mrf.mxu0  ;;  %v6049_v1 = vld [vmem:[#allocation2 + $0x28] sm:$0xff] }
  0xef   : > { %7952 = vst [vmem:[#allocation14_spill] sm:$0xff] %v5973_v39  ;;  %494 = vst.msk [vmem:[#allocation2 + $0x48] sm:$0xff] %vm484_vm1, %v5973_v39  ;;  %v5977_v41 = vadd.f32 %v4192_v20, %v445_v40 }
  0xf0   : > { %v4830_v42 = vpop.f32.mrf.mxu0  ;;  %v6043_v0 = vld [vmem:[#allocation2 + $0x20] sm:$0xff] }
  0xf1   : > { %7953 = vst [vmem:[#allocation15_spill] sm:$0xff] %v5977_v41  ;;  %493 = vst.msk [vmem:[#allocation2 + $0x40] sm:$0xff] %vm484_vm1, %v5977_v41  ;;  %v5981_v43 = vadd.f32 %v4830_v42, %v4192_v20 }
  0xf2   : > { %v455_v44 = vpop.f32.mrf.mxu0  ;;  %v6041_v63 = vld [vmem:[#allocation2 + $0x38] sm:$0xff] }
  0xf3   : > { %7954 = vst [vmem:[#allocation16_spill] sm:$0xff] %v5981_v43  ;;  %496 = vst.msk [vmem:[#allocation2 + $0x58] sm:$0xff] %vm484_vm1, %v5981_v43  ;;  %v5985_v45 = vadd.f32 %v4192_v20, %v455_v44 }
  0xf4   : > { %v4833_v46 = vpop.f32.mrf.mxu0  ;;  %v6035_v62 = vld [vmem:[#allocation2 + $0x30] sm:$0xff] }
  0xf5   : > { %495 = vst.msk [vmem:[#allocation2 + $0x50] sm:$0xff] %vm484_vm1, %v5985_v45  ;;  %v5989_v47 = vadd.f32 %v4833_v46, %v4192_v20 }
  0xf6   : > { %v465_v48 = vpop.f32.mrf.mxu0  ;;  %v6033_v61 = vld [vmem:[#allocation2 + $0x48] sm:$0xff] }
  0xf7   : > { %498 = vst.msk [vmem:[#allocation2 + $0x68] sm:$0xff] %vm484_vm1, %v5989_v47  ;;  %v5993_v49 = vadd.f32 %v4192_v20, %v465_v48 }
  0xf8   : > { %v4836_v50 = vpop.f32.mrf.mxu0  ;;  %v6027_v60 = vld [vmem:[#allocation2 + $0x40] sm:$0xff] }
  0xf9   : > { %497 = vst.msk [vmem:[#allocation2 + $0x60] sm:$0xff] %vm484_vm1, %v5993_v49  ;;  %v5997_v51 = vadd.f32 %v4836_v50, %v4192_v20 }
  0xfa   : > { %v475_v52 = vpop.f32.mrf.mxu0  ;;  %v6025_v59 = vld [vmem:[#allocation2 + $0x58] sm:$0xff] }
  0xfb   : > { %500 = vst.msk [vmem:[#allocation2 + $0x78] sm:$0xff] %vm484_vm1, %v5997_v51  ;;  %v6001_v53 = vadd.f32 %v4192_v20, %v475_v52 }
  0xfc   : > { %v6019_v58 = vld [vmem:[#allocation2 + $0x50] sm:$0xff] }
  0xfd   : > { %499 = vst.msk [vmem:[#allocation2 + $0x70] sm:$0xff] %vm484_vm1, %v6001_v53 }
  0xfe   : > { %v6005_v54 = vld [vmem:[#allocation2 + $0x68] sm:$0xff] }
  0xff   : > { %774 = vrot.lane.b32.xlu1 %v6005_v54, %s5786_s9 }
 0x100   : > { %v6011_v56 = vld [vmem:[#allocation2 + $0x60] sm:$0xff] }
 0x102   : > { %v6009_v55 = vld [vmem:[#allocation2 + $0x78] sm:$0xff] }
 0x103   : > { %778 = vrot.lane.b32.xlu0 %v6009_v55, %s5786_s9  ;;  %772 = vrot.lane.b32.xlu1 %v6011_v56, %s5786_s9 }
 0x104   : > { %v6017_v57 = vld [vmem:[#allocation2 + $0x70] sm:$0xff] }
 0x107   : > { %776 = vrot.lane.b32.xlu0 %v6017_v57, %s5786_s9  ;;  %768 = vrot.lane.b32.xlu1 %v6019_v58, %s5786_s9 }
 0x10b   : > { %770 = vrot.lane.b32.xlu0 %v6025_v59, %s5786_s9  ;;  %764 = vrot.lane.b32.xlu1 %v6027_v60, %s5786_s9 }
 0x10f   : > { %766 = vrot.lane.b32.xlu0 %v6033_v61, %s5786_s9  ;;  %760 = vrot.lane.b32.xlu1 %v6035_v62, %s5786_s9 }
 0x113   : > { %762 = vrot.lane.b32.xlu0 %v6041_v63, %s5786_s9  ;;  %756 = vrot.lane.b32.xlu1 %v6043_v0, %s5786_s9 }
 0x117   : > { %758 = vrot.lane.b32.xlu0 %v6049_v1, %s5786_s9  ;;  %752 = vrot.lane.b32.xlu1 %v6051_v2, %s5786_s9 }
 0x11b   : > { %754 = vrot.lane.b32.xlu0 %v6057_v3, %s5786_s9  ;;  %748 = vrot.lane.b32.xlu1 %v5959_v34, %s5786_s9 }
 0x11f   : > { %750 = vrot.lane.b32.xlu0 %v6063_v4, %s5786_s9  ;;  %547 = vrot.lane.b32.xlu1 %v5997_v51, %s5787_s10 }
 0x123   : > { %545 = vrot.lane.b32.xlu0 %v6001_v53, %s5787_s10  ;;  %543 = vrot.lane.b32.xlu1 %v5989_v47, %s5787_s10 }
 0x127   : > { %539 = vrot.lane.b32.xlu0 %v5981_v43, %s5787_s10  ;;  %541 = vrot.lane.b32.xlu1 %v5993_v49, %s5787_s10 }
 0x12b   : > { %529 = vrot.lane.b32.xlu0 %v5969_v37, %s5787_s10  ;;  %537 = vrot.lane.b32.xlu1 %v5985_v45, %s5787_s10 }
 0x12f   : > { %527 = vrot.lane.b32.xlu0 %v5953_v30, %s5787_s10  ;;  %535 = vrot.lane.b32.xlu1 %v5973_v39, %s5787_s10 }
 0x133   : > { %1172 = vrot.lane.b32.xlu0 %v6025_v59, %s5788_s11  ;;  %533 = vrot.lane.b32.xlu1 %v5977_v41, %s5787_s10 }
 0x137   : > { %525 = vrot.lane.b32.xlu0 %v5957_v32, %s5787_s10  ;;  %531 = vrot.lane.b32.xlu1 %v5963_v35, %s5787_s10 }
 0x13b   : > { %1168 = vrot.lane.b32.xlu0 %v6033_v61, %s5788_s11  ;;  %1180 = vrot.lane.b32.xlu1 %v6009_v55, %s5788_s11 }
 0x13f   : > { %1166 = vrot.lane.b32.xlu0 %v6027_v60, %s5788_s11  ;;  %1176 = vrot.lane.b32.xlu1 %v6005_v54, %s5788_s11 }
 0x143   : > { %521 = vrot.lane.b32.xlu0 %v5949_v28, %s5787_s10  ;;  %1174 = vrot.lane.b32.xlu1 %v6011_v56, %s5788_s11 }
 0x147   : > { %1160 = vrot.lane.b32.xlu0 %v6049_v1, %s5788_s11  ;;  %1170 = vrot.lane.b32.xlu1 %v6019_v58, %s5788_s11 }
 0x14b   : > { %1158 = vrot.lane.b32.xlu0 %v6043_v0, %s5788_s11  ;;  %523 = vrot.lane.b32.xlu1 %v5945_v26, %s5787_s10 }
 0x14f   : > { %517 = vrot.lane.b32.xlu0 %v5941_v24, %s5787_s10  ;;  %1164 = vrot.lane.b32.xlu1 %v6041_v63, %s5788_s11 }
 0x153   : > { %1152 = vrot.lane.b32.xlu0 %v6063_v4, %s5788_s11  ;;  %1162 = vrot.lane.b32.xlu1 %v6035_v62, %s5788_s11 }
 0x157   : > { %519 = vrot.lane.b32.xlu1 %v5937_v22, %s5787_s10 }
 0x15b   : > { %1156 = vrot.lane.b32.xlu1 %v6057_v3, %s5788_s11 }
 0x15f   : > { %1154 = vrot.lane.b32.xlu1 %v6051_v2, %s5788_s11 }
 0x163   : > { %1150 = vrot.lane.b32.xlu1 %v5959_v34, %s5788_s11 }
 0x167   : > { %1178 = vrot.lane.b32.xlu1 %v6017_v57, %s5788_s11 }
 0x171   : > { %v775_v5 = vpop.permute.xlu1 %774 }
 0x175   : > { %v779_v6 = vpop.permute.xlu0 %778  ;;  %v773_v7 = vpop.permute.xlu1 %772 }
 0x176   : > { %4837 = vmatprep.subr.msk.mxu1 %vm780_vm2, %v779_v6 }
 0x177   : > { %4838 = vmatpush3.xpose.msk.msra.mxu1 %vm780_vm2, %v779_v6 }
 0x179   : > { %v777_v8 = vpop.permute.xlu0 %776  ;;  %v769_v9 = vpop.permute.xlu1 %768 }
 0x17a   : > { %4839 = vmatprep.subr.msk.mxu1 %vm780_vm2, %v777_v8 }
 0x17b   : > { %4840 = vmatpush3.xpose.msk.msra.mxu1 %vm780_vm2, %v777_v8 }
 0x17c   : > { %4841 = vmatprep.subr.msk.mxu1 %vm780_vm2, %v775_v5 }
 0x17d   : > { %v771_v10 = vpop.permute.xlu0 %770  ;;  %v765_v11 = vpop.permute.xlu1 %764 }
 0x17f   : > { %4842 = vmatpush3.xpose.msk.msra.mxu1 %vm780_vm2, %v775_v5 }
 0x180   : > { %4843 = vmatprep.subr.msk.mxu1 %vm780_vm2, %v773_v7 }
 0x181   : > { %v767_v12 = vpop.permute.xlu0 %766  ;;  %v761_v13 = vpop.permute.xlu1 %760 }
 0x183   : > { %4844 = vmatpush3.xpose.msk.msra.mxu1 %vm780_vm2, %v773_v7 }
 0x184   : > { %4845 = vmatprep.subr.msk.mxu1 %vm780_vm2, %v771_v10 }
 0x185   : > { %v763_v14 = vpop.permute.xlu0 %762  ;;  %v757_v15 = vpop.permute.xlu1 %756 }
 0x187   : > { %4846 = vmatpush3.xpose.msk.msra.mxu1 %vm780_vm2, %v771_v10 }
 0x188   : > { %4847 = vmatprep.subr.msk.mxu1 %vm780_vm2, %v769_v9 }
 0x189   : > { %v759_v16 = vpop.permute.xlu0 %758  ;;  %v753_v17 = vpop.permute.xlu1 %752 }
 0x18b   : > { %4848 = vmatpush3.xpose.msk.msra.mxu1 %vm780_vm2, %v769_v9 }
 0x18c   : > { %4849 = vmatprep.subr.msk.mxu1 %vm780_vm2, %v767_v12 }
 0x18d   : > { %v755_v18 = vpop.permute.xlu0 %754  ;;  %v6128_v19 = vpop.permute.xlu1 %748 }
 0x18f   : > { %4850 = vmatpush3.xpose.msk.msra.mxu1 %vm780_vm2, %v767_v12 }
 0x190   : > { %4851 = vmatprep.subr.msk.mxu1 %vm780_vm2, %v765_v11 }
 0x191   : > { %v751_v20 = vpop.permute.xlu0 %750  ;;  %v548_v21 = vpop.permute.xlu1 %547 }
 0x192   : > { %581 = vst.msk [vmem:[#allocation2 + $0xf8] sm:$0xff] %vm484_vm1, %v548_v21 }
 0x193   : > { %4852 = vmatpush3.xpose.msk.msra.mxu1 %vm780_vm2, %v765_v11 }
 0x194   : > { %4853 = vmatprep.subr.msk.mxu1 %vm780_vm2, %v763_v14 }
 0x195   : > { %v546_v23 = vpop.permute.xlu0 %545  ;;  %v544_v25 = vpop.permute.xlu1 %543 }
 0x196   : > { %580 = vst.msk [vmem:[#allocation2 + $0xf0] sm:$0xff] %vm484_vm1, %v546_v23  ;;  %579 = vst.msk [vmem:[#allocation2 + $0xe8] sm:$0xff] %vm484_vm1, %v544_v25 }
 0x197   : > { %4854 = vmatpush3.xpose.msk.msra.mxu1 %vm780_vm2, %v763_v14 }
 0x198   : > { %4855 = vmatprep.subr.msk.mxu1 %vm780_vm2, %v761_v13 }
 0x199   : > { %v540_v27 = vpop.permute.xlu0 %539  ;;  %v542_v29 = vpop.permute.xlu1 %541 }
 0x19a   : > { %577 = vst.msk [vmem:[#allocation2 + $0xd8] sm:$0xff] %vm484_vm1, %v540_v27  ;;  %578 = vst.msk [vmem:[#allocation2 + $0xe0] sm:$0xff] %vm484_vm1, %v542_v29 }
 0x19b   : > { %4856 = vmatpush3.xpose.msk.msra.mxu1 %vm780_vm2, %v761_v13  ;;  %v6189_v13 = vld [vmem:[#allocation2 + $0xf8] sm:$0xff] }
 0x19c   : > { %4857 = vmatprep.subr.msk.mxu1 %vm780_vm2, %v759_v16 }
 0x19d   : > { %v530_v31 = vpop.permute.xlu0 %529  ;;  %v538_v33 = vpop.permute.xlu1 %537  ;;  %v6172_v6 = vld [vmem:[#allocation2 + $0xf0] sm:$0xff]  ;;  %v6183_v10 = vld [vmem:[#allocation2 + $0xe8] sm:$0xff] }
 0x19e   : > { %572 = vst.msk [vmem:[#allocation2 + $0xb0] sm:$0xff] %vm484_vm1, %v530_v31  ;;  %576 = vst.msk [vmem:[#allocation2 + $0xd0] sm:$0xff] %vm484_vm1, %v538_v33 }
 0x19f   : > { %4858 = vmatpush3.xpose.msk.msra.mxu1 %vm780_vm2, %v759_v16 }
 0x1a0   : > { %4859 = vmatprep.subr.msk.mxu1 %vm780_vm2, %v757_v15 }
 0x1a1   : > { %v528_v34 = vpop.permute.xlu0 %527  ;;  %v536_v36 = vpop.permute.xlu1 %535  ;;  %v6160_v48 = vld [vmem:[#allocation2 + $0xe0] sm:$0xff]  ;;  %v6174_v7 = vld [vmem:[#allocation2 + $0xd8] sm:$0xff] }
 0x1a2   : > { %571 = vst.msk [vmem:[#allocation2 + $0xa8] sm:$0xff] %vm484_vm1, %v528_v34  ;;  %575 = vst.msk [vmem:[#allocation2 + $0xc8] sm:$0xff] %vm484_vm1, %v536_v36 }
 0x1a3   : > { %4860 = vmatpush3.xpose.msk.msra.mxu1 %vm780_vm2, %v757_v15 }
 0x1a4   : > { %4861 = vmatprep.subr.msk.mxu1 %vm780_vm2, %v755_v18 }
 0x1a5   : > { %v6151_v38 = vpop.permute.xlu0 %1172  ;;  %v534_v40 = vpop.permute.xlu1 %533  ;;  %v6153_v42 = vld [vmem:[#allocation2 + $0xd0] sm:$0xff] }
 0x1a6   : > { %574 = vst.msk [vmem:[#allocation2 + $0xc0] sm:$0xff] %vm484_vm1, %v534_v40  ;;  %1396 = vrot.lane.b32.xlu1 %v6153_v42, %s5786_s9 }
 0x1a7   : > { %4862 = vmatpush3.xpose.msk.msra.mxu1 %vm780_vm2, %v755_v18 }
 0x1a8   : > { %4863 = vmatprep.subr.msk.mxu1 %vm780_vm2, %v753_v17 }
 0x1a9   : > { %v526_v44 = vpop.permute.xlu0 %525  ;;  %v532_v46 = vpop.permute.xlu1 %531  ;;  %v6162_v50 = vld [vmem:[#allocation2 + $0xc8] sm:$0xff] }
 0x1aa   : > { %570 = vst.msk [vmem:[#allocation2 + $0xa0] sm:$0xff] %vm484_vm1, %v526_v44  ;;  %573 = vst.msk [vmem:[#allocation2 + $0xb8] sm:$0xff] %vm484_vm1, %v532_v46  ;;  %1400 = vrot.lane.b32.xlu1 %v6160_v48, %s5786_s9  ;;  %1394 = vrot.lane.b32.xlu0 %v6162_v50, %s5786_s9 }
 0x1ab   : > { %4864 = vmatpush3.xpose.msk.msra.mxu1 %vm780_vm2, %v753_v17 }
 0x1ac   : > { %4865 = vmatprep.subr.msk.mxu1 %vm780_vm2, %v751_v20 }
 0x1ad   : > { %v1169_v52 = vpop.permute.xlu0 %1168  ;;  %v1181_v5 = vpop.permute.xlu1 %1180 }
 0x1ae   : > { %1404 = vrot.lane.b32.xlu1 %v6172_v6, %s5786_s9  ;;  %1398 = vrot.lane.b32.xlu0 %v6174_v7, %s5786_s9 }
 0x1af   : > { %4893 = vmatprep.subr.mxu0 %v1181_v5  ;;  %4866 = vmatpush3.xpose.msk.msra.mxu1 %vm780_vm2, %v751_v20 }
 0x1b0   : > { %4894 = vmatpush3.msra.mxu0 %v1181_v5  ;;  %4867 = vmatprep.subr.msk.mxu1 %vm780_vm2, %v6128_v19 }
 0x1b1   : > { %v1167_v8 = vpop.permute.xlu0 %1166  ;;  %v1177_v9 = vpop.permute.xlu1 %1176  ;;  %v6198_v16 = vld [vmem:[#allocation2 + $0xb8] sm:$0xff] }
 0x1b2   : > { %1402 = vrot.lane.b32.xlu0 %v6183_v10, %s5786_s9 }
 0x1b3   : > { %4868 = vmatpush3.xpose.msk.msra.mxu1 %vm780_vm2, %v6128_v19  ;;  %v5789_v19 = vmov -inf  }
 0x1b5   : > { %v522_v11 = vpop.permute.xlu0 %521  ;;  %v1175_v12 = vpop.permute.xlu1 %1174 }
 0x1b6   : > { %568 = vst.msk [vmem:[#allocation2 + $0x90] sm:$0xff] %vm484_vm1, %v522_v11  ;;  %1406 = vrot.lane.b32.xlu0 %v6189_v13, %s5786_s9  ;;  %4870 = vmatmul.mubr.msk.f32.vlgmr.msra.gmra.mxu1 %vm780_vm2, %v6063_v4 }
 0x1b7   : > { %4872 = vmatprep.mubr.msk.f32.mxu1 %vm780_vm2, %v6051_v2 }
 0x1b9   : > { %v1161_v14 = vpop.permute.xlu0 %1160  ;;  %v1171_v15 = vpop.permute.xlu1 %1170 }
 0x1ba   : > { %1390 = vrot.lane.b32.xlu0 %v6198_v16, %s5786_s9  ;;  %4873 = vmatmul.mubr.msk.f32.gmra.mxu1 %vm780_vm2, %v6057_v3 }
 0x1bb   : > { %4875 = vmatprep.mubr.msk.f32.mxu1 %vm780_vm2, %v6043_v0 }
 0x1bd   : > { %v1159_v17 = vpop.permute.xlu0 %1158  ;;  %v524_v18 = vpop.permute.xlu1 %523 }
 0x1be   : > { %569 = vst.msk [vmem:[#allocation2 + $0x98] sm:$0xff] %vm484_vm1, %v524_v18  ;;  %4876 = vmatmul.mubr.msk.f32.gmra.mxu1 %vm780_vm2, %v6049_v1 }
 0x1bf   : > { %4878 = vmatprep.mubr.msk.f32.mxu1 %vm780_vm2, %v6035_v62 }
 0x1c1   : > { %v518_v2 = vpop.permute.xlu0 %517  ;;  %v1165_v4 = vpop.permute.xlu1 %1164 }
 0x1c2   : > { %566 = vst.msk [vmem:[#allocation2 + $0x80] sm:$0xff] %vm484_vm1, %v518_v2  ;;  %4879 = vmatmul.mubr.msk.f32.gmra.mxu1 %vm780_vm2, %v6041_v63  ;;  %v712_v63 = vlaneseq }
 0x1c3   : > { %4881 = vmatprep.mubr.msk.f32.mxu1 %vm780_vm2, %v6027_v60 }
 0x1c4   : > { %v713_v3 = vand.u32 127, %v712_v63 }
 0x1c5   : > { %v1163_v0 = vpop.permute.xlu1 %1162 }
 0x1c6   : > { %4882 = vmatmul.mubr.msk.f32.gmra.mxu1 %vm780_vm2, %v6033_v61  ;;  %vm714_vm3 = vcmp.lt.s32.totalorder %v713_v3, 8  ;;  %v6300_v3 = vld [vmem:[#allocation2 + $0xa8] sm:$0xff] }
 0x1c7   : > { %4884 = vmatprep.mubr.msk.f32.mxu1 %vm780_vm2, %v6019_v58  ;;  %v6243_v20 = vsel %vm714_vm3, 0.0, %v5789_v19  ;;  %v6305_v19 = vld [vmem:[#allocation2 + $0xa0] sm:$0xff] }
 0x1c9   : > { %v520_v1 = vpop.permute.xlu1 %519 }
 0x1ca   : > { %567 = vst.msk [vmem:[#allocation2 + $0x88] sm:$0xff] %vm484_vm1, %v520_v1  ;;  %4885 = vmatmul.mubr.msk.f32.gmra.mxu1 %vm780_vm2, %v6025_v59 }
 0x1cb   : > { %4887 = vmatprep.mubr.msk.f32.mxu1 %vm780_vm2, %v6011_v56 }
 0x1cd   : > { %v1157_v62 = vpop.permute.xlu1 %1156 }
 0x1ce   : > { %4888 = vmatmul.mubr.msk.f32.gmra.mxu1 %vm780_vm2, %v6005_v54  ;;  %v1153_v54 = vpop.permute.xlu0 %1152 }
 0x1cf   : > { %4890 = vmatprep.mubr.msk.f32.mxu1 %vm780_vm2, %v6017_v57 }
 0x1d1   : > { %v1155_v60 = vpop.permute.xlu1 %1154 }
 0x1d2   : > { %4891 = vmatmul.mubr.msk.f32.gmra.mxu1 %vm780_vm2, %v6009_v55 }
 0x1d5   : > { %v1151_v58 = vpop.permute.xlu1 %1150 }
 0x1d9   : > { %v1179_v61 = vpop.permute.xlu1 %1178 }
 0x1da   : > { %4895 = vmatprep.subr.mxu0 %v1179_v61 }
 0x1db   : > { %4896 = vmatpush3.msra.mxu0 %v1179_v61 }
 0x1dc   : > { %4897 = vmatprep.subr.mxu0 %v1177_v9 }
 0x1dd   : > { %4898 = vmatpush3.msra.mxu0 %v1177_v9  ;;  %v6262_v9 = vld [vmem:[#allocation2 + $0xc0] sm:$0xff] }
 0x1de   : > { %4899 = vmatprep.subr.mxu0 %v1175_v12 }
 0x1df   : > { %4900 = vmatpush3.msra.mxu0 %v1175_v12 }
 0x1e0   : > { %4901 = vmatprep.subr.mxu0 %v6151_v38 }
 0x1e1   : > { %4902 = vmatpush3.msra.mxu0 %v6151_v38 }
 0x1e2   : > { %4903 = vmatprep.subr.mxu0 %v1171_v15 }
 0x1e3   : > { %4904 = vmatpush3.msra.mxu0 %v1171_v15 }
 0x1e4   : > { %4905 = vmatprep.subr.mxu0 %v1169_v52 }
 0x1e5   : > { %4906 = vmatpush3.msra.mxu0 %v1169_v52 }
 0x1e6   : > { %4907 = vmatprep.subr.mxu0 %v1167_v8 }
 0x1e7   : > { %4908 = vmatpush3.msra.mxu0 %v1167_v8 }
 0x1e8   : > { %4909 = vmatprep.subr.mxu0 %v1165_v4 }
 0x1e9   : > { %4910 = vmatpush3.msra.mxu0 %v1165_v4 }
 0x1ea   : > { %4911 = vmatprep.subr.mxu0 %v1163_v0 }
 0x1eb   : > { %4912 = vmatpush3.msra.mxu0 %v1163_v0 }
 0x1ec   : > { %4913 = vmatprep.subr.mxu0 %v1161_v14 }
 0x1ed   : > { %4914 = vmatpush3.msra.mxu0 %v1161_v14 }
 0x1ee   : > { %4915 = vmatprep.subr.mxu0 %v1159_v17 }
 0x1ef   : > { %4916 = vmatpush3.msra.mxu0 %v1159_v17 }
 0x1f0   : > { %4917 = vmatprep.subr.mxu0 %v1157_v62 }
 0x1f1   : > { %4918 = vmatpush3.msra.mxu0 %v1157_v62 }
 0x1f2   : > { %4919 = vmatprep.subr.mxu0 %v1155_v60 }
 0x1f3   : > { %4920 = vmatpush3.msra.mxu0 %v1155_v60 }
 0x1f4   : > { %4921 = vmatprep.subr.mxu0 %v1153_v54 }
 0x1f5   : > { %4922 = vmatpush3.msra.mxu0 %v1153_v54 }
 0x1f6   : > { %4923 = vmatprep.subr.mxu0 %v1151_v58 }
 0x1f7   : > { %4924 = vmatpush3.msra.mxu0 %v1151_v58 }
 0x21c   : > { %v6233_v55 = vpop.permute.xlu0 %1394 }
 0x220   : > { %v6235_v56 = vpop.permute.xlu0 %1398 }
 0x224   : > { %v6237_v57 = vpop.permute.xlu0 %1402 }
 0x228   : > { %v6239_v59 = vpop.permute.xlu0 %1406 }
 0x229   : > { %4949 = vmatprep.subr.msk.mxu0 %vm780_vm2, %v6239_v59 }
 0x276   : > { %v4871_v21 = vpop.f32.mrf.mxu1 }
 0x277   : > { %v917_v23 = vadd.f32 %v4871_v21, %v6243_v20  ;;  %v6309_v21 = vld [vmem:[#allocation2 + $0x98] sm:$0xff] }
 0x278   : > { %v911_v25 = vpop.f32.mrf.mxu1 }
 0x279   : > { %v6247_v27 = vadd.f32 %v911_v25, %v6243_v20  ;;  %992 = vmax.xlane.f32.xlu1 %v917_v23  ;;  %v6313_v25 = vpop.permute.xlu1 %1396 }
 0x27a   : > { %v4874_v29 = vpop.f32.mrf.mxu1 }
 0x27b   : > { %990 = vmax.xlane.f32.xlu0 %v6247_v27  ;;  %v6251_v33 = vadd.f32 %v4874_v29, %v6243_v20 }
 0x27c   : > { %v921_v31 = vpop.f32.mrf.mxu1 }
 0x27d   : > { %v922_v38 = vadd.f32 %v921_v31, %v6243_v20  ;;  %v6315_v29 = vpop.permute.xlu1 %1400 }
 0x27e   : > { %v4877_v34 = vpop.f32.mrf.mxu1 }
 0x27f   : > { %996 = vmax.xlane.f32.xlu0 %v6251_v33  ;;  %v6256_v46 = vadd.f32 %v4877_v34, %v6243_v20  ;;  %v6319_v34 = vpop.permute.xlu0 %1390 }
 0x280   : > { %v931_v36 = vpop.f32.mrf.mxu1 }
 0x281   : > { %v932_v58 = vadd.f32 %v931_v36, %v6243_v20  ;;  %v6317_v31 = vpop.permute.xlu1 %1404 }
 0x282   : > { %v4880_v40 = vpop.f32.mrf.mxu1 }
 0x283   : > { %994 = vmax.xlane.f32.xlu0 %v922_v38  ;;  %v6260_v8 = vadd.f32 %v4880_v40, %v6243_v20 }
 0x284   : > { %v941_v44 = vpop.f32.mrf.mxu1 }
 0x285   : > { %v942_v61 = vadd.f32 %v941_v44, %v6243_v20 }
 0x286   : > { %v4883_v52 = vpop.f32.mrf.mxu1 }
 0x287   : > { %1000 = vmax.xlane.f32.xlu0 %v6256_v46  ;;  %v6268_v12 = vadd.f32 %v4883_v52, %v6243_v20 }
 0x288   : > { %v951_v5 = vpop.f32.mrf.mxu1 }
 0x289   : > { %v6294_v54 = vadd.f32 %v951_v5, %v6243_v20 }
 0x28a   : > { %1392 = vrot.lane.b32.xlu1 %v6262_v9, %s5786_s9  ;;  %v4886_v11 = vpop.f32.mrf.mxu1 }
 0x28b   : > { %1004 = vmax.xlane.f32.xlu0 %v6260_v8  ;;  %v6272_v15 = vadd.f32 %v4886_v11, %v6243_v20 }
 0x28c   : > { %v961_v14 = vpop.f32.mrf.mxu1 }
 0x28d   : > { %v6276_v18 = vadd.f32 %v961_v14, %v6243_v20 }
 0x28e   : > { %v4889_v17 = vpop.f32.mrf.mxu1 }
 0x28f   : > { %1008 = vmax.xlane.f32.xlu0 %v6268_v12  ;;  %v6280_v4 = vadd.f32 %v4889_v17, %v6243_v20 }
 0x290   : > { %v971_v2 = vpop.f32.mrf.mxu1 }
 0x291   : > { %v6298_v63 = vadd.f32 %v971_v2, %v6243_v20 }
 0x292   : > { %v4892_v0 = vpop.f32.mrf.mxu1 }
 0x293   : > { %1012 = vmax.xlane.f32.xlu0 %v6272_v15  ;;  %v6284_v1 = vadd.f32 %v4892_v0, %v6243_v20 }
 0x294   : > { %v981_v62 = vpop.f32.mrf.mxu1 }
 0x295   : > { %v6288_v60 = vadd.f32 %v981_v62, %v6243_v20 }
 0x297   : > { %1010 = vmax.xlane.f32.xlu0 %v6276_v18 }
 0x29b   : > { %1016 = vmax.xlane.f32.xlu0 %v6280_v4 }
 0x29f   : > { %1020 = vmax.xlane.f32.xlu0 %v6284_v1 }
 0x2a3   : > { %1018 = vmax.xlane.f32.xlu0 %v6288_v60 }
 0x2ae   : > { %998 = vmax.xlane.f32.xlu1 %v932_v58 }
 0x2b2   : > { %1002 = vmax.xlane.f32.xlu1 %v942_v61 }
 0x2b6   : > { %1006 = vmax.xlane.f32.xlu1 %v6294_v54 }
 0x2b9   : > { %1386 = vrot.lane.b32.xlu0 %v6300_v3, %s5786_s9 }
 0x2ba   : > { %1014 = vmax.xlane.f32.xlu1 %v6298_v63 }
 0x2bd   : > { %1384 = vrot.lane.b32.xlu0 %v6305_v19, %s5786_s9 }
 0x2c1   : > { %1382 = vrot.lane.b32.xlu0 %v6309_v21, %s5786_s9 }
 0x302   : > { %v993_v36 = vpop.xlane.xlu1 %992 }
 0x303   : > { %v1023_v40 = vsub.f32 %v917_v23, %v993_v36  ;;  %v6331_v36 = vld [vmem:[#allocation2 + $0xb0] sm:$0xff] }
 0x304   : > { %v991_v44 = vpop.xlane.xlu0 %990 }
 0x305   : > { %v1040_v52 = vmul.f32 1.442695, %v1023_v40  ;;  %v1022_v5 = vsub.f32 %v6247_v27, %v991_v44 }
 0x306   : > { %v6335_v44 = vpop.permute.xlu1 %1392 }
 0x307   : > { %5468 = vpow2.f32 %v1040_v52  ;;  %v1038_v11 = vmul.f32 1.442695, %v1022_v5  ;;  %v6338_v5 = vld [vmem:[#allocation2 + $0x90] sm:$0xff] }
 0x308   : > { %v997_v14 = vpop.xlane.xlu0 %996 }
 0x309   : > { %5470 = vpow2.f32 %v1038_v11  ;;  %v1025_v52 = vsub.f32 %v6251_v33, %v997_v14 }
 0x30c   : > { %v995_v17 = vpop.xlane.xlu0 %994 }
 0x30d   : > { %v1024_v2 = vsub.f32 %v922_v38, %v995_v17 }
 0x30f   : > { %v1042_v0 = vmul.f32 1.442695, %v1024_v2  ;;  %v1044_v2 = vmul.f32 1.442695, %v1025_v52 }
 0x310   : > { %v1001_v27 = vpop.xlane.xlu0 %1000 }
 0x311   : > { %5472 = vpow2.f32 %v1042_v0  ;;  %v1027_v0 = vsub.f32 %v6256_v46, %v1001_v27 }
 0x312   : > { %5474 = vpow2.f32 %v1044_v2 }
 0x313   : > { %v1048_v28 = vmul.f32 1.442695, %v1027_v0 }
 0x314   : > { %v6322_v62 = vpop.eup %5468  ;;  %v1005_v38 = vpop.xlane.xlu0 %1004 }
 0x315   : > { %1072 = vadd.xlane.f32.xlu1 %v6322_v62  ;;  %5476 = vpow2.f32 %v1048_v28  ;;  %v1029_v35 = vsub.f32 %v6260_v8, %v1005_v38 }
 0x316   : > { %v6325_v22 = vpop.eup %5470 }
 0x317   : > { %1070 = vadd.xlane.f32.xlu0 %v6325_v22  ;;  %v1052_v41 = vmul.f32 1.442695, %v1029_v35 }
 0x318   : > { %v1009_v40 = vpop.xlane.xlu0 %1008 }
 0x319   : > { %v1031_v43 = vsub.f32 %v6268_v12, %v1009_v40 }
 0x31c   : > { %v1013_v11 = vpop.xlane.xlu0 %1012 }
 0x31e   : > { %v6328_v23 = vpop.eup %5472 }
 0x31f   : > { %1074 = vadd.xlane.f32.xlu0 %v6328_v23  ;;  %v6348_v8 = vpop.eup %5474 }
 0x320   : > { %v1011_v24 = vpop.xlane.xlu0 %1010 }
 0x321   : > { %v1032_v37 = vsub.f32 %v6276_v18, %v1011_v24 }
 0x323   : > { %v1058_v46 = vmul.f32 1.442695, %v1032_v37  ;;  %v6353_v37 = vpop.eup %5476 }
 0x324   : > { %v1017_v14 = vpop.xlane.xlu0 %1016 }
 0x325   : > { %v1035_v27 = vsub.f32 %v6280_v4, %v1017_v14  ;;  %v6391_v14 = vld [vmem:[#allocation2 + $0x88] sm:$0xff] }
 0x326   : > { %1388 = vrot.lane.b32.xlu1 %v6331_v36, %s5786_s9 }
 0x328   : > { %v1021_v2 = vpop.xlane.xlu0 %1020 }
 0x329   : > { %v1037_v24 = vsub.f32 %v6284_v1, %v1021_v2 }
 0x32c   : > { %v1019_v4 = vpop.xlane.xlu0 %1018 }
 0x335   : > { %1380 = vrot.lane.b32.xlu0 %v6338_v5, %s5786_s9 }
 0x337   : > { %v999_v17 = vpop.xlane.xlu1 %998 }
 0x338   : > { %v1026_v30 = vsub.f32 %v932_v58, %v999_v17 }
 0x33a   : > { %v1046_v33 = vmul.f32 1.442695, %v1026_v30  ;;  %v1064_v30 = vmul.f32 1.442695, %v1035_v27 }
 0x33b   : > { %v1003_v26 = vpop.xlane.xlu1 %1002 }
 0x33c   : > { %v1028_v32 = vsub.f32 %v942_v61, %v1003_v26  ;;  %5478 = vpow2.f32 %v1046_v33  ;;  %v1056_v26 = vmul.f32 1.442695, %v1031_v43 }
 0x33e   : > { %v1050_v39 = vmul.f32 1.442695, %v1028_v32  ;;  %v1033_v32 = vsub.f32 %v6272_v15, %v1013_v11  ;;  %v1036_v15 = vsub.f32 %v6288_v60, %v1019_v4 }
 0x33f   : > { %v1007_v52 = vpop.xlane.xlu1 %1006 }
 0x340   : > { %5480 = vpow2.f32 %v1050_v39  ;;  %v1030_v28 = vsub.f32 %v6294_v54, %v1007_v52  ;;  %v1060_v43 = vmul.f32 1.442695, %v1033_v32  ;;  %v6397_v52 = vld [vmem:[#allocation2 + $0x80] sm:$0xff] }
 0x341   : > { %5482 = vpow2.f32 %v1052_v41  ;;  %v1068_v41 = vmul.f32 1.442695, %v1037_v24 }
 0x342   : > { %5484 = vpow2.f32 %v1058_v46  ;;  %v1054_v35 = vmul.f32 1.442695, %v1030_v28  ;;  %v1387_v46 = vpop.permute.xlu0 %1386 }
 0x343   : > { %5486 = vpow2.f32 %v1056_v26  ;;  %v1015_v39 = vpop.xlane.xlu1 %1014 }
 0x344   : > { %5488 = vpow2.f32 %v1064_v30  ;;  %v1034_v12 = vsub.f32 %v6298_v63, %v1015_v39  ;;  %v1066_v63 = vmul.f32 1.442695, %v1036_v15 }
 0x345   : > { %5490 = vpow2.f32 %v1054_v35 }
 0x346   : > { %5492 = vpow2.f32 %v1068_v41  ;;  %v1062_v58 = vmul.f32 1.442695, %v1034_v12  ;;  %v1385_v27 = vpop.permute.xlu0 %1384 }
 0x347   : > { %5494 = vpow2.f32 %v1060_v43 }
 0x348   : > { %5496 = vpow2.f32 %v1062_v58 }
 0x349   : > { %v6357_v18 = vpop.eup %5478  ;;  %5498 = vpow2.f32 %v1066_v63 }
 0x34a   : > { %1076 = vadd.xlane.f32.xlu1 %v6348_v8  ;;  %v1383_v2 = vpop.permute.xlu0 %1382 }
 0x34d   : > { %v6360_v1 = vpop.eup %5480 }
 0x34e   : > { %1080 = vadd.xlane.f32.xlu1 %v6353_v37  ;;  %v6364_v61 = vpop.eup %5482 }
 0x34f   : > { %v6367_v54 = vpop.eup %5484 }
 0x350   : > { %v6370_v38 = vpop.eup %5486 }
 0x351   : > { %v6373_v40 = vpop.eup %5488 }
 0x352   : > { %1078 = vadd.xlane.f32.xlu1 %v6357_v18  ;;  %v6376_v60 = vpop.eup %5490 }
 0x353   : > { %v6379_v11 = vpop.eup %5492 }
 0x354   : > { %1082 = vadd.xlane.f32.xlu0 %v6360_v1  ;;  %v6382_v17 = vpop.eup %5494 }
 0x355   : > { %v6385_v0 = vpop.eup %5496 }
 0x356   : > { %1084 = vadd.xlane.f32.xlu1 %v6364_v61  ;;  %v6388_v33 = vpop.eup %5498 }
 0x358   : > { %1090 = vadd.xlane.f32.xlu0 %v6367_v54 }
 0x35a   : > { %1088 = vadd.xlane.f32.xlu1 %v6370_v38 }
 0x35c   : > { %1096 = vadd.xlane.f32.xlu0 %v6373_v40 }
 0x35e   : > { %1086 = vadd.xlane.f32.xlu1 %v6376_v60 }
 0x360   : > { %1100 = vadd.xlane.f32.xlu0 %v6379_v11 }
 0x362   : > { %1092 = vadd.xlane.f32.xlu1 %v6382_v17 }
 0x366   : > { %1094 = vadd.xlane.f32.xlu1 %v6385_v0 }
 0x36a   : > { %1098 = vadd.xlane.f32.xlu1 %v6388_v33 }
 0x376   : > { %1378 = vrot.lane.b32.xlu0 %v6391_v14, %s5786_s9 }
 0x37a   : > { %1806 = vrot.lane.b32.xlu0 %v6172_v6, %s5788_s11 }
 0x37b   : > { %1376 = vrot.lane.b32.xlu1 %v6397_v52, %s5786_s9 }
 0x37e   : > { %1802 = vrot.lane.b32.xlu0 %v6160_v48, %s5788_s11 }
 0x37f   : > { %1808 = vrot.lane.b32.xlu1 %v6189_v13, %s5788_s11 }
 0x382   : > { %1796 = vrot.lane.b32.xlu0 %v6162_v50, %s5788_s11 }
 0x383   : > { %1804 = vrot.lane.b32.xlu1 %v6183_v10, %s5788_s11 }
 0x386   : > { %1792 = vrot.lane.b32.xlu0 %v6198_v16, %s5788_s11 }
 0x387   : > { %1800 = vrot.lane.b32.xlu1 %v6174_v7, %s5788_s11 }
 0x38a   : > { %1788 = vrot.lane.b32.xlu0 %v6300_v3, %s5788_s11 }
 0x38b   : > { %1798 = vrot.lane.b32.xlu1 %v6153_v42, %s5788_s11 }
 0x38f   : > { %1794 = vrot.lane.b32.xlu1 %v6262_v9, %s5788_s11 }
 0x393   : > { %1790 = vrot.lane.b32.xlu1 %v6331_v36, %s5788_s11 }
 0x397   : > { %1786 = vrot.lane.b32.xlu1 %v6305_v19, %s5788_s11 }
 0x39e   : > { %v1073_v26 = vpop.xlane.xlu1 %1072 }
 0x39f   : > { %5500 = vrcp.f32 %v1073_v26 }
 0x3a0   : > { %v1071_v28 = vpop.xlane.xlu0 %1070 }
 0x3a1   : > { %5502 = vrcp.f32 %v1071_v28 }
 0x3a8   : > { %v1075_v30 = vpop.xlane.xlu0 %1074 }
 0x3a9   : > { %5504 = vrcp.f32 %v1075_v30 }
 0x3ac   : > { %v5501_v24 = vpop.eup %5500 }
 0x3ad   : > { %v1119_v32 = vmul.f32 %v5501_v24, %v6322_v62 }
 0x3ae   : > { %v5503_v35 = vpop.eup %5502 }
 0x3af   : > { %v1118_v39 = vmul.f32 %v5503_v35, %v6325_v22  ;;  %1135 = vst [vmem:[%s6428_s14 + $0x8] sm:$0xff] %v1119_v32 }
 0x3b1   : > { %1134 = vst [vmem:[%s6428_s14] sm:$0xff] %v1118_v39  ;;  %4925 = vmatprep.mubr.f32.mxu0 %v1118_v39 }
 0x3b2   : > { %4926 = vmatmul.mubr.f32.vlgmr.msra.gmra.mxu0 %v1119_v32 }
 0x3b3   : > { %4950 = vmatpush3.xpose.msk.msra.mxu0 %vm780_vm2, %v6239_v59  ;;  %v1381_v59 = vpop.permute.xlu0 %1380 }
 0x3b4   : > { %4951 = vmatprep.subr.msk.mxu0 %vm780_vm2, %v6317_v31 }
 0x3b6   : > { %v5505_v41 = vpop.eup %5504 }
 0x3b7   : > { %4952 = vmatpush3.xpose.msk.msra.mxu0 %vm780_vm2, %v6317_v31  ;;  %v1120_v22 = vmul.f32 %v5505_v41, %v6328_v23 }
 0x3b8   : > { %4953 = vmatprep.subr.msk.mxu0 %vm780_vm2, %v6237_v57 }
 0x3b9   : > { %1136 = vst [vmem:[%s6428_s14 + $0x10] sm:$0xff] %v1120_v22  ;;  %4928 = vmatprep.mubr.f32.mxu0 %v1120_v22 }
 0x3bb   : > { %4954 = vmatpush3.xpose.msk.msra.mxu0 %vm780_vm2, %v6237_v57  ;;  %v1389_v57 = vpop.permute.xlu1 %1388 }
 0x3bc   : > { %4955 = vmatprep.subr.msk.mxu0 %vm780_vm2, %v6315_v29 }
 0x3bf   : > { %4956 = vmatpush3.xpose.msk.msra.mxu0 %vm780_vm2, %v6315_v29 }
 0x3c0   : > { %4957 = vmatprep.subr.msk.mxu0 %vm780_vm2, %v6235_v56 }
 0x3c3   : > { %4958 = vmatpush3.xpose.msk.msra.mxu0 %vm780_vm2, %v6235_v56 }
 0x3c4   : > { %4959 = vmatprep.subr.msk.mxu0 %vm780_vm2, %v6313_v25 }
 0x3c7   : > { %4960 = vmatpush3.xpose.msk.msra.mxu0 %vm780_vm2, %v6313_v25 }
 0x3c8   : > { %4961 = vmatprep.subr.msk.mxu0 %vm780_vm2, %v6233_v55 }
 0x3cb   : > { %4962 = vmatpush3.xpose.msk.msra.mxu0 %vm780_vm2, %v6233_v55 }
 0x3cc   : > { %4963 = vmatprep.subr.msk.mxu0 %vm780_vm2, %v6335_v44 }
 0x3cf   : > { %4964 = vmatpush3.xpose.msk.msra.mxu0 %vm780_vm2, %v6335_v44 }
 0x3d0   : > { %4965 = vmatprep.subr.msk.mxu0 %vm780_vm2, %v6319_v34 }
 0x3d3   : > { %4966 = vmatpush3.xpose.msk.msra.mxu0 %vm780_vm2, %v6319_v34  ;;  %v1077_v56 = vpop.xlane.xlu1 %1076 }
 0x3d4   : > { %5506 = vrcp.f32 %v1077_v56  ;;  %4967 = vmatprep.subr.msk.mxu0 %vm780_vm2, %v1389_v57 }
 0x3d7   : > { %4968 = vmatpush3.xpose.msk.msra.mxu0 %vm780_vm2, %v1389_v57  ;;  %v1081_v55 = vpop.xlane.xlu1 %1080 }
 0x3d8   : > { %5508 = vrcp.f32 %v1081_v55  ;;  %4969 = vmatprep.subr.msk.mxu0 %vm780_vm2, %v1387_v46 }
 0x3db   : > { %4970 = vmatpush3.xpose.msk.msra.mxu0 %vm780_vm2, %v1387_v46  ;;  %v1079_v25 = vpop.xlane.xlu1 %1078 }
 0x3dc   : > { %5510 = vrcp.f32 %v1079_v25  ;;  %4971 = vmatprep.subr.msk.mxu0 %vm780_vm2, %v1385_v27 }
 0x3dd   : > { %v1083_v29 = vpop.xlane.xlu0 %1082 }
 0x3de   : > { %5512 = vrcp.f32 %v1083_v29 }
 0x3df   : > { %4972 = vmatpush3.xpose.msk.msra.mxu0 %vm780_vm2, %v1385_v27  ;;  %v1085_v31 = vpop.xlane.xlu1 %1084 }
 0x3e0   : > { %5514 = vrcp.f32 %v1085_v31  ;;  %4973 = vmatprep.subr.msk.mxu0 %vm780_vm2, %v1383_v2 }
 0x3e1   : > { %v5507_v34 = vpop.eup %5506  ;;  %v1091_v62 = vpop.xlane.xlu0 %1090 }
 0x3e2   : > { %5516 = vrcp.f32 %v1091_v62  ;;  %v1121_v23 = vmul.f32 %v5507_v34, %v6348_v8 }
 0x3e3   : > { %4974 = vmatpush3.xpose.msk.msra.mxu0 %vm780_vm2, %v1383_v2  ;;  %v1089_v44 = vpop.xlane.xlu1 %1088 }
 0x3e4   : > { %5518 = vrcp.f32 %v1089_v44  ;;  %4975 = vmatprep.subr.msk.mxu0 %vm780_vm2, %v1381_v59  ;;  %1137 = vst [vmem:[%s6428_s14 + $0x18] sm:$0xff] %v1121_v23  ;;  %4929 = vmatmul.mubr.f32.gmra.mxu0 %v1121_v23 }
 0x3e5   : > { %v5509_v43 = vpop.eup %5508  ;;  %v1097_v12 = vpop.xlane.xlu0 %1096 }
 0x3e6   : > { %5520 = vrcp.f32 %v1097_v12  ;;  %v1123_v4 = vmul.f32 %v5509_v43, %v6353_v37 }
 0x3e7   : > { %4976 = vmatpush3.xpose.msk.msra.mxu0 %vm780_vm2, %v1381_v59  ;;  %v1087_v15 = vpop.xlane.xlu1 %1086 }
 0x3e8   : > { %5522 = vrcp.f32 %v1087_v15  ;;  %1139 = vst [vmem:[%s6428_s14 + $0x28] sm:$0xff] %v1123_v4 }
 0x3e9   : > { %v5511_v8 = vpop.eup %5510  ;;  %v1101_v58 = vpop.xlane.xlu0 %1100 }
 0x3ea   : > { %5524 = vrcp.f32 %v1101_v58  ;;  %v1122_v63 = vmul.f32 %v5511_v8, %v6357_v18 }
 0x3eb   : > { %v5513_v46 = vpop.eup %5512  ;;  %v1093_v27 = vpop.xlane.xlu1 %1092 }
 0x3ec   : > { %5526 = vrcp.f32 %v1093_v27  ;;  %1138 = vst [vmem:[%s6428_s14 + $0x20] sm:$0xff] %v1122_v63  ;;  %4931 = vmatprep.mubr.f32.mxu0 %v1122_v63  ;;  %v1124_v2 = vmul.f32 %v5513_v46, %v6360_v1 }
 0x3ed   : > { %v5515_v37 = vpop.eup %5514  ;;  %4932 = vmatmul.mubr.f32.gmra.mxu0 %v1123_v4  ;;  %v1379_v26 = vpop.permute.xlu0 %1378 }
 0x3ee   : > { %1140 = vst [vmem:[%s6428_s14 + $0x30] sm:$0xff] %v1124_v2  ;;  %4934 = vmatprep.mubr.f32.mxu0 %v1124_v2  ;;  %4977 = vmatprep.subr.msk.mxu0 %vm780_vm2, %v1379_v26  ;;  %v1125_v28 = vmul.f32 %v5515_v37, %v6364_v61 }
 0x3ef   : > { %v5517_v18 = vpop.eup %5516  ;;  %v1095_v30 = vpop.xlane.xlu1 %1094  ;;  %4978 = vmatpush3.xpose.msk.msra.mxu0 %vm780_vm2, %v1379_v26 }
 0x3f0   : > { %5528 = vrcp.f32 %v1095_v30  ;;  %1141 = vst [vmem:[%s6428_s14 + $0x38] sm:$0xff] %v1125_v28  ;;  %v1128_v1 = vmul.f32 %v5517_v18, %v6367_v54 }
 0x3f1   : > { %v5519_v24 = vpop.eup %5518  ;;  %4935 = vmatmul.mubr.f32.gmra.mxu0 %v1125_v28 }
 0x3f2   : > { %v1127_v32 = vmul.f32 %v5519_v24, %v6370_v38  ;;  %1144 = vst [vmem:[%s6428_s14 + $0x50] sm:$0xff] %v1128_v1  ;;  %v1343_v38 = vld [vmem:[%s7916_s3] sm:$0xff] }
 0x3f3   : > { %v5521_v35 = vpop.eup %5520  ;;  %v1099_v39 = vpop.xlane.xlu1 %1098 }
 0x3f4   : > { %5530 = vrcp.f32 %v1099_v39  ;;  %1143 = vst [vmem:[%s6428_s14 + $0x48] sm:$0xff] %v1127_v32  ;;  %v1131_v61 = vmul.f32 %v5521_v35, %v6373_v40  ;;  %v1807_v40 = vpop.permute.xlu0 %1806 }
 0x3f5   : > { %v5523_v41 = vpop.eup %5522 }
 0x3f6   : > { %v1126_v22 = vmul.f32 %v5523_v41, %v6376_v60  ;;  %1147 = vst [vmem:[%s6428_s14 + $0x68] sm:$0xff] %v1131_v61 }
 0x3f7   : > { %v5525_v57 = vpop.eup %5524  ;;  %v1377_v56 = vpop.permute.xlu1 %1376 }
 0x3f8   : > { %1142 = vst [vmem:[%s6428_s14 + $0x40] sm:$0xff] %v1126_v22  ;;  %4937 = vmatprep.mubr.f32.mxu0 %v1126_v22  ;;  %4979 = vmatprep.subr.msk.mxu0 %vm780_vm2, %v1377_v56  ;;  %v1133_v54 = vmul.f32 %v5525_v57, %v6379_v11  ;;  %v1803_v29 = vpop.permute.xlu0 %1802 }
 0x3f9   : > { %v5527_v55 = vpop.eup %5526  ;;  %4938 = vmatmul.mubr.f32.gmra.mxu0 %v1127_v32 }
 0x3fa   : > { %4980 = vmatpush3.xpose.msk.msra.mxu0 %vm780_vm2, %v1377_v56  ;;  %4940 = vmatprep.mubr.f32.mxu0 %v1128_v1  ;;  %v1129_v60 = vmul.f32 %v5527_v55, %v6382_v17  ;;  %1149 = vst [vmem:[%s6428_s14 + $0x78] sm:$0xff] %v1133_v54 }
 0x3fb   : > { %v1809_v59 = vpop.permute.xlu1 %1808  ;;  %5087 = vmatprep.subr.mxu0 %v1343_v38 }
 0x3fc   : > { %5005 = vmatprep.subr.mxu1 %v1809_v59  ;;  %1145 = vst [vmem:[%s6428_s14 + $0x58] sm:$0xff] %v1129_v60  ;;  %v1797_v23 = vpop.permute.xlu0 %1796 }
 0x3fd   : > { %v5529_v25 = vpop.eup %5528  ;;  %4941 = vmatmul.mubr.f32.gmra.mxu0 %v1129_v60  ;;  %5006 = vmatpush3.msra.mxu1 %v1809_v59 }
 0x3fe   : > { %5007 = vmatprep.subr.mxu1 %v1807_v40  ;;  %v1130_v11 = vmul.f32 %v5529_v25, %v6385_v0 }
 0x3ff   : > { %v1805_v31 = vpop.permute.xlu1 %1804  ;;  %5008 = vmatpush3.msra.mxu1 %v1807_v40 }
 0x400   : > { %1146 = vst [vmem:[%s6428_s14 + $0x60] sm:$0xff] %v1130_v11  ;;  %4943 = vmatprep.mubr.f32.mxu0 %v1130_v11  ;;  %5009 = vmatprep.subr.mxu1 %v1805_v31 }
 0x401   : > { %v5531_v34 = vpop.eup %5530  ;;  %4944 = vmatmul.mubr.f32.gmra.mxu0 %v1131_v61  ;;  %5010 = vmatpush3.msra.mxu1 %v1805_v31 }
 0x402   : > { %5011 = vmatprep.subr.mxu1 %v1803_v29  ;;  %v1132_v17 = vmul.f32 %v5531_v34, %v6388_v33  ;;  %v1793_v33 = vpop.permute.xlu0 %1792 }
 0x403   : > { %v1801_v62 = vpop.permute.xlu1 %1800  ;;  %5012 = vmatpush3.msra.mxu1 %v1803_v29 }
 0x404   : > { %1148 = vst [vmem:[%s6428_s14 + $0x70] sm:$0xff] %v1132_v17  ;;  %4946 = vmatprep.mubr.f32.mxu0 %v1132_v17  ;;  %5013 = vmatprep.subr.mxu1 %v1801_v62 }
 0x405   : > { %4947 = vmatmul.mubr.f32.gmra.mxu0 %v1133_v54  ;;  %5014 = vmatpush3.msra.mxu1 %v1801_v62 }
 0x406   : > { %4981 = vmatprep.mubr.msk.f32.mxu0 %vm780_vm2, %v6397_v52  ;;  %v1789_v12 = vpop.permute.xlu0 %1788 }
 0x407   : > { %v1799_v0 = vpop.permute.xlu1 %1798 }
 0x408   : > { %5015 = vmatprep.subr.mxu1 %v1799_v0 }
 0x409   : > { %4982 = vmatmul.mubr.msk.f32.vlgmr.msra.gmra.mxu0 %vm780_vm2, %v6391_v14  ;;  %5016 = vmatpush3.msra.mxu1 %v1799_v0 }
 0x40a   : > { %4984 = vmatprep.mubr.msk.f32.mxu0 %vm780_vm2, %v6338_v5  ;;  %5017 = vmatprep.subr.mxu1 %v1797_v23 }
 0x40b   : > { %v1795_v44 = vpop.permute.xlu1 %1794  ;;  %5018 = vmatpush3.msra.mxu1 %v1797_v23  ;;  %5088 = vmatpush3.msra.mxu0 %v1343_v38 }
 0x40c   : > { %5019 = vmatprep.subr.mxu1 %v1795_v44 }
 0x40d   : > { %4985 = vmatmul.mubr.msk.f32.gmra.mxu0 %vm780_vm2, %v6309_v21  ;;  %5020 = vmatpush3.msra.mxu1 %v1795_v44 }
 0x40e   : > { %4987 = vmatprep.mubr.msk.f32.mxu0 %vm780_vm2, %v6305_v19  ;;  %5021 = vmatprep.subr.mxu1 %v1793_v33 }
 0x40f   : > { %v1791_v43 = vpop.permute.xlu1 %1790  ;;  %5022 = vmatpush3.msra.mxu1 %v1793_v33 }
 0x410   : > { %5023 = vmatprep.subr.mxu1 %v1791_v43 }
 0x411   : > { %4988 = vmatmul.mubr.msk.f32.gmra.mxu0 %vm780_vm2, %v6300_v3  ;;  %5024 = vmatpush3.msra.mxu1 %v1791_v43 }
 0x412   : > { %4990 = vmatprep.mubr.msk.f32.mxu0 %vm780_vm2, %v6331_v36  ;;  %5025 = vmatprep.subr.mxu1 %v1789_v12 }
 0x413   : > { %v1787_v4 = vpop.permute.xlu1 %1786  ;;  %5026 = vmatpush3.msra.mxu1 %v1789_v12 }
 0x414   : > { %5027 = vmatprep.subr.mxu1 %v1787_v4 }
 0x415   : > { %4991 = vmatmul.mubr.msk.f32.gmra.mxu0 %vm780_vm2, %v6198_v16  ;;  %5028 = vmatpush3.msra.mxu1 %v1787_v4 }
 0x416   : > { %4993 = vmatprep.mubr.msk.f32.mxu0 %vm780_vm2, %v6262_v9 }
 0x419   : > { %4994 = vmatmul.mubr.msk.f32.gmra.mxu0 %vm780_vm2, %v6162_v50 }
 0x41a   : > { %4996 = vmatprep.mubr.msk.f32.mxu0 %vm780_vm2, %v6153_v42 }
 0x41d   : > { %4997 = vmatmul.mubr.msk.f32.gmra.mxu0 %vm780_vm2, %v6174_v7 }
 0x41e   : > { %4999 = vmatprep.mubr.msk.f32.mxu0 %vm780_vm2, %v6160_v48 }
 0x421   : > { %5000 = vmatmul.mubr.msk.f32.gmra.mxu0 %vm780_vm2, %v6183_v10 }
 0x422   : > { %5002 = vmatprep.mubr.msk.f32.mxu0 %vm780_vm2, %v6172_v6 }
 0x425   : > { %5003 = vmatmul.mubr.msk.f32.gmra.mxu0 %vm780_vm2, %v6189_v13 }
 0x472   : > { %v4927_v16 = vpop.f32.mrf.mxu0 }
 0x474   : > { %v1264_v50 = vpop.f32.mrf.mxu0 }
 0x475   : > { %5089 = vmatprep.mubr.msk.f32.mxu0 %vm780_vm2, %v1264_v50 }
 0x476   : > { %5090 = vmatmul.mubr.msk.f32.vlgmr.msra.gmra.mxu0 %vm780_vm2, %v4927_v16 }
 0x4a4   : > { %v4930_v42 = vpop.f32.mrf.mxu0 }
 0x4a6   : > { %v1274_v7 = vpop.f32.mrf.mxu0 }
 0x4a7   : > { %5092 = vmatprep.mubr.msk.f32.mxu0 %vm780_vm2, %v1274_v7 }
 0x4a8   : > { %5093 = vmatmul.mubr.msk.f32.gmra.mxu0 %vm780_vm2, %v4930_v42 }
 0x4ad   : > { %v4933_v48 = vpop.f32.mrf.mxu0 }
 0x4af   : > { %v1284_v10 = vpop.f32.mrf.mxu0 }
 0x4b0   : > { %5095 = vmatprep.mubr.msk.f32.mxu0 %vm780_vm2, %v1284_v10 }
 0x4b1   : > { %v4936_v6 = vpop.f32.mrf.mxu0  ;;  %5096 = vmatmul.mubr.msk.f32.gmra.mxu0 %vm780_vm2, %v4933_v48 }
 0x4b3   : > { %v1294_v13 = vpop.f32.mrf.mxu0 }
 0x4b4   : > { %5098 = vmatprep.mubr.msk.f32.mxu0 %vm780_vm2, %v1294_v13 }
 0x4b5   : > { %5099 = vmatmul.mubr.msk.f32.gmra.mxu0 %vm780_vm2, %v4936_v6 }
 0x4b9   : > { %v4939_v9 = vpop.f32.mrf.mxu0 }
 0x4bb   : > { %v1304_v3 = vpop.f32.mrf.mxu0 }
 0x4bc   : > { %5101 = vmatprep.mubr.msk.f32.mxu0 %vm780_vm2, %v1304_v3 }
 0x4bd   : > { %v4942_v19 = vpop.f32.mrf.mxu0  ;;  %5102 = vmatmul.mubr.msk.f32.gmra.mxu0 %vm780_vm2, %v4939_v9 }
 0x4bf   : > { %v1314_v36 = vpop.f32.mrf.mxu0 }
 0x4c0   : > { %5104 = vmatprep.mubr.msk.f32.mxu0 %vm780_vm2, %v1314_v36 }
 0x4c1   : > { %v4945_v15 = vpop.f32.mrf.mxu0  ;;  %5105 = vmatmul.mubr.msk.f32.gmra.mxu0 %vm780_vm2, %v4942_v19 }
 0x4c3   : > { %v1324_v8 = vpop.f32.mrf.mxu0 }
 0x4c4   : > { %5107 = vmatprep.mubr.msk.f32.mxu0 %vm780_vm2, %v1324_v8 }
 0x4c5   : > { %v4948_v58 = vpop.f32.mrf.mxu0  ;;  %5108 = vmatmul.mubr.msk.f32.gmra.mxu0 %vm780_vm2, %v4945_v15 }
 0x4c7   : > { %v1334_v63 = vpop.f32.mrf.mxu0 }
 0x4c8   : > { %5110 = vmatprep.mubr.msk.f32.mxu0 %vm780_vm2, %v1334_v63 }
 0x4c9   : > { %v4983_v46 = vpop.f32.mrf.mxu0  ;;  %5111 = vmatmul.mubr.msk.f32.gmra.mxu0 %vm780_vm2, %v4948_v58 }
 0x4ca   : > { %v1544_v27 = vadd.f32 %v4983_v46, %v6243_v20 }
 0x4cb   : > { %v1538_v2 = vpop.f32.mrf.mxu0 }
 0x4cc   : > { %v1539_v37 = vadd.f32 %v1538_v2, %v6243_v20  ;;  %1619 = vmax.xlane.f32.xlu1 %v1544_v27 }
 0x4cd   : > { %v4986_v26 = vpop.f32.mrf.mxu0 }
 0x4ce   : > { %1617 = vmax.xlane.f32.xlu0 %v1539_v37  ;;  %v6562_v18 = vadd.f32 %v4986_v26, %v6243_v20 }
 0x4cf   : > { %v1548_v28 = vpop.f32.mrf.mxu0 }
 0x4d0   : > { %v6566_v24 = vadd.f32 %v1548_v28, %v6243_v20 }
 0x4d1   : > { %v4989_v30 = vpop.f32.mrf.mxu0 }
 0x4d2   : > { %1623 = vmax.xlane.f32.xlu0 %v6562_v18  ;;  %v6574_v61 = vadd.f32 %v4989_v30, %v6243_v20 }
 0x4d3   : > { %v1558_v1 = vpop.f32.mrf.mxu0 }
 0x4d4   : > { %v6569_v32 = vadd.f32 %v1558_v1, %v6243_v20 }
 0x4d5   : > { %v4992_v35 = vpop.f32.mrf.mxu0 }
 0x4d6   : > { %1625 = vmax.xlane.f32.xlu1 %v6569_v32  ;;  %1621 = vmax.xlane.f32.xlu0 %v6566_v24  ;;  %v6582_v56 = vadd.f32 %v4992_v35, %v6243_v20 }
 0x4d7   : > { %v1568_v39 = vpop.f32.mrf.mxu0 }
 0x4d8   : > { %v6577_v41 = vadd.f32 %v1568_v39, %v6243_v20 }
 0x4d9   : > { %v4995_v22 = vpop.f32.mrf.mxu0 }
 0x4da   : > { %1629 = vmax.xlane.f32.xlu1 %v6577_v41  ;;  %1627 = vmax.xlane.f32.xlu0 %v6574_v61  ;;  %v6590_v40 = vadd.f32 %v4995_v22, %v6243_v20 }
 0x4db   : > { %v1578_v57 = vpop.f32.mrf.mxu0 }
 0x4dc   : > { %v6585_v54 = vadd.f32 %v1578_v57, %v6243_v20 }
 0x4dd   : > { %v4998_v38 = vpop.f32.mrf.mxu0 }
 0x4de   : > { %1633 = vmax.xlane.f32.xlu1 %v6585_v54  ;;  %1631 = vmax.xlane.f32.xlu0 %v6582_v56  ;;  %v6598_v11 = vadd.f32 %v4998_v38, %v6243_v20 }
 0x4df   : > { %v1588_v55 = vpop.f32.mrf.mxu0 }
 0x4e0   : > { %v6593_v60 = vadd.f32 %v1588_v55, %v6243_v20 }
 0x4e1   : > { %v5001_v59 = vpop.f32.mrf.mxu0 }
 0x4e2   : > { %1637 = vmax.xlane.f32.xlu1 %v6593_v60  ;;  %1635 = vmax.xlane.f32.xlu0 %v6590_v40  ;;  %v6606_v17 = vadd.f32 %v5001_v59, %v6243_v20 }
 0x4e3   : > { %v1598_v25 = vpop.f32.mrf.mxu0 }
 0x4e4   : > { %v6601_v29 = vadd.f32 %v1598_v25, %v6243_v20 }
 0x4e5   : > { %v5004_v31 = vpop.f32.mrf.mxu0 }
 0x4e6   : > { %1641 = vmax.xlane.f32.xlu1 %v6601_v29  ;;  %1639 = vmax.xlane.f32.xlu0 %v6598_v11  ;;  %v6614_v23 = vadd.f32 %v5004_v31, %v6243_v20 }
 0x4e7   : > { %v1608_v34 = vpop.f32.mrf.mxu0 }
 0x4e8   : > { %v6609_v62 = vadd.f32 %v1608_v34, %v6243_v20 }
 0x4ea   : > { %1645 = vmax.xlane.f32.xlu1 %v6609_v62  ;;  %1643 = vmax.xlane.f32.xlu0 %v6606_v17 }
 0x4ee   : > { %1647 = vmax.xlane.f32.xlu0 %v6614_v23 }
 0x4fb   : > { %1782 = vrot.lane.b32.xlu1 %v6338_v5, %s5788_s11 }
 0x504   : > { %1784 = vrot.lane.b32.xlu0 %v6309_v21, %s5788_s11 }
 0x555   : > { %v1620_v0 = vpop.xlane.xlu1 %1619 }
 0x556   : > { %v1650_v33 = vsub.f32 %v1544_v27, %v1620_v0 }
 0x557   : > { %v1618_v44 = vpop.xlane.xlu0 %1617 }
 0x558   : > { %v1667_v43 = vmul.f32 1.442695, %v1650_v33  ;;  %v1649_v12 = vsub.f32 %v1539_v37, %v1618_v44 }
 0x55a   : > { %5532 = vpow2.f32 %v1667_v43  ;;  %v1665_v4 = vmul.f32 1.442695, %v1649_v12 }
 0x55b   : > { %v1624_v16 = vpop.xlane.xlu0 %1623 }
 0x55c   : > { %5534 = vpow2.f32 %v1665_v4  ;;  %v1652_v27 = vsub.f32 %v6562_v18, %v1624_v16 }
 0x55e   : > { %v1671_v26 = vmul.f32 1.442695, %v1652_v27 }
 0x55f   : > { %v1626_v50 = vpop.xlane.xlu1 %1625  ;;  %v1622_v42 = vpop.xlane.xlu0 %1621 }
 0x560   : > { %v1651_v46 = vsub.f32 %v6566_v24, %v1622_v42  ;;  %v1653_v2 = vsub.f32 %v6569_v32, %v1626_v50  ;;  %v7955_v42 = vld [vmem:[#allocation16_spill] sm:$0xff] }
 0x562   : > { %v1669_v37 = vmul.f32 1.442695, %v1651_v46 }
 0x563   : > { %v1630_v7 = vpop.xlane.xlu1 %1629  ;;  %v1628_v48 = vpop.xlane.xlu0 %1627 }
 0x564   : > { %v1655_v28 = vsub.f32 %v6577_v41, %v1630_v7  ;;  %5536 = vpow2.f32 %v1669_v37  ;;  %v1654_v30 = vsub.f32 %v6574_v61, %v1628_v48  ;;  %v7956_v7 = vld [vmem:[#allocation15_spill] sm:$0xff]  ;;  %v7957_v48 = vld [vmem:[#allocation14_spill] sm:$0xff] }
 0x565   : > { %5538 = vpow2.f32 %v1671_v26 }
 0x566   : > { %v1677_v1 = vmul.f32 1.442695, %v1655_v28  ;;  %v1675_v35 = vmul.f32 1.442695, %v1654_v30  ;;  %v4289_v28 = vld [vmem:[%s7916_s3 + $0x8] sm:$0xff] }
 0x567   : > { %v6621_v10 = vpop.eup %5532  ;;  %v1634_v6 = vpop.xlane.xlu1 %1633 }
 0x568   : > { %v1632_v5 = vpop.xlane.xlu0 %1631  ;;  %1699 = vadd.xlane.f32.xlu0 %v6621_v10 }
 0x569   : > { %v6624_v21 = vpop.eup %5534  ;;  %v1656_v24 = vsub.f32 %v6582_v56, %v1632_v5  ;;  %v7959_v5 = vld [vmem:[#allocation12_spill] sm:$0xff] }
 0x56a   : > { %1697 = vadd.xlane.f32.xlu1 %v6624_v21 }
 0x56b   : > { %v1638_v9 = vpop.xlane.xlu1 %1637  ;;  %v1679_v39 = vmul.f32 1.442695, %v1656_v24 }
 0x56c   : > { %v1636_v13 = vpop.xlane.xlu0 %1635  ;;  %v1659_v32 = vsub.f32 %v6593_v60, %v1638_v9  ;;  %v7961_v9 = vld [vmem:[#allocation10_spill] sm:$0xff] }
 0x56d   : > { %v1658_v41 = vsub.f32 %v6590_v40, %v1636_v13  ;;  %v7960_v13 = vld [vmem:[#allocation11_spill] sm:$0xff] }
 0x56e   : > { %v1685_v22 = vmul.f32 1.442695, %v1659_v32 }
 0x56f   : > { %v1642_v19 = vpop.xlane.xlu1 %1641  ;;  %v1683_v57 = vmul.f32 1.442695, %v1658_v41 }
 0x570   : > { %v1640_v3 = vpop.xlane.xlu0 %1639  ;;  %v1661_v61 = vsub.f32 %v6601_v29, %v1642_v19  ;;  %v7963_v19 = vld [vmem:[#allocation8_spill] sm:$0xff] }
 0x571   : > { %v6642_v38 = vpop.eup %5536 }
 0x572   : > { %v1689_v56 = vmul.f32 1.442695, %v1661_v61  ;;  %v6646_v60 = vpop.eup %5538 }
 0x573   : > { %v1646_v15 = vpop.xlane.xlu1 %1645 }
 0x574   : > { %v1644_v36 = vpop.xlane.xlu0 %1643  ;;  %v1663_v55 = vsub.f32 %v6609_v62, %v1646_v15  ;;  %v7965_v15 = vld [vmem:[#allocation6_spill] sm:$0xff] }
 0x575   : > { %v1662_v59 = vsub.f32 %v6606_v17, %v1644_v36  ;;  %v7964_v36 = vld [vmem:[#allocation7_spill] sm:$0xff] }
 0x577   : > { %v1783_v63 = vpop.permute.xlu1 %1782  ;;  %v1691_v31 = vmul.f32 1.442695, %v1662_v59 }
 0x578   : > { %v1648_v8 = vpop.xlane.xlu0 %1647 }
 0x579   : > { %v1664_v34 = vsub.f32 %v6614_v23, %v1648_v8 }
 0x57b   : > { %1778 = vrot.lane.b32.xlu1 %v6397_v52, %s5788_s11  ;;  %v1673_v52 = vmul.f32 1.442695, %v1653_v2  ;;  %v1695_v0 = vmul.f32 1.442695, %v1664_v34 }
 0x57c   : > { %v1785_v58 = vpop.permute.xlu0 %1784 }
 0x57d   : > { %5029 = vmatprep.subr.mxu1 %v1785_v58  ;;  %5540 = vpow2.f32 %v1673_v52 }
 0x57e   : > { %5030 = vmatpush3.msra.mxu1 %v1785_v58  ;;  %1780 = vrot.lane.b32.xlu0 %v6391_v14, %s5788_s11  ;;  %v1657_v14 = vsub.f32 %v6585_v54, %v1634_v6  ;;  %5542 = vpow2.f32 %v1677_v1  ;;  %v1660_v54 = vsub.f32 %v6598_v11, %v1640_v3  ;;  %v1693_v11 = vmul.f32 1.442695, %v1663_v55  ;;  %v7958_v6 = vld [vmem:[#allocation13_spill] sm:$0xff] }
 0x57f   : > { %5031 = vmatprep.subr.mxu1 %v1783_v63  ;;  %5544 = vpow2.f32 %v1675_v35  ;;  %v7962_v3 = vld [vmem:[#allocation9_spill] sm:$0xff] }
 0x580   : > { %5032 = vmatpush3.msra.mxu1 %v1783_v63  ;;  %v1681_v18 = vmul.f32 1.442695, %v1657_v14  ;;  %v1687_v40 = vmul.f32 1.442695, %v1660_v54 }
 0x582   : > { %5546 = vpow2.f32 %v1681_v18 }
 0x583   : > { %5548 = vpow2.f32 %v1679_v39 }
 0x584   : > { %5550 = vpow2.f32 %v1685_v22 }
 0x585   : > { %5552 = vpow2.f32 %v1683_v57 }
 0x586   : > { %5554 = vpow2.f32 %v1689_v56 }
 0x587   : > { %5556 = vpow2.f32 %v1687_v40 }
 0x588   : > { %5558 = vpow2.f32 %v1693_v11 }
 0x589   : > { %5560 = vpow2.f32 %v1691_v31 }
 0x58a   : > { %v6650_v25 = vpop.eup %5540  ;;  %5562 = vpow2.f32 %v1695_v0 }
 0x58b   : > { %v6653_v29 = vpop.eup %5542 }
 0x58c   : > { %v6657_v62 = vpop.eup %5544 }
 0x58f   : > { %v6660_v17 = vpop.eup %5546 }
 0x590   : > { %v6663_v33 = vpop.eup %5548 }
 0x591   : > { %v6666_v44 = vpop.eup %5550 }
 0x592   : > { %v6669_v23 = vpop.eup %5552 }
 0x593   : > { %v6672_v43 = vpop.eup %5554 }
 0x594   : > { %v6675_v12 = vpop.eup %5556 }
 0x595   : > { %v6678_v4 = vpop.eup %5558 }
 0x596   : > { %v6681_v16 = vpop.eup %5560 }
 0x597   : > { %v6684_v50 = vpop.eup %5562 }
 0x59d   : > { %1701 = vadd.xlane.f32.xlu0 %v6642_v38 }
 0x59f   : > { %1703 = vadd.xlane.f32.xlu1 %v6646_v60 }
 0x5a1   : > { %1705 = vadd.xlane.f32.xlu0 %v6650_v25 }
 0x5a3   : > { %1709 = vadd.xlane.f32.xlu1 %v6653_v29 }
 0x5a5   : > { %1707 = vadd.xlane.f32.xlu0 %v6657_v62 }
 0x5a7   : > { %1713 = vadd.xlane.f32.xlu1 %v6660_v17 }
 0x5a9   : > { %1711 = vadd.xlane.f32.xlu0 %v6663_v33 }
 0x5ab   : > { %1717 = vadd.xlane.f32.xlu1 %v6666_v44 }
 0x5ad   : > { %1715 = vadd.xlane.f32.xlu0 %v6669_v23 }
 0x5af   : > { %1721 = vadd.xlane.f32.xlu1 %v6672_v43 }
 0x5b1   : > { %1719 = vadd.xlane.f32.xlu0 %v6675_v12 }
 0x5b3   : > { %1725 = vadd.xlane.f32.xlu1 %v6678_v4 }
 0x5b5   : > { %1723 = vadd.xlane.f32.xlu0 %v6681_v16 }
 0x5b9   : > { %1727 = vadd.xlane.f32.xlu0 %v6684_v50 }
 0x5c4   : > { %612 = vrot.lane.b32.xlu1 %v5997_v51, %s5790_s19 }
 0x5c8   : > { %608 = vrot.lane.b32.xlu1 %v5989_v47, %s5790_s19 }
 0x5cc   : > { %606 = vrot.lane.b32.xlu1 %v5993_v49, %s5790_s19 }
 0x5cf   : > { %610 = vrot.lane.b32.xlu0 %v6001_v53, %s5790_s19 }
 0x5d0   : > { %602 = vrot.lane.b32.xlu1 %v5985_v45, %s5790_s19 }
 0x5d3   : > { %604 = vrot.lane.b32.xlu0 %v7955_v42, %s5790_s19 }
 0x5d4   : > { %598 = vrot.lane.b32.xlu1 %v7956_v7, %s5790_s19 }
 0x5d7   : > { %600 = vrot.lane.b32.xlu0 %v7957_v48, %s5790_s19 }
 0x5d8   : > { %594 = vrot.lane.b32.xlu1 %v7958_v6, %s5790_s19 }
 0x5db   : > { %596 = vrot.lane.b32.xlu0 %v7959_v5, %s5790_s19 }
 0x5dc   : > { %590 = vrot.lane.b32.xlu1 %v7960_v13, %s5790_s19 }
 0x5df   : > { %592 = vrot.lane.b32.xlu0 %v7961_v9, %s5790_s19 }
 0x5e0   : > { %586 = vrot.lane.b32.xlu1 %v7962_v3, %s5790_s19 }
 0x5e3   : > { %588 = vrot.lane.b32.xlu0 %v7963_v19, %s5790_s19 }
 0x5e4   : > { %582 = vrot.lane.b32.xlu1 %v7964_v36, %s5790_s19 }
 0x5e7   : > { %584 = vrot.lane.b32.xlu0 %v7965_v15, %s5790_s19 }
 0x5f1   : > { %v1700_v8 = vpop.xlane.xlu0 %1699 }
 0x5f2   : > { %5564 = vrcp.f32 %v1700_v8 }
 0x5f3   : > { %v1698_v58 = vpop.xlane.xlu1 %1697 }
 0x5f4   : > { %5566 = vrcp.f32 %v1698_v58 }
 0x5f5   : > { %v1781_v63 = vpop.permute.xlu0 %1780 }
 0x5f6   : > { %5033 = vmatprep.subr.mxu1 %v1781_v63 }
 0x5f7   : > { %v1779_v46 = vpop.permute.xlu1 %1778  ;;  %5034 = vmatpush3.msra.mxu1 %v1781_v63 }
 0x5f8   : > { %5035 = vmatprep.subr.mxu1 %v1779_v46 }
 0x5f9   : > { %5036 = vmatpush3.msra.mxu1 %v1779_v46 }
 0x5fa   : > { %5061 = vmatprep.subr.mxu1 %v4289_v28 }
 0x5ff   : > { %v5565_v27 = vpop.eup %5564 }
 0x600   : > { %v1746_v2 = vmul.f32 %v5565_v27, %v6621_v10 }
 0x601   : > { %v5567_v37 = vpop.eup %5566 }
 0x602   : > { %v1745_v26 = vmul.f32 %v5567_v37, %v6624_v21  ;;  %4274 = vst [vmem:[%s6428_s14 + $0x88] sm:$0xff] %v1746_v2 }
 0x604   : > { %4273 = vst [vmem:[%s6428_s14 + $0x80] sm:$0xff] %v1745_v26  ;;  %5037 = vmatprep.mubr.f32.mxu1 %v1745_v26 }
 0x605   : > { %5038 = vmatmul.mubr.f32.vlgmr.msra.gmra.mxu1 %v1746_v2 }
 0x606   : > { %5062 = vmatpush3.msra.mxu1 %v4289_v28 }
 0x626   : > { %v1702_v52 = vpop.xlane.xlu0 %1701 }
 0x627   : > { %5568 = vrcp.f32 %v1702_v52 }
 0x628   : > { %v1704_v30 = vpop.xlane.xlu1 %1703 }
 0x629   : > { %5570 = vrcp.f32 %v1704_v30 }
 0x62a   : > { %v1706_v1 = vpop.xlane.xlu0 %1705 }
 0x62b   : > { %5572 = vrcp.f32 %v1706_v1 }
 0x62c   : > { %v1710_v10 = vpop.xlane.xlu1 %1709 }
 0x62d   : > { %5574 = vrcp.f32 %v1710_v10 }
 0x62e   : > { %v1708_v21 = vpop.xlane.xlu0 %1707 }
 0x62f   : > { %5576 = vrcp.f32 %v1708_v21 }
 0x630   : > { %v1714_v14 = vpop.xlane.xlu1 %1713 }
 0x631   : > { %5578 = vrcp.f32 %v1714_v14 }
 0x632   : > { %v1712_v35 = vpop.xlane.xlu0 %1711 }
 0x633   : > { %5580 = vrcp.f32 %v1712_v35 }
 0x634   : > { %v5569_v24 = vpop.eup %5568  ;;  %v1718_v18 = vpop.xlane.xlu1 %1717 }
 0x635   : > { %5582 = vrcp.f32 %v1718_v18  ;;  %v1747_v32 = vmul.f32 %v5569_v24, %v6642_v38 }
 0x636   : > { %v5571_v39 = vpop.eup %5570  ;;  %v1716_v41 = vpop.xlane.xlu0 %1715 }
 0x637   : > { %5584 = vrcp.f32 %v1716_v41  ;;  %4275 = vst [vmem:[%s6428_s14 + $0x90] sm:$0xff] %v1747_v32  ;;  %5040 = vmatprep.mubr.f32.mxu1 %v1747_v32  ;;  %v1748_v22 = vmul.f32 %v5571_v39, %v6646_v60 }
 0x638   : > { %v5573_v61 = vpop.eup %5572  ;;  %v1722_v57 = vpop.xlane.xlu1 %1721 }
 0x639   : > { %5586 = vrcp.f32 %v1722_v57  ;;  %4276 = vst [vmem:[%s6428_s14 + $0x98] sm:$0xff] %v1748_v22  ;;  %5041 = vmatmul.mubr.f32.gmra.mxu1 %v1748_v22  ;;  %v1749_v54 = vmul.f32 %v5573_v61, %v6650_v25 }
 0x63a   : > { %v5575_v56 = vpop.eup %5574  ;;  %v1720_v55 = vpop.xlane.xlu0 %1719 }
 0x63b   : > { %5588 = vrcp.f32 %v1720_v55  ;;  %4277 = vst [vmem:[%s6428_s14 + $0xa0] sm:$0xff] %v1749_v54  ;;  %5043 = vmatprep.mubr.f32.mxu1 %v1749_v54  ;;  %v1751_v38 = vmul.f32 %v5575_v56, %v6653_v29 }
 0x63c   : > { %v5577_v40 = vpop.eup %5576  ;;  %v1726_v59 = vpop.xlane.xlu1 %1725 }
 0x63d   : > { %5590 = vrcp.f32 %v1726_v59  ;;  %v1750_v60 = vmul.f32 %v5577_v40, %v6657_v62  ;;  %4279 = vst [vmem:[%s6428_s14 + $0xb0] sm:$0xff] %v1751_v38 }
 0x63e   : > { %v5579_v11 = vpop.eup %5578  ;;  %v1724_v31 = vpop.xlane.xlu0 %1723 }
 0x63f   : > { %5592 = vrcp.f32 %v1724_v31  ;;  %4278 = vst [vmem:[%s6428_s14 + $0xa8] sm:$0xff] %v1750_v60  ;;  %5044 = vmatmul.mubr.f32.gmra.mxu1 %v1750_v60  ;;  %v1753_v25 = vmul.f32 %v5579_v11, %v6660_v17 }
 0x640   : > { %v5581_v34 = vpop.eup %5580  ;;  %v613_v0 = vpop.permute.xlu1 %612  ;;  %5046 = vmatprep.mubr.f32.mxu1 %v1751_v38 }
 0x641   : > { %646 = vst.msk [vmem:[#allocation2 + $0x178] sm:$0xff] %vm484_vm1, %v613_v0  ;;  %v1752_v29 = vmul.f32 %v5581_v34, %v6663_v33  ;;  %4281 = vst [vmem:[%s6428_s14 + $0xc0] sm:$0xff] %v1753_v25 }
 0x642   : > { %v5583_v62 = vpop.eup %5582  ;;  %v1728_v8 = vpop.xlane.xlu0 %1727 }
 0x643   : > { %5594 = vrcp.f32 %v1728_v8  ;;  %4280 = vst [vmem:[%s6428_s14 + $0xb8] sm:$0xff] %v1752_v29  ;;  %5047 = vmatmul.mubr.f32.gmra.mxu1 %v1752_v29  ;;  %v1755_v58 = vmul.f32 %v5583_v62, %v6666_v44 }
 0x644   : > { %v5585_v63 = vpop.eup %5584  ;;  %v609_v46 = vpop.permute.xlu1 %608  ;;  %5049 = vmatprep.mubr.f32.mxu1 %v1753_v25 }
 0x645   : > { %644 = vst.msk [vmem:[#allocation2 + $0x168] sm:$0xff] %vm484_vm1, %v609_v46  ;;  %v1754_v17 = vmul.f32 %v5585_v63, %v6669_v23  ;;  %4283 = vst [vmem:[%s6428_s14 + $0xd0] sm:$0xff] %v1755_v58 }
 0x646   : > { %v5587_v27 = vpop.eup %5586  ;;  %v611_v33 = vpop.permute.xlu0 %610 }
 0x647   : > { %645 = vst.msk [vmem:[#allocation2 + $0x170] sm:$0xff] %vm484_vm1, %v611_v33  ;;  %4282 = vst [vmem:[%s6428_s14 + $0xc8] sm:$0xff] %v1754_v17  ;;  %5050 = vmatmul.mubr.f32.gmra.mxu1 %v1754_v17  ;;  %v1757_v2 = vmul.f32 %v5587_v27, %v6672_v43 }
 0x648   : > { %v5589_v37 = vpop.eup %5588  ;;  %v607_v44 = vpop.permute.xlu1 %606  ;;  %5052 = vmatprep.mubr.f32.mxu1 %v1755_v58  ;;  %v6732_v26 = vld [vmem:[#allocation2 + $0x178] sm:$0xff] }
 0x649   : > { %643 = vst.msk [vmem:[#allocation2 + $0x160] sm:$0xff] %vm484_vm1, %v607_v44  ;;  %2421 = vrot.lane.b32.xlu0 %v6732_v26, %s5786_s9  ;;  %v1756_v23 = vmul.f32 %v5589_v37, %v6675_v12  ;;  %4285 = vst [vmem:[%s6428_s14 + $0xe0] sm:$0xff] %v1757_v2 }
 0x64a   : > { %v5591_v28 = vpop.eup %5590  ;;  %v605_v52 = vpop.permute.xlu0 %604 }
 0x64b   : > { %642 = vst.msk [vmem:[#allocation2 + $0x158] sm:$0xff] %vm484_vm1, %v605_v52  ;;  %4284 = vst [vmem:[%s6428_s14 + $0xd8] sm:$0xff] %v1756_v23  ;;  %5053 = vmatmul.mubr.f32.gmra.mxu1 %v1756_v23  ;;  %v1759_v43 = vmul.f32 %v5591_v28, %v6678_v4 }
 0x64c   : > { %v5593_v30 = vpop.eup %5592  ;;  %v603_v1 = vpop.permute.xlu1 %602  ;;  %5055 = vmatprep.mubr.f32.mxu1 %v1757_v2  ;;  %v6742_v10 = vld [vmem:[#allocation2 + $0x168] sm:$0xff] }
 0x64d   : > { %641 = vst.msk [vmem:[#allocation2 + $0x150] sm:$0xff] %vm484_vm1, %v603_v1  ;;  %2417 = vrot.lane.b32.xlu0 %v6742_v10, %s5786_s9  ;;  %v1758_v12 = vmul.f32 %v5593_v30, %v6681_v16  ;;  %4287 = vst [vmem:[%s6428_s14 + $0xf0] sm:$0xff] %v1759_v43 }
 0x64e   : > { %v601_v21 = vpop.permute.xlu0 %600  ;;  %v6749_v14 = vld [vmem:[#allocation2 + $0x170] sm:$0xff] }
 0x64f   : > { %640 = vst.msk [vmem:[#allocation2 + $0x148] sm:$0xff] %vm484_vm1, %v601_v21  ;;  %4286 = vst [vmem:[%s6428_s14 + $0xe8] sm:$0xff] %v1758_v12  ;;  %5056 = vmatmul.mubr.f32.gmra.mxu1 %v1758_v12  ;;  %2419 = vrot.lane.b32.xlu1 %v6749_v14, %s5786_s9 }
 0x650   : > { %v5595_v4 = vpop.eup %5594  ;;  %v599_v35 = vpop.permute.xlu1 %598  ;;  %5058 = vmatprep.mubr.f32.mxu1 %v1759_v43  ;;  %v6757_v18 = vld [vmem:[#allocation2 + $0x160] sm:$0xff] }
 0x651   : > { %639 = vst.msk [vmem:[#allocation2 + $0x140] sm:$0xff] %vm484_vm1, %v599_v35  ;;  %v1760_v24 = vmul.f32 %v5595_v4, %v6684_v50 }
 0x652   : > { %v597_v16 = vpop.permute.xlu0 %596  ;;  %v6759_v32 = vld [vmem:[#allocation2 + $0x158] sm:$0xff] }
 0x653   : > { %638 = vst.msk [vmem:[#allocation2 + $0x138] sm:$0xff] %vm484_vm1, %v597_v16  ;;  %4288 = vst [vmem:[%s6428_s14 + $0xf8] sm:$0xff] %v1760_v24  ;;  %5059 = vmatmul.mubr.f32.gmra.mxu1 %v1760_v24  ;;  %2415 = vrot.lane.b32.xlu1 %v6757_v18, %s5786_s9 }
 0x654   : > { %2413 = vrot.lane.b32.xlu0 %v6759_v32, %s5786_s9  ;;  %v595_v39 = vpop.permute.xlu1 %594  ;;  %v6768_v50 = vld [vmem:[#allocation2 + $0x150] sm:$0xff] }
 0x655   : > { %637 = vst.msk [vmem:[#allocation2 + $0x130] sm:$0xff] %vm484_vm1, %v595_v39 }
 0x656   : > { %v593_v41 = vpop.permute.xlu0 %592  ;;  %v6770_v22 = vld [vmem:[#allocation2 + $0x148] sm:$0xff] }
 0x657   : > { %636 = vst.msk [vmem:[#allocation2 + $0x128] sm:$0xff] %vm484_vm1, %v593_v41  ;;  %2411 = vrot.lane.b32.xlu1 %v6768_v50, %s5786_s9 }
 0x658   : > { %2409 = vrot.lane.b32.xlu0 %v6770_v22, %s5786_s9  ;;  %v591_v61 = vpop.permute.xlu1 %590  ;;  %v6778_v54 = vld [vmem:[#allocation2 + $0x140] sm:$0xff] }
 0x659   : > { %635 = vst.msk [vmem:[#allocation2 + $0x120] sm:$0xff] %vm484_vm1, %v591_v61 }
 0x65a   : > { %v589_v57 = vpop.permute.xlu0 %588  ;;  %v6780_v56 = vld [vmem:[#allocation2 + $0x138] sm:$0xff] }
 0x65b   : > { %634 = vst.msk [vmem:[#allocation2 + $0x118] sm:$0xff] %vm484_vm1, %v589_v57  ;;  %2407 = vrot.lane.b32.xlu1 %v6778_v54, %s5786_s9 }
 0x65c   : > { %2405 = vrot.lane.b32.xlu0 %v6780_v56, %s5786_s9  ;;  %v587_v55 = vpop.permute.xlu1 %586  ;;  %v6788_v40 = vld [vmem:[#allocation2 + $0x130] sm:$0xff] }
 0x65d   : > { %633 = vst.msk [vmem:[#allocation2 + $0x110] sm:$0xff] %vm484_vm1, %v587_v55 }
 0x65e   : > { %v585_v38 = vpop.permute.xlu0 %584  ;;  %v6790_v59 = vld [vmem:[#allocation2 + $0x128] sm:$0xff] }
 0x65f   : > { %632 = vst.msk [vmem:[#allocation2 + $0x108] sm:$0xff] %vm484_vm1, %v585_v38  ;;  %2403 = vrot.lane.b32.xlu1 %v6788_v40, %s5786_s9 }
 0x660   : > { %2401 = vrot.lane.b32.xlu0 %v6790_v59, %s5786_s9  ;;  %v583_v60 = vpop.permute.xlu1 %582  ;;  %v6798_v11 = vld [vmem:[#allocation2 + $0x120] sm:$0xff] }
 0x661   : > { %631 = vst.msk [vmem:[#allocation2 + $0x100] sm:$0xff] %vm484_vm1, %v583_v60 }
 0x662   : > { %v6800_v31 = vld [vmem:[#allocation2 + $0x118] sm:$0xff] }
 0x663   : > { %2399 = vrot.lane.b32.xlu1 %v6798_v11, %s5786_s9 }
 0x664   : > { %2397 = vrot.lane.b32.xlu0 %v6800_v31, %s5786_s9  ;;  %v6806_v25 = vld [vmem:[#allocation2 + $0x110] sm:$0xff] }
 0x666   : > { %v6808_v34 = vld [vmem:[#allocation2 + $0x108] sm:$0xff] }
 0x667   : > { %2395 = vrot.lane.b32.xlu1 %v6806_v25, %s5786_s9 }
 0x668   : > { %2393 = vrot.lane.b32.xlu0 %v6808_v34, %s5786_s9  ;;  %v6814_v0 = vld [vmem:[#allocation2 + $0x100] sm:$0xff] }
 0x66b   : > { %2391 = vrot.lane.b32.xlu1 %v6814_v0, %s5786_s9 }
 0x66c   : > { %677 = vrot.lane.b32.xlu0 %v5997_v51, %s5791_s28 }
 0x66f   : > { %675 = vrot.lane.b32.xlu1 %v6001_v53, %s5791_s28 }
 0x670   : > { %673 = vrot.lane.b32.xlu0 %v5989_v47, %s5791_s28 }
 0x673   : > { %671 = vrot.lane.b32.xlu1 %v5993_v49, %s5791_s28 }
 0x674   : > { %669 = vrot.lane.b32.xlu0 %v7955_v42, %s5791_s28 }
 0x677   : > { %667 = vrot.lane.b32.xlu1 %v5985_v45, %s5791_s28 }
 0x678   : > { %665 = vrot.lane.b32.xlu0 %v7957_v48, %s5791_s28 }
 0x67b   : > { %663 = vrot.lane.b32.xlu1 %v7956_v7, %s5791_s28 }
 0x67c   : > { %661 = vrot.lane.b32.xlu0 %v7959_v5, %s5791_s28 }
 0x67f   : > { %659 = vrot.lane.b32.xlu1 %v7958_v6, %s5791_s28 }
 0x680   : > { %657 = vrot.lane.b32.xlu0 %v7961_v9, %s5791_s28 }
 0x683   : > { %655 = vrot.lane.b32.xlu1 %v7960_v13, %s5791_s28 }
 0x684   : > { %653 = vrot.lane.b32.xlu0 %v7963_v19, %s5791_s28 }
 0x687   : > { %651 = vrot.lane.b32.xlu1 %v7962_v3, %s5791_s28 }
 0x688   : > { %649 = vrot.lane.b32.xlu0 %v7965_v15, %s5791_s28 }
 0x68b   : > { %647 = vrot.lane.b32.xlu1 %v7964_v36, %s5791_s28  ;;  %s5724_s28 = scalar_lea.vmem %s7793_s16, 8192 }
 0x68c   : > { %p5725_p11 = scmp.ne.s32.totalorder %s7793_s16, %s5724_s28 }
 0x68e   : > { %p5726_p12 = pnand %p5725_p11, %p5868_p5 }
 0x690   : > { %p5727_p13 = pneg %p5726_p12 }
 0x6bb   : > { %v2422_v45 = vpop.permute.xlu0 %2421 }
 0x6bc   : > { %5113 = vmatprep.subr.msk.mxu1 %vm780_vm2, %v2422_v45 }
 0x6bf   : > { %v2418_v49 = vpop.permute.xlu0 %2417 }
 0x6c1   : > { %v2420_v47 = vpop.permute.xlu1 %2419 }
 0x6c5   : > { %v5039_v51 = vpop.f32.mrf.mxu1  ;;  %v2416_v53 = vpop.permute.xlu1 %2415 }
 0x6c6   : > { %v2414_v42 = vpop.permute.xlu0 %2413 }
 0x6c7   : > { %v1892_v7 = vpop.f32.mrf.mxu1 }
 0x6c8   : > { %5063 = vmatprep.mubr.msk.f32.mxu1 %vm780_vm2, %v1892_v7 }
 0x6c9   : > { %5064 = vmatmul.mubr.msk.f32.vlgmr.msra.gmra.mxu1 %vm780_vm2, %v5039_v51  ;;  %v2412_v48 = vpop.permute.xlu1 %2411 }
 0x6ca   : > { %5114 = vmatpush3.xpose.msk.msra.mxu1 %vm780_vm2, %v2422_v45  ;;  %v2410_v6 = vpop.permute.xlu0 %2409 }
 0x6cb   : > { %5115 = vmatprep.subr.msk.mxu1 %vm780_vm2, %v2420_v47 }
 0x6cd   : > { %v2408_v5 = vpop.permute.xlu1 %2407 }
 0x6ce   : > { %5116 = vmatpush3.xpose.msk.msra.mxu1 %vm780_vm2, %v2420_v47  ;;  %v2406_v13 = vpop.permute.xlu0 %2405 }
 0x6cf   : > { %5117 = vmatprep.subr.msk.mxu1 %vm780_vm2, %v2418_v49 }
 0x6d1   : > { %v2404_v9 = vpop.permute.xlu1 %2403 }
 0x6d2   : > { %5118 = vmatpush3.xpose.msk.msra.mxu1 %vm780_vm2, %v2418_v49  ;;  %v2402_v3 = vpop.permute.xlu0 %2401 }
 0x6d3   : > { %5119 = vmatprep.subr.msk.mxu1 %vm780_vm2, %v2416_v53 }
 0x6d5   : > { %v2400_v19 = vpop.permute.xlu1 %2399 }
 0x6d6   : > { %5120 = vmatpush3.xpose.msk.msra.mxu1 %vm780_vm2, %v2416_v53  ;;  %v6844_v36 = vpop.permute.xlu0 %2397 }
 0x6d7   : > { %5121 = vmatprep.subr.msk.mxu1 %vm780_vm2, %v2414_v42 }
 0x6d9   : > { %v6847_v15 = vpop.permute.xlu1 %2395 }
 0x6da   : > { %5122 = vmatpush3.xpose.msk.msra.mxu1 %vm780_vm2, %v2414_v42  ;;  %v6850_v29 = vpop.permute.xlu0 %2393 }
 0x6db   : > { %5123 = vmatprep.subr.msk.mxu1 %vm780_vm2, %v2412_v48 }
 0x6dd   : > { %v6853_v62 = vpop.permute.xlu1 %2391 }
 0x6de   : > { %5124 = vmatpush3.xpose.msk.msra.mxu1 %vm780_vm2, %v2412_v48  ;;  %v678_v8 = vpop.permute.xlu0 %677 }
 0x6df   : > { %711 = vst.msk [vmem:[#allocation2 + $0x1f8] sm:$0xff] %vm484_vm1, %v678_v8  ;;  %5125 = vmatprep.subr.msk.mxu1 %vm780_vm2, %v2410_v6 }
 0x6e1   : > { %v676_v58 = vpop.permute.xlu1 %675 }
 0x6e2   : > { %710 = vst.msk [vmem:[#allocation2 + $0x1f0] sm:$0xff] %vm484_vm1, %v676_v58  ;;  %5126 = vmatpush3.xpose.msk.msra.mxu1 %vm780_vm2, %v2410_v6  ;;  %v674_v63 = vpop.permute.xlu0 %673 }
 0x6e3   : > { %709 = vst.msk [vmem:[#allocation2 + $0x1e8] sm:$0xff] %vm484_vm1, %v674_v63  ;;  %5127 = vmatprep.subr.msk.mxu1 %vm780_vm2, %v2408_v5 }
 0x6e5   : > { %v672_v46 = vpop.permute.xlu1 %671 }
 0x6e6   : > { %708 = vst.msk [vmem:[#allocation2 + $0x1e0] sm:$0xff] %vm484_vm1, %v672_v46  ;;  %5128 = vmatpush3.xpose.msk.msra.mxu1 %vm780_vm2, %v2408_v5  ;;  %v670_v17 = vpop.permute.xlu0 %669  ;;  %v6864_v27 = vld [vmem:[#allocation2 + $0x1f8] sm:$0xff] }
 0x6e7   : > { %707 = vst.msk [vmem:[#allocation2 + $0x1d8] sm:$0xff] %vm484_vm1, %v670_v17  ;;  %5129 = vmatprep.subr.msk.mxu1 %vm780_vm2, %v2406_v13  ;;  %3259 = vrot.lane.b32.xlu0 %v6864_v27, %s5786_s9 }
 0x6e9   : > { %v668_v33 = vpop.permute.xlu1 %667  ;;  %v6870_v2 = vld [vmem:[#allocation2 + $0x1f0] sm:$0xff] }
 0x6ea   : > { %706 = vst.msk [vmem:[#allocation2 + $0x1d0] sm:$0xff] %vm484_vm1, %v668_v33  ;;  %5130 = vmatpush3.xpose.msk.msra.mxu1 %vm780_vm2, %v2406_v13  ;;  %v666_v37 = vpop.permute.xlu0 %665  ;;  %3257 = vrot.lane.b32.xlu1 %v6870_v2, %s5786_s9  ;;  %v6876_v44 = vld [vmem:[#allocation2 + $0x1e8] sm:$0xff] }
 0x6eb   : > { %705 = vst.msk [vmem:[#allocation2 + $0x1c8] sm:$0xff] %vm484_vm1, %v666_v37  ;;  %5131 = vmatprep.subr.msk.mxu1 %vm780_vm2, %v2404_v9  ;;  %3255 = vrot.lane.b32.xlu0 %v6876_v44, %s5786_s9 }
 0x6ed   : > { %v664_v23 = vpop.permute.xlu1 %663  ;;  %v6882_v28 = vld [vmem:[#allocation2 + $0x1e0] sm:$0xff] }
 0x6ee   : > { %704 = vst.msk [vmem:[#allocation2 + $0x1c0] sm:$0xff] %vm484_vm1, %v664_v23  ;;  %5132 = vmatpush3.xpose.msk.msra.mxu1 %vm780_vm2, %v2404_v9  ;;  %v662_v52 = vpop.permute.xlu0 %661  ;;  %3253 = vrot.lane.b32.xlu1 %v6882_v28, %s5786_s9  ;;  %v6888_v43 = vld [vmem:[#allocation2 + $0x1d8] sm:$0xff] }
 0x6ef   : > { %703 = vst.msk [vmem:[#allocation2 + $0x1b8] sm:$0xff] %vm484_vm1, %v662_v52  ;;  %5133 = vmatprep.subr.msk.mxu1 %vm780_vm2, %v2402_v3  ;;  %3251 = vrot.lane.b32.xlu0 %v6888_v43, %s5786_s9 }
 0x6f1   : > { %v660_v30 = vpop.permute.xlu1 %659  ;;  %v6894_v1 = vld [vmem:[#allocation2 + $0x1d0] sm:$0xff] }
 0x6f2   : > { %702 = vst.msk [vmem:[#allocation2 + $0x1b0] sm:$0xff] %vm484_vm1, %v660_v30  ;;  %5134 = vmatpush3.xpose.msk.msra.mxu1 %vm780_vm2, %v2402_v3  ;;  %v658_v12 = vpop.permute.xlu0 %657  ;;  %3249 = vrot.lane.b32.xlu1 %v6894_v1, %s5786_s9  ;;  %v6900_v21 = vld [vmem:[#allocation2 + $0x1c8] sm:$0xff] }
 0x6f3   : > { %701 = vst.msk [vmem:[#allocation2 + $0x1a8] sm:$0xff] %vm484_vm1, %v658_v12  ;;  %5135 = vmatprep.subr.msk.mxu1 %vm780_vm2, %v2400_v19  ;;  %3247 = vrot.lane.b32.xlu0 %v6900_v21, %s5786_s9 }
 0x6f5   : > { %v656_v4 = vpop.permute.xlu1 %655  ;;  %v6906_v35 = vld [vmem:[#allocation2 + $0x1c0] sm:$0xff] }
 0x6f6   : > { %700 = vst.msk [vmem:[#allocation2 + $0x1a0] sm:$0xff] %vm484_vm1, %v656_v4  ;;  %5136 = vmatpush3.xpose.msk.msra.mxu1 %vm780_vm2, %v2400_v19  ;;  %v654_v24 = vpop.permute.xlu0 %653  ;;  %3245 = vrot.lane.b32.xlu1 %v6906_v35, %s5786_s9  ;;  %v6912_v16 = vld [vmem:[#allocation2 + $0x1b8] sm:$0xff] }
 0x6f7   : > { %699 = vst.msk [vmem:[#allocation2 + $0x198] sm:$0xff] %vm484_vm1, %v654_v24  ;;  %5137 = vmatprep.subr.msk.mxu1 %vm780_vm2, %v6844_v36  ;;  %3243 = vrot.lane.b32.xlu0 %v6912_v16, %s5786_s9 }
 0x6f9   : > { %v5042_v39 = vpop.f32.mrf.mxu1  ;;  %v652_v41 = vpop.permute.xlu1 %651  ;;  %v6919_v61 = vld [vmem:[#allocation2 + $0x1b0] sm:$0xff] }
 0x6fa   : > { %698 = vst.msk [vmem:[#allocation2 + $0x190] sm:$0xff] %vm484_vm1, %v652_v41  ;;  %5138 = vmatpush3.xpose.msk.msra.mxu1 %vm780_vm2, %v6844_v36  ;;  %v650_v57 = vpop.permute.xlu0 %649  ;;  %3241 = vrot.lane.b32.xlu1 %v6919_v61, %s5786_s9  ;;  %v6926_v55 = vld [vmem:[#allocation2 + $0x1a8] sm:$0xff] }
 0x6fb   : > { %697 = vst.msk [vmem:[#allocation2 + $0x188] sm:$0xff] %vm484_vm1, %v650_v57  ;;  %5139 = vmatprep.subr.msk.mxu1 %vm780_vm2, %v6847_v15  ;;  %3239 = vrot.lane.b32.xlu0 %v6926_v55, %s5786_s9  ;;  %v1902_v38 = vpop.f32.mrf.mxu1 }
 0x6fc   : > { %5066 = vmatprep.mubr.msk.f32.mxu1 %vm780_vm2, %v1902_v38 }
 0x6fd   : > { %5067 = vmatmul.mubr.msk.f32.gmra.mxu1 %vm780_vm2, %v5042_v39  ;;  %v648_v60 = vpop.permute.xlu1 %647  ;;  %v6935_v45 = vld [vmem:[#allocation2 + $0x1a0] sm:$0xff] }
 0x6fe   : > { %696 = vst.msk [vmem:[#allocation2 + $0x180] sm:$0xff] %vm484_vm1, %v648_v60  ;;  %5140 = vmatpush3.xpose.msk.msra.mxu1 %vm780_vm2, %v6847_v15  ;;  %3237 = vrot.lane.b32.xlu1 %v6935_v45, %s5786_s9  ;;  %v6942_v47 = vld [vmem:[#allocation2 + $0x198] sm:$0xff] }
 0x6ff   : > { %5141 = vmatprep.subr.msk.mxu1 %vm780_vm2, %v6850_v29  ;;  %3235 = vrot.lane.b32.xlu0 %v6942_v47, %s5786_s9  ;;  %v5045_v49 = vpop.f32.mrf.mxu1 }
 0x701   : > { %v1912_v51 = vpop.f32.mrf.mxu1  ;;  %v6948_v53 = vld [vmem:[#allocation2 + $0x190] sm:$0xff] }
 0x702   : > { %5142 = vmatpush3.xpose.msk.msra.mxu1 %vm780_vm2, %v6850_v29  ;;  %5069 = vmatprep.mubr.msk.f32.mxu1 %vm780_vm2, %v1912_v51  ;;  %v6953_v42 = vld [vmem:[#allocation2 + $0x188] sm:$0xff] }
 0x703   : > { %3233 = vrot.lane.b32.xlu1 %v6948_v53, %s5786_s9  ;;  %5143 = vmatprep.subr.msk.mxu1 %vm780_vm2, %v6853_v62  ;;  %v5048_v7 = vpop.f32.mrf.mxu1 }
 0x704   : > { %3231 = vrot.lane.b32.xlu0 %v6953_v42, %s5786_s9  ;;  %5070 = vmatmul.mubr.msk.f32.gmra.mxu1 %vm780_vm2, %v5045_v49 }
 0x705   : > { %v1922_v48 = vpop.f32.mrf.mxu1  ;;  %v6962_v6 = vld [vmem:[#allocation2 + $0x180] sm:$0xff] }
 0x706   : > { %5144 = vmatpush3.xpose.msk.msra.mxu1 %vm780_vm2, %v6853_v62  ;;  %5072 = vmatprep.mubr.msk.f32.mxu1 %vm780_vm2, %v1922_v48 }
 0x707   : > { %3229 = vrot.lane.b32.xlu1 %v6962_v6, %s5786_s9  ;;  %v5051_v5 = vpop.f32.mrf.mxu1 }
 0x708   : > { %2821 = vrot.lane.b32.xlu0 %v6749_v14, %s5788_s11  ;;  %5073 = vmatmul.mubr.msk.f32.gmra.mxu1 %vm780_vm2, %v5048_v7 }
 0x709   : > { %v1932_v13 = vpop.f32.mrf.mxu1 }
 0x70a   : > { %5075 = vmatprep.mubr.msk.f32.mxu1 %vm780_vm2, %v1932_v13 }
 0x70b   : > { %2823 = vrot.lane.b32.xlu1 %v6732_v26, %s5788_s11  ;;  %v5054_v9 = vpop.f32.mrf.mxu1 }
 0x70c   : > { %2817 = vrot.lane.b32.xlu0 %v6757_v18, %s5788_s11  ;;  %5076 = vmatmul.mubr.msk.f32.gmra.mxu1 %vm780_vm2, %v5051_v5 }
 0x70d   : > { %v1942_v3 = vpop.f32.mrf.mxu1 }
 0x70e   : > { %5078 = vmatprep.mubr.msk.f32.mxu1 %vm780_vm2, %v1942_v3 }
 0x70f   : > { %2819 = vrot.lane.b32.xlu1 %v6742_v10, %s5788_s11  ;;  %v5057_v19 = vpop.f32.mrf.mxu1 }
 0x710   : > { %2813 = vrot.lane.b32.xlu0 %v6768_v50, %s5788_s11  ;;  %5079 = vmatmul.mubr.msk.f32.gmra.mxu1 %vm780_vm2, %v5054_v9 }
 0x711   : > { %v1952_v36 = vpop.f32.mrf.mxu1 }
 0x712   : > { %5081 = vmatprep.mubr.msk.f32.mxu1 %vm780_vm2, %v1952_v36 }
 0x713   : > { %2815 = vrot.lane.b32.xlu1 %v6759_v32, %s5788_s11  ;;  %v5060_v15 = vpop.f32.mrf.mxu1 }
 0x714   : > { %2809 = vrot.lane.b32.xlu0 %v6778_v54, %s5788_s11  ;;  %5082 = vmatmul.mubr.msk.f32.gmra.mxu1 %vm780_vm2, %v5057_v19 }
 0x715   : > { %v1962_v29 = vpop.f32.mrf.mxu1 }
 0x716   : > { %5084 = vmatprep.mubr.msk.f32.mxu1 %vm780_vm2, %v1962_v29 }
 0x717   : > { %2811 = vrot.lane.b32.xlu1 %v6770_v22, %s5788_s11 }
 0x718   : > { %2805 = vrot.lane.b32.xlu0 %v6788_v40, %s5788_s11  ;;  %5085 = vmatmul.mubr.msk.f32.gmra.mxu1 %vm780_vm2, %v5060_v15 }
 0x719   : > { %5145 = vmatprep.mubr.msk.f32.mxu1 %vm780_vm2, %v6814_v0 }
 0x71c   : > { %5146 = vmatmul.mubr.msk.f32.vlgmr.msra.gmra.mxu1 %vm780_vm2, %v6808_v34 }
 0x71d   : > { %5148 = vmatprep.mubr.msk.f32.mxu1 %vm780_vm2, %v6806_v25 }
 0x720   : > { %5149 = vmatmul.mubr.msk.f32.gmra.mxu1 %vm780_vm2, %v6800_v31 }
 0x721   : > { %5151 = vmatprep.mubr.msk.f32.mxu1 %vm780_vm2, %v6798_v11 }
 0x724   : > { %5152 = vmatmul.mubr.msk.f32.gmra.mxu1 %vm780_vm2, %v6790_v59 }
 0x725   : > { %5154 = vmatprep.mubr.msk.f32.mxu1 %vm780_vm2, %v6788_v40 }
 0x728   : > { %5155 = vmatmul.mubr.msk.f32.gmra.mxu1 %vm780_vm2, %v6780_v56 }
 0x729   : > { %5157 = vmatprep.mubr.msk.f32.mxu1 %vm780_vm2, %v6778_v54 }
 0x72c   : > { %5158 = vmatmul.mubr.msk.f32.gmra.mxu1 %vm780_vm2, %v6770_v22 }
 0x72d   : > { %5160 = vmatprep.mubr.msk.f32.mxu1 %vm780_vm2, %v6768_v50 }
 0x730   : > { %5161 = vmatmul.mubr.msk.f32.gmra.mxu1 %vm780_vm2, %v6759_v32 }
 0x731   : > { %5163 = vmatprep.mubr.msk.f32.mxu1 %vm780_vm2, %v6757_v18 }
 0x734   : > { %5164 = vmatmul.mubr.msk.f32.gmra.mxu1 %vm780_vm2, %v6742_v10 }
 0x735   : > { %5166 = vmatprep.mubr.msk.f32.mxu1 %vm780_vm2, %v6749_v14 }
 0x738   : > { %5167 = vmatmul.mubr.msk.f32.gmra.mxu1 %vm780_vm2, %v6732_v26 }
 0x739   : > { %5283 = vmatprep.mubr.msk.f32.mxu1 %vm780_vm2, %v6962_v6 }
 0x759   : > { %v3260_v22 = vpop.permute.xlu0 %3259 }
 0x75a   : > { %5251 = vmatprep.subr.msk.mxu1 %vm780_vm2, %v3260_v22 }
 0x75b   : > { %5252 = vmatpush3.xpose.msk.msra.mxu1 %vm780_vm2, %v3260_v22 }
 0x75c   : > { %v3258_v32 = vpop.permute.xlu1 %3257 }
 0x75d   : > { %v3256_v50 = vpop.permute.xlu0 %3255  ;;  %5253 = vmatprep.subr.msk.mxu1 %vm780_vm2, %v3258_v32 }
 0x75f   : > { %5254 = vmatpush3.xpose.msk.msra.mxu1 %vm780_vm2, %v3258_v32 }
 0x760   : > { %5255 = vmatprep.subr.msk.mxu1 %vm780_vm2, %v3256_v50  ;;  %v3254_v10 = vpop.permute.xlu1 %3253 }
 0x761   : > { %v3252_v14 = vpop.permute.xlu0 %3251 }
 0x763   : > { %5256 = vmatpush3.xpose.msk.msra.mxu1 %vm780_vm2, %v3256_v50 }
 0x764   : > { %5257 = vmatprep.subr.msk.mxu1 %vm780_vm2, %v3254_v10  ;;  %v3250_v26 = vpop.permute.xlu1 %3249 }
 0x765   : > { %v3248_v18 = vpop.permute.xlu0 %3247 }
 0x767   : > { %5258 = vmatpush3.xpose.msk.msra.mxu1 %vm780_vm2, %v3254_v10 }
 0x768   : > { %5259 = vmatprep.subr.msk.mxu1 %vm780_vm2, %v3252_v14  ;;  %v3246_v54 = vpop.permute.xlu1 %3245 }
 0x769   : > { %v3244_v40 = vpop.permute.xlu0 %3243 }
 0x76b   : > { %5260 = vmatpush3.xpose.msk.msra.mxu1 %vm780_vm2, %v3252_v14 }
 0x76c   : > { %5261 = vmatprep.subr.msk.mxu1 %vm780_vm2, %v3250_v26  ;;  %v3242_v62 = vpop.permute.xlu1 %3241 }
 0x76d   : > { %v3240_v8 = vpop.permute.xlu0 %3239 }
 0x76f   : > { %5262 = vmatpush3.xpose.msk.msra.mxu1 %vm780_vm2, %v3250_v26 }
 0x770   : > { %5263 = vmatprep.subr.msk.mxu1 %vm780_vm2, %v3248_v18  ;;  %v3238_v58 = vpop.permute.xlu1 %3237 }
 0x771   : > { %v3236_v63 = vpop.permute.xlu0 %3235 }
 0x773   : > { %5264 = vmatpush3.xpose.msk.msra.mxu1 %vm780_vm2, %v3248_v18 }
 0x774   : > { %5265 = vmatprep.subr.msk.mxu1 %vm780_vm2, %v3246_v54 }
 0x775   : > { %v3234_v46 = vpop.permute.xlu1 %3233 }
 0x776   : > { %v3232_v17 = vpop.permute.xlu0 %3231 }
 0x777   : > { %5266 = vmatpush3.xpose.msk.msra.mxu1 %vm780_vm2, %v3246_v54 }
 0x778   : > { %5267 = vmatprep.subr.msk.mxu1 %vm780_vm2, %v3244_v40 }
 0x779   : > { %v3230_v33 = vpop.permute.xlu1 %3229 }
 0x77a   : > { %v2822_v37 = vpop.permute.xlu0 %2821 }
 0x77b   : > { %5268 = vmatpush3.xpose.msk.msra.mxu1 %vm780_vm2, %v3244_v40 }
 0x77c   : > { %5269 = vmatprep.subr.msk.mxu1 %vm780_vm2, %v3242_v62 }
 0x77d   : > { %v2824_v23 = vpop.permute.xlu1 %2823 }
 0x77e   : > { %5169 = vmatprep.subr.mxu0 %v2824_v23  ;;  %v2818_v52 = vpop.permute.xlu0 %2817 }
 0x77f   : > { %5170 = vmatpush3.msra.mxu0 %v2824_v23  ;;  %5270 = vmatpush3.xpose.msk.msra.mxu1 %vm780_vm2, %v3242_v62 }
 0x780   : > { %5171 = vmatprep.subr.mxu0 %v2822_v37  ;;  %5271 = vmatprep.subr.msk.mxu1 %vm780_vm2, %v3240_v8 }
 0x781   : > { %v2820_v30 = vpop.permute.xlu1 %2819  ;;  %5172 = vmatpush3.msra.mxu0 %v2822_v37 }
 0x782   : > { %5173 = vmatprep.subr.mxu0 %v2820_v30  ;;  %v2814_v12 = vpop.permute.xlu0 %2813 }
 0x783   : > { %5174 = vmatpush3.msra.mxu0 %v2820_v30  ;;  %5272 = vmatpush3.xpose.msk.msra.mxu1 %vm780_vm2, %v3240_v8 }
 0x784   : > { %5175 = vmatprep.subr.mxu0 %v2818_v52  ;;  %5273 = vmatprep.subr.msk.mxu1 %vm780_vm2, %v3238_v58 }
 0x785   : > { %v2816_v4 = vpop.permute.xlu1 %2815  ;;  %5176 = vmatpush3.msra.mxu0 %v2818_v52 }
 0x786   : > { %5177 = vmatprep.subr.mxu0 %v2816_v4  ;;  %v2810_v39 = vpop.permute.xlu0 %2809 }
 0x787   : > { %5178 = vmatpush3.msra.mxu0 %v2816_v4  ;;  %5274 = vmatpush3.xpose.msk.msra.mxu1 %vm780_vm2, %v3238_v58 }
 0x788   : > { %5179 = vmatprep.subr.mxu0 %v2814_v12  ;;  %5275 = vmatprep.subr.msk.mxu1 %vm780_vm2, %v3236_v63 }
 0x789   : > { %v2812_v24 = vpop.permute.xlu1 %2811  ;;  %5180 = vmatpush3.msra.mxu0 %v2814_v12  ;;  %v7092_v41 = vpop.f32.mrf.mxu1 }
 0x78a   : > { %5181 = vmatprep.subr.mxu0 %v2812_v24 }
 0x78b   : > { %5182 = vmatpush3.msra.mxu0 %v2812_v24  ;;  %5276 = vmatpush3.xpose.msk.msra.mxu1 %vm780_vm2, %v3236_v63  ;;  %v7094_v57 = vpop.f32.mrf.mxu1 }
 0x78c   : > { %5183 = vmatprep.subr.mxu0 %v2810_v39  ;;  %5277 = vmatprep.subr.msk.mxu1 %vm780_vm2, %v3234_v46 }
 0x78d   : > { %5184 = vmatpush3.msra.mxu0 %v2810_v39 }
 0x78f   : > { %5278 = vmatpush3.xpose.msk.msra.mxu1 %vm780_vm2, %v3234_v46 }
 0x790   : > { %5279 = vmatprep.subr.msk.mxu1 %vm780_vm2, %v3232_v17 }
 0x793   : > { %5280 = vmatpush3.xpose.msk.msra.mxu1 %vm780_vm2, %v3232_v17 }
 0x794   : > { %5281 = vmatprep.subr.msk.mxu1 %vm780_vm2, %v3230_v33 }
 0x797   : > { %5282 = vmatpush3.xpose.msk.msra.mxu1 %vm780_vm2, %v3230_v33 }
 0x79a   : > { %5284 = vmatmul.mubr.msk.f32.vlgmr.msra.gmra.mxu1 %vm780_vm2, %v6953_v42 }
 0x79b   : > { %5286 = vmatprep.mubr.msk.f32.mxu1 %vm780_vm2, %v6948_v53 }
 0x79e   : > { %5287 = vmatmul.mubr.msk.f32.gmra.mxu1 %vm780_vm2, %v6942_v47 }
 0x79f   : > { %5289 = vmatprep.mubr.msk.f32.mxu1 %vm780_vm2, %v6935_v45 }
 0x7a2   : > { %5290 = vmatmul.mubr.msk.f32.gmra.mxu1 %vm780_vm2, %v6926_v55 }
 0x7a3   : > { %5292 = vmatprep.mubr.msk.f32.mxu1 %vm780_vm2, %v6919_v61 }
 0x7a6   : > { %5293 = vmatmul.mubr.msk.f32.gmra.mxu1 %vm780_vm2, %v6912_v16 }
 0x7a7   : > { %5295 = vmatprep.mubr.msk.f32.mxu1 %vm780_vm2, %v6906_v35 }
 0x7aa   : > { %5296 = vmatmul.mubr.msk.f32.gmra.mxu1 %vm780_vm2, %v6900_v21 }
 0x7ab   : > { %5298 = vmatprep.mubr.msk.f32.mxu1 %vm780_vm2, %v6894_v1 }
 0x7ae   : > { %5299 = vmatmul.mubr.msk.f32.gmra.mxu1 %vm780_vm2, %v6888_v43 }
 0x7af   : > { %5301 = vmatprep.mubr.msk.f32.mxu1 %vm780_vm2, %v6882_v28 }
 0x7b2   : > { %5302 = vmatmul.mubr.msk.f32.gmra.mxu1 %vm780_vm2, %v6876_v44 }
 0x7b3   : > { %5304 = vmatprep.mubr.msk.f32.mxu1 %vm780_vm2, %v6870_v2 }
 0x7b6   : > { %5305 = vmatmul.mubr.msk.f32.gmra.mxu1 %vm780_vm2, %v6864_v27 }
 0x7bd   : > { %v7096_v38 = vpop.f32.mrf.mxu1 }
 0x7bf   : > { %v7098_v60 = vpop.f32.mrf.mxu1 }
 0x7c4   : > { %v7100_v49 = vpop.f32.mrf.mxu1 }
 0x7c6   : > { %v7102_v51 = vpop.f32.mrf.mxu1 }
 0x7c8   : > { %v7104_v7 = vpop.f32.mrf.mxu1 }
 0x7ca   : > { %v7106_v48 = vpop.f32.mrf.mxu1 }
 0x7cc   : > { %v7108_v5 = vpop.f32.mrf.mxu1 }
 0x7ce   : > { %v7110_v13 = vpop.f32.mrf.mxu1 }
 0x7d0   : > { %v7112_v9 = vpop.f32.mrf.mxu1 }
 0x7d2   : > { %v7114_v3 = vpop.f32.mrf.mxu1 }
 0x7d3   : > { %7966 = vst [vmem:[#allocation16_spill] sm:$0xff] %v7114_v3 }
 0x7d4   : > { %v7116_v19 = vpop.f32.mrf.mxu1 }
 0x7d5   : > { %7967 = vst [vmem:[#allocation15_spill] sm:$0xff] %v7116_v19 }
 0x7d6   : > { %v7118_v36 = vpop.f32.mrf.mxu1 }
 0x7d7   : > { %7968 = vst [vmem:[#allocation14_spill] sm:$0xff] %v7118_v36 }
 0x7d8   : > { %v7120_v15 = vpop.f32.mrf.mxu1 }
 0x7d9   : > { %7969 = vst [vmem:[#allocation13_spill] sm:$0xff] %v7120_v15 }
 0x7da   : > { %v7122_v29 = vpop.f32.mrf.mxu1 }
 0x7db   : > { %7970 = vst [vmem:[#allocation12_spill] sm:$0xff] %v7122_v29 }
 0x7dc   : > { %v5147_v22 = vpop.f32.mrf.mxu1 }
 0x7dd   : > { %v2559_v32 = vadd.f32 %v5147_v22, %v6243_v20 }
 0x7de   : > { %v2553_v50 = vpop.f32.mrf.mxu1 }
 0x7df   : > { %v2554_v10 = vadd.f32 %v2553_v50, %v6243_v20  ;;  %2634 = vmax.xlane.f32.xlu1 %v2559_v32 }
 0x7e0   : > { %v5150_v14 = vpop.f32.mrf.mxu1 }
 0x7e1   : > { %2632 = vmax.xlane.f32.xlu0 %v2554_v10  ;;  %v7127_v18 = vadd.f32 %v5150_v14, %v6243_v20 }
 0x7e2   : > { %v2563_v26 = vpop.f32.mrf.mxu1 }
 0x7e3   : > { %v7131_v62 = vadd.f32 %v2563_v26, %v6243_v20 }
 0x7e4   : > { %v5153_v54 = vpop.f32.mrf.mxu1 }
 0x7e5   : > { %2638 = vmax.xlane.f32.xlu0 %v7127_v18  ;;  %v7135_v63 = vadd.f32 %v5153_v54, %v6243_v20 }
 0x7e6   : > { %v2573_v40 = vpop.f32.mrf.mxu1 }
 0x7e7   : > { %v7161_v22 = vadd.f32 %v2573_v40, %v6243_v20 }
 0x7e8   : > { %v5156_v8 = vpop.f32.mrf.mxu1 }
 0x7e9   : > { %2636 = vmax.xlane.f32.xlu0 %v7131_v62  ;;  %v7139_v33 = vadd.f32 %v5156_v8, %v6243_v20 }
 0x7ea   : > { %v2583_v58 = vpop.f32.mrf.mxu1 }
 0x7eb   : > { %v7165_v50 = vadd.f32 %v2583_v58, %v6243_v20 }
 0x7ec   : > { %v5159_v46 = vpop.f32.mrf.mxu1 }
 0x7ed   : > { %2642 = vmax.xlane.f32.xlu0 %v7135_v63  ;;  %v7145_v52 = vadd.f32 %v5159_v46, %v6243_v20 }
 0x7ee   : > { %v2593_v17 = vpop.f32.mrf.mxu1 }
 0x7ef   : > { %v7171_v14 = vadd.f32 %v2593_v17, %v6243_v20 }
 0x7f0   : > { %2807 = vrot.lane.b32.xlu1 %v6780_v56, %s5788_s11  ;;  %v5162_v37 = vpop.f32.mrf.mxu1 }
 0x7f1   : > { %2646 = vmax.xlane.f32.xlu0 %v7139_v33  ;;  %v7149_v12 = vadd.f32 %v5162_v37, %v6243_v20 }
 0x7f2   : > { %v2603_v23 = vpop.f32.mrf.mxu1 }
 0x7f3   : > { %v7177_v26 = vadd.f32 %v2603_v23, %v6243_v20 }
 0x7f4   : > { %v5165_v30 = vpop.f32.mrf.mxu1 }
 0x7f5   : > { %2650 = vmax.xlane.f32.xlu0 %v7145_v52  ;;  %v7153_v24 = vadd.f32 %v5165_v30, %v6243_v20 }
 0x7f6   : > { %v2613_v4 = vpop.f32.mrf.mxu1 }
 0x7f8   : > { %v5168_v56 = vpop.f32.mrf.mxu1 }
 0x7f9   : > { %2654 = vmax.xlane.f32.xlu0 %v7149_v12  ;;  %v7157_v39 = vadd.f32 %v5168_v56, %v6243_v20 }
 0x7fa   : > { %v2623_v54 = vpop.f32.mrf.mxu1 }
 0x7fb   : > { %v7187_v40 = vadd.f32 %v2623_v54, %v6243_v20 }
 0x7fd   : > { %2658 = vmax.xlane.f32.xlu0 %v7153_v24 }
 0x801   : > { %2662 = vmax.xlane.f32.xlu0 %v7157_v39 }
 0x814   : > { %2640 = vmax.xlane.f32.xlu1 %v7161_v22 }
 0x817   : > { %2801 = vrot.lane.b32.xlu0 %v6798_v11, %s5788_s11  ;;  %v7183_v11 = vadd.f32 %v2613_v4, %v6243_v20 }
 0x818   : > { %2644 = vmax.xlane.f32.xlu1 %v7165_v50 }
 0x81b   : > { %2797 = vrot.lane.b32.xlu0 %v6806_v25, %s5788_s11  ;;  %v2806_v25 = vpop.permute.xlu0 %2805 }
 0x81c   : > { %2648 = vmax.xlane.f32.xlu1 %v7171_v14 }
 0x81f   : > { %2793 = vrot.lane.b32.xlu0 %v6814_v0, %s5788_s11 }
 0x820   : > { %2652 = vmax.xlane.f32.xlu1 %v7177_v26 }
 0x824   : > { %2656 = vmax.xlane.f32.xlu1 %v7183_v11 }
 0x828   : > { %2660 = vmax.xlane.f32.xlu1 %v7187_v40 }
 0x839   : > { %2803 = vrot.lane.b32.xlu1 %v6790_v59, %s5788_s11 }
 0x83d   : > { %2799 = vrot.lane.b32.xlu1 %v6800_v31, %s5788_s11 }
 0x841   : > { %2795 = vrot.lane.b32.xlu1 %v6808_v34, %s5788_s11 }
 0x868   : > { %v2635_v0 = vpop.xlane.xlu1 %2634 }
 0x869   : > { %v2665_v8 = vsub.f32 %v2559_v32, %v2635_v0 }
 0x86a   : > { %v2633_v58 = vpop.xlane.xlu0 %2632 }
 0x86b   : > { %v2682_v46 = vmul.f32 1.442695, %v2665_v8  ;;  %v2664_v17 = vsub.f32 %v2554_v10, %v2633_v58 }
 0x86c   : > { %v2808_v37 = vpop.permute.xlu1 %2807 }
 0x86d   : > { %5596 = vpow2.f32 %v2682_v46  ;;  %v2680_v23 = vmul.f32 1.442695, %v2664_v17  ;;  %5185 = vmatprep.subr.mxu0 %v2808_v37 }
 0x86e   : > { %5186 = vmatpush3.msra.mxu0 %v2808_v37  ;;  %v2639_v30 = vpop.xlane.xlu0 %2638 }
 0x86f   : > { %5598 = vpow2.f32 %v2680_v23  ;;  %v2667_v59 = vsub.f32 %v7127_v18, %v2639_v30  ;;  %5187 = vmatprep.subr.mxu0 %v2806_v25 }
 0x870   : > { %5188 = vmatpush3.msra.mxu0 %v2806_v25 }
 0x871   : > { %v2686_v31 = vmul.f32 1.442695, %v2667_v59 }
 0x872   : > { %v2637_v4 = vpop.xlane.xlu0 %2636 }
 0x873   : > { %5600 = vpow2.f32 %v2686_v31  ;;  %v2666_v34 = vsub.f32 %v7131_v62, %v2637_v4 }
 0x875   : > { %v2684_v32 = vmul.f32 1.442695, %v2666_v34 }
 0x876   : > { %v2643_v56 = vpop.xlane.xlu0 %2642 }
 0x877   : > { %5602 = vpow2.f32 %v2684_v32  ;;  %v2669_v10 = vsub.f32 %v7135_v63, %v2643_v56  ;;  %v5285_v63 = vpop.f32.mrf.mxu1 }
 0x879   : > { %v2690_v54 = vmul.f32 1.442695, %v2669_v10  ;;  %v7213_v59 = vpop.f32.mrf.mxu1 }
 0x87a   : > { %v7199_v0 = vpop.eup %5596  ;;  %v2647_v8 = vpop.xlane.xlu0 %2646 }
 0x87b   : > { %5604 = vpow2.f32 %v2690_v54  ;;  %v2671_v58 = vsub.f32 %v7139_v33, %v2647_v8  ;;  %2714 = vadd.xlane.f32.xlu0 %v7199_v0  ;;  %v5288_v32 = vpop.f32.mrf.mxu1 }
 0x87c   : > { %v7203_v18 = vpop.eup %5598  ;;  %v7249_v29 = vadd.f32 %v5288_v32, %v6243_v20 }
 0x87d   : > { %v2694_v25 = vmul.f32 1.442695, %v2671_v58  ;;  %2712 = vadd.xlane.f32.xlu1 %v7203_v18  ;;  %v7223_v8 = vpop.f32.mrf.mxu1 }
 0x87e   : > { %v2651_v62 = vpop.xlane.xlu0 %2650 }
 0x87f   : > { %5606 = vpow2.f32 %v2694_v25  ;;  %v2673_v46 = vsub.f32 %v7145_v52, %v2651_v62 }
 0x880   : > { %v7207_v17 = vpop.eup %5600 }
 0x881   : > { %v2698_v37 = vmul.f32 1.442695, %v2673_v46  ;;  %2718 = vadd.xlane.f32.xlu0 %v7207_v17 }
 0x882   : > { %v2655_v23 = vpop.xlane.xlu0 %2654 }
 0x883   : > { %5608 = vpow2.f32 %v2698_v37  ;;  %v2675_v33 = vsub.f32 %v7149_v12, %v2655_v23 }
 0x884   : > { %v7211_v30 = vpop.eup %5602 }
 0x885   : > { %v2702_v31 = vmul.f32 1.442695, %v2675_v33  ;;  %2716 = vadd.xlane.f32.xlu1 %v7211_v30 }
 0x886   : > { %v2659_v4 = vpop.xlane.xlu0 %2658 }
 0x887   : > { %5610 = vpow2.f32 %v2702_v31  ;;  %v2677_v52 = vsub.f32 %v7153_v24, %v2659_v4  ;;  %v5291_v24 = vpop.f32.mrf.mxu1 }
 0x888   : > { %v7217_v34 = vpop.eup %5604 }
 0x889   : > { %v2706_v56 = vmul.f32 1.442695, %v2677_v52  ;;  %2722 = vadd.xlane.f32.xlu0 %v7217_v34  ;;  %v7231_v46 = vpop.f32.mrf.mxu1  ;;  %v7244_v52 = vadd.f32 %v5285_v63, %v6243_v20  ;;  %v7256_v63 = vadd.f32 %v5291_v24, %v6243_v20 }
 0x88a   : > { %v2663_v10 = vpop.xlane.xlu0 %2662 }
 0x88b   : > { %5612 = vpow2.f32 %v2706_v56  ;;  %v2679_v12 = vsub.f32 %v7157_v39, %v2663_v10  ;;  %v5294_v37 = vpop.f32.mrf.mxu1 }
 0x88c   : > { %v7221_v54 = vpop.eup %5606  ;;  %v7261_v32 = vadd.f32 %v5294_v37, %v6243_v20 }
 0x88d   : > { %v2710_v58 = vmul.f32 1.442695, %v2679_v12  ;;  %2726 = vadd.xlane.f32.xlu0 %v7221_v54  ;;  %v7239_v33 = vpop.f32.mrf.mxu1 }
 0x88f   : > { %5614 = vpow2.f32 %v2710_v58  ;;  %v5297_v56 = vpop.f32.mrf.mxu1 }
 0x890   : > { %v7226_v25 = vpop.eup %5608  ;;  %v7270_v24 = vadd.f32 %v5297_v56, %v6243_v20 }
 0x891   : > { %2730 = vadd.xlane.f32.xlu0 %v7226_v25  ;;  %v7251_v15 = vpop.f32.mrf.mxu1 }
 0x894   : > { %v7229_v62 = vpop.eup %5610 }
 0x895   : > { %2734 = vadd.xlane.f32.xlu0 %v7229_v62 }
 0x898   : > { %v7234_v39 = vpop.eup %5612 }
 0x899   : > { %2738 = vadd.xlane.f32.xlu0 %v7234_v39 }
 0x89c   : > { %v7237_v23 = vpop.eup %5614 }
 0x89d   : > { %v2641_v31 = vpop.xlane.xlu1 %2640  ;;  %2742 = vadd.xlane.f32.xlu0 %v7237_v23 }
 0x89e   : > { %v2668_v4 = vsub.f32 %v7161_v22, %v2641_v31  ;;  %v5300_v31 = vpop.f32.mrf.mxu1 }
 0x8a0   : > { %v2688_v10 = vmul.f32 1.442695, %v2668_v4 }
 0x8a1   : > { %v2645_v12 = vpop.xlane.xlu1 %2644  ;;  %3472 = vmax.xlane.f32.xlu0 %v7244_v52 }
 0x8a2   : > { %5616 = vpow2.f32 %v2688_v10  ;;  %v2670_v58 = vsub.f32 %v7165_v50, %v2645_v12  ;;  %v7263_v12 = vpop.f32.mrf.mxu1 }
 0x8a4   : > { %v2692_v36 = vmul.f32 1.442695, %v2670_v58 }
 0x8a5   : > { %v2649_v19 = vpop.xlane.xlu1 %2648  ;;  %3476 = vmax.xlane.f32.xlu0 %v7249_v29 }
 0x8a6   : > { %5618 = vpow2.f32 %v2692_v36  ;;  %v2672_v22 = vsub.f32 %v7171_v14, %v2649_v19 }
 0x8a8   : > { %v2696_v4 = vmul.f32 1.442695, %v2672_v22  ;;  %v5303_v22 = vpop.f32.mrf.mxu1 }
 0x8a9   : > { %v2653_v10 = vpop.xlane.xlu1 %2652  ;;  %3480 = vmax.xlane.f32.xlu0 %v7256_v63 }
 0x8aa   : > { %5620 = vpow2.f32 %v2696_v4  ;;  %v2674_v50 = vsub.f32 %v7177_v26, %v2653_v10 }
 0x8ac   : > { %v2700_v58 = vmul.f32 1.442695, %v2674_v50  ;;  %v7278_v50 = vadd.f32 %v5300_v31, %v6243_v20 }
 0x8ad   : > { %v2657_v36 = vpop.xlane.xlu1 %2656  ;;  %3484 = vmax.xlane.f32.xlu0 %v7261_v32 }
 0x8ae   : > { %5622 = vpow2.f32 %v2700_v58  ;;  %v2676_v19 = vsub.f32 %v7183_v11, %v2657_v36  ;;  %v2802_v11 = vpop.permute.xlu0 %2801  ;;  %v3451_v58 = vpop.f32.mrf.mxu1 }
 0x8af   : > { %v7267_v14 = vpop.eup %5616 }
 0x8b0   : > { %v2704_v4 = vmul.f32 1.442695, %v2676_v19  ;;  %2720 = vadd.xlane.f32.xlu1 %v7267_v14 }
 0x8b1   : > { %v2661_v26 = vpop.xlane.xlu1 %2660  ;;  %3488 = vmax.xlane.f32.xlu0 %v7270_v24 }
 0x8b2   : > { %5624 = vpow2.f32 %v2704_v4  ;;  %v2678_v37 = vsub.f32 %v7187_v40, %v2661_v26  ;;  %v7285_v4 = vadd.f32 %v5303_v22, %v6243_v20  ;;  %v5306_v40 = vpop.f32.mrf.mxu1  ;;  %v2798_v31 = vpop.permute.xlu0 %2797 }
 0x8b3   : > { %v7275_v10 = vpop.eup %5618 }
 0x8b4   : > { %v2708_v36 = vmul.f32 1.442695, %v2678_v37  ;;  %2724 = vadd.xlane.f32.xlu1 %v7275_v10 }
 0x8b5   : > { %v2804_v56 = vpop.permute.xlu1 %2803  ;;  %3492 = vmax.xlane.f32.xlu0 %v7278_v50 }
 0x8b6   : > { %5626 = vpow2.f32 %v2708_v36  ;;  %5189 = vmatprep.subr.mxu0 %v2804_v56  ;;  %v7292_v36 = vadd.f32 %v5306_v40, %v6243_v20  ;;  %v2794_v3 = vpop.permute.xlu0 %2793  ;;  %v7304_v40 = vadd.f32 %v7213_v59, %v6243_v20  ;;  %v7326_v59 = vadd.f32 %v7251_v15, %v6243_v20 }
 0x8b7   : > { %v7282_v19 = vpop.eup %5620  ;;  %5190 = vmatpush3.msra.mxu0 %v2804_v56 }
 0x8b8   : > { %2728 = vadd.xlane.f32.xlu1 %v7282_v19  ;;  %5191 = vmatprep.subr.mxu0 %v2802_v11 }
 0x8b9   : > { %v2800_v26 = vpop.permute.xlu1 %2799  ;;  %3496 = vmax.xlane.f32.xlu0 %v7285_v4  ;;  %5192 = vmatpush3.msra.mxu0 %v2802_v11 }
 0x8ba   : > { %5193 = vmatprep.subr.mxu0 %v2800_v26 }
 0x8bb   : > { %v7289_v37 = vpop.eup %5622  ;;  %5194 = vmatpush3.msra.mxu0 %v2800_v26  ;;  %v7314_v26 = vadd.f32 %v7231_v46, %v6243_v20  ;;  %v3461_v46 = vpop.f32.mrf.mxu1 }
 0x8bc   : > { %2732 = vadd.xlane.f32.xlu1 %v7289_v37  ;;  %5195 = vmatprep.subr.mxu0 %v2798_v31 }
 0x8bd   : > { %v2796_v22 = vpop.permute.xlu1 %2795  ;;  %3500 = vmax.xlane.f32.xlu0 %v7292_v36  ;;  %5196 = vmatpush3.msra.mxu0 %v2798_v31  ;;  %v7309_v31 = vadd.f32 %v7223_v8, %v6243_v20  ;;  %v7333_v8 = vadd.f32 %v7263_v12, %v6243_v20 }
 0x8be   : > { %5197 = vmatprep.subr.mxu0 %v2796_v22 }
 0x8bf   : > { %v7296_v56 = vpop.eup %5624  ;;  %5198 = vmatpush3.msra.mxu0 %v2796_v22 }
 0x8c0   : > { %2736 = vadd.xlane.f32.xlu1 %v7296_v56  ;;  %5199 = vmatprep.subr.mxu0 %v2794_v3 }
 0x8c1   : > { %5200 = vmatpush3.msra.mxu0 %v2794_v3  ;;  %v7319_v3 = vadd.f32 %v7239_v33, %v6243_v20 }
 0x8c3   : > { %v7299_v11 = vpop.eup %5626 }
 0x8c4   : > { %2740 = vadd.xlane.f32.xlu1 %v7299_v11 }
 0x8c8   : > { %3470 = vmax.xlane.f32.xlu1 %v7304_v40 }
 0x8cc   : > { %3474 = vmax.xlane.f32.xlu1 %v7309_v31 }
 0x8d0   : > { %3478 = vmax.xlane.f32.xlu1 %v7314_v26 }
 0x8d3   : > { %3659 = vrot.lane.b32.xlu0 %v6870_v2, %s5788_s11  ;;  %v7339_v2 = vadd.f32 %v3451_v58, %v6243_v20 }
 0x8d4   : > { %3482 = vmax.xlane.f32.xlu1 %v7319_v3 }
 0x8d7   : > { %3655 = vrot.lane.b32.xlu0 %v6882_v28, %s5788_s11  ;;  %v7345_v28 = vadd.f32 %v3461_v46, %v6243_v20 }
 0x8d8   : > { %3486 = vmax.xlane.f32.xlu1 %v7326_v59 }
 0x8db   : > { %3651 = vrot.lane.b32.xlu0 %v6894_v1, %s5788_s11  ;;  %v4370_v1 = vld [vmem:[%s7916_s3 + $0x10] sm:$0xff] }
 0x8dc   : > { %3490 = vmax.xlane.f32.xlu1 %v7333_v8  ;;  %5225 = vmatprep.subr.mxu0 %v4370_v1 }
 0x8df   : > { %3647 = vrot.lane.b32.xlu0 %v6906_v35, %s5788_s11 }
 0x8e0   : > { %3494 = vmax.xlane.f32.xlu1 %v7339_v2 }
 0x8e3   : > { %3643 = vrot.lane.b32.xlu0 %v6919_v61, %s5788_s11 }
 0x8e4   : > { %3498 = vmax.xlane.f32.xlu1 %v7345_v28 }
 0x8e7   : > { %3639 = vrot.lane.b32.xlu0 %v6935_v45, %s5788_s11 }
 0x8eb   : > { %3635 = vrot.lane.b32.xlu0 %v6948_v53, %s5788_s11 }
 0x8ef   : > { %3631 = vrot.lane.b32.xlu0 %v6962_v6, %s5788_s11 }
 0x8f5   : > { %3661 = vrot.lane.b32.xlu1 %v6864_v27, %s5788_s11 }
 0x8f9   : > { %3657 = vrot.lane.b32.xlu1 %v6876_v44, %s5788_s11 }
 0x8fd   : > { %3653 = vrot.lane.b32.xlu1 %v6888_v43, %s5788_s11 }
 0x901   : > { %3649 = vrot.lane.b32.xlu1 %v6900_v21, %s5788_s11 }
 0x904   : > { %v2715_v20 = vpop.xlane.xlu0 %2714 }
 0x905   : > { %5628 = vrcp.f32 %v2715_v20  ;;  %3645 = vrot.lane.b32.xlu1 %v6912_v16, %s5788_s11 }
 0x906   : > { %v2713_v35 = vpop.xlane.xlu1 %2712 }
 0x907   : > { %5630 = vrcp.f32 %v2713_v35 }
 0x909   : > { %3641 = vrot.lane.b32.xlu1 %v6926_v55, %s5788_s11 }
 0x90a   : > { %v2719_v27 = vpop.xlane.xlu0 %2718 }
 0x90b   : > { %5632 = vrcp.f32 %v2719_v27 }
 0x90d   : > { %3637 = vrot.lane.b32.xlu1 %v6942_v47, %s5788_s11 }
 0x90e   : > { %v2717_v44 = vpop.xlane.xlu1 %2716 }
 0x90f   : > { %5634 = vrcp.f32 %v2717_v44 }
 0x911   : > { %3633 = vrot.lane.b32.xlu1 %v6953_v42, %s5788_s11 }
 0x912   : > { %v5629_v43 = vpop.eup %5628  ;;  %v2723_v21 = vpop.xlane.xlu0 %2722 }
 0x913   : > { %5636 = vrcp.f32 %v2723_v21  ;;  %v2761_v16 = vmul.f32 %v5629_v43, %v7199_v0 }
 0x914   : > { %v5631_v61 = vpop.eup %5630 }
 0x915   : > { %v2760_v55 = vmul.f32 %v5631_v61, %v7203_v18  ;;  %4355 = vst [vmem:[%s6428_s14 + $0x108] sm:$0xff] %v2761_v16 }
 0x916   : > { %v2727_v45 = vpop.xlane.xlu0 %2726 }
 0x917   : > { %5638 = vrcp.f32 %v2727_v45  ;;  %4354 = vst [vmem:[%s6428_s14 + $0x100] sm:$0xff] %v2760_v55  ;;  %5201 = vmatprep.mubr.f32.mxu0 %v2760_v55 }
 0x918   : > { %v5633_v47 = vpop.eup %5632  ;;  %5202 = vmatmul.mubr.f32.vlgmr.msra.gmra.mxu0 %v2761_v16 }
 0x919   : > { %v2763_v53 = vmul.f32 %v5633_v47, %v7207_v17  ;;  %5226 = vmatpush3.msra.mxu0 %v4370_v1 }
 0x91a   : > { %v2731_v42 = vpop.xlane.xlu0 %2730 }
 0x91b   : > { %5640 = vrcp.f32 %v2731_v42  ;;  %4357 = vst [vmem:[%s6428_s14 + $0x118] sm:$0xff] %v2763_v53 }
 0x91c   : > { %v5635_v6 = vpop.eup %5634 }
 0x91d   : > { %v2762_v15 = vmul.f32 %v5635_v6, %v7211_v30 }
 0x91e   : > { %v2735_v0 = vpop.xlane.xlu0 %2734 }
 0x91f   : > { %5642 = vrcp.f32 %v2735_v0  ;;  %4356 = vst [vmem:[%s6428_s14 + $0x110] sm:$0xff] %v2762_v15  ;;  %5204 = vmatprep.mubr.f32.mxu0 %v2762_v15 }
 0x920   : > { %v5637_v18 = vpop.eup %5636  ;;  %5205 = vmatmul.mubr.f32.gmra.mxu0 %v2763_v53 }
 0x921   : > { %v7384_v33 = vmul.f32 %v5637_v18, %v7217_v34 }
 0x922   : > { %v2739_v17 = vpop.xlane.xlu0 %2738 }
 0x923   : > { %5644 = vrcp.f32 %v2739_v17  ;;  %4359 = vst [vmem:[%s6428_s14 + $0x128] sm:$0xff] %v7384_v33 }
 0x924   : > { %v5639_v12 = vpop.eup %5638 }
 0x925   : > { %v7389_v58 = vmul.f32 %v5639_v12, %v7221_v54 }
 0x926   : > { %v2743_v30 = vpop.xlane.xlu0 %2742 }
 0x927   : > { %5646 = vrcp.f32 %v2743_v30  ;;  %4361 = vst [vmem:[%s6428_s14 + $0x138] sm:$0xff] %v7389_v58 }
 0x928   : > { %v5641_v22 = vpop.eup %5640 }
 0x929   : > { %v7394_v46 = vmul.f32 %v5641_v22, %v7226_v25 }
 0x92a   : > { %v3473_v1 = vpop.xlane.xlu0 %3472 }
 0x92b   : > { %v3503_v34 = vsub.f32 %v7244_v52, %v3473_v1  ;;  %4363 = vst [vmem:[%s6428_s14 + $0x148] sm:$0xff] %v7394_v46 }
 0x92c   : > { %v5643_v20 = vpop.eup %5642 }
 0x92d   : > { %v3520_v35 = vmul.f32 1.442695, %v3503_v34  ;;  %v7400_v27 = vmul.f32 %v5643_v20, %v7229_v62 }
 0x92e   : > { %v3477_v54 = vpop.xlane.xlu0 %3476 }
 0x92f   : > { %5648 = vpow2.f32 %v3520_v35  ;;  %v3505_v44 = vsub.f32 %v7249_v29, %v3477_v54  ;;  %4365 = vst [vmem:[%s6428_s14 + $0x158] sm:$0xff] %v7400_v27 }
 0x930   : > { %v5645_v25 = vpop.eup %5644 }
 0x931   : > { %v3524_v43 = vmul.f32 1.442695, %v3505_v44  ;;  %v7406_v21 = vmul.f32 %v5645_v25, %v7234_v39 }
 0x932   : > { %v3481_v52 = vpop.xlane.xlu0 %3480 }
 0x933   : > { %5650 = vpow2.f32 %v3524_v43  ;;  %v3507_v16 = vsub.f32 %v7256_v63, %v3481_v52  ;;  %4367 = vst [vmem:[%s6428_s14 + $0x168] sm:$0xff] %v7406_v21 }
 0x934   : > { %v5647_v62 = vpop.eup %5646 }
 0x935   : > { %v3528_v61 = vmul.f32 1.442695, %v3507_v16  ;;  %v7412_v55 = vmul.f32 %v5647_v62, %v7237_v23 }
 0x936   : > { %v3485_v45 = vpop.xlane.xlu0 %3484 }
 0x937   : > { %5652 = vpow2.f32 %v3528_v61  ;;  %v3509_v29 = vsub.f32 %v7261_v32, %v3485_v45  ;;  %4369 = vst [vmem:[%s6428_s14 + $0x178] sm:$0xff] %v7412_v55 }
 0x939   : > { %v3532_v47 = vmul.f32 1.442695, %v3509_v29  ;;  %v2721_v39 = vpop.xlane.xlu1 %2720 }
 0x93a   : > { %5654 = vrcp.f32 %v2721_v39  ;;  %v3489_v53 = vpop.xlane.xlu0 %3488 }
 0x93b   : > { %5656 = vpow2.f32 %v3532_v47  ;;  %v3511_v63 = vsub.f32 %v7270_v24, %v3489_v53 }
 0x93c   : > { %v7418_v42 = vpop.eup %5648 }
 0x93d   : > { %v3536_v6 = vmul.f32 1.442695, %v3511_v63  ;;  %v2725_v15 = vpop.xlane.xlu1 %2724  ;;  %3552 = vadd.xlane.f32.xlu0 %v7418_v42 }
 0x93e   : > { %5658 = vrcp.f32 %v2725_v15  ;;  %v3493_v23 = vpop.xlane.xlu0 %3492 }
 0x93f   : > { %5660 = vpow2.f32 %v3536_v6  ;;  %v3513_v32 = vsub.f32 %v7278_v50, %v3493_v23 }
 0x940   : > { %v7422_v0 = vpop.eup %5650 }
 0x941   : > { %v3540_v18 = vmul.f32 1.442695, %v3513_v32  ;;  %v2729_v17 = vpop.xlane.xlu1 %2728  ;;  %3556 = vadd.xlane.f32.xlu0 %v7422_v0 }
 0x942   : > { %5662 = vrcp.f32 %v2729_v17  ;;  %v3497_v12 = vpop.xlane.xlu0 %3496 }
 0x943   : > { %5664 = vpow2.f32 %v3540_v18  ;;  %v3515_v24 = vsub.f32 %v7285_v4, %v3497_v12 }
 0x944   : > { %v7426_v30 = vpop.eup %5652 }
 0x945   : > { %v3544_v22 = vmul.f32 1.442695, %v3515_v24  ;;  %v2733_v1 = vpop.xlane.xlu1 %2732  ;;  %3560 = vadd.xlane.f32.xlu0 %v7426_v30 }
 0x946   : > { %5666 = vrcp.f32 %v2733_v1  ;;  %v3501_v50 = vpop.xlane.xlu0 %3500 }
 0x947   : > { %v5655_v34 = vpop.eup %5654  ;;  %5668 = vpow2.f32 %v3544_v22  ;;  %v3517_v20 = vsub.f32 %v7292_v36, %v3501_v50 }
 0x948   : > { %v7430_v35 = vpop.eup %5656  ;;  %v2764_v54 = vmul.f32 %v5655_v34, %v7267_v14 }
 0x949   : > { %v3548_v44 = vmul.f32 1.442695, %v3517_v20  ;;  %v2737_v4 = vpop.xlane.xlu1 %2736  ;;  %3564 = vadd.xlane.f32.xlu0 %v7430_v35 }
 0x94a   : > { %5670 = vrcp.f32 %v2737_v4  ;;  %4358 = vst [vmem:[%s6428_s14 + $0x120] sm:$0xff] %v2764_v54  ;;  %5207 = vmatprep.mubr.f32.mxu0 %v2764_v54 }
 0x94b   : > { %v5659_v25 = vpop.eup %5658  ;;  %5672 = vpow2.f32 %v3548_v44  ;;  %5208 = vmatmul.mubr.f32.gmra.mxu0 %v7384_v33 }
 0x94c   : > { %v7436_v43 = vpop.eup %5660  ;;  %v2766_v36 = vmul.f32 %v5659_v25, %v7275_v10 }
 0x94d   : > { %v2741_v52 = vpop.xlane.xlu1 %2740  ;;  %3568 = vadd.xlane.f32.xlu0 %v7436_v43 }
 0x94e   : > { %5674 = vrcp.f32 %v2741_v52  ;;  %4360 = vst [vmem:[%s6428_s14 + $0x130] sm:$0xff] %v2766_v36  ;;  %5210 = vmatprep.mubr.f32.mxu0 %v2766_v36 }
 0x94f   : > { %v5663_v14 = vpop.eup %5662  ;;  %5211 = vmatmul.mubr.f32.gmra.mxu0 %v7389_v58 }
 0x950   : > { %v7442_v16 = vpop.eup %5664  ;;  %v2768_v62 = vmul.f32 %v5663_v14, %v7282_v19 }
 0x951   : > { %v3471_v61 = vpop.xlane.xlu1 %3470  ;;  %3572 = vadd.xlane.f32.xlu0 %v7442_v16 }
 0x952   : > { %v3502_v33 = vsub.f32 %v7304_v40, %v3471_v61  ;;  %4362 = vst [vmem:[%s6428_s14 + $0x140] sm:$0xff] %v2768_v62  ;;  %5213 = vmatprep.mubr.f32.mxu0 %v2768_v62 }
 0x953   : > { %v5667_v10 = vpop.eup %5666  ;;  %5214 = vmatmul.mubr.f32.gmra.mxu0 %v7394_v46 }
 0x954   : > { %v7449_v45 = vpop.eup %5668  ;;  %v3518_v29 = vmul.f32 1.442695, %v3502_v33  ;;  %v2770_v58 = vmul.f32 %v5667_v10, %v7289_v37 }
 0x955   : > { %v3475_v47 = vpop.xlane.xlu1 %3474  ;;  %3576 = vadd.xlane.f32.xlu0 %v7449_v45 }
 0x956   : > { %5676 = vpow2.f32 %v3518_v29  ;;  %v3504_v19 = vsub.f32 %v7309_v31, %v3475_v47  ;;  %4364 = vst [vmem:[%s6428_s14 + $0x150] sm:$0xff] %v2770_v58  ;;  %5216 = vmatprep.mubr.f32.mxu0 %v2770_v58 }
 0x957   : > { %v5671_v40 = vpop.eup %5670  ;;  %5217 = vmatmul.mubr.f32.gmra.mxu0 %v7400_v27 }
 0x958   : > { %v7456_v39 = vpop.eup %5672  ;;  %v3522_v46 = vmul.f32 1.442695, %v3504_v19  ;;  %v2772_v53 = vmul.f32 %v5671_v40, %v7296_v56 }
 0x959   : > { %v3479_v63 = vpop.xlane.xlu1 %3478  ;;  %3580 = vadd.xlane.f32.xlu0 %v7456_v39 }
 0x95a   : > { %5678 = vpow2.f32 %v3522_v46  ;;  %v3506_v37 = vsub.f32 %v7314_v26, %v3479_v63  ;;  %4366 = vst [vmem:[%s6428_s14 + $0x160] sm:$0xff] %v2772_v53  ;;  %5219 = vmatprep.mubr.f32.mxu0 %v2772_v53  ;;  %v7560_v53 = vpop.f32.mrf.mxu0 }
 0x95b   : > { %v5675_v31 = vpop.eup %5674  ;;  %5220 = vmatmul.mubr.f32.gmra.mxu0 %v7406_v21  ;;  %v7471_v21 = vpop.permute.xlu0 %3659 }
 0x95c   : > { %v3526_v6 = vmul.f32 1.442695, %v3506_v37  ;;  %v2774_v27 = vmul.f32 %v5675_v31, %v7299_v11  ;;  %v7562_v63 = vpop.f32.mrf.mxu0 }
 0x95d   : > { %v3483_v15 = vpop.xlane.xlu1 %3482 }
 0x95e   : > { %5680 = vpow2.f32 %v3526_v6  ;;  %v3508_v23 = vsub.f32 %v7319_v3, %v3483_v15  ;;  %4368 = vst [vmem:[%s6428_s14 + $0x170] sm:$0xff] %v2774_v27  ;;  %5222 = vmatprep.mubr.f32.mxu0 %v2774_v27  ;;  %v7564_v37 = vpop.f32.mrf.mxu0 }
 0x95f   : > { %5223 = vmatmul.mubr.f32.gmra.mxu0 %v7412_v55  ;;  %v7480_v1 = vpop.permute.xlu0 %3655 }
 0x960   : > { %v3530_v56 = vmul.f32 1.442695, %v3508_v23  ;;  %v7566_v31 = vpop.f32.mrf.mxu0 }
 0x961   : > { %v3487_v32 = vpop.xlane.xlu1 %3486 }
 0x962   : > { %5682 = vpow2.f32 %v3530_v56  ;;  %v3510_v26 = vsub.f32 %v7326_v59, %v3487_v32  ;;  %v7568_v6 = vpop.f32.mrf.mxu0 }
 0x963   : > { %v7468_v18 = vpop.eup %5676  ;;  %v7487_v44 = vpop.permute.xlu0 %3651 }
 0x964   : > { %v3534_v17 = vmul.f32 1.442695, %v3510_v26  ;;  %3550 = vadd.xlane.f32.xlu1 %v7468_v18  ;;  %v7570_v27 = vpop.f32.mrf.mxu0 }
 0x965   : > { %v3491_v11 = vpop.xlane.xlu1 %3490 }
 0x966   : > { %5684 = vpow2.f32 %v3534_v17  ;;  %v3512_v3 = vsub.f32 %v7333_v8, %v3491_v11  ;;  %v7572_v15 = vpop.f32.mrf.mxu0 }
 0x967   : > { %v7474_v12 = vpop.eup %5678  ;;  %v7504_v36 = vpop.permute.xlu0 %3647 }
 0x968   : > { %v3538_v24 = vmul.f32 1.442695, %v3512_v3  ;;  %3554 = vadd.xlane.f32.xlu1 %v7474_v12  ;;  %v7574_v23 = vpop.f32.mrf.mxu0 }
 0x969   : > { %v3495_v55 = vpop.xlane.xlu1 %3494 }
 0x96a   : > { %5686 = vpow2.f32 %v3538_v24  ;;  %v3514_v59 = vsub.f32 %v7339_v2, %v3495_v55  ;;  %v7576_v56 = vpop.f32.mrf.mxu0 }
 0x96b   : > { %v7478_v22 = vpop.eup %5680  ;;  %v7518_v62 = vpop.permute.xlu0 %3643 }
 0x96c   : > { %v3542_v50 = vmul.f32 1.442695, %v3514_v59  ;;  %3558 = vadd.xlane.f32.xlu1 %v7478_v22  ;;  %v7578_v32 = vpop.f32.mrf.mxu0 }
 0x96d   : > { %v3499_v34 = vpop.xlane.xlu1 %3498 }
 0x96e   : > { %5688 = vpow2.f32 %v3542_v50  ;;  %v3516_v8 = vsub.f32 %v7345_v28, %v3499_v34  ;;  %v7580_v26 = vpop.f32.mrf.mxu0 }
 0x96f   : > { %v7484_v20 = vpop.eup %5682  ;;  %v7533_v29 = vpop.permute.xlu0 %3639 }
 0x970   : > { %v3546_v54 = vmul.f32 1.442695, %v3516_v8  ;;  %3562 = vadd.xlane.f32.xlu1 %v7484_v20  ;;  %v7582_v17 = vpop.f32.mrf.mxu0 }
 0x971   : > { %v7489_v4 = vpop.permute.xlu1 %3661  ;;  %7971 = vst [vmem:[#allocation11_spill] sm:$0xff] %v7582_v17 }
 0x972   : > { %5690 = vpow2.f32 %v3546_v54  ;;  %5307 = vmatprep.subr.mxu0 %v7489_v4  ;;  %5389 = vmatprep.subr.mxu1 %v7489_v4  ;;  %v7584_v3 = vpop.f32.mrf.mxu0 }
 0x973   : > { %v7493_v2 = vpop.eup %5684  ;;  %5405 = vmatpush3.msra.mxu1 %v7489_v4  ;;  %v7543_v47 = vpop.permute.xlu0 %3635  ;;  %7972 = vst [vmem:[#allocation10_spill] sm:$0xff] %v7584_v3 }
 0x974   : > { %3566 = vadd.xlane.f32.xlu1 %v7493_v2  ;;  %5390 = vmatprep.subr.mxu1 %v7471_v21  ;;  %v7586_v55 = vpop.f32.mrf.mxu0 }
 0x975   : > { %v7498_v28 = vpop.permute.xlu1 %3657  ;;  %5406 = vmatpush3.msra.mxu1 %v7471_v21  ;;  %7973 = vst [vmem:[#allocation9_spill] sm:$0xff] %v7586_v55 }
 0x976   : > { %5391 = vmatprep.subr.mxu1 %v7498_v28  ;;  %v7588_v50 = vpop.f32.mrf.mxu0 }
 0x977   : > { %v7502_v25 = vpop.eup %5686  ;;  %5407 = vmatpush3.msra.mxu1 %v7498_v28  ;;  %v7555_v46 = vpop.permute.xlu0 %3631  ;;  %7974 = vst [vmem:[#allocation8_spill] sm:$0xff] %v7588_v50 }
 0x978   : > { %3570 = vadd.xlane.f32.xlu1 %v7502_v25  ;;  %5392 = vmatprep.subr.mxu1 %v7480_v1  ;;  %v7593_v17 = vpop.f32.mrf.mxu0 }
 0x979   : > { %v7509_v52 = vpop.permute.xlu1 %3653  ;;  %5408 = vmatpush3.msra.mxu1 %v7480_v1 }
 0x97a   : > { %5393 = vmatprep.subr.mxu1 %v7509_v52 }
 0x97b   : > { %v7513_v14 = vpop.eup %5688  ;;  %5409 = vmatpush3.msra.mxu1 %v7509_v52 }
 0x97c   : > { %3574 = vadd.xlane.f32.xlu1 %v7513_v14  ;;  %5394 = vmatprep.subr.mxu1 %v7487_v44 }
 0x97d   : > { %v7520_v61 = vpop.permute.xlu1 %3649  ;;  %5410 = vmatpush3.msra.mxu1 %v7487_v44 }
 0x97e   : > { %5395 = vmatprep.subr.mxu1 %v7520_v61 }
 0x97f   : > { %v7524_v33 = vpop.eup %5690  ;;  %5411 = vmatpush3.msra.mxu1 %v7520_v61 }
 0x980   : > { %3578 = vadd.xlane.f32.xlu1 %v7524_v33  ;;  %5396 = vmatprep.subr.mxu1 %v7504_v36 }
 0x981   : > { %v7529_v10 = vpop.permute.xlu1 %3645  ;;  %5412 = vmatpush3.msra.mxu1 %v7504_v36 }
 0x982   : > { %5397 = vmatprep.subr.mxu1 %v7529_v10 }
 0x983   : > { %5413 = vmatpush3.msra.mxu1 %v7529_v10 }
 0x984   : > { %5398 = vmatprep.subr.mxu1 %v7518_v62 }
 0x985   : > { %v7537_v58 = vpop.permute.xlu1 %3641  ;;  %5414 = vmatpush3.msra.mxu1 %v7518_v62 }
 0x986   : > { %5399 = vmatprep.subr.mxu1 %v7537_v58 }
 0x987   : > { %5415 = vmatpush3.msra.mxu1 %v7537_v58 }
 0x988   : > { %5400 = vmatprep.subr.mxu1 %v7533_v29 }
 0x989   : > { %v7545_v19 = vpop.permute.xlu1 %3637  ;;  %5416 = vmatpush3.msra.mxu1 %v7533_v29 }
 0x98a   : > { %5401 = vmatprep.subr.mxu1 %v7545_v19 }
 0x98b   : > { %5417 = vmatpush3.msra.mxu1 %v7545_v19 }
 0x98c   : > { %5402 = vmatprep.subr.mxu1 %v7543_v47 }
 0x98d   : > { %v7551_v40 = vpop.permute.xlu1 %3633  ;;  %5418 = vmatpush3.msra.mxu1 %v7543_v47 }
 0x98e   : > { %5403 = vmatprep.subr.mxu1 %v7551_v40 }
 0x98f   : > { %5419 = vmatpush3.msra.mxu1 %v7551_v40 }
 0x990   : > { %5404 = vmatprep.subr.mxu1 %v7555_v46 }
 0x991   : > { %5420 = vmatpush3.msra.mxu1 %v7555_v46 }
 0x9c6   : > { %v3553_v11 = vpop.xlane.xlu0 %3552 }
 0x9c7   : > { %5692 = vrcp.f32 %v3553_v11 }
 0x9ca   : > { %v3557_v24 = vpop.xlane.xlu0 %3556 }
 0x9cb   : > { %5694 = vrcp.f32 %v3557_v24 }
 0x9ce   : > { %v3561_v59 = vpop.xlane.xlu0 %3560 }
 0x9cf   : > { %5696 = vrcp.f32 %v3561_v59 }
 0x9d2   : > { %v3565_v34 = vpop.xlane.xlu0 %3564 }
 0x9d3   : > { %5698 = vrcp.f32 %v3565_v34 }
 0x9d4   : > { %v5693_v8 = vpop.eup %5692 }
 0x9d5   : > { %v7591_v54 = vmul.f32 %v5693_v8, %v7418_v42 }
 0x9d6   : > { %v3569_v11 = vpop.xlane.xlu0 %3568 }
 0x9d7   : > { %5700 = vrcp.f32 %v3569_v11  ;;  %4420 = vst [vmem:[%s6428_s14 + $0x188] sm:$0xff] %v7591_v54 }
 0x9d8   : > { %v5695_v24 = vpop.eup %5694  ;;  %v5203_v55 = vpop.f32.mrf.mxu0 }
 0x9d9   : > { %v7598_v59 = vmul.f32 %v5695_v24, %v7422_v0 }
 0x9da   : > { %v2907_v50 = vpop.f32.mrf.mxu0  ;;  %v3573_v3 = vpop.xlane.xlu0 %3572 }
 0x9db   : > { %5702 = vrcp.f32 %v3573_v3  ;;  %5227 = vmatprep.mubr.msk.f32.mxu0 %vm780_vm2, %v2907_v50  ;;  %4422 = vst [vmem:[%s6428_s14 + $0x198] sm:$0xff] %v7598_v59 }
 0x9dc   : > { %v5697_v42 = vpop.eup %5696  ;;  %5228 = vmatmul.mubr.msk.f32.vlgmr.msra.gmra.mxu0 %vm780_vm2, %v5203_v55 }
 0x9dd   : > { %5308 = vmatpush3.msra.mxu0 %v7489_v4  ;;  %v7606_v34 = vmul.f32 %v5697_v42, %v7426_v30 }
 0x9de   : > { %5309 = vmatprep.subr.mxu0 %v7471_v21  ;;  %v3577_v0 = vpop.xlane.xlu0 %3576 }
 0x9df   : > { %5310 = vmatpush3.msra.mxu0 %v7471_v21  ;;  %5704 = vrcp.f32 %v3577_v0  ;;  %4424 = vst [vmem:[%s6428_s14 + $0x1a8] sm:$0xff] %v7606_v34 }
 0x9e0   : > { %v5699_v3 = vpop.eup %5698  ;;  %5311 = vmatprep.subr.mxu0 %v7498_v28  ;;  %v5206_v50 = vpop.f32.mrf.mxu0 }
 0x9e1   : > { %5312 = vmatpush3.msra.mxu0 %v7498_v28  ;;  %v7615_v4 = vmul.f32 %v5699_v3, %v7430_v35 }
 0x9e2   : > { %5313 = vmatprep.subr.mxu0 %v7480_v1  ;;  %v2917_v30 = vpop.f32.mrf.mxu0  ;;  %v3581_v55 = vpop.xlane.xlu0 %3580 }
 0x9e3   : > { %5314 = vmatpush3.msra.mxu0 %v7480_v1  ;;  %5706 = vrcp.f32 %v3581_v55  ;;  %5230 = vmatprep.mubr.msk.f32.mxu0 %vm780_vm2, %v2917_v30  ;;  %4426 = vst [vmem:[%s6428_s14 + $0x1b8] sm:$0xff] %v7615_v4 }
 0x9e4   : > { %v5701_v21 = vpop.eup %5700  ;;  %5315 = vmatprep.subr.mxu0 %v7509_v52  ;;  %5231 = vmatmul.mubr.msk.f32.gmra.mxu0 %vm780_vm2, %v5206_v50 }
 0x9e5   : > { %5316 = vmatpush3.msra.mxu0 %v7509_v52  ;;  %v7626_v35 = vmul.f32 %v5701_v21, %v7436_v43 }
 0x9e6   : > { %5317 = vmatprep.subr.mxu0 %v7487_v44 }
 0x9e7   : > { %5318 = vmatpush3.msra.mxu0 %v7487_v44  ;;  %4428 = vst [vmem:[%s6428_s14 + $0x1c8] sm:$0xff] %v7626_v35 }
 0x9e8   : > { %v5703_v1 = vpop.eup %5702  ;;  %5319 = vmatprep.subr.mxu0 %v7520_v61 }
 0x9e9   : > { %5320 = vmatpush3.msra.mxu0 %v7520_v61  ;;  %v7635_v28 = vmul.f32 %v5703_v1, %v7442_v16 }
 0x9ea   : > { %5321 = vmatprep.subr.mxu0 %v7504_v36 }
 0x9eb   : > { %5322 = vmatpush3.msra.mxu0 %v7504_v36  ;;  %4430 = vst [vmem:[%s6428_s14 + $0x1d8] sm:$0xff] %v7635_v28 }
 0x9ec   : > { %v5705_v43 = vpop.eup %5704  ;;  %5323 = vmatprep.subr.mxu0 %v7529_v10 }
 0x9ed   : > { %5324 = vmatpush3.msra.mxu0 %v7529_v10  ;;  %v3551_v44 = vpop.xlane.xlu1 %3550  ;;  %v7644_v52 = vmul.f32 %v5705_v43, %v7449_v45 }
 0x9ee   : > { %5708 = vrcp.f32 %v3551_v44  ;;  %5325 = vmatprep.subr.mxu0 %v7518_v62 }
 0x9ef   : > { %5326 = vmatpush3.msra.mxu0 %v7518_v62  ;;  %4432 = vst [vmem:[%s6428_s14 + $0x1e8] sm:$0xff] %v7644_v52 }
 0x9f0   : > { %v5707_v16 = vpop.eup %5706  ;;  %5327 = vmatprep.subr.mxu0 %v7537_v58 }
 0x9f1   : > { %5328 = vmatpush3.msra.mxu0 %v7537_v58  ;;  %v3555_v36 = vpop.xlane.xlu1 %3554  ;;  %v7653_v61 = vmul.f32 %v5707_v16, %v7456_v39 }
 0x9f2   : > { %5710 = vrcp.f32 %v3555_v36  ;;  %5329 = vmatprep.subr.mxu0 %v7533_v29 }
 0x9f3   : > { %5330 = vmatpush3.msra.mxu0 %v7533_v29  ;;  %4434 = vst [vmem:[%s6428_s14 + $0x1f8] sm:$0xff] %v7653_v61 }
 0x9f4   : > { %5331 = vmatprep.subr.mxu0 %v7545_v19 }
 0x9f5   : > { %5332 = vmatpush3.msra.mxu0 %v7545_v19  ;;  %v3559_v45 = vpop.xlane.xlu1 %3558 }
 0x9f6   : > { %5712 = vrcp.f32 %v3559_v45  ;;  %5333 = vmatprep.subr.mxu0 %v7543_v47 }
 0x9f7   : > { %5334 = vmatpush3.msra.mxu0 %v7543_v47 }
 0x9f8   : > { %5335 = vmatprep.subr.mxu0 %v7551_v40 }
 0x9f9   : > { %5336 = vmatpush3.msra.mxu0 %v7551_v40  ;;  %v3563_v39 = vpop.xlane.xlu1 %3562 }
 0x9fa   : > { %5714 = vrcp.f32 %v3563_v39  ;;  %5337 = vmatprep.subr.mxu0 %v7555_v46 }
 0x9fb   : > { %v5709_v62 = vpop.eup %5708  ;;  %5338 = vmatpush3.msra.mxu0 %v7555_v46 }
 0x9fc   : > { %v3598_v10 = vmul.f32 %v5709_v62, %v7468_v18 }
 0x9fd   : > { %v3567_v29 = vpop.xlane.xlu1 %3566 }
 0x9fe   : > { %5716 = vrcp.f32 %v3567_v29  ;;  %4419 = vst [vmem:[%s6428_s14 + $0x180] sm:$0xff] %v3598_v10 }
 0x9ff   : > { %v5711_v58 = vpop.eup %5710 }
 0xa00   : > { %v3600_v47 = vmul.f32 %v5711_v58, %v7474_v12 }
 0xa01   : > { %v3571_v19 = vpop.xlane.xlu1 %3570 }
 0xa02   : > { %5718 = vrcp.f32 %v3571_v19  ;;  %4421 = vst [vmem:[%s6428_s14 + $0x190] sm:$0xff] %v3600_v47 }
 0xa03   : > { %v5713_v40 = vpop.eup %5712 }
 0xa04   : > { %v3602_v8 = vmul.f32 %v5713_v40, %v7478_v22 }
 0xa05   : > { %v3575_v11 = vpop.xlane.xlu1 %3574 }
 0xa06   : > { %5720 = vrcp.f32 %v3575_v11  ;;  %4423 = vst [vmem:[%s6428_s14 + $0x1a0] sm:$0xff] %v3602_v8 }
 0xa07   : > { %v5715_v46 = vpop.eup %5714 }
 0xa08   : > { %v3604_v18 = vmul.f32 %v5715_v46, %v7484_v20  ;;  %v7976_v46 = vld [vmem:[#allocation11_spill] sm:$0xff] }
 0xa09   : > { %v3579_v24 = vpop.xlane.xlu1 %3578 }
 0xa0a   : > { %5722 = vrcp.f32 %v3579_v24  ;;  %4425 = vst [vmem:[%s6428_s14 + $0x1b0] sm:$0xff] %v3604_v18 }
 0xa0b   : > { %v5717_v42 = vpop.eup %5716  ;;  %v5209_v0 = vpop.f32.mrf.mxu0 }
 0xa0c   : > { %v3606_v12 = vmul.f32 %v5717_v42, %v7493_v2  ;;  %v7978_v42 = vld [vmem:[#allocation10_spill] sm:$0xff] }
 0xa0d   : > { %v2927_v3 = vpop.f32.mrf.mxu0 }
 0xa0e   : > { %5233 = vmatprep.mubr.msk.f32.mxu0 %vm780_vm2, %v2927_v3  ;;  %4427 = vst [vmem:[%s6428_s14 + $0x1c0] sm:$0xff] %v3606_v12  ;;  %v7980_v3 = vld [vmem:[#allocation9_spill] sm:$0xff] }
 0xa0f   : > { %v5719_v22 = vpop.eup %5718  ;;  %v5212_v50 = vpop.f32.mrf.mxu0  ;;  %5234 = vmatmul.mubr.msk.f32.gmra.mxu0 %vm780_vm2, %v5209_v0 }
 0xa10   : > { %v3608_v30 = vmul.f32 %v5719_v22, %v7502_v25 }
 0xa11   : > { %v2937_v20 = vpop.f32.mrf.mxu0 }
 0xa12   : > { %5236 = vmatprep.mubr.msk.f32.mxu0 %vm780_vm2, %v2937_v20  ;;  %4429 = vst [vmem:[%s6428_s14 + $0x1d0] sm:$0xff] %v3608_v30 }
 0xa13   : > { %v5721_v55 = vpop.eup %5720  ;;  %v5215_v21 = vpop.f32.mrf.mxu0  ;;  %5237 = vmatmul.mubr.msk.f32.gmra.mxu0 %vm780_vm2, %v5212_v50 }
 0xa14   : > { %v3610_v2 = vmul.f32 %v5721_v55, %v7513_v14 }
 0xa15   : > { %v2947_v1 = vpop.f32.mrf.mxu0 }
 0xa16   : > { %5239 = vmatprep.mubr.msk.f32.mxu0 %vm780_vm2, %v2947_v1  ;;  %4431 = vst [vmem:[%s6428_s14 + $0x1e0] sm:$0xff] %v3610_v2 }
 0xa17   : > { %v5723_v43 = vpop.eup %5722  ;;  %v5218_v44 = vpop.f32.mrf.mxu0  ;;  %5240 = vmatmul.mubr.msk.f32.gmra.mxu0 %vm780_vm2, %v5215_v21 }
 0xa18   : > { %v3612_v25 = vmul.f32 %v5723_v43, %v7524_v33  ;;  %v4435_v33 = vld [vmem:[%s7916_s3 + $0x18] sm:$0xff] }
 0xa19   : > { %v2957_v16 = vpop.f32.mrf.mxu0  ;;  %5363 = vmatprep.subr.mxu0 %v4435_v33 }
 0xa1a   : > { %5242 = vmatprep.mubr.msk.f32.mxu0 %vm780_vm2, %v2957_v16  ;;  %4433 = vst [vmem:[%s6428_s14 + $0x1f0] sm:$0xff] %v3612_v25  ;;  %5360 = vmatprep.mubr.f32.mxu1 %v3612_v25  ;;  %s5728_s14 = sshll.u32 %s5792_s25, 4  ;;  %s5729_s14 = int_to_ptr.vmem [resolvable:$false] %s5728_s14 }
 0xa1b   : > { %v5221_v36 = vpop.f32.mrf.mxu0  ;;  %5243 = vmatmul.mubr.msk.f32.gmra.mxu0 %vm780_vm2, %v5218_v44  ;;  %5361 = vmatmul.mubr.f32.vlgmr.msra.gmra.mxu1 %v7653_v61  ;;  %s5730_s29 = scalar_lea.vmem %s5729_s14, 16384  ;;  %p5731_p0 = scmp.lt.s32.totalorder %s7793_s16, %s5729_s14 }
 0xa1c   : > { %p5732_p1 = scmp.lt.s32.totalorder %s5730_s29, %s5724_s28 }
 0xa1d   : > { %v2967_v14 = vpop.f32.mrf.mxu0 }
 0xa1e   : > { %5245 = vmatprep.mubr.msk.f32.mxu0 %vm780_vm2, %v2967_v14  ;;  %p5733_p2 = por %p5732_p1, %p5731_p0 }
 0xa1f   : > { %v5224_v45 = vpop.f32.mrf.mxu0  ;;  %5246 = vmatmul.mubr.msk.f32.gmra.mxu0 %vm780_vm2, %v5221_v36 }
 0xa20   : > { %p5734_p3 = pnand %p5733_p2, %p5727_p13 }
 0xa21   : > { %v2977_v39 = vpop.f32.mrf.mxu0 }
 0xa22   : > { %5248 = vmatprep.mubr.msk.f32.mxu0 %vm780_vm2, %v2977_v39 }
 0xa23   : > { %5249 = vmatmul.mubr.msk.f32.gmra.mxu0 %vm780_vm2, %v5224_v45 }
 0xa24   : > { %5339 = vmatprep.mubr.f32.mxu0 %v3598_v10 }
 0xa27   : > { %5340 = vmatmul.mubr.f32.vlgmr.msra.gmra.mxu0 %v7591_v54  ;;  %v2286_v54 = vadd.f32 %v7560_v53, %v7092_v41 }
 0xa28   : > { %5342 = vmatprep.mubr.f32.mxu0 %v3600_v47  ;;  %5364 = vmatpush3.msra.mxu0 %v4435_v33 }
 0xa2b   : > { %5343 = vmatmul.mubr.f32.gmra.mxu0 %v7598_v59  ;;  %v2281_v59 = vadd.f32 %v7562_v63, %v7094_v57  ;;  %v2306_v57 = vadd.f32 %v7568_v6, %v7100_v49  ;;  %v2301_v63 = vadd.f32 %v7570_v27, %v7102_v51  ;;  %v2326_v49 = vadd.f32 %v7576_v56, %v7108_v5  ;;  %v7977_v56 = vld [vmem:[#allocation15_spill] sm:$0xff] }
 0xa2c   : > { %5345 = vmatprep.mubr.f32.mxu0 %v3602_v8  ;;  %v2321_v27 = vadd.f32 %v7578_v32, %v7110_v13  ;;  %v2346_v0 = vadd.f32 %v7978_v42, %v7977_v56  ;;  %v7979_v32 = vld [vmem:[#allocation14_spill] sm:$0xff] }
 0xa2d   : > { %v2341_v22 = vadd.f32 %v7980_v3, %v7979_v32 }
 0xa2f   : > { %5346 = vmatmul.mubr.f32.gmra.mxu0 %v7606_v34 }
 0xa30   : > { %5348 = vmatprep.mubr.f32.mxu0 %v3604_v18 }
 0xa33   : > { %5349 = vmatmul.mubr.f32.gmra.mxu0 %v7615_v4 }
 0xa34   : > { %5351 = vmatprep.mubr.f32.mxu0 %v3606_v12 }
 0xa37   : > { %5352 = vmatmul.mubr.f32.gmra.mxu0 %v7626_v35  ;;  %v2296_v35 = vadd.f32 %v7564_v37, %v7096_v38  ;;  %v2316_v38 = vadd.f32 %v7572_v15, %v7104_v7  ;;  %v2336_v15 = vadd.f32 %v7580_v26, %v7112_v9  ;;  %v7981_v26 = vld [vmem:[#allocation13_spill] sm:$0xff] }
 0xa38   : > { %5354 = vmatprep.mubr.f32.mxu0 %v3608_v30  ;;  %v7982_v30 = vld [vmem:[#allocation8_spill] sm:$0xff] }
 0xa39   : > { %v2356_v20 = vadd.f32 %v7982_v30, %v7981_v26 }
 0xa3b   : > { %5355 = vmatmul.mubr.f32.gmra.mxu0 %v7635_v28  ;;  %v2291_v28 = vadd.f32 %v7566_v31, %v7098_v60  ;;  %v2311_v31 = vadd.f32 %v7574_v23, %v7106_v48  ;;  %v7975_v23 = vld [vmem:[#allocation16_spill] sm:$0xff] }
 0xa3c   : > { %5357 = vmatprep.mubr.f32.mxu0 %v3610_v2  ;;  %v2331_v18 = vadd.f32 %v7976_v46, %v7975_v23  ;;  %v7983_v2 = vld [vmem:[#allocation12_spill] sm:$0xff] }
 0xa3d   : > { %v2351_v1 = vadd.f32 %v7593_v17, %v7983_v2 }
 0xa3f   : > { %5358 = vmatmul.mubr.f32.gmra.mxu0 %v7644_v52 }
 0xa9c   : > { %v5229_v61 = vpop.f32.mrf.mxu0 }
 0xa9d   : > { %v7710_v34 = vadd.f32 %v5229_v61, %v2286_v54 }
 0xa9e   : > { %v3102_v62 = vpop.f32.mrf.mxu0 }
 0xa9f   : > { %v7712_v4 = vadd.f32 %v3102_v62, %v2281_v59 }
 0xaa4   : > { %v5232_v10 = vpop.f32.mrf.mxu0 }
 0xaa5   : > { %v7718_v52 = vadd.f32 %v5232_v10, %v2296_v35 }
 0xaa6   : > { %v3112_v29 = vpop.f32.mrf.mxu0 }
 0xaa7   : > { %v7720_v41 = vadd.f32 %v3112_v29, %v2291_v28 }
 0xacf   : > { %v5235_v53 = vpop.f32.mrf.mxu0 }
 0xad0   : > { %v7726_v58 = vadd.f32 %v5235_v53, %v2306_v57 }
 0xad1   : > { %v3122_v47 = vpop.f32.mrf.mxu0 }
 0xad2   : > { %v7730_v37 = vadd.f32 %v3122_v47, %v2301_v63 }
 0xad3   : > { %v5238_v60 = vpop.f32.mrf.mxu0 }
 0xad4   : > { %v7734_v19 = vadd.f32 %v5238_v60, %v2316_v38 }
 0xad5   : > { %v3132_v40 = vpop.f32.mrf.mxu0 }
 0xad6   : > { %v7738_v6 = vadd.f32 %v3132_v40, %v2311_v31 }
 0xad7   : > { %v5241_v51 = vpop.f32.mrf.mxu0 }
 0xad8   : > { %v7742_v8 = vadd.f32 %v5241_v51, %v2326_v49 }
 0xad9   : > { %v3142_v7 = vpop.f32.mrf.mxu0 }
 0xada   : > { %v7746_v11 = vadd.f32 %v3142_v7, %v2321_v27 }
 0xadb   : > { %v5244_v48 = vpop.f32.mrf.mxu0  ;;  %v5362_v10 = vpop.f32.mrf.mxu1 }
 0xadc   : > { %v7750_v24 = vadd.f32 %v5244_v48, %v2336_v15 }
 0xadd   : > { %v3152_v5 = vpop.f32.mrf.mxu0  ;;  %v3815_v57 = vpop.f32.mrf.mxu1 }
 0xade   : > { %v7754_v12 = vadd.f32 %v3152_v5, %v2331_v18 }
 0xadf   : > { %v5247_v13 = vpop.f32.mrf.mxu0 }
 0xae0   : > { %v7758_v50 = vadd.f32 %v5247_v13, %v2346_v0 }
 0xae1   : > { %v3162_v9 = vpop.f32.mrf.mxu0 }
 0xae2   : > { %v7762_v55 = vadd.f32 %v3162_v9, %v2341_v22 }
 0xae3   : > { %v5250_v21 = vpop.f32.mrf.mxu0 }
 0xae4   : > { %v7766_v43 = vadd.f32 %v5250_v21, %v2356_v20 }
 0xae5   : > { %v3172_v44 = vpop.f32.mrf.mxu0 }
 0xae6   : > { %v7768_v25 = vadd.f32 %v3172_v44, %v2351_v1 }
 0xae7   : > { %v5341_v16 = vpop.f32.mrf.mxu0 }
 0xae9   : > { %v3745_v36 = vpop.f32.mrf.mxu0 }
 0xaea   : > { %5365 = vmatprep.mubr.msk.f32.mxu0 %vm780_vm2, %v3745_v36 }
 0xaeb   : > { %v5344_v14 = vpop.f32.mrf.mxu0  ;;  %5366 = vmatmul.mubr.msk.f32.vlgmr.msra.gmra.mxu0 %vm780_vm2, %v5341_v16 }
 0xaed   : > { %v3755_v45 = vpop.f32.mrf.mxu0 }
 0xaee   : > { %5368 = vmatprep.mubr.msk.f32.mxu0 %vm780_vm2, %v3755_v45 }
 0xaef   : > { %v5347_v39 = vpop.f32.mrf.mxu0  ;;  %5369 = vmatmul.mubr.msk.f32.gmra.mxu0 %vm780_vm2, %v5344_v14 }
 0xaf1   : > { %v3765_v33 = vpop.f32.mrf.mxu0 }
 0xaf2   : > { %5371 = vmatprep.mubr.msk.f32.mxu0 %vm780_vm2, %v3765_v33 }
 0xaf3   : > { %v5350_v17 = vpop.f32.mrf.mxu0  ;;  %5372 = vmatmul.mubr.msk.f32.gmra.mxu0 %vm780_vm2, %v5347_v39 }
 0xaf5   : > { %v3775_v54 = vpop.f32.mrf.mxu0 }
 0xaf6   : > { %5374 = vmatprep.mubr.msk.f32.mxu0 %vm780_vm2, %v3775_v54 }
 0xaf7   : > { %v5353_v61 = vpop.f32.mrf.mxu0  ;;  %5375 = vmatmul.mubr.msk.f32.gmra.mxu0 %vm780_vm2, %v5350_v17 }
 0xaf9   : > { %v3785_v59 = vpop.f32.mrf.mxu0 }
 0xafa   : > { %5377 = vmatprep.mubr.msk.f32.mxu0 %vm780_vm2, %v3785_v59 }
 0xafb   : > { %v5356_v62 = vpop.f32.mrf.mxu0  ;;  %5378 = vmatmul.mubr.msk.f32.gmra.mxu0 %vm780_vm2, %v5353_v61 }
 0xafd   : > { %v3795_v35 = vpop.f32.mrf.mxu0 }
 0xafe   : > { %5380 = vmatprep.mubr.msk.f32.mxu0 %vm780_vm2, %v3795_v35 }
 0xaff   : > { %v5359_v28 = vpop.f32.mrf.mxu0  ;;  %5381 = vmatmul.mubr.msk.f32.gmra.mxu0 %vm780_vm2, %v5356_v62 }
 0xb01   : > { %v3805_v29 = vpop.f32.mrf.mxu0 }
 0xb02   : > { %5383 = vmatprep.mubr.msk.f32.mxu0 %vm780_vm2, %v3805_v29 }
 0xb03   : > { %5384 = vmatmul.mubr.msk.f32.gmra.mxu0 %vm780_vm2, %v5359_v28 }
 0xb04   : > { %5386 = vmatprep.mubr.msk.f32.mxu0 %vm780_vm2, %v3815_v57 }
 0xb07   : > { %5387 = vmatmul.mubr.msk.f32.gmra.mxu0 %vm780_vm2, %v5362_v10 }
 0xb08   : > { %5737 = shalt.err (!%p5734_p3)
}
 0xb09   : > { %s5738_s12 = scalar_lea.hbm %s7791_s20, 8192  ;;  %s5742_s11 = scalar_lea.hbm %s7919_s6, 16384 }
 0xb0a   : > { %p5739_p4 = scmp.ne.s32.totalorder %s7791_s20, %s5738_s12  ;;  %p5743_p9 = scmp.lt.s32.totalorder %s7791_s20, %s7919_s6 }
 0xb0b   : > { %p5744_p10 = scmp.lt.s32.totalorder %s5742_s11, %s5738_s12 }
 0xb0c   : > { %p5740_p7 = pnand %p5739_p4, %p5868_p5 }
 0xb0d   : > { %p5745_p11 = por %p5744_p10, %p5743_p9 }
 0xb0e   : > { %p5741_p8 = pneg %p5740_p7 }
 0xb10   : > { %p5746_p12 = pnand %p5745_p11, %p5741_p8 }
 0xb12   : > { %5749 = shalt.err (!%p5746_p12)
}
 0xb13   : > { %s5793_s19 = smov 128   ;;  %s5794_s28 = smov 8   ;;  %v7823_v63 = vld [vmem:[%s7917_s4] ss:$0 sm:$0xff] }
 0xb14   : > { %5421 = dma.vmem_to_hbm [thread:$0]  (%p5868_p5), %s7793_s16, 8192, %s7791_s20, %s7797_s26, %s5793_s19, %s5793_s19, %s5794_s28  }
 0xb15   : > { %s7831_s9 = scalar_lea.vmem %s7918_s5, %s4458_s18 }
 0xbab   : > { %v5367_v53 = vpop.f32.mrf.mxu0 }
 0xbac   : > { %v4020_v47 = vadd.f32 %v5367_v53, %v7710_v34 }
 0xbad   : > { %v3940_v38 = vpop.f32.mrf.mxu0 }
 0xbae   : > { %v4043_v60 = vadd.f32 %v7823_v63, %v4020_v47  ;;  %v4019_v31 = vadd.f32 %v3940_v38, %v7712_v4 }
 0xbaf   : > { %v5370_v40 = vpop.f32.mrf.mxu0 }
 0xbb0   : > { %4059 = vst.msk [vmem:[%s7831_s9 + $0x8] sm:$0xff] %vm290_vm0, %v4043_v60  ;;  %v4042_v34 = vadd.f32 %v7823_v63, %v4019_v31  ;;  %v4022_v49 = vadd.f32 %v5370_v40, %v7718_v52 }
 0xbb1   : > { %v3950_v51 = vpop.f32.mrf.mxu0 }
 0xbb2   : > { %4058 = vst.msk [vmem:[%s7831_s9] sm:$0xff] %vm290_vm0, %v4042_v34  ;;  %v4045_v27 = vadd.f32 %v7823_v63, %v4022_v49  ;;  %v4021_v7 = vadd.f32 %v3950_v51, %v7720_v41 }
 0xbb3   : > { %v5373_v15 = vpop.f32.mrf.mxu0 }
 0xbb4   : > { %4061 = vst.msk [vmem:[%s7831_s9 + $0x18] sm:$0xff] %vm290_vm0, %v4045_v27  ;;  %v4044_v4 = vadd.f32 %v7823_v63, %v4021_v7  ;;  %v4024_v48 = vadd.f32 %v5373_v15, %v7726_v58 }
 0xbb5   : > { %v3960_v23 = vpop.f32.mrf.mxu0 }
 0xbb6   : > { %4060 = vst.msk [vmem:[%s7831_s9 + $0x10] sm:$0xff] %vm290_vm0, %v4044_v4  ;;  %v4047_v52 = vadd.f32 %v7823_v63, %v4024_v48  ;;  %v4023_v46 = vadd.f32 %v3960_v23, %v7730_v37 }
 0xbb7   : > { %v5376_v18 = vpop.f32.mrf.mxu0 }
 0xbb8   : > { %4063 = vst.msk [vmem:[%s7831_s9 + $0x28] sm:$0xff] %vm290_vm0, %v4047_v52  ;;  %v4046_v41 = vadd.f32 %v7823_v63, %v4023_v46  ;;  %v4026_v5 = vadd.f32 %v5376_v18, %v7734_v19 }
 0xbb9   : > { %v3970_v56 = vpop.f32.mrf.mxu0 }
 0xbba   : > { %4062 = vst.msk [vmem:[%s7831_s9 + $0x20] sm:$0xff] %vm290_vm0, %v4046_v41  ;;  %v4049_v58 = vadd.f32 %v7823_v63, %v4026_v5  ;;  %v4025_v42 = vadd.f32 %v3970_v56, %v7738_v6 }
 0xbbb   : > { %v5379_v0 = vpop.f32.mrf.mxu0 }
 0xbbc   : > { %4065 = vst.msk [vmem:[%s7831_s9 + $0x38] sm:$0xff] %vm290_vm0, %v4049_v58  ;;  %v4048_v37 = vadd.f32 %v7823_v63, %v4025_v42  ;;  %v4028_v13 = vadd.f32 %v5379_v0, %v7742_v8 }
 0xbbd   : > { %v3980_v32 = vpop.f32.mrf.mxu0 }
 0xbbe   : > { %4064 = vst.msk [vmem:[%s7831_s9 + $0x30] sm:$0xff] %vm290_vm0, %v4048_v37  ;;  %v4051_v19 = vadd.f32 %v7823_v63, %v4028_v13  ;;  %v4027_v3 = vadd.f32 %v3980_v32, %v7746_v11 }
 0xbbf   : > { %v5382_v22 = vpop.f32.mrf.mxu0 }
 0xbc0   : > { %4067 = vst.msk [vmem:[%s7831_s9 + $0x48] sm:$0xff] %vm290_vm0, %v4051_v19  ;;  %v4050_v6 = vadd.f32 %v7823_v63, %v4027_v3  ;;  %v4030_v9 = vadd.f32 %v5382_v22, %v7750_v24 }
 0xbc1   : > { %v3990_v26 = vpop.f32.mrf.mxu0 }
 0xbc2   : > { %4066 = vst.msk [vmem:[%s7831_s9 + $0x40] sm:$0xff] %vm290_vm0, %v4050_v6  ;;  %v4053_v8 = vadd.f32 %v7823_v63, %v4030_v9  ;;  %v4029_v30 = vadd.f32 %v3990_v26, %v7754_v12 }
 0xbc3   : > { %v5385_v20 = vpop.f32.mrf.mxu0 }
 0xbc4   : > { %4069 = vst.msk [vmem:[%s7831_s9 + $0x58] sm:$0xff] %vm290_vm0, %v4053_v8  ;;  %v4052_v11 = vadd.f32 %v7823_v63, %v4029_v30  ;;  %v4032_v21 = vadd.f32 %v5385_v20, %v7758_v50 }
 0xbc5   : > { %v4000_v2 = vpop.f32.mrf.mxu0 }
 0xbc6   : > { %4068 = vst.msk [vmem:[%s7831_s9 + $0x50] sm:$0xff] %vm290_vm0, %v4052_v11  ;;  %v4055_v24 = vadd.f32 %v7823_v63, %v4032_v21  ;;  %v4031_v1 = vadd.f32 %v4000_v2, %v7762_v55 }
 0xbc7   : > { %v5388_v44 = vpop.f32.mrf.mxu0 }
 0xbc8   : > { %4071 = vst.msk [vmem:[%s7831_s9 + $0x68] sm:$0xff] %vm290_vm0, %v4055_v24  ;;  %v4054_v12 = vadd.f32 %v7823_v63, %v4031_v1  ;;  %v4034_v16 = vadd.f32 %v5388_v44, %v7766_v43 }
 0xbc9   : > { %v4010_v36 = vpop.f32.mrf.mxu0 }
 0xbca   : > { %4070 = vst.msk [vmem:[%s7831_s9 + $0x60] sm:$0xff] %vm290_vm0, %v4054_v12  ;;  %v4057_v14 = vadd.f32 %v7823_v63, %v4034_v16  ;;  %v4033_v50 = vadd.f32 %v4010_v36, %v7768_v25 }
 0xbcc   : > { %4073 = vst.msk [vmem:[%s7831_s9 + $0x78] sm:$0xff] %vm290_vm0, %v4057_v14  ;;  %v4056_v45 = vadd.f32 %v7823_v63, %v4033_v50 }
 0xbce   : > { %4072 = vst.msk [vmem:[%s7831_s9 + $0x70] sm:$0xff] %vm290_vm0, %v4056_v45 }
 0xbcf PF: > { %p5427_p5 = scmp.ge.s32.totalorder %s5784_s24, 2  ;;  %s4119_s7 = sand.u32 1, %s5772_s21  }
 0xbd0   : > { %s4120_s15 = scalar_lea.sflag [#allocation4], %s4119_s7 }
 0xbd1   : > { %p5424_p13 = pnand %p5427_p5, %p5872_p6 }
 0xbd3   : > { %p5425_p0 = pneg %p5424_p13 }
 0xbd5   : > { %5767 = dma.done.wait (%p5425_p0), %s4120_s15, 8192  }
 0xbd6   : > { %5769 = vsyncadd (%p5425_p0), %s4120_s15, 4294959104  ;;  %p17_p1 = scmp.ge.s32.totalorder %s5855_s27, 4   ;;  %s7984_s21 = smov %s5776_s22 }
 0xbd7   : > { %s7985_s22 = smov %s5780_s23  ;;  %s7986_s23 = smov %s5866_s30 }
 0xbd8   : > { %s7987_s24 = smov %s5855_s27  ;;  %19 = sbr.rel (!%p17_p1) target bundleno = 3 (0x3), region = 96 }
 0xbdd   :  { %4125 = vsyncpa [#allocation4], 1 }
 0xbde   :  { %4127 = vsyncpa [#allocation4 + $0x1], 1 }

</bundles_post_ra>
